<compile_context>
chip_gen: v6e
topology: v6e:2x2x1
jax: 0.10.0
libtpu: 0.0.40
codegen_flags: <defaults>
</compile_context>

<pallas_src>
import jax
import jax.numpy as jnp
from jax.experimental import pallas as pl
from jax.experimental.pallas import tpu as pltpu

# ---- static model configuration (small, consistent with the module) --------
B = 2              # batch
L = 128            # num_links (lane axis)
H = 32             # hidden_size
F = 2              # num_features (source features)
SEQ = 8            # seq_len
HORIZON = 3        # int horizon
NUM_TARGETS = 1    # len(target_feature); output_size = NUM_TARGETS * L = L
TARGET_MASK = (True, False)   # source feature 0 is the target feature
BL = B * L         # lane-stacked width (batch folded onto lanes)


# ---- Pallas kernel: full recurrence, whole batch in one grid step -----------
def grnn_kernel(x_ref, h0_ref, adj_ref, wh_ref, aux_ref, out_ref):
    aux = aux_ref[...]                               # (3H, F+2) f32 packed params
    wi_cols = [aux[:, f:f + 1] for f in range(F)]    # (3H, 1) input weights per feature
    b_in = aux[:, F:F + 1]                           # (3H, 1) = [bri+brh; bui+buh; bni]
    wfc_col = aux[0:H, F + 1:F + 2]                  # (H, 1)  fc weight (NUM_TARGETS == 1)
    bnh = aux[H:2 * H, F + 1:F + 2]                  # (H, 1)  new-gate hidden bias
    bfc = aux[2 * H:2 * H + 1, F + 1:F + 2]          # (1, 1)  fc bias

    def gru(h, in_term):
        # h: (H, BL) f32; in_term: (3H, BL) f32 input-side pre-activations (biases in).
        # adj/wh are read from VMEM at the point of use (no long vreg live ranges).
        hd = jnp.dot(h, adj_ref[...], preferred_element_type=jnp.float32)    # diffusion
        gh = jnp.dot(wh_ref[...], hd, preferred_element_type=jnp.float32)    # stacked gates
        r = jax.nn.sigmoid(gh[0:H] + in_term[0:H])
        u = jax.nn.sigmoid(gh[H:2 * H] + in_term[H:2 * H])
        n = jnp.tanh(r * (gh[2 * H:3 * H] + bnh) + in_term[2 * H:3 * H])
        return (1.0 - u) * n + u * hd                # convex combo uses DIFFUSED hidden

    h = h0_ref[...]                                  # (H, BL)

    # encoder: consume the input sequence (static unroll; input term off the serial
    # chain -> computed as VPU broadcast-FMAs).
    for t in range(SEQ):
        in_term = b_in
        for f in range(F):
            in_term = in_term + wi_cols[f] * x_ref[t * F + f:t * F + f + 1, :]
        h = gru(h, in_term)

    # decoder: autoregressive horizon rollout; fc = VPU multiply + sublane reduce;
    # rows stored directly; the dead GRU step after the last output is skipped.
    for d in range(HORIZON):
        out_row = jnp.sum(wfc_col * h, axis=0, keepdims=True) + bfc          # (1, BL)
        out_ref[d:d + 1, :] = out_row
        if d + 1 < HORIZON:
            in_term = b_in
            for f, is_tgt in enumerate(TARGET_MASK):
                if is_tgt:                            # non-target features feed zeros
                    in_term = in_term + wi_cols[f] * out_row
            h = gru(h, in_term)


# ---- wrapper ----------------------------------------------------------------
def grnn_forward(x, h0, adj, params):
    """x: (B, SEQ, F*L) f32, h0: (B, H, L) f32 -> (B, HORIZON, NUM_TARGETS*L) f32."""
    (wrh, wri, wuh, wui, wnh, wni,
     brh, bri, buh, bui, bnh, bni, wfc, bfc) = params

    # host-side packing: fold batch onto lanes, stack gate params (5 operands total)
    x_stacked = jnp.transpose(x.reshape(B, SEQ * F, L), (1, 0, 2)).reshape(SEQ * F, BL)
    h0_stacked = jnp.transpose(h0, (1, 0, 2)).reshape(H, BL)
    adj_bd = jnp.zeros((BL, BL), jnp.float32)
    adj_bd = adj_bd.at[:L, :L].set(adj).at[L:, L:].set(adj)       # block-diagonal

    wh_stack = jnp.concatenate([wrh, wuh, wnh], axis=0)           # (3H, H)
    wi_stack = jnp.concatenate([wri, wui, wni], axis=0)           # (3H, F)
    b_in = jnp.concatenate([bri + brh, bui + buh, bni], axis=0)   # (3H, 1) folded biases
    fc_col = jnp.zeros((3 * H, 1), jnp.float32)
    fc_col = fc_col.at[0:H, 0].set(wfc[0])                        # fc weight
    fc_col = fc_col.at[H:2 * H, 0].set(bnh[:, 0])                 # n-gate hidden bias
    fc_col = fc_col.at[2 * H, 0].set(bfc[0, 0])                   # fc bias
    aux = jnp.concatenate([wi_stack, b_in, fc_col], axis=1)       # (3H, F+2)

    out = pl.pallas_call(
        grnn_kernel,
        out_shape=jax.ShapeDtypeStruct((HORIZON, BL), jnp.float32),
        grid=(1,),
        in_specs=[
            pl.BlockSpec((SEQ * F, BL), lambda i: (0, 0)),        # x slab
            pl.BlockSpec((H, BL), lambda i: (0, 0)),              # h0 (lane-stacked)
            pl.BlockSpec((BL, BL), lambda i: (0, 0)),             # block-diag adjacency
            pl.BlockSpec((3 * H, H), lambda i: (0, 0)),           # stacked hidden weights
            pl.BlockSpec((3 * H, F + 2), lambda i: (0, 0)),       # packed aux params
        ],
        out_specs=pl.BlockSpec((HORIZON, BL), lambda i: (0, 0)),
        compiler_params=pltpu.CompilerParams(
            dimension_semantics=("arbitrary",)),
    )(x_stacked, h0_stacked, adj_bd, wh_stack, aux)

    # un-stack lanes back to (B, HORIZON, NUM_TARGETS * L)
    return jnp.transpose(out.reshape(HORIZON, B, L), (1, 0, 2))


# ---- pure-JAX reference (same math, f32, batched with einsum) ---------------
def grnn_reference(x, h0, adj, params):
    (wrh, wri, wuh, wui, wnh, wni,
     brh, bri, buh, bui, bnh, bni, wfc, bfc) = params
    x4 = x.reshape(B, SEQ, F, L)

    def step(h, in_fl):
        hd = jnp.einsum('bhl,lm->bhm', h, adj)
        r = jax.nn.sigmoid(jnp.einsum('ij,bjl->bil', wrh, hd) + brh[None]
                           + jnp.einsum('if,bfl->bil', wri, in_fl) + bri[None])
        u = jax.nn.sigmoid(jnp.einsum('ij,bjl->bil', wuh, hd) + buh[None]
                           + jnp.einsum('if,bfl->bil', wui, in_fl) + bui[None])
        n = jnp.tanh(r * (jnp.einsum('ij,bjl->bil', wnh, hd) + bnh[None])
                     + jnp.einsum('if,bfl->bil', wni, in_fl) + bni[None])
        return (1.0 - u) * n + u * hd

    h = h0
    for t in range(SEQ):
        h = step(h, x4[:, t])
    outs = []
    for d in range(HORIZON):
        o = jnp.einsum('th,bhl->btl', wfc, h) + bfc[None]        # (B, NUM_TARGETS, L)
        outs.append(o[:, 0])
        if d + 1 < HORIZON:
            in_fl = jnp.concatenate(
                [o if m else jnp.zeros_like(o) for m in TARGET_MASK], axis=1)
            h = step(h, in_fl)
    return jnp.stack(outs, axis=1)


# ---- deterministic parameter construction -----------------------------------
def make_params(key, scale=0.1):
    ks = jax.random.split(key, 14)
    f32 = jnp.float32
    wrh = scale * jax.random.normal(ks[0], (H, H), f32)
    wri = scale * jax.random.normal(ks[1], (H, F), f32)
    wuh = scale * jax.random.normal(ks[2], (H, H), f32)
    wui = scale * jax.random.normal(ks[3], (H, F), f32)
    wnh = scale * jax.random.normal(ks[4], (H, H), f32)
    wni = scale * jax.random.normal(ks[5], (H, F), f32)
    brh = scale * jax.random.normal(ks[6], (H, 1), f32)
    bri = scale * jax.random.normal(ks[7], (H, 1), f32)
    buh = scale * jax.random.normal(ks[8], (H, 1), f32)
    bui = scale * jax.random.normal(ks[9], (H, 1), f32)
    bnh = scale * jax.random.normal(ks[10], (H, 1), f32)
    bni = scale * jax.random.normal(ks[11], (H, 1), f32)
    wfc = scale * jax.random.normal(ks[12], (NUM_TARGETS, H), f32)
    bfc = scale * jax.random.normal(ks[13], (NUM_TARGETS, 1), f32)
    return (wrh, wri, wuh, wui, wnh, wni,
            brh, bri, buh, bui, bnh, bni, wfc, bfc)


def make_adj_matrix(alpha=0.5):
    # diagonal 1, ring-graph neighbors set to alpha (synthetic road graph)
    eye = jnp.eye(L, dtype=jnp.float32)
    return eye + alpha * (jnp.roll(eye, 1, axis=0) + jnp.roll(eye, -1, axis=0))


if __name__ == "__main__":
    key = jax.random.PRNGKey(0)
    k_x, k_h, k_p = jax.random.split(key, 3)

    x = jax.random.normal(k_x, (B, SEQ, F * L), jnp.float32)
    h0 = jax.random.normal(k_h, (B, H, L), jnp.float32)   # replaces torch.randn hidden
    adj = make_adj_matrix()
    params = make_params(k_p)

    out = jax.block_until_ready(grnn_forward(x, h0, adj, params))
    ref = jax.block_until_ready(grnn_reference(x, h0, adj, params))

    assert out.shape == (B, HORIZON, NUM_TARGETS * L)
    # f32 everywhere in the kernel; tolerance only has to absorb MXU default-precision
    # accumulation-order differences through the 11-step recurrence.
    err = float(jnp.max(jnp.abs(out - ref)))
    assert jnp.allclose(out, ref, rtol=2e-2, atol=2e-2), f"mismatch vs reference (max abs err {err})"

    print("KERNEL_OK")
</pallas_src>

<mosaic_0001>
module attributes {stable_mosaic.version = 11 : i64} {
  func.func @grnn_kernel(%arg0: i32, %arg1: memref<16x256xf32, #tpu.memory_space<vmem>>, %arg2: memref<32x256xf32, #tpu.memory_space<vmem>>, %arg3: memref<256x256xf32, #tpu.memory_space<vmem>>, %arg4: memref<96x32xf32, #tpu.memory_space<vmem>>, %arg5: memref<96x4xf32, #tpu.memory_space<vmem>>, %arg6: memref<3x256xf32, #tpu.memory_space<vmem>>) attributes {dimension_semantics = [#tpu.dimension_semantics<arbitrary>], iteration_bounds = array<i64: 1>, scalar_prefetch = 0 : i64, scratch_operands = 0 : i64, tpu.core_type = #tpu.core_type<tc>, window_params = [{pipeline_mode = #tpu.pipeline_mode<synchronous>, transform_indices = @transform_0, window_bounds = array<i64: 16, 256>}, {pipeline_mode = #tpu.pipeline_mode<synchronous>, transform_indices = @transform_1, window_bounds = array<i64: 32, 256>}, {pipeline_mode = #tpu.pipeline_mode<synchronous>, transform_indices = @transform_2, window_bounds = array<i64: 256, 256>}, {pipeline_mode = #tpu.pipeline_mode<synchronous>, transform_indices = @transform_3, window_bounds = array<i64: 96, 32>}, {pipeline_mode = #tpu.pipeline_mode<synchronous>, transform_indices = @transform_4, window_bounds = array<i64: 96, 4>}, {pipeline_mode = #tpu.pipeline_mode<synchronous>, transform_indices = @transform_5, window_bounds = array<i64: 3, 256>}]} {
    %c0 = arith.constant 0 : index
    %c0_0 = arith.constant 0 : index
    %0 = vector.load %arg5[%c0, %c0_0] : memref<96x4xf32, #tpu.memory_space<vmem>>, vector<96x4xf32>
    %1 = vector.extract_strided_slice %0 {offsets = [0, 0], sizes = [96, 1], strides = [1, 1]} : vector<96x4xf32> to vector<96x1xf32>
    %2 = vector.extract_strided_slice %0 {offsets = [0, 1], sizes = [96, 1], strides = [1, 1]} : vector<96x4xf32> to vector<96x1xf32>
    %3 = vector.extract_strided_slice %0 {offsets = [0, 2], sizes = [96, 1], strides = [1, 1]} : vector<96x4xf32> to vector<96x1xf32>
    %4 = vector.extract_strided_slice %0 {offsets = [0, 3], sizes = [32, 1], strides = [1, 1]} : vector<96x4xf32> to vector<32x1xf32>
    %5 = vector.extract_strided_slice %0 {offsets = [32, 3], sizes = [32, 1], strides = [1, 1]} : vector<96x4xf32> to vector<32x1xf32>
    %6 = vector.extract_strided_slice %0 {offsets = [64, 3], sizes = [1, 1], strides = [1, 1]} : vector<96x4xf32> to vector<1x1xf32>
    %c0_1 = arith.constant 0 : index
    %c0_2 = arith.constant 0 : index
    %7 = vector.load %arg2[%c0_1, %c0_2] : memref<32x256xf32, #tpu.memory_space<vmem>>, vector<32x256xf32>
    %c0_3 = arith.constant 0 : index
    %c0_4 = arith.constant 0 : index
    %8 = vector.load %arg1[%c0_3, %c0_4] : memref<16x256xf32, #tpu.memory_space<vmem>>, vector<1x256xf32>
    %9 = vector.broadcast %1 : vector<96x1xf32> to vector<96x256xf32>
    %10 = vector.broadcast %8 : vector<1x256xf32> to vector<96x256xf32>
    %11 = arith.mulf %9, %10 : vector<96x256xf32>
    %12 = vector.broadcast %3 : vector<96x1xf32> to vector<96x256xf32>
    %13 = arith.addf %12, %11 : vector<96x256xf32>
    %c1 = arith.constant 1 : index
    %c0_5 = arith.constant 0 : index
    %14 = vector.load %arg1[%c1, %c0_5] : memref<16x256xf32, #tpu.memory_space<vmem>>, vector<1x256xf32>
    %15 = vector.broadcast %2 : vector<96x1xf32> to vector<96x256xf32>
    %16 = vector.broadcast %14 : vector<1x256xf32> to vector<96x256xf32>
    %17 = arith.mulf %15, %16 : vector<96x256xf32>
    %18 = arith.addf %13, %17 : vector<96x256xf32>
    %c0_6 = arith.constant 0 : index
    %c0_7 = arith.constant 0 : index
    %19 = vector.load %arg3[%c0_6, %c0_7] : memref<256x256xf32, #tpu.memory_space<vmem>>, vector<256x256xf32>
    %cst = arith.constant dense<0.000000e+00> : vector<32x256xf32>
    %20 = tpu.matmul %7, %19, %cst {dimension_numbers = #tpu.dot_dimension_numbers<[1], [0], [0], [1], [0, 0, 1, 1], [], []>} : vector<32x256xf32>, vector<256x256xf32>, vector<32x256xf32> -> vector<32x256xf32>
    %c0_8 = arith.constant 0 : index
    %c0_9 = arith.constant 0 : index
    %21 = vector.load %arg4[%c0_8, %c0_9] : memref<96x32xf32, #tpu.memory_space<vmem>>, vector<96x32xf32>
    %cst_10 = arith.constant dense<0.000000e+00> : vector<96x256xf32>
    %22 = tpu.matmul %21, %20, %cst_10 {dimension_numbers = #tpu.dot_dimension_numbers<[1], [0], [0], [1], [0, 0, 1, 1], [], []>} : vector<96x32xf32>, vector<32x256xf32>, vector<96x256xf32> -> vector<96x256xf32>
    %23 = vector.extract_strided_slice %22 {offsets = [0, 0], sizes = [32, 256], strides = [1, 1]} : vector<96x256xf32> to vector<32x256xf32>
    %24 = vector.extract_strided_slice %18 {offsets = [0, 0], sizes = [32, 256], strides = [1, 1]} : vector<96x256xf32> to vector<32x256xf32>
    %25 = arith.addf %23, %24 : vector<32x256xf32>
    %26 = arith.negf %25 : vector<32x256xf32>
    %27 = math.exp %26 : vector<32x256xf32>
    %cst_11 = arith.constant 1.000000e+00 : f32
    %28 = vector.broadcast %cst_11 : f32 to vector<32x256xf32>
    %29 = arith.addf %28, %27 : vector<32x256xf32>
    %30 = arith.divf %28, %29 : vector<32x256xf32>
    %31 = vector.extract_strided_slice %22 {offsets = [32, 0], sizes = [32, 256], strides = [1, 1]} : vector<96x256xf32> to vector<32x256xf32>
    %32 = vector.extract_strided_slice %18 {offsets = [32, 0], sizes = [32, 256], strides = [1, 1]} : vector<96x256xf32> to vector<32x256xf32>
    %33 = arith.addf %31, %32 : vector<32x256xf32>
    %34 = arith.negf %33 : vector<32x256xf32>
    %35 = math.exp %34 : vector<32x256xf32>
    %cst_12 = arith.constant 1.000000e+00 : f32
    %36 = vector.broadcast %cst_12 : f32 to vector<32x256xf32>
    %37 = arith.addf %36, %35 : vector<32x256xf32>
    %38 = arith.divf %36, %37 : vector<32x256xf32>
    %39 = vector.extract_strided_slice %22 {offsets = [64, 0], sizes = [32, 256], strides = [1, 1]} : vector<96x256xf32> to vector<32x256xf32>
    %40 = vector.broadcast %5 : vector<32x1xf32> to vector<32x256xf32>
    %41 = arith.addf %39, %40 : vector<32x256xf32>
    %42 = arith.mulf %30, %41 : vector<32x256xf32>
    %43 = vector.extract_strided_slice %18 {offsets = [64, 0], sizes = [32, 256], strides = [1, 1]} : vector<96x256xf32> to vector<32x256xf32>
    %44 = arith.addf %42, %43 : vector<32x256xf32>
    %45 = math.tanh %44 : vector<32x256xf32>
    %cst_13 = arith.constant 1.000000e+00 : f32
    %46 = vector.broadcast %cst_13 : f32 to vector<32x256xf32>
    %47 = arith.subf %46, %38 : vector<32x256xf32>
    %48 = arith.mulf %47, %45 : vector<32x256xf32>
    %49 = arith.mulf %38, %20 : vector<32x256xf32>
    %50 = arith.addf %48, %49 : vector<32x256xf32>
    %c2 = arith.constant 2 : index
    %c0_14 = arith.constant 0 : index
    %51 = vector.load %arg1[%c2, %c0_14] : memref<16x256xf32, #tpu.memory_space<vmem>>, vector<1x256xf32>
    %52 = vector.broadcast %1 : vector<96x1xf32> to vector<96x256xf32>
    %53 = vector.broadcast %51 : vector<1x256xf32> to vector<96x256xf32>
    %54 = arith.mulf %52, %53 : vector<96x256xf32>
    %55 = vector.broadcast %3 : vector<96x1xf32> to vector<96x256xf32>
    %56 = arith.addf %55, %54 : vector<96x256xf32>
    %c3 = arith.constant 3 : index
    %c0_15 = arith.constant 0 : index
    %57 = vector.load %arg1[%c3, %c0_15] : memref<16x256xf32, #tpu.memory_space<vmem>>, vector<1x256xf32>
    %58 = vector.broadcast %2 : vector<96x1xf32> to vector<96x256xf32>
    %59 = vector.broadcast %57 : vector<1x256xf32> to vector<96x256xf32>
    %60 = arith.mulf %58, %59 : vector<96x256xf32>
    %61 = arith.addf %56, %60 : vector<96x256xf32>
    %c0_16 = arith.constant 0 : index
    %c0_17 = arith.constant 0 : index
    %62 = vector.load %arg3[%c0_16, %c0_17] : memref<256x256xf32, #tpu.memory_space<vmem>>, vector<256x256xf32>
    %cst_18 = arith.constant dense<0.000000e+00> : vector<32x256xf32>
    %63 = tpu.matmul %50, %62, %cst_18 {dimension_numbers = #tpu.dot_dimension_numbers<[1], [0], [0], [1], [0, 0, 1, 1], [], []>} : vector<32x256xf32>, vector<256x256xf32>, vector<32x256xf32> -> vector<32x256xf32>
    %c0_19 = arith.constant 0 : index
    %c0_20 = arith.constant 0 : index
    %64 = vector.load %arg4[%c0_19, %c0_20] : memref<96x32xf32, #tpu.memory_space<vmem>>, vector<96x32xf32>
    %cst_21 = arith.constant dense<0.000000e+00> : vector<96x256xf32>
    %65 = tpu.matmul %64, %63, %cst_21 {dimension_numbers = #tpu.dot_dimension_numbers<[1], [0], [0], [1], [0, 0, 1, 1], [], []>} : vector<96x32xf32>, vector<32x256xf32>, vector<96x256xf32> -> vector<96x256xf32>
    %66 = vector.extract_strided_slice %65 {offsets = [0, 0], sizes = [32, 256], strides = [1, 1]} : vector<96x256xf32> to vector<32x256xf32>
    %67 = vector.extract_strided_slice %61 {offsets = [0, 0], sizes = [32, 256], strides = [1, 1]} : vector<96x256xf32> to vector<32x256xf32>
    %68 = arith.addf %66, %67 : vector<32x256xf32>
    %69 = arith.negf %68 : vector<32x256xf32>
    %70 = math.exp %69 : vector<32x256xf32>
    %cst_22 = arith.constant 1.000000e+00 : f32
    %71 = vector.broadcast %cst_22 : f32 to vector<32x256xf32>
    %72 = arith.addf %71, %70 : vector<32x256xf32>
    %73 = arith.divf %71, %72 : vector<32x256xf32>
    %74 = vector.extract_strided_slice %65 {offsets = [32, 0], sizes = [32, 256], strides = [1, 1]} : vector<96x256xf32> to vector<32x256xf32>
    %75 = vector.extract_strided_slice %61 {offsets = [32, 0], sizes = [32, 256], strides = [1, 1]} : vector<96x256xf32> to vector<32x256xf32>
    %76 = arith.addf %74, %75 : vector<32x256xf32>
    %77 = arith.negf %76 : vector<32x256xf32>
    %78 = math.exp %77 : vector<32x256xf32>
    %cst_23 = arith.constant 1.000000e+00 : f32
    %79 = vector.broadcast %cst_23 : f32 to vector<32x256xf32>
    %80 = arith.addf %79, %78 : vector<32x256xf32>
    %81 = arith.divf %79, %80 : vector<32x256xf32>
    %82 = vector.extract_strided_slice %65 {offsets = [64, 0], sizes = [32, 256], strides = [1, 1]} : vector<96x256xf32> to vector<32x256xf32>
    %83 = vector.broadcast %5 : vector<32x1xf32> to vector<32x256xf32>
    %84 = arith.addf %82, %83 : vector<32x256xf32>
    %85 = arith.mulf %73, %84 : vector<32x256xf32>
    %86 = vector.extract_strided_slice %61 {offsets = [64, 0], sizes = [32, 256], strides = [1, 1]} : vector<96x256xf32> to vector<32x256xf32>
    %87 = arith.addf %85, %86 : vector<32x256xf32>
    %88 = math.tanh %87 : vector<32x256xf32>
    %cst_24 = arith.constant 1.000000e+00 : f32
    %89 = vector.broadcast %cst_24 : f32 to vector<32x256xf32>
    %90 = arith.subf %89, %81 : vector<32x256xf32>
    %91 = arith.mulf %90, %88 : vector<32x256xf32>
    %92 = arith.mulf %81, %63 : vector<32x256xf32>
    %93 = arith.addf %91, %92 : vector<32x256xf32>
    %c4 = arith.constant 4 : index
    %c0_25 = arith.constant 0 : index
    %94 = vector.load %arg1[%c4, %c0_25] : memref<16x256xf32, #tpu.memory_space<vmem>>, vector<1x256xf32>
    %95 = vector.broadcast %1 : vector<96x1xf32> to vector<96x256xf32>
    %96 = vector.broadcast %94 : vector<1x256xf32> to vector<96x256xf32>
    %97 = arith.mulf %95, %96 : vector<96x256xf32>
    %98 = vector.broadcast %3 : vector<96x1xf32> to vector<96x256xf32>
    %99 = arith.addf %98, %97 : vector<96x256xf32>
    %c5 = arith.constant 5 : index
    %c0_26 = arith.constant 0 : index
    %100 = vector.load %arg1[%c5, %c0_26] : memref<16x256xf32, #tpu.memory_space<vmem>>, vector<1x256xf32>
    %101 = vector.broadcast %2 : vector<96x1xf32> to vector<96x256xf32>
    %102 = vector.broadcast %100 : vector<1x256xf32> to vector<96x256xf32>
    %103 = arith.mulf %101, %102 : vector<96x256xf32>
    %104 = arith.addf %99, %103 : vector<96x256xf32>
    %c0_27 = arith.constant 0 : index
    %c0_28 = arith.constant 0 : index
    %105 = vector.load %arg3[%c0_27, %c0_28] : memref<256x256xf32, #tpu.memory_space<vmem>>, vector<256x256xf32>
    %cst_29 = arith.constant dense<0.000000e+00> : vector<32x256xf32>
    %106 = tpu.matmul %93, %105, %cst_29 {dimension_numbers = #tpu.dot_dimension_numbers<[1], [0], [0], [1], [0, 0, 1, 1], [], []>} : vector<32x256xf32>, vector<256x256xf32>, vector<32x256xf32> -> vector<32x256xf32>
    %c0_30 = arith.constant 0 : index
    %c0_31 = arith.constant 0 : index
    %107 = vector.load %arg4[%c0_30, %c0_31] : memref<96x32xf32, #tpu.memory_space<vmem>>, vector<96x32xf32>
    %cst_32 = arith.constant dense<0.000000e+00> : vector<96x256xf32>
    %108 = tpu.matmul %107, %106, %cst_32 {dimension_numbers = #tpu.dot_dimension_numbers<[1], [0], [0], [1], [0, 0, 1, 1], [], []>} : vector<96x32xf32>, vector<32x256xf32>, vector<96x256xf32> -> vector<96x256xf32>
    %109 = vector.extract_strided_slice %108 {offsets = [0, 0], sizes = [32, 256], strides = [1, 1]} : vector<96x256xf32> to vector<32x256xf32>
    %110 = vector.extract_strided_slice %104 {offsets = [0, 0], sizes = [32, 256], strides = [1, 1]} : vector<96x256xf32> to vector<32x256xf32>
    %111 = arith.addf %109, %110 : vector<32x256xf32>
    %112 = arith.negf %111 : vector<32x256xf32>
    %113 = math.exp %112 : vector<32x256xf32>
    %cst_33 = arith.constant 1.000000e+00 : f32
    %114 = vector.broadcast %cst_33 : f32 to vector<32x256xf32>
    %115 = arith.addf %114, %113 : vector<32x256xf32>
    %116 = arith.divf %114, %115 : vector<32x256xf32>
    %117 = vector.extract_strided_slice %108 {offsets = [32, 0], sizes = [32, 256], strides = [1, 1]} : vector<96x256xf32> to vector<32x256xf32>
    %118 = vector.extract_strided_slice %104 {offsets = [32, 0], sizes = [32, 256], strides = [1, 1]} : vector<96x256xf32> to vector<32x256xf32>
    %119 = arith.addf %117, %118 : vector<32x256xf32>
    %120 = arith.negf %119 : vector<32x256xf32>
    %121 = math.exp %120 : vector<32x256xf32>
    %cst_34 = arith.constant 1.000000e+00 : f32
    %122 = vector.broadcast %cst_34 : f32 to vector<32x256xf32>
    %123 = arith.addf %122, %121 : vector<32x256xf32>
    %124 = arith.divf %122, %123 : vector<32x256xf32>
    %125 = vector.extract_strided_slice %108 {offsets = [64, 0], sizes = [32, 256], strides = [1, 1]} : vector<96x256xf32> to vector<32x256xf32>
    %126 = vector.broadcast %5 : vector<32x1xf32> to vector<32x256xf32>
    %127 = arith.addf %125, %126 : vector<32x256xf32>
    %128 = arith.mulf %116, %127 : vector<32x256xf32>
    %129 = vector.extract_strided_slice %104 {offsets = [64, 0], sizes = [32, 256], strides = [1, 1]} : vector<96x256xf32> to vector<32x256xf32>
    %130 = arith.addf %128, %129 : vector<32x256xf32>
    %131 = math.tanh %130 : vector<32x256xf32>
    %cst_35 = arith.constant 1.000000e+00 : f32
    %132 = vector.broadcast %cst_35 : f32 to vector<32x256xf32>
    %133 = arith.subf %132, %124 : vector<32x256xf32>
    %134 = arith.mulf %133, %131 : vector<32x256xf32>
    %135 = arith.mulf %124, %106 : vector<32x256xf32>
    %136 = arith.addf %134, %135 : vector<32x256xf32>
    %c6 = arith.constant 6 : index
    %c0_36 = arith.constant 0 : index
    %137 = vector.load %arg1[%c6, %c0_36] : memref<16x256xf32, #tpu.memory_space<vmem>>, vector<1x256xf32>
    %138 = vector.broadcast %1 : vector<96x1xf32> to vector<96x256xf32>
    %139 = vector.broadcast %137 : vector<1x256xf32> to vector<96x256xf32>
    %140 = arith.mulf %138, %139 : vector<96x256xf32>
    %141 = vector.broadcast %3 : vector<96x1xf32> to vector<96x256xf32>
    %142 = arith.addf %141, %140 : vector<96x256xf32>
    %c7 = arith.constant 7 : index
    %c0_37 = arith.constant 0 : index
    %143 = vector.load %arg1[%c7, %c0_37] : memref<16x256xf32, #tpu.memory_space<vmem>>, vector<1x256xf32>
    %144 = vector.broadcast %2 : vector<96x1xf32> to vector<96x256xf32>
    %145 = vector.broadcast %143 : vector<1x256xf32> to vector<96x256xf32>
    %146 = arith.mulf %144, %145 : vector<96x256xf32>
    %147 = arith.addf %142, %146 : vector<96x256xf32>
    %c0_38 = arith.constant 0 : index
    %c0_39 = arith.constant 0 : index
    %148 = vector.load %arg3[%c0_38, %c0_39] : memref<256x256xf32, #tpu.memory_space<vmem>>, vector<256x256xf32>
    %cst_40 = arith.constant dense<0.000000e+00> : vector<32x256xf32>
    %149 = tpu.matmul %136, %148, %cst_40 {dimension_numbers = #tpu.dot_dimension_numbers<[1], [0], [0], [1], [0, 0, 1, 1], [], []>} : vector<32x256xf32>, vector<256x256xf32>, vector<32x256xf32> -> vector<32x256xf32>
    %c0_41 = arith.constant 0 : index
    %c0_42 = arith.constant 0 : index
    %150 = vector.load %arg4[%c0_41, %c0_42] : memref<96x32xf32, #tpu.memory_space<vmem>>, vector<96x32xf32>
    %cst_43 = arith.constant dense<0.000000e+00> : vector<96x256xf32>
    %151 = tpu.matmul %150, %149, %cst_43 {dimension_numbers = #tpu.dot_dimension_numbers<[1], [0], [0], [1], [0, 0, 1, 1], [], []>} : vector<96x32xf32>, vector<32x256xf32>, vector<96x256xf32> -> vector<96x256xf32>
    %152 = vector.extract_strided_slice %151 {offsets = [0, 0], sizes = [32, 256], strides = [1, 1]} : vector<96x256xf32> to vector<32x256xf32>
    %153 = vector.extract_strided_slice %147 {offsets = [0, 0], sizes = [32, 256], strides = [1, 1]} : vector<96x256xf32> to vector<32x256xf32>
    %154 = arith.addf %152, %153 : vector<32x256xf32>
    %155 = arith.negf %154 : vector<32x256xf32>
    %156 = math.exp %155 : vector<32x256xf32>
    %cst_44 = arith.constant 1.000000e+00 : f32
    %157 = vector.broadcast %cst_44 : f32 to vector<32x256xf32>
    %158 = arith.addf %157, %156 : vector<32x256xf32>
    %159 = arith.divf %157, %158 : vector<32x256xf32>
    %160 = vector.extract_strided_slice %151 {offsets = [32, 0], sizes = [32, 256], strides = [1, 1]} : vector<96x256xf32> to vector<32x256xf32>
    %161 = vector.extract_strided_slice %147 {offsets = [32, 0], sizes = [32, 256], strides = [1, 1]} : vector<96x256xf32> to vector<32x256xf32>
    %162 = arith.addf %160, %161 : vector<32x256xf32>
    %163 = arith.negf %162 : vector<32x256xf32>
    %164 = math.exp %163 : vector<32x256xf32>
    %cst_45 = arith.constant 1.000000e+00 : f32
    %165 = vector.broadcast %cst_45 : f32 to vector<32x256xf32>
    %166 = arith.addf %165, %164 : vector<32x256xf32>
    %167 = arith.divf %165, %166 : vector<32x256xf32>
    %168 = vector.extract_strided_slice %151 {offsets = [64, 0], sizes = [32, 256], strides = [1, 1]} : vector<96x256xf32> to vector<32x256xf32>
    %169 = vector.broadcast %5 : vector<32x1xf32> to vector<32x256xf32>
    %170 = arith.addf %168, %169 : vector<32x256xf32>
    %171 = arith.mulf %159, %170 : vector<32x256xf32>
    %172 = vector.extract_strided_slice %147 {offsets = [64, 0], sizes = [32, 256], strides = [1, 1]} : vector<96x256xf32> to vector<32x256xf32>
    %173 = arith.addf %171, %172 : vector<32x256xf32>
    %174 = math.tanh %173 : vector<32x256xf32>
    %cst_46 = arith.constant 1.000000e+00 : f32
    %175 = vector.broadcast %cst_46 : f32 to vector<32x256xf32>
    %176 = arith.subf %175, %167 : vector<32x256xf32>
    %177 = arith.mulf %176, %174 : vector<32x256xf32>
    %178 = arith.mulf %167, %149 : vector<32x256xf32>
    %179 = arith.addf %177, %178 : vector<32x256xf32>
    %c8 = arith.constant 8 : index
    %c0_47 = arith.constant 0 : index
    %180 = vector.load %arg1[%c8, %c0_47] : memref<16x256xf32, #tpu.memory_space<vmem>>, vector<1x256xf32>
    %181 = vector.broadcast %1 : vector<96x1xf32> to vector<96x256xf32>
    %182 = vector.broadcast %180 : vector<1x256xf32> to vector<96x256xf32>
    %183 = arith.mulf %181, %182 : vector<96x256xf32>
    %184 = vector.broadcast %3 : vector<96x1xf32> to vector<96x256xf32>
    %185 = arith.addf %184, %183 : vector<96x256xf32>
    %c9 = arith.constant 9 : index
    %c0_48 = arith.constant 0 : index
    %186 = vector.load %arg1[%c9, %c0_48] : memref<16x256xf32, #tpu.memory_space<vmem>>, vector<1x256xf32>
    %187 = vector.broadcast %2 : vector<96x1xf32> to vector<96x256xf32>
    %188 = vector.broadcast %186 : vector<1x256xf32> to vector<96x256xf32>
    %189 = arith.mulf %187, %188 : vector<96x256xf32>
    %190 = arith.addf %185, %189 : vector<96x256xf32>
    %c0_49 = arith.constant 0 : index
    %c0_50 = arith.constant 0 : index
    %191 = vector.load %arg3[%c0_49, %c0_50] : memref<256x256xf32, #tpu.memory_space<vmem>>, vector<256x256xf32>
    %cst_51 = arith.constant dense<0.000000e+00> : vector<32x256xf32>
    %192 = tpu.matmul %179, %191, %cst_51 {dimension_numbers = #tpu.dot_dimension_numbers<[1], [0], [0], [1], [0, 0, 1, 1], [], []>} : vector<32x256xf32>, vector<256x256xf32>, vector<32x256xf32> -> vector<32x256xf32>
    %c0_52 = arith.constant 0 : index
    %c0_53 = arith.constant 0 : index
    %193 = vector.load %arg4[%c0_52, %c0_53] : memref<96x32xf32, #tpu.memory_space<vmem>>, vector<96x32xf32>
    %cst_54 = arith.constant dense<0.000000e+00> : vector<96x256xf32>
    %194 = tpu.matmul %193, %192, %cst_54 {dimension_numbers = #tpu.dot_dimension_numbers<[1], [0], [0], [1], [0, 0, 1, 1], [], []>} : vector<96x32xf32>, vector<32x256xf32>, vector<96x256xf32> -> vector<96x256xf32>
    %195 = vector.extract_strided_slice %194 {offsets = [0, 0], sizes = [32, 256], strides = [1, 1]} : vector<96x256xf32> to vector<32x256xf32>
    %196 = vector.extract_strided_slice %190 {offsets = [0, 0], sizes = [32, 256], strides = [1, 1]} : vector<96x256xf32> to vector<32x256xf32>
    %197 = arith.addf %195, %196 : vector<32x256xf32>
    %198 = arith.negf %197 : vector<32x256xf32>
    %199 = math.exp %198 : vector<32x256xf32>
    %cst_55 = arith.constant 1.000000e+00 : f32
    %200 = vector.broadcast %cst_55 : f32 to vector<32x256xf32>
    %201 = arith.addf %200, %199 : vector<32x256xf32>
    %202 = arith.divf %200, %201 : vector<32x256xf32>
    %203 = vector.extract_strided_slice %194 {offsets = [32, 0], sizes = [32, 256], strides = [1, 1]} : vector<96x256xf32> to vector<32x256xf32>
    %204 = vector.extract_strided_slice %190 {offsets = [32, 0], sizes = [32, 256], strides = [1, 1]} : vector<96x256xf32> to vector<32x256xf32>
    %205 = arith.addf %203, %204 : vector<32x256xf32>
    %206 = arith.negf %205 : vector<32x256xf32>
    %207 = math.exp %206 : vector<32x256xf32>
    %cst_56 = arith.constant 1.000000e+00 : f32
    %208 = vector.broadcast %cst_56 : f32 to vector<32x256xf32>
    %209 = arith.addf %208, %207 : vector<32x256xf32>
    %210 = arith.divf %208, %209 : vector<32x256xf32>
    %211 = vector.extract_strided_slice %194 {offsets = [64, 0], sizes = [32, 256], strides = [1, 1]} : vector<96x256xf32> to vector<32x256xf32>
    %212 = vector.broadcast %5 : vector<32x1xf32> to vector<32x256xf32>
    %213 = arith.addf %211, %212 : vector<32x256xf32>
    %214 = arith.mulf %202, %213 : vector<32x256xf32>
    %215 = vector.extract_strided_slice %190 {offsets = [64, 0], sizes = [32, 256], strides = [1, 1]} : vector<96x256xf32> to vector<32x256xf32>
    %216 = arith.addf %214, %215 : vector<32x256xf32>
    %217 = math.tanh %216 : vector<32x256xf32>
    %cst_57 = arith.constant 1.000000e+00 : f32
    %218 = vector.broadcast %cst_57 : f32 to vector<32x256xf32>
    %219 = arith.subf %218, %210 : vector<32x256xf32>
    %220 = arith.mulf %219, %217 : vector<32x256xf32>
    %221 = arith.mulf %210, %192 : vector<32x256xf32>
    %222 = arith.addf %220, %221 : vector<32x256xf32>
    %c10 = arith.constant 10 : index
    %c0_58 = arith.constant 0 : index
    %223 = vector.load %arg1[%c10, %c0_58] : memref<16x256xf32, #tpu.memory_space<vmem>>, vector<1x256xf32>
    %224 = vector.broadcast %1 : vector<96x1xf32> to vector<96x256xf32>
    %225 = vector.broadcast %223 : vector<1x256xf32> to vector<96x256xf32>
    %226 = arith.mulf %224, %225 : vector<96x256xf32>
    %227 = vector.broadcast %3 : vector<96x1xf32> to vector<96x256xf32>
    %228 = arith.addf %227, %226 : vector<96x256xf32>
    %c11 = arith.constant 11 : index
    %c0_59 = arith.constant 0 : index
    %229 = vector.load %arg1[%c11, %c0_59] : memref<16x256xf32, #tpu.memory_space<vmem>>, vector<1x256xf32>
    %230 = vector.broadcast %2 : vector<96x1xf32> to vector<96x256xf32>
    %231 = vector.broadcast %229 : vector<1x256xf32> to vector<96x256xf32>
    %232 = arith.mulf %230, %231 : vector<96x256xf32>
    %233 = arith.addf %228, %232 : vector<96x256xf32>
    %c0_60 = arith.constant 0 : index
    %c0_61 = arith.constant 0 : index
    %234 = vector.load %arg3[%c0_60, %c0_61] : memref<256x256xf32, #tpu.memory_space<vmem>>, vector<256x256xf32>
    %cst_62 = arith.constant dense<0.000000e+00> : vector<32x256xf32>
    %235 = tpu.matmul %222, %234, %cst_62 {dimension_numbers = #tpu.dot_dimension_numbers<[1], [0], [0], [1], [0, 0, 1, 1], [], []>} : vector<32x256xf32>, vector<256x256xf32>, vector<32x256xf32> -> vector<32x256xf32>
    %c0_63 = arith.constant 0 : index
    %c0_64 = arith.constant 0 : index
    %236 = vector.load %arg4[%c0_63, %c0_64] : memref<96x32xf32, #tpu.memory_space<vmem>>, vector<96x32xf32>
    %cst_65 = arith.constant dense<0.000000e+00> : vector<96x256xf32>
    %237 = tpu.matmul %236, %235, %cst_65 {dimension_numbers = #tpu.dot_dimension_numbers<[1], [0], [0], [1], [0, 0, 1, 1], [], []>} : vector<96x32xf32>, vector<32x256xf32>, vector<96x256xf32> -> vector<96x256xf32>
    %238 = vector.extract_strided_slice %237 {offsets = [0, 0], sizes = [32, 256], strides = [1, 1]} : vector<96x256xf32> to vector<32x256xf32>
    %239 = vector.extract_strided_slice %233 {offsets = [0, 0], sizes = [32, 256], strides = [1, 1]} : vector<96x256xf32> to vector<32x256xf32>
    %240 = arith.addf %238, %239 : vector<32x256xf32>
    %241 = arith.negf %240 : vector<32x256xf32>
    %242 = math.exp %241 : vector<32x256xf32>
    %cst_66 = arith.constant 1.000000e+00 : f32
    %243 = vector.broadcast %cst_66 : f32 to vector<32x256xf32>
    %244 = arith.addf %243, %242 : vector<32x256xf32>
    %245 = arith.divf %243, %244 : vector<32x256xf32>
    %246 = vector.extract_strided_slice %237 {offsets = [32, 0], sizes = [32, 256], strides = [1, 1]} : vector<96x256xf32> to vector<32x256xf32>
    %247 = vector.extract_strided_slice %233 {offsets = [32, 0], sizes = [32, 256], strides = [1, 1]} : vector<96x256xf32> to vector<32x256xf32>
    %248 = arith.addf %246, %247 : vector<32x256xf32>
    %249 = arith.negf %248 : vector<32x256xf32>
    %250 = math.exp %249 : vector<32x256xf32>
    %cst_67 = arith.constant 1.000000e+00 : f32
    %251 = vector.broadcast %cst_67 : f32 to vector<32x256xf32>
    %252 = arith.addf %251, %250 : vector<32x256xf32>
    %253 = arith.divf %251, %252 : vector<32x256xf32>
    %254 = vector.extract_strided_slice %237 {offsets = [64, 0], sizes = [32, 256], strides = [1, 1]} : vector<96x256xf32> to vector<32x256xf32>
    %255 = vector.broadcast %5 : vector<32x1xf32> to vector<32x256xf32>
    %256 = arith.addf %254, %255 : vector<32x256xf32>
    %257 = arith.mulf %245, %256 : vector<32x256xf32>
    %258 = vector.extract_strided_slice %233 {offsets = [64, 0], sizes = [32, 256], strides = [1, 1]} : vector<96x256xf32> to vector<32x256xf32>
    %259 = arith.addf %257, %258 : vector<32x256xf32>
    %260 = math.tanh %259 : vector<32x256xf32>
    %cst_68 = arith.constant 1.000000e+00 : f32
    %261 = vector.broadcast %cst_68 : f32 to vector<32x256xf32>
    %262 = arith.subf %261, %253 : vector<32x256xf32>
    %263 = arith.mulf %262, %260 : vector<32x256xf32>
    %264 = arith.mulf %253, %235 : vector<32x256xf32>
    %265 = arith.addf %263, %264 : vector<32x256xf32>
    %c12 = arith.constant 12 : index
    %c0_69 = arith.constant 0 : index
    %266 = vector.load %arg1[%c12, %c0_69] : memref<16x256xf32, #tpu.memory_space<vmem>>, vector<1x256xf32>
    %267 = vector.broadcast %1 : vector<96x1xf32> to vector<96x256xf32>
    %268 = vector.broadcast %266 : vector<1x256xf32> to vector<96x256xf32>
    %269 = arith.mulf %267, %268 : vector<96x256xf32>
    %270 = vector.broadcast %3 : vector<96x1xf32> to vector<96x256xf32>
    %271 = arith.addf %270, %269 : vector<96x256xf32>
    %c13 = arith.constant 13 : index
    %c0_70 = arith.constant 0 : index
    %272 = vector.load %arg1[%c13, %c0_70] : memref<16x256xf32, #tpu.memory_space<vmem>>, vector<1x256xf32>
    %273 = vector.broadcast %2 : vector<96x1xf32> to vector<96x256xf32>
    %274 = vector.broadcast %272 : vector<1x256xf32> to vector<96x256xf32>
    %275 = arith.mulf %273, %274 : vector<96x256xf32>
    %276 = arith.addf %271, %275 : vector<96x256xf32>
    %c0_71 = arith.constant 0 : index
    %c0_72 = arith.constant 0 : index
    %277 = vector.load %arg3[%c0_71, %c0_72] : memref<256x256xf32, #tpu.memory_space<vmem>>, vector<256x256xf32>
    %cst_73 = arith.constant dense<0.000000e+00> : vector<32x256xf32>
    %278 = tpu.matmul %265, %277, %cst_73 {dimension_numbers = #tpu.dot_dimension_numbers<[1], [0], [0], [1], [0, 0, 1, 1], [], []>} : vector<32x256xf32>, vector<256x256xf32>, vector<32x256xf32> -> vector<32x256xf32>
    %c0_74 = arith.constant 0 : index
    %c0_75 = arith.constant 0 : index
    %279 = vector.load %arg4[%c0_74, %c0_75] : memref<96x32xf32, #tpu.memory_space<vmem>>, vector<96x32xf32>
    %cst_76 = arith.constant dense<0.000000e+00> : vector<96x256xf32>
    %280 = tpu.matmul %279, %278, %cst_76 {dimension_numbers = #tpu.dot_dimension_numbers<[1], [0], [0], [1], [0, 0, 1, 1], [], []>} : vector<96x32xf32>, vector<32x256xf32>, vector<96x256xf32> -> vector<96x256xf32>
    %281 = vector.extract_strided_slice %280 {offsets = [0, 0], sizes = [32, 256], strides = [1, 1]} : vector<96x256xf32> to vector<32x256xf32>
    %282 = vector.extract_strided_slice %276 {offsets = [0, 0], sizes = [32, 256], strides = [1, 1]} : vector<96x256xf32> to vector<32x256xf32>
    %283 = arith.addf %281, %282 : vector<32x256xf32>
    %284 = arith.negf %283 : vector<32x256xf32>
    %285 = math.exp %284 : vector<32x256xf32>
    %cst_77 = arith.constant 1.000000e+00 : f32
    %286 = vector.broadcast %cst_77 : f32 to vector<32x256xf32>
    %287 = arith.addf %286, %285 : vector<32x256xf32>
    %288 = arith.divf %286, %287 : vector<32x256xf32>
    %289 = vector.extract_strided_slice %280 {offsets = [32, 0], sizes = [32, 256], strides = [1, 1]} : vector<96x256xf32> to vector<32x256xf32>
    %290 = vector.extract_strided_slice %276 {offsets = [32, 0], sizes = [32, 256], strides = [1, 1]} : vector<96x256xf32> to vector<32x256xf32>
    %291 = arith.addf %289, %290 : vector<32x256xf32>
    %292 = arith.negf %291 : vector<32x256xf32>
    %293 = math.exp %292 : vector<32x256xf32>
    %cst_78 = arith.constant 1.000000e+00 : f32
    %294 = vector.broadcast %cst_78 : f32 to vector<32x256xf32>
    %295 = arith.addf %294, %293 : vector<32x256xf32>
    %296 = arith.divf %294, %295 : vector<32x256xf32>
    %297 = vector.extract_strided_slice %280 {offsets = [64, 0], sizes = [32, 256], strides = [1, 1]} : vector<96x256xf32> to vector<32x256xf32>
    %298 = vector.broadcast %5 : vector<32x1xf32> to vector<32x256xf32>
    %299 = arith.addf %297, %298 : vector<32x256xf32>
    %300 = arith.mulf %288, %299 : vector<32x256xf32>
    %301 = vector.extract_strided_slice %276 {offsets = [64, 0], sizes = [32, 256], strides = [1, 1]} : vector<96x256xf32> to vector<32x256xf32>
    %302 = arith.addf %300, %301 : vector<32x256xf32>
    %303 = math.tanh %302 : vector<32x256xf32>
    %cst_79 = arith.constant 1.000000e+00 : f32
    %304 = vector.broadcast %cst_79 : f32 to vector<32x256xf32>
    %305 = arith.subf %304, %296 : vector<32x256xf32>
    %306 = arith.mulf %305, %303 : vector<32x256xf32>
    %307 = arith.mulf %296, %278 : vector<32x256xf32>
    %308 = arith.addf %306, %307 : vector<32x256xf32>
    %c14 = arith.constant 14 : index
    %c0_80 = arith.constant 0 : index
    %309 = vector.load %arg1[%c14, %c0_80] : memref<16x256xf32, #tpu.memory_space<vmem>>, vector<1x256xf32>
    %310 = vector.broadcast %1 : vector<96x1xf32> to vector<96x256xf32>
    %311 = vector.broadcast %309 : vector<1x256xf32> to vector<96x256xf32>
    %312 = arith.mulf %310, %311 : vector<96x256xf32>
    %313 = vector.broadcast %3 : vector<96x1xf32> to vector<96x256xf32>
    %314 = arith.addf %313, %312 : vector<96x256xf32>
    %c15 = arith.constant 15 : index
    %c0_81 = arith.constant 0 : index
    %315 = vector.load %arg1[%c15, %c0_81] : memref<16x256xf32, #tpu.memory_space<vmem>>, vector<1x256xf32>
    %316 = vector.broadcast %2 : vector<96x1xf32> to vector<96x256xf32>
    %317 = vector.broadcast %315 : vector<1x256xf32> to vector<96x256xf32>
    %318 = arith.mulf %316, %317 : vector<96x256xf32>
    %319 = arith.addf %314, %318 : vector<96x256xf32>
    %c0_82 = arith.constant 0 : index
    %c0_83 = arith.constant 0 : index
    %320 = vector.load %arg3[%c0_82, %c0_83] : memref<256x256xf32, #tpu.memory_space<vmem>>, vector<256x256xf32>
    %cst_84 = arith.constant dense<0.000000e+00> : vector<32x256xf32>
    %321 = tpu.matmul %308, %320, %cst_84 {dimension_numbers = #tpu.dot_dimension_numbers<[1], [0], [0], [1], [0, 0, 1, 1], [], []>} : vector<32x256xf32>, vector<256x256xf32>, vector<32x256xf32> -> vector<32x256xf32>
    %c0_85 = arith.constant 0 : index
    %c0_86 = arith.constant 0 : index
    %322 = vector.load %arg4[%c0_85, %c0_86] : memref<96x32xf32, #tpu.memory_space<vmem>>, vector<96x32xf32>
    %cst_87 = arith.constant dense<0.000000e+00> : vector<96x256xf32>
    %323 = tpu.matmul %322, %321, %cst_87 {dimension_numbers = #tpu.dot_dimension_numbers<[1], [0], [0], [1], [0, 0, 1, 1], [], []>} : vector<96x32xf32>, vector<32x256xf32>, vector<96x256xf32> -> vector<96x256xf32>
    %324 = vector.extract_strided_slice %323 {offsets = [0, 0], sizes = [32, 256], strides = [1, 1]} : vector<96x256xf32> to vector<32x256xf32>
    %325 = vector.extract_strided_slice %319 {offsets = [0, 0], sizes = [32, 256], strides = [1, 1]} : vector<96x256xf32> to vector<32x256xf32>
    %326 = arith.addf %324, %325 : vector<32x256xf32>
    %327 = arith.negf %326 : vector<32x256xf32>
    %328 = math.exp %327 : vector<32x256xf32>
    %cst_88 = arith.constant 1.000000e+00 : f32
    %329 = vector.broadcast %cst_88 : f32 to vector<32x256xf32>
    %330 = arith.addf %329, %328 : vector<32x256xf32>
    %331 = arith.divf %329, %330 : vector<32x256xf32>
    %332 = vector.extract_strided_slice %323 {offsets = [32, 0], sizes = [32, 256], strides = [1, 1]} : vector<96x256xf32> to vector<32x256xf32>
    %333 = vector.extract_strided_slice %319 {offsets = [32, 0], sizes = [32, 256], strides = [1, 1]} : vector<96x256xf32> to vector<32x256xf32>
    %334 = arith.addf %332, %333 : vector<32x256xf32>
    %335 = arith.negf %334 : vector<32x256xf32>
    %336 = math.exp %335 : vector<32x256xf32>
    %cst_89 = arith.constant 1.000000e+00 : f32
    %337 = vector.broadcast %cst_89 : f32 to vector<32x256xf32>
    %338 = arith.addf %337, %336 : vector<32x256xf32>
    %339 = arith.divf %337, %338 : vector<32x256xf32>
    %340 = vector.extract_strided_slice %323 {offsets = [64, 0], sizes = [32, 256], strides = [1, 1]} : vector<96x256xf32> to vector<32x256xf32>
    %341 = vector.broadcast %5 : vector<32x1xf32> to vector<32x256xf32>
    %342 = arith.addf %340, %341 : vector<32x256xf32>
    %343 = arith.mulf %331, %342 : vector<32x256xf32>
    %344 = vector.extract_strided_slice %319 {offsets = [64, 0], sizes = [32, 256], strides = [1, 1]} : vector<96x256xf32> to vector<32x256xf32>
    %345 = arith.addf %343, %344 : vector<32x256xf32>
    %346 = math.tanh %345 : vector<32x256xf32>
    %cst_90 = arith.constant 1.000000e+00 : f32
    %347 = vector.broadcast %cst_90 : f32 to vector<32x256xf32>
    %348 = arith.subf %347, %339 : vector<32x256xf32>
    %349 = arith.mulf %348, %346 : vector<32x256xf32>
    %350 = arith.mulf %339, %321 : vector<32x256xf32>
    %351 = arith.addf %349, %350 : vector<32x256xf32>
    %352 = vector.broadcast %4 : vector<32x1xf32> to vector<32x256xf32>
    %353 = arith.mulf %352, %351 : vector<32x256xf32>
    %cst_91 = arith.constant dense<0.000000e+00> : vector<256xf32>
    %354 = vector.multi_reduction <add>, %353, %cst_91 [0] : vector<32x256xf32> to vector<256xf32>
    %355 = vector.shape_cast %354 : vector<256xf32> to vector<1x256xf32>
    %356 = vector.broadcast %6 : vector<1x1xf32> to vector<1x256xf32>
    %357 = arith.addf %355, %356 : vector<1x256xf32>
    %c0_92 = arith.constant 0 : index
    %c0_93 = arith.constant 0 : index
    %358 = vector.load %arg6[%c0_92, %c0_93] : memref<3x256xf32, #tpu.memory_space<vmem>>, vector<1x256xf32>
    tpu.vector_store %arg6[%c0_92, %c0_93], %357 {strides = array<i32>} : memref<3x256xf32, #tpu.memory_space<vmem>>, vector<1x256xf32>,
    %359 = vector.broadcast %1 : vector<96x1xf32> to vector<96x256xf32>
    %360 = vector.broadcast %357 : vector<1x256xf32> to vector<96x256xf32>
    %361 = arith.mulf %359, %360 : vector<96x256xf32>
    %362 = vector.broadcast %3 : vector<96x1xf32> to vector<96x256xf32>
    %363 = arith.addf %362, %361 : vector<96x256xf32>
    %c0_94 = arith.constant 0 : index
    %c0_95 = arith.constant 0 : index
    %364 = vector.load %arg3[%c0_94, %c0_95] : memref<256x256xf32, #tpu.memory_space<vmem>>, vector<256x256xf32>
    %cst_96 = arith.constant dense<0.000000e+00> : vector<32x256xf32>
    %365 = tpu.matmul %351, %364, %cst_96 {dimension_numbers = #tpu.dot_dimension_numbers<[1], [0], [0], [1], [0, 0, 1, 1], [], []>} : vector<32x256xf32>, vector<256x256xf32>, vector<32x256xf32> -> vector<32x256xf32>
    %c0_97 = arith.constant 0 : index
    %c0_98 = arith.constant 0 : index
    %366 = vector.load %arg4[%c0_97, %c0_98] : memref<96x32xf32, #tpu.memory_space<vmem>>, vector<96x32xf32>
    %cst_99 = arith.constant dense<0.000000e+00> : vector<96x256xf32>
    %367 = tpu.matmul %366, %365, %cst_99 {dimension_numbers = #tpu.dot_dimension_numbers<[1], [0], [0], [1], [0, 0, 1, 1], [], []>} : vector<96x32xf32>, vector<32x256xf32>, vector<96x256xf32> -> vector<96x256xf32>
    %368 = vector.extract_strided_slice %367 {offsets = [0, 0], sizes = [32, 256], strides = [1, 1]} : vector<96x256xf32> to vector<32x256xf32>
    %369 = vector.extract_strided_slice %363 {offsets = [0, 0], sizes = [32, 256], strides = [1, 1]} : vector<96x256xf32> to vector<32x256xf32>
    %370 = arith.addf %368, %369 : vector<32x256xf32>
    %371 = arith.negf %370 : vector<32x256xf32>
    %372 = math.exp %371 : vector<32x256xf32>
    %cst_100 = arith.constant 1.000000e+00 : f32
    %373 = vector.broadcast %cst_100 : f32 to vector<32x256xf32>
    %374 = arith.addf %373, %372 : vector<32x256xf32>
    %375 = arith.divf %373, %374 : vector<32x256xf32>
    %376 = vector.extract_strided_slice %367 {offsets = [32, 0], sizes = [32, 256], strides = [1, 1]} : vector<96x256xf32> to vector<32x256xf32>
    %377 = vector.extract_strided_slice %363 {offsets = [32, 0], sizes = [32, 256], strides = [1, 1]} : vector<96x256xf32> to vector<32x256xf32>
    %378 = arith.addf %376, %377 : vector<32x256xf32>
    %379 = arith.negf %378 : vector<32x256xf32>
    %380 = math.exp %379 : vector<32x256xf32>
    %cst_101 = arith.constant 1.000000e+00 : f32
    %381 = vector.broadcast %cst_101 : f32 to vector<32x256xf32>
    %382 = arith.addf %381, %380 : vector<32x256xf32>
    %383 = arith.divf %381, %382 : vector<32x256xf32>
    %384 = vector.extract_strided_slice %367 {offsets = [64, 0], sizes = [32, 256], strides = [1, 1]} : vector<96x256xf32> to vector<32x256xf32>
    %385 = vector.broadcast %5 : vector<32x1xf32> to vector<32x256xf32>
    %386 = arith.addf %384, %385 : vector<32x256xf32>
    %387 = arith.mulf %375, %386 : vector<32x256xf32>
    %388 = vector.extract_strided_slice %363 {offsets = [64, 0], sizes = [32, 256], strides = [1, 1]} : vector<96x256xf32> to vector<32x256xf32>
    %389 = arith.addf %387, %388 : vector<32x256xf32>
    %390 = math.tanh %389 : vector<32x256xf32>
    %cst_102 = arith.constant 1.000000e+00 : f32
    %391 = vector.broadcast %cst_102 : f32 to vector<32x256xf32>
    %392 = arith.subf %391, %383 : vector<32x256xf32>
    %393 = arith.mulf %392, %390 : vector<32x256xf32>
    %394 = arith.mulf %383, %365 : vector<32x256xf32>
    %395 = arith.addf %393, %394 : vector<32x256xf32>
    %396 = vector.broadcast %4 : vector<32x1xf32> to vector<32x256xf32>
    %397 = arith.mulf %396, %395 : vector<32x256xf32>
    %cst_103 = arith.constant dense<0.000000e+00> : vector<256xf32>
    %398 = vector.multi_reduction <add>, %397, %cst_103 [0] : vector<32x256xf32> to vector<256xf32>
    %399 = vector.shape_cast %398 : vector<256xf32> to vector<1x256xf32>
    %400 = vector.broadcast %6 : vector<1x1xf32> to vector<1x256xf32>
    %401 = arith.addf %399, %400 : vector<1x256xf32>
    %c1_104 = arith.constant 1 : index
    %c0_105 = arith.constant 0 : index
    %402 = vector.load %arg6[%c1_104, %c0_105] : memref<3x256xf32, #tpu.memory_space<vmem>>, vector<1x256xf32>
    tpu.vector_store %arg6[%c1_104, %c0_105], %401 {strides = array<i32>} : memref<3x256xf32, #tpu.memory_space<vmem>>, vector<1x256xf32>,
    %403 = vector.broadcast %1 : vector<96x1xf32> to vector<96x256xf32>
    %404 = vector.broadcast %401 : vector<1x256xf32> to vector<96x256xf32>
    %405 = arith.mulf %403, %404 : vector<96x256xf32>
    %406 = vector.broadcast %3 : vector<96x1xf32> to vector<96x256xf32>
    %407 = arith.addf %406, %405 : vector<96x256xf32>
    %c0_106 = arith.constant 0 : index
    %c0_107 = arith.constant 0 : index
    %408 = vector.load %arg3[%c0_106, %c0_107] : memref<256x256xf32, #tpu.memory_space<vmem>>, vector<256x256xf32>
    %cst_108 = arith.constant dense<0.000000e+00> : vector<32x256xf32>
    %409 = tpu.matmul %395, %408, %cst_108 {dimension_numbers = #tpu.dot_dimension_numbers<[1], [0], [0], [1], [0, 0, 1, 1], [], []>} : vector<32x256xf32>, vector<256x256xf32>, vector<32x256xf32> -> vector<32x256xf32>
    %c0_109 = arith.constant 0 : index
    %c0_110 = arith.constant 0 : index
    %410 = vector.load %arg4[%c0_109, %c0_110] : memref<96x32xf32, #tpu.memory_space<vmem>>, vector<96x32xf32>
    %cst_111 = arith.constant dense<0.000000e+00> : vector<96x256xf32>
    %411 = tpu.matmul %410, %409, %cst_111 {dimension_numbers = #tpu.dot_dimension_numbers<[1], [0], [0], [1], [0, 0, 1, 1], [], []>} : vector<96x32xf32>, vector<32x256xf32>, vector<96x256xf32> -> vector<96x256xf32>
    %412 = vector.extract_strided_slice %411 {offsets = [0, 0], sizes = [32, 256], strides = [1, 1]} : vector<96x256xf32> to vector<32x256xf32>
    %413 = vector.extract_strided_slice %407 {offsets = [0, 0], sizes = [32, 256], strides = [1, 1]} : vector<96x256xf32> to vector<32x256xf32>
    %414 = arith.addf %412, %413 : vector<32x256xf32>
    %415 = arith.negf %414 : vector<32x256xf32>
    %416 = math.exp %415 : vector<32x256xf32>
    %cst_112 = arith.constant 1.000000e+00 : f32
    %417 = vector.broadcast %cst_112 : f32 to vector<32x256xf32>
    %418 = arith.addf %417, %416 : vector<32x256xf32>
    %419 = arith.divf %417, %418 : vector<32x256xf32>
    %420 = vector.extract_strided_slice %411 {offsets = [32, 0], sizes = [32, 256], strides = [1, 1]} : vector<96x256xf32> to vector<32x256xf32>
    %421 = vector.extract_strided_slice %407 {offsets = [32, 0], sizes = [32, 256], strides = [1, 1]} : vector<96x256xf32> to vector<32x256xf32>
    %422 = arith.addf %420, %421 : vector<32x256xf32>
    %423 = arith.negf %422 : vector<32x256xf32>
    %424 = math.exp %423 : vector<32x256xf32>
    %cst_113 = arith.constant 1.000000e+00 : f32
    %425 = vector.broadcast %cst_113 : f32 to vector<32x256xf32>
    %426 = arith.addf %425, %424 : vector<32x256xf32>
    %427 = arith.divf %425, %426 : vector<32x256xf32>
    %428 = vector.extract_strided_slice %411 {offsets = [64, 0], sizes = [32, 256], strides = [1, 1]} : vector<96x256xf32> to vector<32x256xf32>
    %429 = vector.broadcast %5 : vector<32x1xf32> to vector<32x256xf32>
    %430 = arith.addf %428, %429 : vector<32x256xf32>
    %431 = arith.mulf %419, %430 : vector<32x256xf32>
    %432 = vector.extract_strided_slice %407 {offsets = [64, 0], sizes = [32, 256], strides = [1, 1]} : vector<96x256xf32> to vector<32x256xf32>
    %433 = arith.addf %431, %432 : vector<32x256xf32>
    %434 = math.tanh %433 : vector<32x256xf32>
    %cst_114 = arith.constant 1.000000e+00 : f32
    %435 = vector.broadcast %cst_114 : f32 to vector<32x256xf32>
    %436 = arith.subf %435, %427 : vector<32x256xf32>
    %437 = arith.mulf %436, %434 : vector<32x256xf32>
    %438 = arith.mulf %427, %409 : vector<32x256xf32>
    %439 = arith.addf %437, %438 : vector<32x256xf32>
    %440 = vector.broadcast %4 : vector<32x1xf32> to vector<32x256xf32>
    %441 = arith.mulf %440, %439 : vector<32x256xf32>
    %cst_115 = arith.constant dense<0.000000e+00> : vector<256xf32>
    %442 = vector.multi_reduction <add>, %441, %cst_115 [0] : vector<32x256xf32> to vector<256xf32>
    %443 = vector.shape_cast %442 : vector<256xf32> to vector<1x256xf32>
    %444 = vector.broadcast %6 : vector<1x1xf32> to vector<1x256xf32>
    %445 = arith.addf %443, %444 : vector<1x256xf32>
    %c2_116 = arith.constant 2 : index
    %c0_117 = arith.constant 0 : index
    %446 = vector.load %arg6[%c2_116, %c0_117] : memref<3x256xf32, #tpu.memory_space<vmem>>, vector<1x256xf32>
    tpu.vector_store %arg6[%c2_116, %c0_117], %445 {strides = array<i32>} : memref<3x256xf32, #tpu.memory_space<vmem>>, vector<1x256xf32>,
    return
  }
  func.func @transform_0(%arg0: i32) -> (i32, i32) {
    %c0_i32 = arith.constant 0 : i32
    %c0_i32_0 = arith.constant 0 : i32
    %c0_i32_1 = arith.constant 0 : i32
    return %c0_i32, %c0_i32_0 : i32, i32
  }
  func.func @transform_1(%arg0: i32) -> (i32, i32) {
    %c0_i32 = arith.constant 0 : i32
    %c0_i32_0 = arith.constant 0 : i32
    %c0_i32_1 = arith.constant 0 : i32
    return %c0_i32, %c0_i32_0 : i32, i32
  }
  func.func @transform_2(%arg0: i32) -> (i32, i32) {
    %c0_i32 = arith.constant 0 : i32
    %c0_i32_0 = arith.constant 0 : i32
    %c0_i32_1 = arith.constant 0 : i32
    return %c0_i32, %c0_i32_0 : i32, i32
  }
  func.func @transform_3(%arg0: i32) -> (i32, i32) {
    %c0_i32 = arith.constant 0 : i32
    %c0_i32_0 = arith.constant 0 : i32
    %c0_i32_1 = arith.constant 0 : i32
    return %c0_i32, %c0_i32_0 : i32, i32
  }
  func.func @transform_4(%arg0: i32) -> (i32, i32) {
    %c0_i32 = arith.constant 0 : i32
    %c0_i32_0 = arith.constant 0 : i32
    %c0_i32_1 = arith.constant 0 : i32
    return %c0_i32, %c0_i32_0 : i32, i32
  }
  func.func @transform_5(%arg0: i32) -> (i32, i32) {
    %c0_i32 = arith.constant 0 : i32
    %c0_i32_0 = arith.constant 0 : i32
    %c0_i32_1 = arith.constant 0 : i32
    return %c0_i32, %c0_i32_0 : i32, i32
  }
}

</mosaic_0001>

<bundles_post_ra>
// kernel: tpu_custom_call.1
= control target key start
LH: loop header
LB: loop body
LE: loop exit
PB: predicated region body
PF: predicated region fallthrough
CT: control target
= control target key end

     0   :  { %10 = vsyncpa [#allocation3], 0  ;;  %s11169_s0 = inlined_call_operand.vmem [shape: f32[16,256], index: 0, kind: input, shape index: {}]   ;;  %s11170_s1 = inlined_call_operand.vmem [shape: f32[32,256], index: 1, kind: input, shape index: {}]   ;;  %s11171_s2 = inlined_call_operand.hbm [shape: f32[256,256], index: 2, kind: input, shape index: {}]   ;;  %s11172_s3 = inlined_call_operand.vmem [shape: f32[96,32], index: 3, kind: input, shape index: {}]   ;;  %s11173_s4 = inlined_call_operand.vmem [shape: f32[96,4], index: 4, kind: input, shape index: {}]   ;;  %s11174_s5 = inlined_call_operand.hbm [shape: f32[3,256], index: 5, kind: output, shape index: {}]  }
   0x1   :  { %11 = vsyncpa [#allocation4], 0  ;;  %s7274_s18 = smov [#allocation2]  }
   0x2   :  { %s21_s19 = sshll.u32 %s7274_s18, 4  ;;  %s22_s19 = int_to_ptr.vmem [resolvable:$true] %s21_s19 }
   0x3   :  { %s7238_s20 = scalar_lea.vmem %s22_s19, 8192  ;;  %p7243_p1 = scmp.lt.s32.totalorder %s22_s19, %s22_s19 }
   0x4   :  { %p7239_p0 = scmp.ne.s32.totalorder %s22_s19, %s7238_s20  ;;  %p7244_p2 = scmp.lt.s32.totalorder %s7238_s20, %s7238_s20 }
   0x6   :  { %p7245_p3 = por %p7244_p2, %p7243_p1 }
   0x8   :  { %p7246_p4 = pnand %p7245_p3, %p7239_p0 }
   0xa   :  { %7249 = shalt.err (!%p7246_p4)
}
   0xb   :  { %s7275_s21 = smov 256   ;;  %s7276_s22 = smov 16  }
   0xc   :  { %27 = dma.hbm_to_vmem [thread:$0]  %s11171_s2, 8192, %s22_s19, [#allocation3], %s7275_s21, %s7275_s21, %s7276_s22  }
   0xd   :  { %7270 = dma.done.wait [#allocation3], 8192  }
   0xe   :  { %7271 = vsyncadd [#allocation3], 4294959104  ;;  %v11175_v0 = vmov 0   ;;  %v7318_v1 = vld [vmem:[#allocation2 + $0xf8] sm:$0xff]  ;;  %v7320_v2 = vld [vmem:[#allocation2 + $0xf0] sm:$0xff]  ;;  %vm497_vm0 = vcmask 261120  }
   0xf   :  { %6158 = vset.pattern.permute.xlu0 %v11175_v0  ;;  %v7322_v3 = vld [vmem:[#allocation2 + $0xe8] sm:$0xff]  ;;  %396 = vmatprep.subr.mxu0 %v7318_v1  ;;  %v7325_v4 = vld [vmem:[#allocation2 + $0xe0] sm:$0xff]  ;;  %v7328_v5 = vld [vmem:[#allocation2 + $0xd8] sm:$0xff] }
  0x10   :  { %397 = vmatpush1.msra.mxu0 %v7320_v2  ;;  %v7331_v6 = vld [vmem:[#allocation2 + $0xd0] sm:$0xff]  ;;  %v7334_v7 = vld [vmem:[#allocation2 + $0xc8] sm:$0xff]  ;;  %v7337_v8 = vld [vmem:[#allocation2 + $0xc0] sm:$0xff] }
  0x11   :  { %398 = vmatprep.subr.mxu0 %v7322_v3  ;;  %v7340_v9 = vld [vmem:[#allocation2 + $0xb8] sm:$0xff]  ;;  %v7343_v10 = vld [vmem:[#allocation2 + $0xb0] sm:$0xff]  ;;  %v7346_v11 = vld [vmem:[#allocation2 + $0xa8] sm:$0xff] }
  0x12   :  { %399 = vmatpush1.msra.mxu0 %v7325_v4  ;;  %v7349_v12 = vld [vmem:[#allocation2 + $0xa0] sm:$0xff]  ;;  %v7352_v13 = vld [vmem:[#allocation2 + $0x98] sm:$0xff]  ;;  %v7355_v14 = vld [vmem:[#allocation2 + $0x90] sm:$0xff] }
  0x13   :  { %400 = vmatprep.subr.mxu0 %v7328_v5  ;;  %v7358_v15 = vld [vmem:[#allocation2 + $0x88] sm:$0xff]  ;;  %v7361_v16 = vld [vmem:[#allocation2 + $0x80] sm:$0xff]  ;;  %v7364_v17 = vld [vmem:[#allocation2 + $0x78] sm:$0xff] }
  0x14   :  { %401 = vmatpush1.msra.mxu0 %v7331_v6  ;;  %v7367_v18 = vld [vmem:[#allocation2 + $0x70] sm:$0xff]  ;;  %v7370_v19 = vld [vmem:[#allocation2 + $0x68] sm:$0xff]  ;;  %v7373_v20 = vld [vmem:[#allocation2 + $0x60] sm:$0xff] }
  0x15   :  { %402 = vmatprep.subr.mxu0 %v7334_v7  ;;  %v7376_v21 = vld [vmem:[#allocation2 + $0x58] sm:$0xff]  ;;  %v7379_v22 = vld [vmem:[#allocation2 + $0x50] sm:$0xff]  ;;  %v7382_v23 = vld [vmem:[#allocation2 + $0x48] sm:$0xff] }
  0x16   :  { %403 = vmatpush1.msra.mxu0 %v7337_v8  ;;  %v7385_v24 = vld [vmem:[#allocation2 + $0x40] sm:$0xff]  ;;  %v48_v25 = vld [vmem:[%s11170_s1 + $0x8] sm:$0xff]  ;;  %v7391_v26 = vld [vmem:[#allocation2 + $0x38] sm:$0xff] }
  0x17   :  { %404 = vmatprep.subr.mxu0 %v7340_v9  ;;  %460 = vmatprep.mubr.f32.mxu0 %v48_v25  ;;  %v7394_v27 = vld [vmem:[#allocation2 + $0x30] sm:$0xff]  ;;  %v7397_v28 = vld [vmem:[#allocation2 + $0x28] sm:$0xff]  ;;  %v7402_v29 = vld [vmem:[%s11173_s4] sm:$0xff] }
  0x18   :  { %405 = vmatpush1.msra.mxu0 %v7343_v10  ;;  %v7405_v30 = vld [vmem:[#allocation2 + $0x20] sm:$0xff]  ;;  %58 = vperm.xlu0 %6158, %v7402_v29   ;;  %v7409_v31 = vld [vmem:[#allocation2 + $0x18] sm:$0xff]  ;;  %v7412_v32 = vld [vmem:[#allocation2 + $0x10] sm:$0xff] }
  0x19   :  { %406 = vmatprep.subr.mxu0 %v7346_v11  ;;  %v7415_v33 = vld [vmem:[#allocation2 + $0x8] sm:$0xff]  ;;  %v7418_v34 = vld [vmem:[#allocation2] sm:$0xff]  ;;  %v7421_v35 = vld [vmem:[#allocation2 + $0x1f8] sm:$0xff] }
  0x1a   :  { %407 = vmatpush1.msra.mxu0 %v7349_v12  ;;  %v7424_v36 = vld [vmem:[#allocation2 + $0x1f0] sm:$0xff]  ;;  %v7427_v37 = vld [vmem:[#allocation2 + $0x1e8] sm:$0xff]  ;;  %v7430_v38 = vld [vmem:[#allocation2 + $0x1e0] sm:$0xff] }
  0x1b   :  { %408 = vmatprep.subr.mxu0 %v7352_v13  ;;  %v7433_v39 = vld [vmem:[#allocation2 + $0x1d8] sm:$0xff]  ;;  %v7436_v40 = vld [vmem:[#allocation2 + $0x1d0] sm:$0xff]  ;;  %v7439_v41 = vld [vmem:[#allocation2 + $0x1c8] sm:$0xff] }
  0x1c   :  { %409 = vmatpush1.msra.mxu0 %v7355_v14  ;;  %v7442_v42 = vld [vmem:[#allocation2 + $0x1c0] sm:$0xff]  ;;  %v7445_v43 = vld [vmem:[#allocation2 + $0x1b8] sm:$0xff]  ;;  %v7448_v44 = vld [vmem:[#allocation2 + $0x1b0] sm:$0xff] }
  0x1d   :  { %410 = vmatprep.subr.mxu0 %v7358_v15  ;;  %v7451_v45 = vld [vmem:[#allocation2 + $0x1a8] sm:$0xff]  ;;  %v7454_v46 = vld [vmem:[#allocation2 + $0x1a0] sm:$0xff]  ;;  %v7457_v47 = vld [vmem:[#allocation2 + $0x198] sm:$0xff] }
  0x1e   :  { %411 = vmatpush1.msra.mxu0 %v7361_v16  ;;  %v7460_v48 = vld [vmem:[#allocation2 + $0x190] sm:$0xff]  ;;  %v7463_v49 = vld [vmem:[#allocation2 + $0x188] sm:$0xff]  ;;  %v7466_v50 = vld [vmem:[#allocation2 + $0x180] sm:$0xff] }
  0x1f   :  { %412 = vmatprep.subr.mxu0 %v7364_v17  ;;  %v7469_v51 = vld [vmem:[#allocation2 + $0x178] sm:$0xff]  ;;  %v7472_v52 = vld [vmem:[#allocation2 + $0x170] sm:$0xff]  ;;  %v7475_v53 = vld [vmem:[#allocation2 + $0x168] sm:$0xff] }
  0x20   :  { %413 = vmatpush1.msra.mxu0 %v7367_v18  ;;  %11686 = vst [vmem:[#allocation8_spill] sm:$0xff] %v7469_v51  ;;  %11687 = vst [vmem:[#allocation9_spill] sm:$0xff] %v7472_v52  ;;  %v7478_v54 = vld [vmem:[#allocation2 + $0x160] sm:$0xff]  ;;  %v7481_v55 = vld [vmem:[#allocation2 + $0x158] sm:$0xff] }
  0x21   :  { %414 = vmatprep.subr.mxu0 %v7370_v19  ;;  %11688 = vst [vmem:[#allocation10_spill] sm:$0xff] %v7475_v53  ;;  %11689 = vst [vmem:[#allocation11_spill] sm:$0xff] %v7478_v54  ;;  %v7484_v56 = vld [vmem:[#allocation2 + $0x150] sm:$0xff]  ;;  %v7487_v57 = vld [vmem:[#allocation2 + $0x148] sm:$0xff] }
  0x22   :  { %415 = vmatpush1.msra.mxu0 %v7373_v20  ;;  %11690 = vst [vmem:[#allocation12_spill] sm:$0xff] %v7481_v55  ;;  %11691 = vst [vmem:[#allocation13_spill] sm:$0xff] %v7484_v56  ;;  %v7490_v58 = vld [vmem:[#allocation2 + $0x140] sm:$0xff]  ;;  %v7493_v59 = vld [vmem:[#allocation2 + $0x138] sm:$0xff] }
  0x23   :  { %416 = vmatprep.subr.mxu0 %v7376_v21  ;;  %11692 = vst [vmem:[#allocation14_spill] sm:$0xff] %v7487_v57  ;;  %11693 = vst [vmem:[#allocation15_spill] sm:$0xff] %v7490_v58  ;;  %v7496_v60 = vld [vmem:[#allocation2 + $0x130] sm:$0xff]  ;;  %v7499_v61 = vld [vmem:[#allocation2 + $0x128] sm:$0xff] }
  0x24   :  { %417 = vmatpush1.msra.mxu0 %v7379_v22  ;;  %11694 = vst [vmem:[#allocation16_spill] sm:$0xff] %v7493_v59  ;;  %11695 = vst [vmem:[#allocation17_spill] sm:$0xff] %v7496_v60  ;;  %v7502_v62 = vld [vmem:[#allocation2 + $0x120] sm:$0xff]  ;;  %v7505_v63 = vld [vmem:[#allocation2 + $0x118] sm:$0xff] }
  0x25   :  { %418 = vmatprep.subr.mxu0 %v7382_v23  ;;  %11696 = vst [vmem:[#allocation18_spill] sm:$0xff] %v7499_v61  ;;  %11697 = vst [vmem:[#allocation19_spill] sm:$0xff] %v7502_v62  ;;  %v7508_v25 = vld [vmem:[#allocation2 + $0x110] sm:$0xff]  ;;  %v7511_v0 = vld [vmem:[#allocation2 + $0x108] sm:$0xff] }
  0x26   :  { %419 = vmatpush1.msra.mxu0 %v7385_v24  ;;  %11698 = vst [vmem:[#allocation20_spill] sm:$0xff] %v7505_v63  ;;  %11699 = vst [vmem:[#allocation21_spill] sm:$0xff] %v7508_v25 }
  0x27   :  { %420 = vmatprep.subr.mxu0 %v7391_v26  ;;  %11700 = vst [vmem:[#allocation22_spill] sm:$0xff] %v7511_v0 }
  0x28   :  { %421 = vmatpush1.msra.mxu0 %v7394_v27 }
  0x29   :  { %422 = vmatprep.subr.mxu0 %v7397_v28 }
  0x2a   :  { %423 = vmatpush1.msra.mxu0 %v7405_v30 }
  0x2b   :  { %424 = vmatprep.subr.mxu0 %v7409_v31 }
  0x2c   :  { %425 = vmatpush1.msra.mxu0 %v7412_v32 }
  0x2d   :  { %426 = vmatprep.subr.mxu0 %v7415_v33 }
  0x2e   :  { %427 = vmatpush1.msra.mxu0 %v7418_v34 }
  0x2f   :  { %428 = vmatprep.subr.mxu0 %v7421_v35 }
  0x30   :  { %429 = vmatpush2.msra.mxu0 %v7424_v36 }
  0x31   :  { %430 = vmatprep.subr.mxu0 %v7427_v37 }
  0x32   :  { %431 = vmatpush2.msra.mxu0 %v7430_v38 }
  0x33   :  { %432 = vmatprep.subr.mxu0 %v7433_v39 }
  0x34   :  { %433 = vmatpush2.msra.mxu0 %v7436_v40 }
  0x35   :  { %434 = vmatprep.subr.mxu0 %v7439_v41 }
  0x36   :  { %435 = vmatpush2.msra.mxu0 %v7442_v42 }
  0x37   :  { %436 = vmatprep.subr.mxu0 %v7445_v43 }
  0x38   :  { %437 = vmatpush2.msra.mxu0 %v7448_v44 }
  0x39   :  { %438 = vmatprep.subr.mxu0 %v7451_v45 }
  0x3a   :  { %439 = vmatpush2.msra.mxu0 %v7454_v46 }
  0x3b   :  { %440 = vmatprep.subr.mxu0 %v7457_v47 }
  0x3c   :  { %441 = vmatpush2.msra.mxu0 %v7460_v48 }
  0x3d   :  { %442 = vmatprep.subr.mxu0 %v7463_v49 }
  0x3e   :  { %443 = vmatpush2.msra.mxu0 %v7466_v50 }
  0x3f   :  { %444 = vmatprep.subr.mxu0 %v7469_v51  ;;  %v11704_v51 = vmov 2  }
  0x40   :  { %445 = vmatpush2.msra.mxu0 %v7472_v52  ;;  %v45_v52 = vld [vmem:[%s11173_s4 + $0x50] sm:$0xff] }
  0x41   :  { %446 = vmatprep.subr.mxu0 %v7475_v53  ;;  %v7281_v53 = vmov 3  }
  0x42   :  { %447 = vmatpush2.msra.mxu0 %v7478_v54  ;;  %v44_v54 = vld [vmem:[%s11173_s4 + $0x48] sm:$0xff] }
  0x43   :  { %448 = vmatprep.subr.mxu0 %v7481_v55  ;;  %v43_v55 = vld [vmem:[%s11173_s4 + $0x40] sm:$0xff] }
  0x44   :  { %449 = vmatpush2.msra.mxu0 %v7484_v56  ;;  %v39_v56 = vld [vmem:[%s11173_s4 + $0x20] sm:$0xff] }
  0x45   :  { %450 = vmatprep.subr.mxu0 %v7487_v57  ;;  %v11703_v57 = vmov 1  }
  0x46   :  { %451 = vmatpush2.msra.mxu0 %v7490_v58  ;;  %v7514_v58 = vld [vmem:[#allocation2 + $0x100] sm:$0xff] }
  0x47   :  { %452 = vmatprep.subr.mxu0 %v7493_v59  ;;  %11701 = vst [vmem:[#allocation23_spill] sm:$0xff] %v7514_v58  ;;  %v38_v59 = vld [vmem:[%s11173_s4 + $0x18] sm:$0xff] }
  0x48   :  { %453 = vmatpush2.msra.mxu0 %v7496_v60  ;;  %v47_v60 = vld [vmem:[%s11170_s1] sm:$0xff] }
  0x49   :  { %454 = vmatprep.subr.mxu0 %v7499_v61  ;;  %v50_v61 = vld [vmem:[%s11170_s1 + $0x18] sm:$0xff] }
  0x4a   :  { %455 = vmatpush2.msra.mxu0 %v7502_v62  ;;  %v11190_v62 = vmov 0.0  }
  0x4b   :  { %456 = vmatprep.subr.mxu0 %v7505_v63  ;;  %v49_v63 = vld [vmem:[%s11170_s1 + $0x10] sm:$0xff]  ;;  %598 = vmatprep.mubr.f32.mxu1 %v11190_v62 }
  0x4c   :  { %457 = vmatpush2.msra.mxu0 %v7508_v25  ;;  %v52_v25 = vld [vmem:[%s11170_s1 + $0x28] sm:$0xff] }
  0x4d   :  { %458 = vmatprep.subr.mxu0 %v7511_v0  ;;  %v51_v0 = vld [vmem:[%s11170_s1 + $0x20] sm:$0xff] }
  0x4e   :  { %459 = vmatpush2.msra.mxu0 %v7514_v58  ;;  %v54_v58 = vld [vmem:[%s11170_s1 + $0x38] sm:$0xff] }
  0x4f   :  { %461 = vmatmul.mubr.f32.vlgmr.msra.gmra.mxu0 %v47_v60  ;;  %v53_v60 = vld [vmem:[%s11170_s1 + $0x30] sm:$0xff] }
  0x50   :  { %466 = vmatprep.mubr.f32.mxu0 %v50_v61  ;;  %v11184_v61 = vmov 1  }
  0x51   :  { %6162 = vset.pattern.permute.xlu0 %v11184_v61  ;;  %6159 = vset.pattern.permute.xlu1 %v11184_v61  ;;  %v11196_v61 = vmov 2  }
  0x52   :  { %226 = vperm.xlu1 %6159, %v7402_v29  }
  0x53   :  { %467 = vmatmul.mubr.f32.gmra.mxu0 %v49_v63  ;;  %v7544_v63 = vld [vmem:[%s11173_s4 + $0x8] sm:$0xff] }
  0x54   :  { %472 = vmatprep.mubr.f32.mxu0 %v52_v25  ;;  %230 = vperm.xlu0 %6162, %v7544_v63   ;;  %v7560_v25 = vld [vmem:[%s11173_s4 + $0x30] sm:$0xff] }
  0x57   :  { %473 = vmatmul.mubr.f32.gmra.mxu0 %v51_v0  ;;  %v7552_v0 = vld [vmem:[%s11173_s4 + $0x10] sm:$0xff] }
  0x58   :  { %478 = vmatprep.mubr.f32.mxu0 %v54_v58  ;;  %234 = vperm.xlu0 %6162, %v7552_v0   ;;  %v11702_v58 = vmov 0  }
  0x59   :  { %6160 = vset.pattern.permute.xlu1 %v11702_v58 }
  0x5a   :  { %63 = vperm.xlu1 %6160, %v7544_v63  }
  0x5b   :  { %479 = vmatmul.mubr.f32.gmra.mxu0 %v53_v60  ;;  %v7566_v60 = vld [vmem:[%s11173_s4 + $0x38] sm:$0xff] }
  0x5c   :  { %250 = vperm.xlu0 %6162, %v7560_v25   ;;  %1138 = vmatprep.mubr.f32.mxu0 %v11190_v62  ;;  %v40_v62 = vld [vmem:[%s11173_s4 + $0x28] sm:$0xff] }
  0x5e   :  { %6161 = vset.pattern.permute.xlu1 %v11196_v61 }
  0x5f   :  { %156 = vperm.xlu1 %6161, %v7544_v63  }
  0x60   :  { %254 = vperm.xlu0 %6162, %v7566_v60  }
  0x63   :  { %6163 = vset.pattern.permute.xlu1 %v11702_v58 }
  0x64   :  { %6174 = vset.pattern.permute.xlu0 %v11196_v61  ;;  %68 = vperm.xlu1 %6163, %v7552_v0  }
  0x65   :  { %152 = vperm.xlu0 %6174, %v7402_v29  }
  0x68   :  { %6164 = vset.pattern.permute.xlu1 %v11196_v61 }
  0x69   :  { %160 = vperm.xlu1 %6164, %v7552_v0   ;;  %164 = vperm.xlu0 %6174, %v38_v59  }
  0x6d   :  { %6165 = vset.pattern.permute.xlu1 %v11702_v58  ;;  %168 = vperm.xlu0 %6174, %v39_v56  }
  0x6e   :  { %73 = vperm.xlu1 %6165, %v38_v59  }
  0x71   :  { %184 = vperm.xlu0 %6174, %v43_v55  }
  0x72   :  { %6166 = vset.pattern.permute.xlu1 %v11703_v57 }
  0x73   :  { %238 = vperm.xlu1 %6166, %v38_v59  }
  0x75   :  { %6176 = vset.pattern.permute.xlu0 %v11702_v58 }
  0x76   :  { %83 = vperm.xlu0 %6176, %v40_v62  }
  0x77   :  { %6167 = vset.pattern.permute.xlu1 %v11702_v58 }
  0x78   :  { %78 = vperm.xlu1 %6167, %v39_v56  }
  0x7a   :  { %88 = vperm.xlu0 %6176, %v7560_v25  }
  0x7c   :  { %6168 = vset.pattern.permute.xlu1 %v11703_v57 }
  0x7d   :  { %242 = vperm.xlu1 %6168, %v39_v56  }
  0x7e   :  { %103 = vperm.xlu0 %6176, %v44_v54  }
  0x81   :  { %6169 = vset.pattern.permute.xlu1 %v11196_v61 }
  0x82   :  { %172 = vperm.xlu1 %6169, %v40_v62   ;;  %6181 = vset.pattern.permute.xlu0 %v7281_v53 }
  0x83   :  { %788 = vperm.xlu0 %6181, %v40_v62  }
  0x86   :  { %6170 = vset.pattern.permute.xlu1 %v11703_v57 }
  0x87   :  { %246 = vperm.xlu1 %6170, %v40_v62   ;;  %6184 = vset.pattern.permute.xlu0 %v11703_v57  ;;  %v11705_v62 = vmov 0.0  }
  0x88   :  { %266 = vperm.xlu0 %6184, %v45_v52  }
  0x8b   :  { %6171 = vset.pattern.permute.xlu1 %v11196_v61 }
  0x8c   :  { %176 = vperm.xlu1 %6171, %v7560_v25   ;;  %6187 = vset.pattern.permute.xlu0 %v11704_v51 }
  0x90   :  { %6172 = vset.pattern.permute.xlu1 %v11702_v58 }
  0x91   :  { %93 = vperm.xlu1 %6172, %v7566_v60  }
  0x95   :  { %6173 = vset.pattern.permute.xlu1 %v11196_v61  ;;  %v46_v61 = vld [vmem:[%s11173_s4 + $0x58] sm:$0xff] }
  0x96   :  { %180 = vperm.xlu1 %6173, %v7566_v60   ;;  %196 = vperm.xlu0 %6187, %v46_v61  }
  0x9a   :  { %6175 = vset.pattern.permute.xlu1 %v11702_v58  ;;  %6190 = vset.pattern.permute.xlu0 %v7281_v53 }
  0x9b   :  { %98 = vperm.xlu1 %6175, %v43_v55   ;;  %4532 = vperm.xlu0 %6190, %v7402_v29  }
  0x9f   :  { %6177 = vset.pattern.permute.xlu1 %v11703_v57  ;;  %4544 = vperm.xlu0 %6190, %v38_v59  }
  0xa0   :  { %258 = vperm.xlu1 %6177, %v43_v55  }
  0xa4   :  { %6178 = vset.pattern.permute.xlu1 %v7281_v53 }
  0xa5   :  { %784 = vperm.xlu1 %6178, %v39_v56  }
  0xa9   :  { %6179 = vset.pattern.permute.xlu1 %v11704_v51 }
  0xaa   :  { %188 = vperm.xlu1 %6179, %v44_v54  }
  0xae   :  { %6180 = vset.pattern.permute.xlu1 %v11703_v57 }
  0xaf   :  { %262 = vperm.xlu1 %6180, %v44_v54  }
  0xb3   :  { %6182 = vset.pattern.permute.xlu1 %v11702_v58 }
  0xb4   :  { %108 = vperm.xlu1 %6182, %v45_v52  }
  0xb8   :  { %6183 = vset.pattern.permute.xlu1 %v11704_v51 }
  0xb9   :  { %192 = vperm.xlu1 %6183, %v45_v52  }
  0xbd   :  { %6185 = vset.pattern.permute.xlu1 %v7281_v53 }
  0xbe   :  { %792 = vperm.xlu1 %6185, %v7560_v25  }
  0xc2   :  { %6186 = vset.pattern.permute.xlu1 %v11702_v58 }
  0xc3   :  { %113 = vperm.xlu1 %6186, %v46_v61  }
  0xc7   :  { %6188 = vset.pattern.permute.xlu1 %v11703_v57 }
  0xc8   :  { %270 = vperm.xlu1 %6188, %v46_v61   ;;  %v486_v61 = vld [vmem:[%s11172_s3 + $0x8] sm:$0xff] }
  0xcc   :  { %6189 = vset.pattern.permute.xlu1 %v7281_v53 }
  0xcd   :  { %796 = vperm.xlu1 %6189, %v7566_v60  }
  0xd1   :  { %4536 = vperm.xlu1 %6189, %v7544_v63   ;;  %v487_v63 = vld [vmem:[%s11172_s3 + $0x10] sm:$0xff] }
  0xd5   :  { %4540 = vperm.xlu1 %6189, %v7552_v0   ;;  %v55_v0 = vld [vmem:[%s11169_s0] ss:$8 sm:$0x3] }
  0xd9   :  { %4574 = vperm.xlu1 %6189, %v43_v55   ;;  %v485_v55 = vld [vmem:[%s11172_s3] sm:$0xff] }
 0x10f   :  { %v7627_v29 = vpop.f32.mrf.mxu0 }
 0x111   :  { %v7629_v54 = vpop.f32.mrf.mxu0 }
 0x113   :  { %v7632_v51 = vpop.f32.mrf.mxu0 }
 0x115   :  { %v7634_v52 = vpop.f32.mrf.mxu0 }
 0x117   :  { %v7637_v56 = vpop.f32.mrf.mxu0 }
 0x119   :  { %v7639_v59 = vpop.f32.mrf.mxu0 }
 0x11b   :  { %v7641_v53 = vpop.f32.mrf.mxu0 }
 0x11d   :  { %v7643_v57 = vpop.f32.mrf.mxu0 }
 0x11e   :  { %558 = vmatprep.subr.mxu1 %v7643_v57 }
 0x11f   :  { %559 = vmatpush1.msra.mxu1 %v7641_v53 }
 0x120   :  { %560 = vmatprep.subr.mxu1 %v7639_v59 }
 0x121   :  { %561 = vmatpush1.msra.mxu1 %v7637_v56 }
 0x122   :  { %562 = vmatprep.subr.mxu1 %v7634_v52 }
 0x123   :  { %563 = vmatpush1.msra.mxu1 %v7632_v51 }
 0x124   :  { %564 = vmatprep.subr.mxu1 %v7629_v54 }
 0x125   :  { %565 = vmatpush1.msra.mxu1 %v7627_v29 }
 0x126   :  { %5854 = vmatmul.mubr.msk.f32.vlgmr.msra.gmra.mxu1 %vm497_vm0, %v485_v55  ;;  %985 = vmatprep.subr.mxu1 %v7318_v1  ;;  %v5853_v55 = vld [vmem:[%s11169_s0 + $0x1] ss:$8 sm:$0x3] }
 0x127   :  { %604 = vmatprep.mubr.f32.mxu1 %v11705_v62  ;;  %986 = vmatpush1.msra.mxu1 %v7320_v2  ;;  %v488_v2 = vld [vmem:[%s11172_s3 + $0x18] sm:$0xff] }
 0x128   :  { %987 = vmatprep.subr.mxu1 %v7322_v3  ;;  %v489_v3 = vld [vmem:[%s11172_s3 + $0x20] sm:$0xff] }
 0x129   :  { %988 = vmatpush1.msra.mxu1 %v7325_v4  ;;  %v490_v4 = vld [vmem:[%s11172_s3 + $0x28] sm:$0xff] }
 0x12a   :  { %5855 = vmatmul.mubr.msk.f32.gmra.mxu1 %vm497_vm0, %v486_v61  ;;  %989 = vmatprep.subr.mxu1 %v7328_v5  ;;  %v491_v5 = vld [vmem:[%s11172_s3 + $0x30] sm:$0xff] }
 0x12b   :  { %610 = vmatprep.mubr.f32.mxu1 %v11705_v62  ;;  %990 = vmatpush1.msra.mxu1 %v7331_v6  ;;  %v7716_v6 = vld [vmem:[%s11172_s3 + $0x38] sm:$0xff] }
 0x12c   :  { %991 = vmatprep.subr.mxu1 %v7334_v7  ;;  %v7728_v7 = vld [vmem:[%s11172_s3 + $0x40] sm:$0xff] }
 0x12d   :  { %992 = vmatpush1.msra.mxu1 %v7337_v8  ;;  %v7740_v8 = vld [vmem:[%s11172_s3 + $0x48] sm:$0xff] }
 0x12e   :  { %5856 = vmatmul.mubr.msk.f32.gmra.mxu1 %vm497_vm0, %v487_v63  ;;  %993 = vmatprep.subr.mxu1 %v7340_v9  ;;  %v7752_v9 = vld [vmem:[%s11172_s3 + $0x50] sm:$0xff] }
 0x12f   :  { %616 = vmatprep.mubr.f32.mxu1 %v11705_v62  ;;  %994 = vmatpush1.msra.mxu1 %v7343_v10  ;;  %v7762_v10 = vld [vmem:[%s11172_s3 + $0x58] sm:$0xff] }
 0x130   :  { %995 = vmatprep.subr.mxu1 %v7346_v11  ;;  %v11706_v11 = vld [vmem:[#allocation8_spill] sm:$0xff] }
 0x131   :  { %996 = vmatpush1.msra.mxu1 %v7349_v12  ;;  %v11707_v12 = vld [vmem:[#allocation9_spill] sm:$0xff] }
 0x132   :  { %5857 = vmatmul.mubr.msk.f32.gmra.mxu1 %vm497_vm0, %v488_v2  ;;  %997 = vmatprep.subr.mxu1 %v7352_v13  ;;  %v11708_v13 = vld [vmem:[#allocation10_spill] sm:$0xff] }
 0x133   :  { %622 = vmatprep.mubr.f32.mxu1 %v11705_v62  ;;  %998 = vmatpush1.msra.mxu1 %v7355_v14  ;;  %v11709_v14 = vld [vmem:[#allocation11_spill] sm:$0xff] }
 0x134   :  { %999 = vmatprep.subr.mxu1 %v7358_v15  ;;  %v11710_v15 = vld [vmem:[#allocation12_spill] sm:$0xff] }
 0x135   :  { %1000 = vmatpush1.msra.mxu1 %v7361_v16  ;;  %v11711_v16 = vld [vmem:[#allocation13_spill] sm:$0xff] }
 0x136   :  { %5858 = vmatmul.mubr.msk.f32.gmra.mxu1 %vm497_vm0, %v489_v3  ;;  %1001 = vmatprep.subr.mxu1 %v7364_v17  ;;  %v11712_v17 = vld [vmem:[#allocation14_spill] sm:$0xff] }
 0x137   :  { %628 = vmatprep.mubr.f32.mxu1 %v11705_v62  ;;  %1002 = vmatpush1.msra.mxu1 %v7367_v18  ;;  %v11713_v18 = vld [vmem:[#allocation15_spill] sm:$0xff] }
 0x138   :  { %1003 = vmatprep.subr.mxu1 %v7370_v19  ;;  %v11714_v19 = vld [vmem:[#allocation16_spill] sm:$0xff] }
 0x139   :  { %1004 = vmatpush1.msra.mxu1 %v7373_v20  ;;  %v11715_v20 = vld [vmem:[#allocation17_spill] sm:$0xff] }
 0x13a   :  { %5859 = vmatmul.mubr.msk.f32.gmra.mxu1 %vm497_vm0, %v490_v4  ;;  %1005 = vmatprep.subr.mxu1 %v7376_v21  ;;  %v11716_v21 = vld [vmem:[#allocation18_spill] sm:$0xff] }
 0x13b   :  { %634 = vmatprep.mubr.f32.mxu1 %v11705_v62  ;;  %1006 = vmatpush1.msra.mxu1 %v7379_v22  ;;  %v11717_v22 = vld [vmem:[#allocation19_spill] sm:$0xff] }
 0x13c   :  { %1007 = vmatprep.subr.mxu1 %v7382_v23  ;;  %v11718_v23 = vld [vmem:[#allocation20_spill] sm:$0xff] }
 0x13d   :  { %1008 = vmatpush1.msra.mxu1 %v7385_v24  ;;  %v11719_v24 = vld [vmem:[#allocation21_spill] sm:$0xff] }
 0x13e   :  { %5860 = vmatmul.mubr.msk.f32.gmra.mxu1 %vm497_vm0, %v491_v5  ;;  %1009 = vmatprep.subr.mxu1 %v7391_v26  ;;  %v11720_v26 = vld [vmem:[#allocation22_spill] sm:$0xff] }
 0x13f   :  { %640 = vmatprep.mubr.f32.mxu1 %v11705_v62  ;;  %1010 = vmatpush1.msra.mxu1 %v7394_v27  ;;  %v11721_v27 = vld [vmem:[#allocation23_spill] sm:$0xff] }
 0x140   :  { %1011 = vmatprep.subr.mxu1 %v7397_v28  ;;  %v7792_v28 = vpop.permute.xlu1 %226 }
 0x141   :  { %1012 = vmatpush1.msra.mxu1 %v7405_v30  ;;  %11722 = vst [vmem:[#allocation8_spill] sm:$0xff] %v7792_v28 }
 0x142   :  { %5861 = vmatmul.mubr.msk.f32.gmra.mxu1 %vm497_vm0, %v7716_v6  ;;  %1013 = vmatprep.subr.mxu1 %v7409_v31 }
 0x143   :  { %646 = vmatprep.mubr.f32.mxu1 %v11705_v62  ;;  %1014 = vmatpush1.msra.mxu1 %v7412_v32 }
 0x144   :  { %1015 = vmatprep.subr.mxu1 %v7415_v33  ;;  %v7794_v30 = vpop.permute.xlu1 %63 }
 0x145   :  { %1016 = vmatpush1.msra.mxu1 %v7418_v34  ;;  %11723 = vst [vmem:[#allocation9_spill] sm:$0xff] %v7794_v30 }
 0x146   :  { %5862 = vmatmul.mubr.msk.f32.gmra.mxu1 %vm497_vm0, %v7728_v7  ;;  %1017 = vmatprep.subr.mxu1 %v7421_v35 }
 0x147   :  { %652 = vmatprep.mubr.f32.mxu1 %v11705_v62  ;;  %1018 = vmatpush2.msra.mxu1 %v7424_v36 }
 0x148   :  { %1019 = vmatprep.subr.mxu1 %v7427_v37  ;;  %v7796_v31 = vpop.permute.xlu1 %156 }
 0x149   :  { %1020 = vmatpush2.msra.mxu1 %v7430_v38  ;;  %11724 = vst [vmem:[#allocation10_spill] sm:$0xff] %v7796_v31  ;;  %v7810_v38 = vpop.permute.xlu0 %58 }
 0x14a   :  { %5863 = vmatmul.mubr.msk.f32.gmra.mxu1 %vm497_vm0, %v7740_v8  ;;  %1021 = vmatprep.subr.mxu1 %v7433_v39  ;;  %11731 = vst [vmem:[#allocation17_spill] sm:$0xff] %v7810_v38 }
 0x14b   :  { %658 = vmatprep.mubr.f32.mxu1 %v11705_v62  ;;  %1022 = vmatpush2.msra.mxu1 %v7436_v40 }
 0x14c   :  { %1023 = vmatprep.subr.mxu1 %v7439_v41  ;;  %v7798_v32 = vpop.permute.xlu1 %68 }
 0x14d   :  { %1024 = vmatpush2.msra.mxu1 %v7442_v42  ;;  %11725 = vst [vmem:[#allocation11_spill] sm:$0xff] %v7798_v32  ;;  %v7814_v39 = vpop.permute.xlu0 %230 }
 0x14e   :  { %5864 = vmatmul.mubr.msk.f32.gmra.mxu1 %vm497_vm0, %v7752_v9  ;;  %1025 = vmatprep.subr.mxu1 %v7445_v43  ;;  %11733 = vst [vmem:[#allocation19_spill] sm:$0xff] %v7814_v39 }
 0x14f   :  { %664 = vmatprep.mubr.f32.mxu1 %v11705_v62  ;;  %1026 = vmatpush2.msra.mxu1 %v7448_v44 }
 0x150   :  { %1027 = vmatprep.subr.mxu1 %v7451_v45  ;;  %v7800_v33 = vpop.permute.xlu1 %160  ;;  %v11199_v45 = vlaneseq }
 0x151   :  { %1028 = vmatpush2.msra.mxu1 %v7454_v46  ;;  %11726 = vst [vmem:[#allocation12_spill] sm:$0xff] %v7800_v33  ;;  %v7818_v41 = vpop.permute.xlu0 %234 }
 0x152   :  { %5865 = vmatmul.mubr.msk.f32.gmra.mxu1 %vm497_vm0, %v7762_v10  ;;  %1029 = vmatprep.subr.mxu1 %v7457_v47  ;;  %11735 = vst [vmem:[#allocation21_spill] sm:$0xff] %v7818_v41  ;;  %v7829_v47 = vshrl.u32 %v11199_v45, 7 }
 0x153   :  { %1030 = vmatpush2.msra.mxu1 %v7460_v48 }
 0x154   :  { %1031 = vmatprep.subr.mxu1 %v7463_v49  ;;  %v7802_v34 = vpop.permute.xlu1 %73  ;;  %11740 = vst [vmem:[#allocation26_spill] sm:$0xff] %v7829_v47  ;;  %v7834_v49 = vsub.s32 0, %v7829_v47  ;;  %v7844_v25 = vsub.s32 1, %v7829_v47 }
 0x155   :  { %1032 = vmatpush2.msra.mxu1 %v7466_v50  ;;  %11727 = vst [vmem:[#allocation13_spill] sm:$0xff] %v7802_v34  ;;  %v7822_v43 = vpop.permute.xlu0 %250 }
 0x156   :  { %1033 = vmatprep.subr.mxu1 %v11706_v11  ;;  %11737 = vst [vmem:[#allocation23_spill] sm:$0xff] %v7822_v43  ;;  %11742 = vst [vmem:[#allocation28_spill] sm:$0xff] %v7834_v49  ;;  %v7847_v60 = vrot.slane %v55_v0, %v7834_v49  ;;  %v7855_v63 = vrot.slane %v55_v0, %v7844_v25  ;;  %v7862_v4 = vrot.slane %v5853_v55, %v7834_v49 }
 0x157   :  { %1034 = vmatpush2.msra.mxu1 %v11707_v12  ;;  %11745 = vst [vmem:[#allocation31_spill] sm:$0xff] %v7844_v25  ;;  %v7869_v12 = vrot.slane %v5853_v55, %v7844_v25 }
 0x158   :  { %1035 = vmatprep.subr.mxu1 %v11708_v13  ;;  %v7804_v35 = vpop.permute.xlu1 %238  ;;  %v127_v3 = vmul.f32 %v7847_v60, %v7810_v38  ;;  %v128_v11 = vmul.f32 %v7855_v63, %v7810_v38  ;;  %v129_v13 = vmul.f32 %v7847_v60, %v7794_v30  ;;  %v132_v55 = vmul.f32 %v7855_v63, %v7798_v32 }
 0x159   :  { %1036 = vmatpush2.msra.mxu1 %v11709_v14  ;;  %11728 = vst [vmem:[#allocation14_spill] sm:$0xff] %v7804_v35  ;;  %v7826_v46 = vpop.permute.xlu0 %254  ;;  %v287_v0 = vmul.f32 %v7869_v12, %v7814_v39 }
 0x15a   :  { %1037 = vmatprep.subr.mxu1 %v11710_v15  ;;  %11739 = vst [vmem:[#allocation25_spill] sm:$0xff] %v7826_v46  ;;  %v284_v15 = vmul.f32 %v7862_v4, %v7792_v28 }
 0x15b   :  { %1038 = vmatpush2.msra.mxu1 %v11711_v16 }
 0x15c   :  { %1039 = vmatprep.subr.mxu1 %v11712_v17  ;;  %v7806_v36 = vpop.permute.xlu1 %78  ;;  %v130_v17 = vmul.f32 %v7855_v63, %v7794_v30  ;;  %v204_v30 = vadd.f32 %v7800_v33, %v132_v55 }
 0x15d   :  { %1040 = vmatpush2.msra.mxu1 %v11713_v18  ;;  %11729 = vst [vmem:[#allocation15_spill] sm:$0xff] %v7806_v36  ;;  %v7841_v58 = vpop.permute.xlu0 %152  ;;  %v136_v55 = vmul.f32 %v7855_v63, %v7806_v36 }
 0x15e   :  { %1041 = vmatprep.subr.mxu1 %v11714_v19  ;;  %11744 = vst [vmem:[#allocation30_spill] sm:$0xff] %v7841_v58  ;;  %v199_v14 = vadd.f32 %v7841_v58, %v127_v3  ;;  %v200_v18 = vadd.f32 %v7841_v58, %v128_v11  ;;  %v285_v19 = vmul.f32 %v7869_v12, %v7792_v28 }
 0x15f   :  { %1042 = vmatpush2.msra.mxu1 %v11715_v20  ;;  %v201_v20 = vadd.f32 %v7796_v31, %v129_v13  ;;  %v133_v3 = vmul.f32 %v7847_v60, %v7802_v34 }
 0x160   :  { %1043 = vmatprep.subr.mxu1 %v11716_v21  ;;  %v7808_v37 = vpop.permute.xlu1 %242  ;;  %v286_v21 = vmul.f32 %v7862_v4, %v7814_v39  ;;  %v309_v13 = vadd.f32 %v285_v19, %v200_v18  ;;  %v288_v39 = vmul.f32 %v7862_v4, %v7818_v41  ;;  %v289_v18 = vmul.f32 %v7869_v12, %v7818_v41 }
 0x161   :  { %1044 = vmatpush2.msra.mxu1 %v11717_v22  ;;  %11730 = vst [vmem:[#allocation16_spill] sm:$0xff] %v7808_v37  ;;  %v7852_v61 = vpop.permute.xlu0 %164 }
 0x162   :  { %1045 = vmatprep.subr.mxu1 %v11718_v23  ;;  %11746 = vst [vmem:[#allocation32_spill] sm:$0xff] %v7852_v61  ;;  %v308_v23 = vadd.f32 %v284_v15, %v199_v14  ;;  %v310_v47 = vadd.f32 %v286_v21, %v201_v20  ;;  %v134_v15 = vmul.f32 %v7855_v63, %v7802_v34 }
 0x163   :  { %1046 = vmatpush2.msra.mxu1 %v11719_v24  ;;  %v131_v24 = vmul.f32 %v7847_v60, %v7798_v32  ;;  %v205_v19 = vadd.f32 %v7852_v61, %v133_v3 }
 0x164   :  { %1047 = vmatprep.subr.mxu1 %v11720_v26 }
 0x165   :  { %1048 = vmatpush2.msra.mxu1 %v11721_v27  ;;  %v7864_v5 = vpop.permute.xlu0 %168  ;;  %v202_v27 = vadd.f32 %v7796_v31, %v130_v17  ;;  %v203_v31 = vadd.f32 %v7800_v33, %v131_v24 }
 0x166   :  { %1509 = vmatprep.subr.mxu1 %v7318_v1  ;;  %v7812_v1 = vpop.permute.xlu1 %172  ;;  %11748 = vst [vmem:[#allocation34_spill] sm:$0xff] %v7864_v5 }
 0x167   :  { %11732 = vst [vmem:[#allocation18_spill] sm:$0xff] %v7812_v1  ;;  %v311_v58 = vadd.f32 %v287_v0, %v202_v27  ;;  %v291_v27 = vmul.f32 %v7869_v12, %v7804_v35  ;;  %v135_v0 = vmul.f32 %v7847_v60, %v7806_v36 }
 0x169   :  { %v7886_v22 = vpop.permute.xlu0 %184 }
 0x16a   :  { %v7816_v40 = vpop.permute.xlu1 %246  ;;  %11749 = vst [vmem:[#allocation35_spill] sm:$0xff] %v7886_v22 }
 0x16b   :  { %11734 = vst [vmem:[#allocation20_spill] sm:$0xff] %v7816_v40 }
 0x16d   :  { %v7908_v20 = vpop.permute.xlu0 %83 }
 0x16e   :  { %v7820_v42 = vpop.permute.xlu1 %176  ;;  %11751 = vst [vmem:[#allocation37_spill] sm:$0xff] %v7908_v20 }
 0x16f   :  { %11736 = vst [vmem:[#allocation22_spill] sm:$0xff] %v7820_v42 }
 0x171   :  { %v7925_v33 = vpop.permute.xlu0 %88 }
 0x172   :  { %v7824_v44 = vpop.permute.xlu1 %93  ;;  %11753 = vst [vmem:[#allocation39_spill] sm:$0xff] %v7925_v33 }
 0x173   :  { %11738 = vst [vmem:[#allocation24_spill] sm:$0xff] %v7824_v44 }
 0x176   :  { %v7831_v48 = vpop.permute.xlu1 %180 }
 0x177   :  { %11741 = vst [vmem:[#allocation27_spill] sm:$0xff] %v7831_v48 }
 0x17a   :  { %v7836_v50 = vpop.permute.xlu1 %98 }
 0x17b   :  { %11743 = vst [vmem:[#allocation29_spill] sm:$0xff] %v7836_v50 }
 0x17e   :  { %v7857_v2 = vpop.permute.xlu1 %258 }
 0x17f   :  { %11747 = vst [vmem:[#allocation33_spill] sm:$0xff] %v7857_v2 }
 0x182   :  { %v7876_v16 = vpop.permute.xlu1 %784 }
 0x186   :  { %v7897_v14 = vpop.permute.xlu1 %188 }
 0x187   :  { %11750 = vst [vmem:[#allocation36_spill] sm:$0xff] %v7897_v14 }
 0x1e6   :  { %v600_v26 = vpop.f32.mrf.mxu1 }
 0x1e7   :  { %v671_v11 = vadd.f32 %v600_v26, %v308_v23  ;;  %v206_v26 = vadd.f32 %v7852_v61, %v134_v15  ;;  %v137_v15 = vmul.f32 %v7847_v60, %v7908_v20 }
 0x1e8   :  { %v602_v45 = vpop.f32.mrf.mxu1 }
 0x1e9   :  { %v5866_v28 = vmul.f32 -1.442695, %v671_v11  ;;  %v672_v17 = vadd.f32 %v602_v45, %v309_v13  ;;  %v290_v45 = vmul.f32 %v7862_v4, %v7804_v35  ;;  %v312_v11 = vadd.f32 %v288_v39, %v203_v31  ;;  %v7919_v13 = vpop.permute.xlu1 %262 }
 0x1ea   :  { %v606_v32 = vpop.f32.mrf.mxu1  ;;  %11752 = vst [vmem:[#allocation38_spill] sm:$0xff] %v7919_v13  ;;  %v207_v31 = vadd.f32 %v7864_v5, %v135_v0  ;;  %v208_v39 = vadd.f32 %v7864_v5, %v136_v55 }
 0x1eb   :  { %6191 = vpow2.f32 %v5866_v28  ;;  %v5867_v21 = vmul.f32 -1.442695, %v672_v17  ;;  %v673_v23 = vadd.f32 %v606_v32, %v310_v47  ;;  %v313_v47 = vadd.f32 %v289_v18, %v204_v30 }
 0x1ec   :  { %v608_v24 = vpop.f32.mrf.mxu1  ;;  %v138_v17 = vmul.f32 %v7855_v63, %v7908_v20  ;;  %v314_v41 = vadd.f32 %v290_v45, %v205_v19  ;;  %v292_v30 = vmul.f32 %v7862_v4, %v7808_v37  ;;  %v209_v19 = vadd.f32 %v7812_v1, %v137_v15 }
 0x1ed   :  { %6193 = vpow2.f32 %v5867_v21  ;;  %v5868_v3 = vmul.f32 -1.442695, %v673_v23  ;;  %v674_v28 = vadd.f32 %v608_v24, %v311_v58  ;;  %v315_v23 = vadd.f32 %v291_v27, %v206_v26 }
 0x1ee   :  { %v612_v32 = vpop.f32.mrf.mxu1  ;;  %v293_v24 = vmul.f32 %v7869_v12, %v7808_v37  ;;  %v294_v45 = vmul.f32 %v7862_v4, %v7816_v40  ;;  %v210_v26 = vadd.f32 %v7812_v1, %v138_v17  ;;  %v295_v27 = vmul.f32 %v7869_v12, %v7816_v40 }
 0x1ef   :  { %6195 = vpow2.f32 %v5868_v3  ;;  %v5869_v35 = vmul.f32 -1.442695, %v674_v28  ;;  %v675_v61 = vadd.f32 %v612_v32, %v312_v11  ;;  %v7941_v28 = vpop.permute.xlu1 %108  ;;  %v140_v11 = vmul.f32 %v7855_v63, %v7925_v33 }
 0x1f0   :  { %v614_v21 = vpop.f32.mrf.mxu1  ;;  %11754 = vst [vmem:[#allocation40_spill] sm:$0xff] %v7941_v28  ;;  %v141_v32 = vmul.f32 %v7847_v60, %v7824_v44  ;;  %v316_v17 = vadd.f32 %v292_v30, %v207_v31  ;;  %v297_v31 = vmul.f32 %v7869_v12, %v7822_v43 }
 0x1f1   :  { %6197 = vpow2.f32 %v5869_v35  ;;  %v5870_v58 = vmul.f32 -1.442695, %v675_v61  ;;  %v676_v18 = vadd.f32 %v614_v21, %v313_v47  ;;  %v139_v35 = vmul.f32 %v7847_v60, %v7925_v33 }
 0x1f2   :  { %v618_v3 = vpop.f32.mrf.mxu1  ;;  %v213_v30 = vadd.f32 %v7831_v48, %v141_v32 }
 0x1f3   :  { %6199 = vpow2.f32 %v5870_v58  ;;  %v5871_v0 = vmul.f32 -1.442695, %v676_v18  ;;  %v677_v55 = vadd.f32 %v618_v3, %v314_v41  ;;  %v317_v58 = vadd.f32 %v293_v24, %v208_v39 }
 0x1f4   :  { %v620_v61 = vpop.f32.mrf.mxu1  ;;  %v318_v18 = vadd.f32 %v294_v45, %v209_v19  ;;  %v319_v41 = vadd.f32 %v295_v27, %v210_v26  ;;  %v142_v3 = vmul.f32 %v7855_v63, %v7824_v44  ;;  %v211_v37 = vadd.f32 %v7820_v42, %v139_v35  ;;  %v7956_v26 = vpop.permute.xlu1 %192 }
 0x1f5   :  { %6201 = vpow2.f32 %v5871_v0  ;;  %v5872_v47 = vmul.f32 -1.442695, %v677_v55  ;;  %v678_v15 = vadd.f32 %v620_v61, %v315_v23  ;;  %v296_v0 = vmul.f32 %v7862_v4, %v7822_v43  ;;  %11755 = vst [vmem:[#allocation41_spill] sm:$0xff] %v7956_v26 }
 0x1f6   :  { %v624_v21 = vpop.f32.mrf.mxu1  ;;  %v212_v23 = vadd.f32 %v7820_v42, %v140_v11  ;;  %v298_v55 = vmul.f32 %v7862_v4, %v7826_v46  ;;  %v214_v35 = vadd.f32 %v7831_v48, %v142_v3  ;;  %v299_v61 = vmul.f32 %v7869_v12, %v7826_v46 }
 0x1f7   :  { %6203 = vpow2.f32 %v5872_v47  ;;  %v5873_v40 = vmul.f32 -1.442695, %v678_v15  ;;  %v727_v1 = vadd.f32 %v624_v21, %v316_v17  ;;  %v143_v11 = vmul.f32 %v7847_v60, %v7836_v50 }
 0x1f8   :  { %v6192_v33 = vpop.eup %6191  ;;  %v626_v5 = vpop.f32.mrf.mxu1  ;;  %v320_v15 = vadd.f32 %v296_v0, %v211_v37  ;;  %v321_v17 = vadd.f32 %v297_v31, %v212_v23  ;;  %v144_v21 = vmul.f32 %v7855_v63, %v7836_v50 }
 0x1f9   :  { %v703_v39 = vadd.f32 1.0, %v6192_v33  ;;  %6205 = vpow2.f32 %v5873_v40  ;;  %v5874_v24 = vmul.f32 -1.442695, %v727_v1  ;;  %v728_v19 = vadd.f32 %v626_v5, %v317_v58  ;;  %v7965_v40 = vpop.permute.xlu0 %103 }
 0x1fa   :  { %v6194_v45 = vpop.eup %6193  ;;  %v630_v27 = vpop.f32.mrf.mxu1  ;;  %11756 = vst [vmem:[#allocation42_spill] sm:$0xff] %v7965_v40  ;;  %v215_v44 = vadd.f32 %v7886_v22, %v143_v11 }
 0x1fb   :  { %6207 = vrcp.f32 %v703_v39  ;;  %v704_v33 = vadd.f32 1.0, %v6194_v45  ;;  %v5875_v1 = vmul.f32 -1.442695, %v728_v19  ;;  %v729_v5 = vadd.f32 %v630_v27, %v318_v18  ;;  %v7974_v19 = vpop.permute.xlu1 %792 }
 0x1fc   :  { %v6196_v32 = vpop.eup %6195  ;;  %6209 = vpow2.f32 %v5874_v24  ;;  %v632_v47 = vpop.f32.mrf.mxu1  ;;  %v322_v45 = vadd.f32 %v298_v55, %v213_v30  ;;  %v300_v18 = vmul.f32 %v7862_v4, %v7857_v2  ;;  %v323_v27 = vadd.f32 %v299_v61, %v214_v35 }
 0x1fd   :  { %6211 = vrcp.f32 %v704_v33  ;;  %v705_v58 = vadd.f32 1.0, %v6196_v32  ;;  %v5876_v3 = vmul.f32 -1.442695, %v729_v5  ;;  %v730_v46 = vadd.f32 %v632_v47, %v319_v41  ;;  %v7972_v37 = vpop.permute.xlu0 %788 }
 0x1fe   :  { %v6198_v48 = vpop.eup %6197  ;;  %6213 = vpow2.f32 %v5875_v1  ;;  %v636_v39 = vpop.f32.mrf.mxu1  ;;  %v216_v33 = vadd.f32 %v7886_v22, %v144_v21  ;;  %v145_v30 = vmul.f32 %v7847_v60, %v7965_v40  ;;  %v301_v32 = vmul.f32 %v7869_v12, %v7857_v2 }
 0x1ff   :  { %6215 = vrcp.f32 %v705_v58  ;;  %v706_v24 = vadd.f32 1.0, %v6198_v48  ;;  %v5877_v0 = vmul.f32 -1.442695, %v730_v46  ;;  %v731_v23 = vadd.f32 %v636_v39, %v320_v15 }
 0x200   :  { %v6200_v31 = vpop.eup %6199  ;;  %6217 = vpow2.f32 %v5876_v3  ;;  %v638_v41 = vpop.f32.mrf.mxu1  ;;  %v324_v46 = vadd.f32 %v300_v18, %v215_v44  ;;  %v146_v47 = vmul.f32 %v7855_v63, %v7965_v40  ;;  %v217_v3 = vadd.f32 %v7897_v14, %v145_v30 }
 0x201   :  { %6219 = vrcp.f32 %v706_v24  ;;  %v707_v55 = vadd.f32 1.0, %v6200_v31  ;;  %v5878_v11 = vmul.f32 -1.442695, %v731_v23  ;;  %v732_v1 = vadd.f32 %v638_v41, %v321_v17  ;;  %v7988_v18 = vpop.permute.xlu0 %266 }
 0x202   :  { %v6202_v48 = vpop.eup %6201  ;;  %6221 = vpow2.f32 %v5877_v0  ;;  %v642_v5 = vpop.f32.mrf.mxu1  ;;  %v302_v17 = vmul.f32 %v7862_v4, %v7919_v13  ;;  %v147_v44 = vmul.f32 %v7847_v60, %v7941_v28  ;;  %11757 = vst [vmem:[#allocation43_spill] sm:$0xff] %v7988_v18  ;;  %v218_v41 = vadd.f32 %v7897_v14, %v146_v47 }
 0x203   :  { %6223 = vrcp.f32 %v707_v55  ;;  %v708_v35 = vadd.f32 1.0, %v6202_v48  ;;  %v5879_v61 = vmul.f32 -1.442695, %v732_v1  ;;  %v733_v15 = vadd.f32 %v642_v5, %v322_v45  ;;  %v7990_v45 = vpop.permute.xlu1 %113 }
 0x204   :  { %v6204_v21 = vpop.eup %6203  ;;  %6225 = vpow2.f32 %v5878_v11  ;;  %v644_v58 = vpop.f32.mrf.mxu1  ;;  %v303_v30 = vmul.f32 %v7869_v12, %v7919_v13  ;;  %v148_v55 = vmul.f32 %v7855_v63, %v7941_v28  ;;  %v304_v47 = vmul.f32 %v7862_v4, %v7988_v18 }
 0x205   :  { %6227 = vrcp.f32 %v708_v35  ;;  %v709_v39 = vadd.f32 1.0, %v6204_v21  ;;  %v5880_v24 = vmul.f32 -1.442695, %v733_v15  ;;  %v734_v0 = vadd.f32 %v644_v58, %v323_v27 }
 0x206   :  { %v6206_v23 = vpop.eup %6205  ;;  %6229 = vpow2.f32 %v5879_v61  ;;  %v648_v31 = vpop.f32.mrf.mxu1  ;;  %v325_v27 = vadd.f32 %v301_v32, %v216_v33  ;;  %v219_v61 = vadd.f32 %v7956_v26, %v147_v44  ;;  %v326_v28 = vadd.f32 %v302_v17, %v217_v3 }
 0x207   :  { %6231 = vrcp.f32 %v709_v39  ;;  %v710_v11 = vadd.f32 1.0, %v6206_v23  ;;  %v5881_v1 = vmul.f32 -1.442695, %v734_v0  ;;  %v799_v48 = vadd.f32 %v7876_v16, %v648_v31 }
 0x208   :  { %v6208_v5 = vpop.eup %6207  ;;  %6233 = vpow2.f32 %v5880_v24  ;;  %v650_v35 = vpop.f32.mrf.mxu1  ;;  %v220_v31 = vadd.f32 %v7956_v26, %v148_v55  ;;  %v305_v33 = vmul.f32 %v7869_v12, %v7988_v18  ;;  %v327_v14 = vadd.f32 %v303_v30, %v218_v41 }
 0x209   :  { %v6210_v15 = vpop.eup %6209  ;;  %6235 = vrcp.f32 %v710_v11  ;;  %v807_v21 = vmul.f32 %v6208_v5, %v799_v48  ;;  %v800_v58 = vadd.f32 %v7876_v16, %v650_v35  ;;  %v8006_v5 = vpop.permute.xlu1 %270  ;;  %v328_v17 = vadd.f32 %v304_v47, %v219_v61 }
 0x20a   :  { %v6212_v39 = vpop.eup %6211  ;;  %v759_v23 = vadd.f32 1.0, %v6210_v15  ;;  %6237 = vpow2.f32 %v5881_v1  ;;  %v654_v0 = vpop.f32.mrf.mxu1  ;;  %v149_v1 = vmul.f32 %v7847_v60, %v7990_v45 }
 0x20b   :  { %v6214_v32 = vpop.eup %6213  ;;  %v815_v44 = vadd.f32 %v807_v21, %v324_v46  ;;  %v808_v24 = vmul.f32 %v6212_v39, %v800_v58  ;;  %v801_v13 = vadd.f32 %v7972_v37, %v654_v0  ;;  %v8011_v21 = vpop.permute.xlu0 %196  ;;  %v329_v39 = vadd.f32 %v305_v33, %v220_v31 }
 0x20c   :  { %v6216_v11 = vpop.eup %6215  ;;  %6239 = vrcp.f32 %v759_v23  ;;  %v760_v48 = vadd.f32 1.0, %v6214_v32  ;;  %v656_v3 = vpop.f32.mrf.mxu1  ;;  %v150_v23 = vmul.f32 %v7855_v63, %v7990_v45 }
 0x20d   :  { %v6218_v55 = vpop.eup %6217  ;;  %6241 = vtanh.f32 %v815_v44  ;;  %v816_v35 = vadd.f32 %v808_v24, %v325_v27  ;;  %v809_v15 = vmul.f32 %v6216_v11, %v801_v13  ;;  %v802_v46 = vadd.f32 %v7972_v37, %v656_v3  ;;  %v8020_v3 = vpop.permute.xlu1 %796 }
 0x20e   :  { %v6220_v58 = vpop.eup %6219  ;;  %6243 = vrcp.f32 %v760_v48  ;;  %v761_v41 = vadd.f32 1.0, %v6218_v55  ;;  %v660_v30 = vpop.f32.mrf.mxu1  ;;  %v221_v44 = vadd.f32 %v8011_v21, %v149_v1  ;;  %v306_v24 = vmul.f32 %v7862_v4, %v8006_v5 }
 0x20f   :  { %v6222_v61 = vpop.eup %6221  ;;  %6245 = vtanh.f32 %v816_v35  ;;  %v817_v47 = vadd.f32 %v809_v15, %v326_v28  ;;  %v810_v60 = vmul.f32 %v6220_v58, %v802_v46  ;;  %v803_v0 = vadd.f32 %v7974_v19, %v660_v30 }
 0x210   :  { %v6224_v27 = vpop.eup %6223  ;;  %6247 = vrcp.f32 %v761_v41  ;;  %v762_v13 = vadd.f32 1.0, %v6222_v61  ;;  %v662_v32 = vpop.f32.mrf.mxu1  ;;  %v222_v35 = vadd.f32 %v8011_v21, %v150_v23  ;;  %v307_v1 = vmul.f32 %v7869_v12, %v8006_v5 }
 0x211   :  { %v6226_v11 = vpop.eup %6225  ;;  %6249 = vtanh.f32 %v817_v47  ;;  %v818_v31 = vadd.f32 %v810_v60, %v327_v14  ;;  %v811_v33 = vmul.f32 %v6224_v27, %v803_v0  ;;  %v804_v63 = vadd.f32 %v7974_v19, %v662_v32 }
 0x212   :  { %v6228_v48 = vpop.eup %6227  ;;  %6251 = vrcp.f32 %v762_v13  ;;  %v763_v28 = vadd.f32 1.0, %v6226_v11  ;;  %v666_v55 = vpop.f32.mrf.mxu1  ;;  %v330_v30 = vadd.f32 %v306_v24, %v221_v44  ;;  %v331_v32 = vadd.f32 %v307_v1, %v222_v35 }
 0x213   :  { %v6230_v15 = vpop.eup %6229  ;;  %6253 = vtanh.f32 %v818_v31  ;;  %v819_v4 = vadd.f32 %v811_v33, %v328_v17  ;;  %v812_v46 = vmul.f32 %v6228_v48, %v804_v63  ;;  %v805_v14 = vadd.f32 %v8020_v3, %v666_v55 }
 0x214   :  { %v6232_v58 = vpop.eup %6231  ;;  %6255 = vrcp.f32 %v763_v28  ;;  %v764_v41 = vadd.f32 1.0, %v6230_v15  ;;  %v668_v61 = vpop.f32.mrf.mxu1 }
 0x215   :  { %v6234_v47 = vpop.eup %6233  ;;  %6257 = vtanh.f32 %v819_v4  ;;  %v820_v60 = vadd.f32 %v812_v46, %v329_v39  ;;  %v813_v0 = vmul.f32 %v6232_v58, %v805_v14  ;;  %v806_v23 = vadd.f32 %v8020_v3, %v668_v61 }
 0x216   :  { %v6236_v27 = vpop.eup %6235  ;;  %6259 = vrcp.f32 %v764_v41  ;;  %v765_v12 = vadd.f32 1.0, %v6234_v47 }
 0x217   :  { %v6238_v13 = vpop.eup %6237  ;;  %6261 = vtanh.f32 %v820_v60  ;;  %v821_v17 = vadd.f32 %v813_v0, %v330_v30  ;;  %v814_v11 = vmul.f32 %v6236_v27, %v806_v23 }
 0x218   :  { %6263 = vrcp.f32 %v765_v12  ;;  %v766_v31 = vadd.f32 1.0, %v6238_v13 }
 0x219   :  { %v6240_v33 = vpop.eup %6239  ;;  %6265 = vtanh.f32 %v821_v17  ;;  %v822_v44 = vadd.f32 %v814_v11, %v331_v32 }
 0x21a   :  { %v6242_v24 = vpop.eup %6241  ;;  %6267 = vrcp.f32 %v766_v31  ;;  %v831_v63 = vsub.f32 1.0, %v6240_v33  ;;  %v847_v58 = vmul.f32 %v6240_v33, %v7627_v29  ;;  %v8031_v29 = vld [vmem:[#allocation2 + $0xf0] sm:$0xff] }
 0x21b   :  { %v6244_v39 = vpop.eup %6243  ;;  %6269 = vtanh.f32 %v822_v44 }
 0x21c   :  { %v6246_v48 = vpop.eup %6245  ;;  %v832_v28 = vsub.f32 1.0, %v6244_v39  ;;  %v839_v15 = vmul.f32 %v6242_v24, %v831_v63  ;;  %v848_v14 = vmul.f32 %v6244_v39, %v7629_v54  ;;  %v8034_v63 = vld [vmem:[#allocation2 + $0xe8] sm:$0xff] }
 0x21d   :  { %v6248_v55 = vpop.eup %6247 }
 0x21e   :  { %v6250_v4 = vpop.eup %6249  ;;  %v840_v46 = vmul.f32 %v6246_v48, %v832_v28  ;;  %v833_v35 = vsub.f32 1.0, %v6248_v55  ;;  %v855_v60 = vadd.f32 %v847_v58, %v839_v15  ;;  %v849_v54 = vmul.f32 %v6248_v55, %v7632_v51  ;;  %v8038_v28 = vld [vmem:[#allocation2 + $0xe0] sm:$0xff] }
 0x21f   :  { %v6252_v1 = vpop.eup %6251 }
 0x220   :  { %v6254_v41 = vpop.eup %6253  ;;  %v856_v30 = vadd.f32 %v848_v14, %v840_v46  ;;  %v834_v61 = vsub.f32 1.0, %v6252_v1  ;;  %v841_v0 = vmul.f32 %v6250_v4, %v833_v35  ;;  %v850_v12 = vmul.f32 %v6252_v1, %v7634_v52  ;;  %v8042_v4 = vld [vmem:[#allocation2 + $0xd8] sm:$0xff]  ;;  %v8045_v1 = vld [vmem:[#allocation2 + $0xd0] sm:$0xff] }
 0x221   :  { %v6256_v47 = vpop.eup %6255  ;;  %11758 = vst [vmem:[#allocation44_spill] sm:$0xff] %v8045_v1 }
 0x222   :  { %v6258_v23 = vpop.eup %6257  ;;  %1049 = vmatprep.mubr.f32.mxu1 %v856_v30  ;;  %v842_v27 = vmul.f32 %v6254_v41, %v834_v61  ;;  %v835_v13 = vsub.f32 1.0, %v6256_v47  ;;  %v857_v44 = vadd.f32 %v849_v54, %v841_v0  ;;  %v851_v15 = vmul.f32 %v6256_v47, %v7637_v56  ;;  %v8048_v41 = vld [vmem:[#allocation2 + $0xc8] sm:$0xff]  ;;  %v8052_v61 = vld [vmem:[#allocation2 + $0xc0] sm:$0xff] }
 0x223   :  { %v6260_v17 = vpop.eup %6259  ;;  %1050 = vmatmul.mubr.f32.vlgmr.msra.gmra.mxu1 %v855_v60  ;;  %11759 = vst [vmem:[#allocation45_spill] sm:$0xff] %v8048_v41  ;;  %11760 = vst [vmem:[#allocation46_spill] sm:$0xff] %v8052_v61  ;;  %v8056_v60 = vld [vmem:[#allocation2 + $0xb8] sm:$0xff]  ;;  %v8077_v54 = vld [vmem:[#allocation2 + $0x80] sm:$0xff] }
 0x224   :  { %v6262_v32 = vpop.eup %6261  ;;  %v858_v11 = vadd.f32 %v850_v12, %v842_v27  ;;  %v836_v31 = vsub.f32 1.0, %v6260_v17  ;;  %1510 = vmatpush1.msra.mxu1 %v8031_v29  ;;  %v843_v24 = vmul.f32 %v6258_v23, %v835_v13  ;;  %v852_v48 = vmul.f32 %v6260_v17, %v7639_v59  ;;  %11761 = vst [vmem:[#allocation47_spill] sm:$0xff] %v8056_v60  ;;  %v8059_v23 = vld [vmem:[#allocation2 + $0xb0] sm:$0xff]  ;;  %v8062_v12 = vld [vmem:[#allocation2 + $0xa8] sm:$0xff] }
 0x225   :  { %v6264_v33 = vpop.eup %6263  ;;  %1511 = vmatprep.subr.mxu1 %v8034_v63  ;;  %11762 = vst [vmem:[#allocation48_spill] sm:$0xff] %v8059_v23  ;;  %11763 = vst [vmem:[#allocation49_spill] sm:$0xff] %v8062_v12  ;;  %v8071_v13 = vld [vmem:[#allocation2 + $0x90] sm:$0xff]  ;;  %v8074_v17 = vld [vmem:[#allocation2 + $0x88] sm:$0xff] }
 0x226   :  { %v6266_v52 = vpop.eup %6265  ;;  %1055 = vmatprep.mubr.f32.mxu1 %v858_v11  ;;  %v844_v39 = vmul.f32 %v6262_v32, %v836_v31  ;;  %v837_v51 = vsub.f32 1.0, %v6264_v33  ;;  %1512 = vmatpush1.msra.mxu1 %v8038_v28  ;;  %v859_v59 = vadd.f32 %v851_v15, %v843_v24  ;;  %v853_v47 = vmul.f32 %v6264_v33, %v7641_v53  ;;  %v8068_v53 = vld [vmem:[#allocation2 + $0x98] sm:$0xff]  ;;  %v8083_v11 = vld [vmem:[#allocation2 + $0x70] sm:$0xff]  ;;  %v8086_v31 = vld [vmem:[#allocation2 + $0x68] sm:$0xff] }
 0x227   :  { %v6268_v55 = vpop.eup %6267  ;;  %1056 = vmatmul.mubr.f32.gmra.mxu1 %v857_v44  ;;  %1513 = vmatprep.subr.mxu1 %v8042_v4  ;;  %11765 = vst [vmem:[#allocation51_spill] sm:$0xff] %v8068_v53  ;;  %11766 = vst [vmem:[#allocation52_spill] sm:$0xff] %v8071_v13  ;;  %v8080_v32 = vld [vmem:[#allocation2 + $0x78] sm:$0xff]  ;;  %v8089_v33 = vld [vmem:[#allocation2 + $0x60] sm:$0xff] }
 0x228   :  { %v6270_v46 = vpop.eup %6269  ;;  %v860_v14 = vadd.f32 %v852_v48, %v844_v39  ;;  %v838_v35 = vsub.f32 1.0, %v6268_v55  ;;  %1514 = vmatpush1.msra.mxu1 %v8045_v1  ;;  %v845_v58 = vmul.f32 %v6266_v52, %v837_v51  ;;  %v854_v56 = vmul.f32 %v6268_v55, %v7643_v57  ;;  %v8065_v57 = vld [vmem:[#allocation2 + $0xa0] sm:$0xff]  ;;  %11767 = vst [vmem:[#allocation53_spill] sm:$0xff] %v8074_v17  ;;  %v8092_v44 = vld [vmem:[#allocation2 + $0x58] sm:$0xff]  ;;  %v8095_v24 = vld [vmem:[#allocation2 + $0x50] sm:$0xff] }
 0x229   :  { %1515 = vmatprep.subr.mxu1 %v8048_v41  ;;  %11764 = vst [vmem:[#allocation50_spill] sm:$0xff] %v8065_v57  ;;  %11768 = vst [vmem:[#allocation54_spill] sm:$0xff] %v8077_v54  ;;  %v8098_v52 = vld [vmem:[#allocation2 + $0x48] sm:$0xff]  ;;  %v8101_v39 = vld [vmem:[#allocation2 + $0x40] sm:$0xff] }
 0x22a   :  { %1061 = vmatprep.mubr.f32.mxu1 %v860_v14  ;;  %v846_v30 = vmul.f32 %v6270_v46, %v838_v35  ;;  %1516 = vmatpush1.msra.mxu1 %v8052_v61  ;;  %v861_v27 = vadd.f32 %v853_v47, %v845_v58  ;;  %11769 = vst [vmem:[#allocation55_spill] sm:$0xff] %v8080_v32  ;;  %11770 = vst [vmem:[#allocation56_spill] sm:$0xff] %v8083_v11  ;;  %v8104_v48 = vld [vmem:[#allocation2 + $0x38] sm:$0xff]  ;;  %v8107_v51 = vld [vmem:[#allocation2 + $0x30] sm:$0xff] }
 0x22b   :  { %1062 = vmatmul.mubr.f32.gmra.mxu1 %v859_v59  ;;  %1517 = vmatprep.subr.mxu1 %v8056_v60  ;;  %11771 = vst [vmem:[#allocation57_spill] sm:$0xff] %v8086_v31  ;;  %11772 = vst [vmem:[#allocation58_spill] sm:$0xff] %v8089_v33  ;;  %v8110_v55 = vld [vmem:[#allocation2 + $0x28] sm:$0xff]  ;;  %v8113_v15 = vld [vmem:[#allocation2 + $0x20] sm:$0xff] }
 0x22c   :  { %v862_v0 = vadd.f32 %v854_v56, %v846_v30  ;;  %1518 = vmatpush1.msra.mxu1 %v8059_v23  ;;  %11773 = vst [vmem:[#allocation59_spill] sm:$0xff] %v8092_v44  ;;  %11774 = vst [vmem:[#allocation60_spill] sm:$0xff] %v8095_v24  ;;  %v8116_v46 = vld [vmem:[#allocation2 + $0x18] sm:$0xff]  ;;  %v8119_v14 = vld [vmem:[#allocation2 + $0x10] sm:$0xff] }
 0x22d   :  { %1519 = vmatprep.subr.mxu1 %v8062_v12  ;;  %11775 = vst [vmem:[#allocation61_spill] sm:$0xff] %v8098_v52  ;;  %11776 = vst [vmem:[#allocation62_spill] sm:$0xff] %v8101_v39  ;;  %v8122_v35 = vld [vmem:[#allocation2 + $0x8] sm:$0xff]  ;;  %v8125_v59 = vld [vmem:[#allocation2] sm:$0xff] }
 0x22e   :  { %1067 = vmatprep.mubr.f32.mxu1 %v862_v0  ;;  %1520 = vmatpush1.msra.mxu1 %v8065_v57  ;;  %11777 = vst [vmem:[#allocation63_spill] sm:$0xff] %v8104_v48  ;;  %11778 = vst [vmem:[#allocation64_spill] sm:$0xff] %v8107_v51  ;;  %v8128_v58 = vld [vmem:[#allocation2 + $0x1f8] sm:$0xff]  ;;  %v8131_v30 = vld [vmem:[#allocation2 + $0x1f0] sm:$0xff] }
 0x22f   :  { %1068 = vmatmul.mubr.f32.gmra.mxu1 %v861_v27  ;;  %1521 = vmatprep.subr.mxu1 %v8068_v53  ;;  %11779 = vst [vmem:[#allocation65_spill] sm:$0xff] %v8110_v55  ;;  %11780 = vst [vmem:[#allocation66_spill] sm:$0xff] %v8113_v15  ;;  %v8134_v56 = vld [vmem:[#allocation2 + $0x1e8] sm:$0xff]  ;;  %v8137_v47 = vld [vmem:[#allocation2 + $0x1e0] sm:$0xff] }
 0x230   :  { %1522 = vmatpush1.msra.mxu1 %v8071_v13  ;;  %11781 = vst [vmem:[#allocation67_spill] sm:$0xff] %v8116_v46  ;;  %11782 = vst [vmem:[#allocation68_spill] sm:$0xff] %v8119_v14  ;;  %v8140_v0 = vld [vmem:[#allocation2 + $0x1d8] sm:$0xff]  ;;  %v8143_v27 = vld [vmem:[#allocation2 + $0x1d0] sm:$0xff] }
 0x231   :  { %1523 = vmatprep.subr.mxu1 %v8074_v17  ;;  %11783 = vst [vmem:[#allocation69_spill] sm:$0xff] %v8122_v35  ;;  %11784 = vst [vmem:[#allocation70_spill] sm:$0xff] %v8125_v59  ;;  %v11827_v13 = vld [vmem:[#allocation11_spill] sm:$0xff]  ;;  %v11828_v60 = vld [vmem:[#allocation12_spill] sm:$0xff] }
 0x232   :  { %1524 = vmatpush1.msra.mxu1 %v8077_v54  ;;  %11785 = vst [vmem:[#allocation71_spill] sm:$0xff] %v8128_v58  ;;  %11786 = vst [vmem:[#allocation72_spill] sm:$0xff] %v8131_v30 }
 0x233   :  { %1525 = vmatprep.subr.mxu1 %v8080_v32  ;;  %11787 = vst [vmem:[#allocation73_spill] sm:$0xff] %v8134_v56  ;;  %11788 = vst [vmem:[#allocation74_spill] sm:$0xff] %v8137_v47 }
 0x234   :  { %1526 = vmatpush1.msra.mxu1 %v8083_v11  ;;  %11789 = vst [vmem:[#allocation75_spill] sm:$0xff] %v8140_v0  ;;  %11790 = vst [vmem:[#allocation76_spill] sm:$0xff] %v8143_v27  ;;  %v11824_v11 = vld [vmem:[#allocation8_spill] sm:$0xff] }
 0x235   :  { %1527 = vmatprep.subr.mxu1 %v8086_v31 }
 0x236   :  { %1528 = vmatpush1.msra.mxu1 %v8089_v33  ;;  %v11823_v33 = vld [vmem:[#allocation30_spill] sm:$0xff] }
 0x237   :  { %1529 = vmatprep.subr.mxu1 %v8092_v44  ;;  %v11822_v44 = vld [vmem:[#allocation9_spill] sm:$0xff] }
 0x238   :  { %1530 = vmatpush1.msra.mxu1 %v8095_v24 }
 0x239   :  { %1531 = vmatprep.subr.mxu1 %v8098_v52 }
 0x23a   :  { %1532 = vmatpush1.msra.mxu1 %v8101_v39  ;;  %v8299_v39 = vld [vmem:[%s11172_s3 + $0x30] sm:$0xff] }
 0x23b   :  { %1533 = vmatprep.subr.mxu1 %v8104_v48  ;;  %v8291_v48 = vld [vmem:[%s11172_s3 + $0x28] sm:$0xff]  ;;  %11821 = vst [vmem:[#allocation107_spill] sm:$0xff] %v8299_v39 }
 0x23c   :  { %1534 = vmatpush1.msra.mxu1 %v8107_v51  ;;  %v8283_v51 = vld [vmem:[%s11172_s3 + $0x20] sm:$0xff]  ;;  %11820 = vst [vmem:[#allocation106_spill] sm:$0xff] %v8291_v48 }
 0x23d   :  { %1535 = vmatprep.subr.mxu1 %v8110_v55  ;;  %v8275_v55 = vld [vmem:[%s11172_s3 + $0x18] sm:$0xff]  ;;  %11819 = vst [vmem:[#allocation105_spill] sm:$0xff] %v8283_v51 }
 0x23e   :  { %1536 = vmatpush1.msra.mxu1 %v8113_v15  ;;  %v8267_v15 = vld [vmem:[%s11172_s3 + $0x10] sm:$0xff]  ;;  %11818 = vst [vmem:[#allocation104_spill] sm:$0xff] %v8275_v55 }
 0x23f   :  { %1537 = vmatprep.subr.mxu1 %v8116_v46  ;;  %11817 = vst [vmem:[#allocation103_spill] sm:$0xff] %v8267_v15 }
 0x240   :  { %1538 = vmatpush1.msra.mxu1 %v8119_v14 }
 0x241   :  { %1539 = vmatprep.subr.mxu1 %v8122_v35 }
 0x242   :  { %1540 = vmatpush1.msra.mxu1 %v8125_v59 }
 0x243   :  { %1541 = vmatprep.subr.mxu1 %v8128_v58  ;;  %v8146_v58 = vld [vmem:[#allocation2 + $0x1c8] sm:$0xff] }
 0x244   :  { %1542 = vmatpush2.msra.mxu1 %v8131_v30  ;;  %11791 = vst [vmem:[#allocation77_spill] sm:$0xff] %v8146_v58  ;;  %v8149_v30 = vld [vmem:[#allocation2 + $0x1c0] sm:$0xff] }
 0x245   :  { %1543 = vmatprep.subr.mxu1 %v8134_v56  ;;  %11792 = vst [vmem:[#allocation78_spill] sm:$0xff] %v8149_v30  ;;  %v8152_v56 = vld [vmem:[#allocation2 + $0x1b8] sm:$0xff] }
 0x246   :  { %1544 = vmatpush2.msra.mxu1 %v8137_v47  ;;  %11793 = vst [vmem:[#allocation79_spill] sm:$0xff] %v8152_v56  ;;  %v8155_v47 = vld [vmem:[#allocation2 + $0x1b0] sm:$0xff] }
 0x247   :  { %1545 = vmatprep.subr.mxu1 %v8140_v0  ;;  %11794 = vst [vmem:[#allocation80_spill] sm:$0xff] %v8155_v47  ;;  %v8158_v0 = vld [vmem:[#allocation2 + $0x1a8] sm:$0xff] }
 0x248   :  { %1546 = vmatpush2.msra.mxu1 %v8143_v27  ;;  %11795 = vst [vmem:[#allocation81_spill] sm:$0xff] %v8158_v0  ;;  %v8161_v27 = vld [vmem:[#allocation2 + $0x1a0] sm:$0xff] }
 0x249   :  { %1547 = vmatprep.subr.mxu1 %v8146_v58  ;;  %11796 = vst [vmem:[#allocation82_spill] sm:$0xff] %v8161_v27  ;;  %v8164_v58 = vld [vmem:[#allocation2 + $0x198] sm:$0xff] }
 0x24a   :  { %1548 = vmatpush2.msra.mxu1 %v8149_v30  ;;  %11797 = vst [vmem:[#allocation83_spill] sm:$0xff] %v8164_v58  ;;  %v8167_v30 = vld [vmem:[#allocation2 + $0x190] sm:$0xff] }
 0x24b   :  { %1549 = vmatprep.subr.mxu1 %v8152_v56  ;;  %11798 = vst [vmem:[#allocation84_spill] sm:$0xff] %v8167_v30  ;;  %v8170_v56 = vld [vmem:[#allocation2 + $0x188] sm:$0xff] }
 0x24c   :  { %1550 = vmatpush2.msra.mxu1 %v8155_v47  ;;  %11799 = vst [vmem:[#allocation85_spill] sm:$0xff] %v8170_v56  ;;  %v8173_v47 = vld [vmem:[#allocation2 + $0x180] sm:$0xff] }
 0x24d   :  { %1551 = vmatprep.subr.mxu1 %v8158_v0  ;;  %11800 = vst [vmem:[#allocation86_spill] sm:$0xff] %v8173_v47  ;;  %v8176_v0 = vld [vmem:[#allocation2 + $0x178] sm:$0xff] }
 0x24e   :  { %1552 = vmatpush2.msra.mxu1 %v8161_v27  ;;  %11801 = vst [vmem:[#allocation87_spill] sm:$0xff] %v8176_v0  ;;  %v8179_v27 = vld [vmem:[#allocation2 + $0x170] sm:$0xff] }
 0x24f   :  { %1553 = vmatprep.subr.mxu1 %v8164_v58  ;;  %11802 = vst [vmem:[#allocation88_spill] sm:$0xff] %v8179_v27  ;;  %v8182_v58 = vld [vmem:[#allocation2 + $0x168] sm:$0xff] }
 0x250   :  { %1554 = vmatpush2.msra.mxu1 %v8167_v30  ;;  %11803 = vst [vmem:[#allocation89_spill] sm:$0xff] %v8182_v58  ;;  %v8185_v30 = vld [vmem:[#allocation2 + $0x160] sm:$0xff] }
 0x251   :  { %1555 = vmatprep.subr.mxu1 %v8170_v56  ;;  %11804 = vst [vmem:[#allocation90_spill] sm:$0xff] %v8185_v30  ;;  %v8188_v56 = vld [vmem:[#allocation2 + $0x158] sm:$0xff] }
 0x252   :  { %1556 = vmatpush2.msra.mxu1 %v8173_v47  ;;  %11805 = vst [vmem:[#allocation91_spill] sm:$0xff] %v8188_v56  ;;  %v8191_v47 = vld [vmem:[#allocation2 + $0x150] sm:$0xff] }
 0x253   :  { %1557 = vmatprep.subr.mxu1 %v8176_v0  ;;  %11806 = vst [vmem:[#allocation92_spill] sm:$0xff] %v8191_v47  ;;  %v8194_v0 = vld [vmem:[#allocation2 + $0x148] sm:$0xff] }
 0x254   :  { %1558 = vmatpush2.msra.mxu1 %v8179_v27  ;;  %11807 = vst [vmem:[#allocation93_spill] sm:$0xff] %v8194_v0  ;;  %v8197_v27 = vld [vmem:[#allocation2 + $0x140] sm:$0xff] }
 0x255   :  { %1559 = vmatprep.subr.mxu1 %v8182_v58  ;;  %11808 = vst [vmem:[#allocation94_spill] sm:$0xff] %v8197_v27  ;;  %v8200_v58 = vld [vmem:[#allocation2 + $0x138] sm:$0xff] }
 0x256   :  { %1560 = vmatpush2.msra.mxu1 %v8185_v30  ;;  %11809 = vst [vmem:[#allocation95_spill] sm:$0xff] %v8200_v58  ;;  %v8203_v30 = vld [vmem:[#allocation2 + $0x130] sm:$0xff] }
 0x257   :  { %1561 = vmatprep.subr.mxu1 %v8188_v56  ;;  %11810 = vst [vmem:[#allocation96_spill] sm:$0xff] %v8203_v30  ;;  %v8206_v56 = vld [vmem:[#allocation2 + $0x128] sm:$0xff] }
 0x258   :  { %1562 = vmatpush2.msra.mxu1 %v8191_v47  ;;  %11811 = vst [vmem:[#allocation97_spill] sm:$0xff] %v8206_v56  ;;  %v8209_v47 = vld [vmem:[#allocation2 + $0x120] sm:$0xff] }
 0x259   :  { %1563 = vmatprep.subr.mxu1 %v8194_v0  ;;  %11812 = vst [vmem:[#allocation98_spill] sm:$0xff] %v8209_v47  ;;  %v8212_v0 = vld [vmem:[#allocation2 + $0x118] sm:$0xff] }
 0x25a   :  { %1564 = vmatpush2.msra.mxu1 %v8197_v27  ;;  %11813 = vst [vmem:[#allocation99_spill] sm:$0xff] %v8212_v0  ;;  %v8215_v27 = vld [vmem:[#allocation2 + $0x110] sm:$0xff] }
 0x25b   :  { %1565 = vmatprep.subr.mxu1 %v8200_v58  ;;  %11814 = vst [vmem:[#allocation100_spill] sm:$0xff] %v8215_v27  ;;  %v8218_v58 = vld [vmem:[#allocation2 + $0x108] sm:$0xff] }
 0x25c   :  { %1566 = vmatpush2.msra.mxu1 %v8203_v30  ;;  %11815 = vst [vmem:[#allocation101_spill] sm:$0xff] %v8218_v58  ;;  %v8221_v30 = vld [vmem:[#allocation2 + $0x100] sm:$0xff] }
 0x25d   :  { %1567 = vmatprep.subr.mxu1 %v8206_v56  ;;  %11816 = vst [vmem:[#allocation102_spill] sm:$0xff] %v8221_v30 }
 0x25e   :  { %1568 = vmatpush2.msra.mxu1 %v8209_v47 }
 0x25f   :  { %1569 = vmatprep.subr.mxu1 %v8212_v0 }
 0x260   :  { %1570 = vmatpush2.msra.mxu1 %v8215_v27 }
 0x261   :  { %1571 = vmatprep.subr.mxu1 %v8218_v58  ;;  %v8259_v58 = vld [vmem:[%s11172_s3 + $0x8] sm:$0xff] }
 0x262   :  { %1572 = vmatpush2.msra.mxu1 %v8221_v30  ;;  %v8251_v30 = vld [vmem:[%s11172_s3] sm:$0xff] }
 0x2e3   :  { %v8224_v56 = vpop.f32.mrf.mxu1 }
 0x2e5   :  { %v8226_v59 = vpop.f32.mrf.mxu1 }
 0x2e7   :  { %v8228_v47 = vpop.f32.mrf.mxu1 }
 0x2e9   :  { %v8230_v35 = vpop.f32.mrf.mxu1 }
 0x2eb   :  { %v8232_v0 = vpop.f32.mrf.mxu1 }
 0x2ed   :  { %v8234_v14 = vpop.f32.mrf.mxu1 }
 0x2ef   :  { %v8236_v27 = vpop.f32.mrf.mxu1 }
 0x2f1   :  { %v8238_v46 = vpop.f32.mrf.mxu1 }
 0x2f2   :  { %1098 = vmatprep.subr.mxu0 %v8238_v46 }
 0x2f3   :  { %1099 = vmatpush1.msra.mxu0 %v8236_v27 }
 0x2f4   :  { %1100 = vmatprep.subr.mxu0 %v8234_v14 }
 0x2f5   :  { %1101 = vmatpush1.msra.mxu0 %v8232_v0 }
 0x2f6   :  { %1102 = vmatprep.subr.mxu0 %v8230_v35 }
 0x2f7   :  { %1103 = vmatpush1.msra.mxu0 %v8228_v47 }
 0x2f8   :  { %1104 = vmatprep.subr.mxu0 %v8226_v59 }
 0x2f9   :  { %1105 = vmatpush1.msra.mxu0 %v8224_v56 }
 0x2fa   :  { %5884 = vmatmul.mubr.msk.f32.vlgmr.msra.gmra.mxu0 %vm497_vm0, %v8251_v30 }
 0x2fb   :  { %1144 = vmatprep.mubr.f32.mxu0 %v11705_v62 }
 0x2fe   :  { %5885 = vmatmul.mubr.msk.f32.gmra.mxu0 %vm497_vm0, %v8259_v58 }
 0x2ff   :  { %1150 = vmatprep.mubr.f32.mxu0 %v11705_v62 }
 0x302   :  { %5886 = vmatmul.mubr.msk.f32.gmra.mxu0 %vm497_vm0, %v8267_v15 }
 0x303   :  { %1156 = vmatprep.mubr.f32.mxu0 %v11705_v62 }
 0x306   :  { %5887 = vmatmul.mubr.msk.f32.gmra.mxu0 %vm497_vm0, %v8275_v55 }
 0x307   :  { %1162 = vmatprep.mubr.f32.mxu0 %v11705_v62 }
 0x30a   :  { %5888 = vmatmul.mubr.msk.f32.gmra.mxu0 %vm497_vm0, %v8283_v51 }
 0x30b   :  { %1168 = vmatprep.mubr.f32.mxu0 %v11705_v62 }
 0x30e   :  { %5889 = vmatmul.mubr.msk.f32.gmra.mxu0 %vm497_vm0, %v8291_v48 }
 0x30f   :  { %1174 = vmatprep.mubr.f32.mxu0 %v11705_v62 }
 0x312   :  { %5890 = vmatmul.mubr.msk.f32.gmra.mxu0 %vm497_vm0, %v8299_v39 }
 0x313   :  { %1180 = vmatprep.mubr.f32.mxu0 %v11705_v62 }
 0x316   :  { %5891 = vmatmul.mubr.msk.f32.gmra.mxu0 %vm497_vm0, %v7716_v6  ;;  %v5882_v6 = vld [vmem:[%s11169_s0 + $0x2] ss:$8 sm:$0x3] }
 0x317   :  { %1186 = vmatprep.mubr.f32.mxu0 %v11705_v62 }
 0x31a   :  { %5892 = vmatmul.mubr.msk.f32.gmra.mxu0 %vm497_vm0, %v7728_v7  ;;  %v8323_v7 = vrot.slane %v5882_v6, %v7834_v49 }
 0x31b   :  { %1192 = vmatprep.mubr.f32.mxu0 %v11705_v62 }
 0x31c   :  { %v876_v39 = vmul.f32 %v8323_v7, %v7810_v38  ;;  %v878_v48 = vmul.f32 %v8323_v7, %v11822_v44 }
 0x31e   :  { %5893 = vmatmul.mubr.msk.f32.gmra.mxu0 %vm497_vm0, %v7740_v8  ;;  %v5883_v8 = vld [vmem:[%s11169_s0 + $0x3] ss:$8 sm:$0x3]  ;;  %v900_v31 = vadd.f32 %v876_v39, %v11823_v33  ;;  %v880_v39 = vmul.f32 %v8323_v7, %v11827_v13 }
 0x31f   :  { %1198 = vmatprep.mubr.f32.mxu0 %v11705_v62  ;;  %v8339_v24 = vrot.slane %v5883_v8, %v7844_v25 }
 0x321   :  { %v938_v51 = vmul.f32 %v8339_v24, %v11824_v11 }
 0x322   :  { %5894 = vmatmul.mubr.msk.f32.gmra.mxu0 %vm497_vm0, %v7752_v9  ;;  %v8329_v9 = vrot.slane %v5882_v6, %v7844_v25 }
 0x323   :  { %1204 = vmatprep.mubr.f32.mxu0 %v11705_v62 }
 0x324   :  { %v877_v52 = vmul.f32 %v8329_v9, %v7810_v38  ;;  %v879_v32 = vmul.f32 %v8329_v9, %v11822_v44  ;;  %v11825_v38 = vld [vmem:[#allocation10_spill] sm:$0xff] }
 0x325   :  { %v902_v54 = vadd.f32 %v878_v48, %v11825_v38  ;;  %v882_v48 = vmul.f32 %v8323_v7, %v7802_v34 }
 0x326   :  { %5895 = vmatmul.mubr.msk.f32.gmra.mxu0 %vm497_vm0, %v7762_v10  ;;  %v8334_v10 = vrot.slane %v5883_v8, %v7834_v49  ;;  %v901_v49 = vadd.f32 %v877_v52, %v11823_v33  ;;  %v11826_v8 = vld [vmem:[#allocation19_spill] sm:$0xff]  ;;  %v903_v55 = vadd.f32 %v879_v32, %v11825_v38  ;;  %v881_v52 = vmul.f32 %v8329_v9, %v11827_v13  ;;  %v11829_v38 = vld [vmem:[#allocation21_spill] sm:$0xff] }
 0x327   :  { %1662 = vmatprep.mubr.f32.mxu0 %v11705_v62  ;;  %v940_v44 = vmul.f32 %v8339_v24, %v11826_v8  ;;  %v904_v32 = vadd.f32 %v880_v39, %v11828_v60 }
 0x328   :  { %v937_v6 = vmul.f32 %v8334_v10, %v11824_v11  ;;  %v939_v25 = vmul.f32 %v8334_v10, %v11826_v8  ;;  %v962_v11 = vadd.f32 %v938_v51, %v901_v49  ;;  %v941_v8 = vmul.f32 %v8334_v10, %v11829_v38 }
 0x329   :  { %v964_v61 = vadd.f32 %v940_v44, %v903_v55  ;;  %v942_v49 = vmul.f32 %v8339_v24, %v11829_v38  ;;  %v884_v44 = vmul.f32 %v8323_v7, %v7806_v36 }
 0x32a   :  { %v961_v17 = vadd.f32 %v937_v6, %v900_v31  ;;  %v963_v12 = vadd.f32 %v939_v25, %v902_v54  ;;  %v883_v31 = vmul.f32 %v8329_v9, %v7802_v34  ;;  %v11830_v54 = vld [vmem:[#allocation32_spill] sm:$0xff] }
 0x32b   :  { %v906_v51 = vadd.f32 %v882_v48, %v11830_v54  ;;  %v886_v48 = vmul.f32 %v8323_v7, %v7908_v20 }
 0x3ba   :  { %v1140_v53 = vpop.f32.mrf.mxu0 }
 0x3bb   :  { %v1211_v33 = vadd.f32 %v1140_v53, %v961_v17  ;;  %v905_v53 = vadd.f32 %v881_v52, %v11828_v60 }
 0x3bc   :  { %v1142_v57 = vpop.f32.mrf.mxu0 }
 0x3bd   :  { %v5896_v6 = vmul.f32 -1.442695, %v1211_v33  ;;  %v1212_v23 = vadd.f32 %v1142_v57, %v962_v11  ;;  %v11831_v33 = vld [vmem:[#allocation14_spill] sm:$0xff]  ;;  %v907_v11 = vadd.f32 %v883_v31, %v11830_v54 }
 0x3be   :  { %v1146_v15 = vpop.f32.mrf.mxu0  ;;  %v943_v57 = vmul.f32 %v8334_v10, %v11831_v33  ;;  %v944_v39 = vmul.f32 %v8339_v24, %v11831_v33  ;;  %v887_v33 = vmul.f32 %v8329_v9, %v7908_v20 }
 0x3bf   :  { %6271 = vpow2.f32 %v5896_v6  ;;  %v5897_v17 = vmul.f32 -1.442695, %v1212_v23  ;;  %v1213_v25 = vadd.f32 %v1146_v15, %v963_v12  ;;  %v965_v6 = vadd.f32 %v941_v8, %v904_v32 }
 0x3c0   :  { %v1148_v34 = vpop.f32.mrf.mxu0  ;;  %v966_v12 = vadd.f32 %v942_v49, %v905_v53  ;;  %v885_v15 = vmul.f32 %v8329_v9, %v7806_v36  ;;  %v967_v60 = vadd.f32 %v943_v57, %v906_v51  ;;  %v11834_v49 = vld [vmem:[#allocation16_spill] sm:$0xff] }
 0x3c1   :  { %6273 = vpow2.f32 %v5897_v17  ;;  %v5898_v55 = vmul.f32 -1.442695, %v1213_v25  ;;  %v1214_v52 = vadd.f32 %v1148_v34, %v964_v61  ;;  %v968_v17 = vadd.f32 %v944_v39, %v907_v11  ;;  %v11832_v25 = vld [vmem:[#allocation34_spill] sm:$0xff]  ;;  %v11833_v61 = vld [vmem:[#allocation39_spill] sm:$0xff]  ;;  %v11836_v57 = vld [vmem:[#allocation20_spill] sm:$0xff] }
 0x3c2   :  { %v1152_v23 = vpop.f32.mrf.mxu0  ;;  %v908_v34 = vadd.f32 %v884_v44, %v11832_v25  ;;  %v888_v8 = vmul.f32 %v8323_v7, %v11833_v61  ;;  %v945_v36 = vmul.f32 %v8334_v10, %v11834_v49  ;;  %v947_v11 = vmul.f32 %v8334_v10, %v11836_v57 }
 0x3c3   :  { %6275 = vpow2.f32 %v5898_v55  ;;  %v5899_v31 = vmul.f32 -1.442695, %v1214_v52  ;;  %v1215_v54 = vadd.f32 %v1152_v23, %v965_v6  ;;  %v909_v52 = vadd.f32 %v885_v15, %v11832_v25  ;;  %v11835_v23 = vld [vmem:[#allocation18_spill] sm:$0xff] }
 0x3c4   :  { %v1154_v38 = vpop.f32.mrf.mxu0  ;;  %v946_v6 = vmul.f32 %v8339_v24, %v11834_v49  ;;  %v910_v51 = vadd.f32 %v886_v48, %v11835_v23  ;;  %v949_v15 = vmul.f32 %v8334_v10, %v7822_v43  ;;  %v889_v48 = vmul.f32 %v8329_v9, %v11833_v61 }
 0x3c5   :  { %6277 = vpow2.f32 %v5899_v31  ;;  %v5900_v32 = vmul.f32 -1.442695, %v1215_v54  ;;  %v1216_v53 = vadd.f32 %v1154_v38, %v966_v12  ;;  %v911_v54 = vadd.f32 %v887_v33, %v11835_v23 }
 0x3c6   :  { %v1158_v55 = vpop.f32.mrf.mxu0  ;;  %v948_v12 = vmul.f32 %v8339_v24, %v11836_v57  ;;  %v912_v31 = vadd.f32 %v888_v8, %v7820_v42  ;;  %v971_v20 = vadd.f32 %v947_v11, %v910_v51 }
 0x3c7   :  { %6279 = vpow2.f32 %v5900_v32  ;;  %v5901_v39 = vmul.f32 -1.442695, %v1216_v53  ;;  %v1217_v44 = vadd.f32 %v1158_v55, %v967_v60  ;;  %v969_v32 = vadd.f32 %v945_v36, %v908_v34  ;;  %v11837_v55 = vld [vmem:[#allocation24_spill] sm:$0xff] }
 0x3c8   :  { %v1160_v38 = vpop.f32.mrf.mxu0  ;;  %v970_v60 = vadd.f32 %v946_v6, %v909_v52  ;;  %v890_v33 = vmul.f32 %v8323_v7, %v11837_v55  ;;  %v891_v57 = vmul.f32 %v8329_v9, %v11837_v55  ;;  %v972_v1 = vadd.f32 %v948_v12, %v911_v54 }
 0x3c9   :  { %6281 = vpow2.f32 %v5901_v39  ;;  %v5902_v49 = vmul.f32 -1.442695, %v1217_v44  ;;  %v1218_v25 = vadd.f32 %v1160_v38, %v968_v17  ;;  %v973_v61 = vadd.f32 %v949_v15, %v912_v31  ;;  %v11838_v38 = vld [vmem:[#allocation27_spill] sm:$0xff] }
 0x3ca   :  { %v1164_v53 = vpop.f32.mrf.mxu0  ;;  %v913_v39 = vadd.f32 %v889_v48, %v7820_v42  ;;  %v950_v36 = vmul.f32 %v8339_v24, %v7822_v43  ;;  %v915_v11 = vadd.f32 %v891_v57, %v11838_v38  ;;  %v892_v54 = vmul.f32 %v8323_v7, %v7836_v50 }
 0x3cb   :  { %6283 = vpow2.f32 %v5902_v49  ;;  %v5903_v8 = vmul.f32 -1.442695, %v1218_v25  ;;  %v1267_v23 = vadd.f32 %v1164_v53, %v969_v32  ;;  %v914_v49 = vadd.f32 %v890_v33, %v11838_v38  ;;  %v11839_v25 = vld [vmem:[#allocation25_spill] sm:$0xff] }
 0x3cc   :  { %v6272_v13 = vpop.eup %6271  ;;  %v1166_v41 = vpop.f32.mrf.mxu0  ;;  %v951_v51 = vmul.f32 %v8334_v10, %v11839_v25  ;;  %v952_v48 = vmul.f32 %v8339_v24, %v11839_v25  ;;  %v893_v32 = vmul.f32 %v8329_v9, %v7836_v50 }
 0x3cd   :  { %v1243_v17 = vadd.f32 1.0, %v6272_v13  ;;  %6285 = vpow2.f32 %v5903_v8  ;;  %v5904_v34 = vmul.f32 -1.442695, %v1267_v23  ;;  %v1268_v52 = vadd.f32 %v1166_v41, %v970_v60 }
 0x3ce   :  { %v6274_v6 = vpop.eup %6273  ;;  %v1170_v44 = vpop.f32.mrf.mxu0  ;;  %v974_v41 = vadd.f32 %v950_v36, %v913_v39 }
 0x3cf   :  { %6287 = vrcp.f32 %v1243_v17  ;;  %v1244_v12 = vadd.f32 1.0, %v6274_v6  ;;  %v5905_v31 = vmul.f32 -1.442695, %v1268_v52  ;;  %v1269_v15 = vadd.f32 %v1170_v44, %v971_v20 }
 0x3d0   :  { %v6276_v13 = vpop.eup %6275  ;;  %6289 = vpow2.f32 %v5904_v34  ;;  %v1172_v23 = vpop.f32.mrf.mxu0  ;;  %v975_v17 = vadd.f32 %v951_v51, %v914_v49  ;;  %v916_v20 = vadd.f32 %v892_v54, %v7886_v22  ;;  %v953_v34 = vmul.f32 %v8334_v10, %v7857_v2 }
 0x3d1   :  { %6291 = vrcp.f32 %v1244_v12  ;;  %v1245_v53 = vadd.f32 1.0, %v6276_v13  ;;  %v5906_v57 = vmul.f32 -1.442695, %v1269_v15  ;;  %v1270_v60 = vadd.f32 %v1172_v23, %v972_v1 }
 0x3d2   :  { %v6278_v33 = vpop.eup %6277  ;;  %6293 = vpow2.f32 %v5905_v31  ;;  %v1176_v8 = vpop.f32.mrf.mxu0  ;;  %v976_v12 = vadd.f32 %v952_v48, %v915_v11  ;;  %v917_v15 = vadd.f32 %v893_v32, %v7886_v22  ;;  %v894_v1 = vmul.f32 %v8323_v7, %v7965_v40 }
 0x3d3   :  { %6295 = vrcp.f32 %v1245_v53  ;;  %v1246_v39 = vadd.f32 1.0, %v6278_v33  ;;  %v5907_v36 = vmul.f32 -1.442695, %v1270_v60  ;;  %v1271_v52 = vadd.f32 %v1176_v8, %v973_v61  ;;  %v11840_v33 = vld [vmem:[#allocation36_spill] sm:$0xff] }
 0x3d4   :  { %v6280_v6 = vpop.eup %6279  ;;  %6297 = vpow2.f32 %v5906_v57  ;;  %v1178_v44 = vpop.f32.mrf.mxu0  ;;  %v977_v23 = vadd.f32 %v953_v34, %v916_v20  ;;  %v954_v61 = vmul.f32 %v8339_v24, %v7857_v2  ;;  %v895_v53 = vmul.f32 %v8329_v9, %v7965_v40 }
 0x3d5   :  { %6299 = vrcp.f32 %v1246_v39  ;;  %v1247_v49 = vadd.f32 1.0, %v6280_v6  ;;  %v5908_v51 = vmul.f32 -1.442695, %v1271_v52  ;;  %v1272_v54 = vadd.f32 %v1178_v44, %v974_v41  ;;  %v11841_v41 = vld [vmem:[#allocation38_spill] sm:$0xff] }
 0x3d6   :  { %v6282_v31 = vpop.eup %6281  ;;  %6301 = vpow2.f32 %v5907_v36  ;;  %v1182_v13 = vpop.f32.mrf.mxu0  ;;  %v918_v8 = vadd.f32 %v894_v1, %v11840_v33  ;;  %v955_v39 = vmul.f32 %v8334_v10, %v11841_v41  ;;  %v11842_v36 = vld [vmem:[#allocation40_spill] sm:$0xff] }
 0x3d7   :  { %6303 = vrcp.f32 %v1247_v49  ;;  %v1248_v11 = vadd.f32 1.0, %v6282_v31  ;;  %v5909_v48 = vmul.f32 -1.442695, %v1272_v54  ;;  %v1273_v32 = vadd.f32 %v1182_v13, %v975_v17 }
 0x3d8   :  { %v6284_v57 = vpop.eup %6283  ;;  %6305 = vpow2.f32 %v5908_v51  ;;  %v1184_v60 = vpop.f32.mrf.mxu0  ;;  %v896_v20 = vmul.f32 %v8323_v7, %v11842_v36  ;;  %v919_v17 = vadd.f32 %v895_v53, %v11840_v33  ;;  %v956_v51 = vmul.f32 %v8339_v24, %v11841_v41 }
 0x3d9   :  { %6307 = vrcp.f32 %v1248_v11  ;;  %v1249_v34 = vadd.f32 1.0, %v6284_v57  ;;  %v5910_v52 = vmul.f32 -1.442695, %v1273_v32  ;;  %v1274_v6 = vadd.f32 %v1184_v60, %v976_v12 }
 0x3da   :  { %v6286_v44 = vpop.eup %6285  ;;  %6309 = vpow2.f32 %v5909_v48  ;;  %v1188_v49 = vpop.f32.mrf.mxu0  ;;  %v897_v1 = vmul.f32 %v8329_v9, %v11842_v36  ;;  %v978_v32 = vadd.f32 %v954_v61, %v917_v15  ;;  %v920_v48 = vadd.f32 %v896_v20, %v7956_v26 }
 0x3db   :  { %6311 = vrcp.f32 %v1249_v34  ;;  %v1250_v54 = vadd.f32 1.0, %v6286_v44  ;;  %v5911_v31 = vmul.f32 -1.442695, %v1274_v6  ;;  %v1323_v13 = vadd.f32 %v1188_v49, %v7876_v16 }
 0x3dc   :  { %v6288_v11 = vpop.eup %6287  ;;  %6313 = vpow2.f32 %v5910_v52  ;;  %v1190_v12 = vpop.f32.mrf.mxu0  ;;  %v957_v53 = vmul.f32 %v8334_v10, %v7988_v18  ;;  %v979_v36 = vadd.f32 %v955_v39, %v918_v8  ;;  %v921_v49 = vadd.f32 %v897_v1, %v7956_v26 }
 0x3dd   :  { %v6290_v57 = vpop.eup %6289  ;;  %6315 = vrcp.f32 %v1250_v54  ;;  %v1331_v60 = vmul.f32 %v6288_v11, %v1323_v13  ;;  %v1324_v41 = vadd.f32 %v1190_v12, %v7876_v16  ;;  %v958_v15 = vmul.f32 %v8339_v24, %v7988_v18 }
 0x3de   :  { %v6292_v34 = vpop.eup %6291  ;;  %v1299_v44 = vadd.f32 1.0, %v6290_v57  ;;  %6317 = vpow2.f32 %v5911_v31  ;;  %v1194_v6 = vpop.f32.mrf.mxu0  ;;  %v980_v40 = vadd.f32 %v956_v51, %v919_v17  ;;  %v981_v8 = vadd.f32 %v957_v53, %v920_v48 }
 0x3df   :  { %v6294_v61 = vpop.eup %6293  ;;  %v1339_v20 = vadd.f32 %v1331_v60, %v977_v23  ;;  %v1332_v52 = vmul.f32 %v6292_v34, %v1324_v41  ;;  %v1325_v33 = vadd.f32 %v1194_v6, %v7972_v37  ;;  %v898_v39 = vmul.f32 %v8323_v7, %v7990_v45 }
 0x3e0   :  { %v6296_v54 = vpop.eup %6295  ;;  %6319 = vrcp.f32 %v1299_v44  ;;  %v1300_v13 = vadd.f32 1.0, %v6294_v61  ;;  %v1196_v11 = vpop.f32.mrf.mxu0  ;;  %v982_v60 = vadd.f32 %v958_v15, %v921_v49  ;;  %v899_v17 = vmul.f32 %v8329_v9, %v7990_v45 }
 0x3e1   :  { %v6298_v31 = vpop.eup %6297  ;;  %6321 = vtanh.f32 %v1339_v20  ;;  %v1340_v1 = vadd.f32 %v1332_v52, %v978_v32  ;;  %v1333_v12 = vmul.f32 %v6296_v54, %v1325_v33  ;;  %v1326_v57 = vadd.f32 %v1196_v11, %v7972_v37 }
 0x3e2   :  { %v6300_v18 = vpop.eup %6299  ;;  %6323 = vrcp.f32 %v1300_v13  ;;  %v1301_v23 = vadd.f32 1.0, %v6298_v31  ;;  %v1200_v41 = vpop.f32.mrf.mxu0  ;;  %v922_v44 = vadd.f32 %v898_v39, %v8011_v21  ;;  %v959_v6 = vmul.f32 %v8334_v10, %v8006_v5 }
 0x3e3   :  { %v6302_v51 = vpop.eup %6301  ;;  %6325 = vtanh.f32 %v1340_v1  ;;  %v1341_v48 = vadd.f32 %v1333_v12, %v979_v36  ;;  %v1334_v53 = vmul.f32 %v6300_v18, %v1326_v57  ;;  %v1327_v7 = vadd.f32 %v1200_v41, %v7974_v19 }
 0x3e4   :  { %v6304_v34 = vpop.eup %6303  ;;  %6327 = vrcp.f32 %v1301_v23  ;;  %v1302_v32 = vadd.f32 1.0, %v6302_v51  ;;  %v1202_v33 = vpop.f32.mrf.mxu0  ;;  %v923_v52 = vadd.f32 %v899_v17, %v8011_v21  ;;  %v960_v54 = vmul.f32 %v8339_v24, %v8006_v5 }
 0x3e5   :  { %v6306_v61 = vpop.eup %6305  ;;  %6329 = vtanh.f32 %v1341_v48  ;;  %v1342_v49 = vadd.f32 %v1334_v53, %v980_v40  ;;  %v1335_v15 = vmul.f32 %v6304_v34, %v1327_v7  ;;  %v1328_v9 = vadd.f32 %v1202_v33, %v7974_v19 }
 0x3e6   :  { %v6308_v20 = vpop.eup %6307  ;;  %6331 = vrcp.f32 %v1302_v32  ;;  %v1303_v18 = vadd.f32 1.0, %v6306_v61  ;;  %v1206_v36 = vpop.f32.mrf.mxu0  ;;  %v983_v1 = vadd.f32 %v959_v6, %v922_v44  ;;  %v984_v53 = vadd.f32 %v960_v54, %v923_v52 }
 0x3e7   :  { %v6310_v13 = vpop.eup %6309  ;;  %6333 = vtanh.f32 %v1342_v49  ;;  %v1343_v11 = vadd.f32 %v1335_v15, %v981_v8  ;;  %v1336_v39 = vmul.f32 %v6308_v20, %v1328_v9  ;;  %v1329_v10 = vadd.f32 %v1206_v36, %v8020_v3 }
 0x3e8   :  { %v6312_v31 = vpop.eup %6311  ;;  %6335 = vrcp.f32 %v1303_v18  ;;  %v1304_v40 = vadd.f32 1.0, %v6310_v13  ;;  %v1208_v12 = vpop.f32.mrf.mxu0 }
 0x3e9   :  { %v6314_v57 = vpop.eup %6313  ;;  %6337 = vtanh.f32 %v1343_v11  ;;  %v1344_v23 = vadd.f32 %v1336_v39, %v982_v60  ;;  %v1337_v41 = vmul.f32 %v6312_v31, %v1329_v10  ;;  %v1330_v17 = vadd.f32 %v1208_v12, %v8020_v3 }
 0x3ea   :  { %v6316_v51 = vpop.eup %6315  ;;  %6339 = vrcp.f32 %v1304_v40  ;;  %v1305_v24 = vadd.f32 1.0, %v6314_v57 }
 0x3eb   :  { %v6318_v48 = vpop.eup %6317  ;;  %6341 = vtanh.f32 %v1344_v23  ;;  %v1345_v8 = vadd.f32 %v1337_v41, %v983_v1  ;;  %v1338_v7 = vmul.f32 %v6316_v51, %v1330_v17 }
 0x3ec   :  { %6343 = vrcp.f32 %v1305_v24  ;;  %v1306_v34 = vadd.f32 1.0, %v6318_v48 }
 0x3ed   :  { %v6320_v32 = vpop.eup %6319  ;;  %6345 = vtanh.f32 %v1345_v8  ;;  %v1346_v33 = vadd.f32 %v1338_v7, %v984_v53 }
 0x3ee   :  { %v6322_v44 = vpop.eup %6321  ;;  %6347 = vrcp.f32 %v1306_v34  ;;  %v1355_v6 = vsub.f32 1.0, %v6320_v32  ;;  %v1371_v13 = vmul.f32 %v6320_v32, %v8224_v56 }
 0x3ef   :  { %v6324_v60 = vpop.eup %6323  ;;  %6349 = vtanh.f32 %v1346_v33 }
 0x3f0   :  { %v6326_v61 = vpop.eup %6325  ;;  %v1356_v49 = vsub.f32 1.0, %v6324_v60  ;;  %v1363_v9 = vmul.f32 %v6322_v44, %v1355_v6  ;;  %v1372_v36 = vmul.f32 %v6324_v60, %v8226_v59 }
 0x3f1   :  { %v6328_v15 = vpop.eup %6327 }
 0x3f2   :  { %v6330_v20 = vpop.eup %6329  ;;  %v1364_v18 = vmul.f32 %v6326_v61, %v1356_v49  ;;  %v1357_v52 = vsub.f32 1.0, %v6328_v15  ;;  %v1379_v40 = vadd.f32 %v1371_v13, %v1363_v9  ;;  %v1373_v59 = vmul.f32 %v6328_v15, %v8228_v47 }
 0x3f3   :  { %v6332_v54 = vpop.eup %6331 }
 0x3f4   :  { %v6334_v11 = vpop.eup %6333  ;;  %v1380_v39 = vadd.f32 %v1372_v36, %v1364_v18  ;;  %v1358_v10 = vsub.f32 1.0, %v6332_v54  ;;  %v1365_v1 = vmul.f32 %v6330_v20, %v1357_v52  ;;  %v1374_v23 = vmul.f32 %v6332_v54, %v8230_v35 }
 0x3f5   :  { %v6336_v31 = vpop.eup %6335 }
 0x3f6   :  { %v6338_v12 = vpop.eup %6337  ;;  %1573 = vmatprep.mubr.f32.mxu1 %v1380_v39  ;;  %v1366_v57 = vmul.f32 %v6334_v11, %v1358_v10  ;;  %v1359_v41 = vsub.f32 1.0, %v6336_v31  ;;  %v1381_v8 = vadd.f32 %v1373_v59, %v1365_v1  ;;  %v1375_v35 = vmul.f32 %v6336_v31, %v8232_v0  ;;  %v8500_v39 = vld [vmem:[#allocation2 + $0xf8] sm:$0xff]  ;;  %v11844_v10 = vld [vmem:[#allocation45_spill] sm:$0xff]  ;;  %v11852_v1 = vld [vmem:[#allocation51_spill] sm:$0xff] }
 0x3f7   :  { %v6340_v17 = vpop.eup %6339  ;;  %1574 = vmatmul.mubr.f32.vlgmr.msra.gmra.mxu1 %v1379_v40  ;;  %v11845_v31 = vld [vmem:[#allocation46_spill] sm:$0xff]  ;;  %v11846_v40 = vld [vmem:[#allocation103_spill] sm:$0xff]  ;;  %v11858_v59 = vld [vmem:[#allocation56_spill] sm:$0xff] }
 0x3f8   :  { %v6342_v51 = vpop.eup %6341  ;;  %v1382_v24 = vadd.f32 %v1374_v23, %v1366_v57  ;;  %v1360_v48 = vsub.f32 1.0, %v6340_v17  ;;  %v1367_v53 = vmul.f32 %v6338_v12, %v1359_v41  ;;  %v1376_v32 = vmul.f32 %v6340_v17, %v8234_v14  ;;  %v11853_v12 = vld [vmem:[#allocation52_spill] sm:$0xff]  ;;  %v11854_v57 = vld [vmem:[#allocation53_spill] sm:$0xff]  ;;  %v11855_v23 = vld [vmem:[#allocation54_spill] sm:$0xff] }
 0x3f9   :  { %v6344_v56 = vpop.eup %6343  ;;  %v11856_v41 = vld [vmem:[#allocation105_spill] sm:$0xff]  ;;  %v11857_v17 = vld [vmem:[#allocation55_spill] sm:$0xff] }
 0x3fa   :  { %v6346_v7 = vpop.eup %6345  ;;  %1579 = vmatprep.mubr.f32.mxu1 %v1382_v24  ;;  %v1368_v34 = vmul.f32 %v6342_v51, %v1360_v48  ;;  %v1361_v33 = vsub.f32 1.0, %v6344_v56  ;;  %v1383_v47 = vadd.f32 %v1375_v35, %v1367_v53  ;;  %v1377_v20 = vmul.f32 %v6344_v56, %v8236_v27  ;;  %v11859_v51 = vld [vmem:[#allocation57_spill] sm:$0xff]  ;;  %v11860_v24 = vld [vmem:[#allocation58_spill] sm:$0xff]  ;;  %v11862_v56 = vld [vmem:[#allocation59_spill] sm:$0xff] }
 0x3fb   :  { %v6348_v44 = vpop.eup %6347  ;;  %1580 = vmatmul.mubr.f32.gmra.mxu1 %v1381_v8  ;;  %v11861_v48 = vld [vmem:[#allocation106_spill] sm:$0xff]  ;;  %v11863_v8 = vld [vmem:[#allocation60_spill] sm:$0xff]  ;;  %v11864_v53 = vld [vmem:[#allocation61_spill] sm:$0xff] }
 0x3fc   :  { %v6350_v6 = vpop.eup %6349  ;;  %v1384_v60 = vadd.f32 %v1376_v32, %v1368_v34  ;;  %v1362_v61 = vsub.f32 1.0, %v6348_v44  ;;  %v1369_v49 = vmul.f32 %v6346_v7, %v1361_v33  ;;  %v1378_v9 = vmul.f32 %v6348_v44, %v8238_v46  ;;  %v11865_v7 = vld [vmem:[#allocation62_spill] sm:$0xff]  ;;  %v11866_v34 = vld [vmem:[#allocation107_spill] sm:$0xff]  ;;  %v11868_v33 = vld [vmem:[#allocation64_spill] sm:$0xff] }
 0x3fd   :  { %v11867_v32 = vld [vmem:[#allocation63_spill] sm:$0xff]  ;;  %v11869_v44 = vld [vmem:[#allocation65_spill] sm:$0xff]  ;;  %v11870_v35 = vld [vmem:[#allocation66_spill] sm:$0xff] }
 0x3fe   :  { %1585 = vmatprep.mubr.f32.mxu1 %v1384_v60  ;;  %v1370_v15 = vmul.f32 %v6350_v6, %v1362_v61  ;;  %v1385_v36 = vadd.f32 %v1377_v20, %v1369_v49  ;;  %v8552_v6 = vld [vmem:[%s11172_s3 + $0x38] sm:$0xff]  ;;  %v11871_v60 = vld [vmem:[#allocation67_spill] sm:$0xff]  ;;  %v11872_v61 = vld [vmem:[#allocation68_spill] sm:$0xff] }
 0x3ff   :  { %1586 = vmatmul.mubr.f32.gmra.mxu1 %v1383_v47  ;;  %v11873_v47 = vld [vmem:[#allocation69_spill] sm:$0xff]  ;;  %v11874_v49 = vld [vmem:[#allocation70_spill] sm:$0xff]  ;;  %v11876_v20 = vld [vmem:[#allocation72_spill] sm:$0xff] }
 0x400   :  { %v1386_v18 = vadd.f32 %v1378_v9, %v1370_v15  ;;  %v8564_v15 = vld [vmem:[%s11172_s3 + $0x40] sm:$0xff] }
 0x401   :  { %v11875_v9 = vld [vmem:[#allocation71_spill] sm:$0xff] }
 0x402   :  { %1591 = vmatprep.mubr.f32.mxu1 %v1386_v18  ;;  %v11877_v18 = vld [vmem:[#allocation73_spill] sm:$0xff] }
 0x403   :  { %1592 = vmatmul.mubr.f32.gmra.mxu1 %v1385_v36  ;;  %v11878_v36 = vld [vmem:[#allocation74_spill] sm:$0xff] }
 0x404   :  { %2186 = vmatprep.mubr.f32.mxu1 %v11705_v62 }
 0x4b7   :  { %v8474_v14 = vpop.f32.mrf.mxu1 }
 0x4b9   :  { %v8476_v0 = vpop.f32.mrf.mxu1 }
 0x4bb   :  { %v8478_v52 = vpop.f32.mrf.mxu1 }
 0x4bd   :  { %v8480_v54 = vpop.f32.mrf.mxu1 }
 0x4bf   :  { %v8482_v13 = vpop.f32.mrf.mxu1 }
 0x4c1   :  { %v8484_v46 = vpop.f32.mrf.mxu1 }
 0x4c3   :  { %v8486_v11 = vpop.f32.mrf.mxu1 }
 0x4c5   :  { %v8488_v27 = vpop.f32.mrf.mxu1 }
 0x4c6   :  { %1622 = vmatprep.subr.mxu0 %v8488_v27 }
 0x4c7   :  { %1623 = vmatpush1.msra.mxu0 %v8486_v11 }
 0x4c8   :  { %1624 = vmatprep.subr.mxu0 %v8484_v46 }
 0x4c9   :  { %1625 = vmatpush1.msra.mxu0 %v8482_v13 }
 0x4ca   :  { %1626 = vmatprep.subr.mxu0 %v8480_v54 }
 0x4cb   :  { %1627 = vmatpush1.msra.mxu0 %v8478_v52 }
 0x4cc   :  { %1628 = vmatprep.subr.mxu0 %v8476_v0 }
 0x4cd   :  { %1629 = vmatpush1.msra.mxu0 %v8474_v14 }
 0x4ce   :  { %5914 = vmatmul.mubr.msk.f32.vlgmr.msra.gmra.mxu0 %vm497_vm0, %v8251_v30  ;;  %2033 = vmatprep.subr.mxu0 %v8500_v39  ;;  %v11843_v30 = vld [vmem:[#allocation44_spill] sm:$0xff] }
 0x4cf   :  { %1668 = vmatprep.mubr.f32.mxu0 %v11705_v62  ;;  %2034 = vmatpush1.msra.mxu0 %v8031_v29  ;;  %v11847_v29 = vld [vmem:[#allocation47_spill] sm:$0xff] }
 0x4d0   :  { %2035 = vmatprep.subr.mxu0 %v8034_v63  ;;  %v11848_v63 = vld [vmem:[#allocation48_spill] sm:$0xff] }
 0x4d1   :  { %2036 = vmatpush1.msra.mxu0 %v8038_v28  ;;  %v11849_v28 = vld [vmem:[#allocation49_spill] sm:$0xff] }
 0x4d2   :  { %5915 = vmatmul.mubr.msk.f32.gmra.mxu0 %vm497_vm0, %v8259_v58  ;;  %2037 = vmatprep.subr.mxu0 %v8042_v4  ;;  %v11850_v4 = vld [vmem:[#allocation50_spill] sm:$0xff]  ;;  %v11851_v58 = vld [vmem:[#allocation104_spill] sm:$0xff] }
 0x4d3   :  { %1674 = vmatprep.mubr.f32.mxu0 %v11705_v62  ;;  %2038 = vmatpush1.msra.mxu0 %v11843_v30  ;;  %v8576_v30 = vld [vmem:[%s11172_s3 + $0x48] sm:$0xff] }
 0x4d4   :  { %2039 = vmatprep.subr.mxu0 %v11844_v10  ;;  %v11879_v10 = vld [vmem:[#allocation75_spill] sm:$0xff] }
 0x4d5   :  { %2040 = vmatpush1.msra.mxu0 %v11845_v31  ;;  %v11880_v31 = vld [vmem:[#allocation76_spill] sm:$0xff] }
 0x4d6   :  { %5916 = vmatmul.mubr.msk.f32.gmra.mxu0 %vm497_vm0, %v11846_v40  ;;  %2041 = vmatprep.subr.mxu0 %v11847_v29  ;;  %v11881_v40 = vld [vmem:[#allocation77_spill] sm:$0xff]  ;;  %v11882_v29 = vld [vmem:[#allocation78_spill] sm:$0xff] }
 0x4d7   :  { %1680 = vmatprep.mubr.f32.mxu0 %v11705_v62  ;;  %2042 = vmatpush1.msra.mxu0 %v11848_v63  ;;  %v8588_v63 = vld [vmem:[%s11172_s3 + $0x50] sm:$0xff] }
 0x4d8   :  { %2043 = vmatprep.subr.mxu0 %v11849_v28  ;;  %v11883_v28 = vld [vmem:[#allocation79_spill] sm:$0xff] }
 0x4d9   :  { %2044 = vmatpush1.msra.mxu0 %v11850_v4  ;;  %v11884_v4 = vld [vmem:[#allocation80_spill] sm:$0xff] }
 0x4da   :  { %5917 = vmatmul.mubr.msk.f32.gmra.mxu0 %vm497_vm0, %v11851_v58  ;;  %2045 = vmatprep.subr.mxu0 %v11852_v1  ;;  %v11885_v58 = vld [vmem:[#allocation81_spill] sm:$0xff]  ;;  %v11886_v1 = vld [vmem:[#allocation82_spill] sm:$0xff] }
 0x4db   :  { %1686 = vmatprep.mubr.f32.mxu0 %v11705_v62  ;;  %2046 = vmatpush1.msra.mxu0 %v11853_v12  ;;  %v8600_v12 = vld [vmem:[%s11172_s3 + $0x58] sm:$0xff] }
 0x4dc   :  { %2047 = vmatprep.subr.mxu0 %v11854_v57  ;;  %v11887_v57 = vld [vmem:[#allocation83_spill] sm:$0xff] }
 0x4dd   :  { %2048 = vmatpush1.msra.mxu0 %v11855_v23  ;;  %v11888_v23 = vld [vmem:[#allocation84_spill] sm:$0xff] }
 0x4de   :  { %5918 = vmatmul.mubr.msk.f32.gmra.mxu0 %vm497_vm0, %v11856_v41  ;;  %2049 = vmatprep.subr.mxu0 %v11857_v17  ;;  %v11889_v41 = vld [vmem:[#allocation85_spill] sm:$0xff]  ;;  %v11890_v17 = vld [vmem:[#allocation86_spill] sm:$0xff] }
 0x4df   :  { %1692 = vmatprep.mubr.f32.mxu0 %v11705_v62  ;;  %2050 = vmatpush1.msra.mxu0 %v11858_v59  ;;  %v11891_v59 = vld [vmem:[#allocation87_spill] sm:$0xff] }
 0x4e0   :  { %2051 = vmatprep.subr.mxu0 %v11859_v51  ;;  %v11892_v51 = vld [vmem:[#allocation88_spill] sm:$0xff] }
 0x4e1   :  { %2052 = vmatpush1.msra.mxu0 %v11860_v24  ;;  %v11893_v24 = vld [vmem:[#allocation89_spill] sm:$0xff] }
 0x4e2   :  { %5919 = vmatmul.mubr.msk.f32.gmra.mxu0 %vm497_vm0, %v11861_v48  ;;  %2053 = vmatprep.subr.mxu0 %v11862_v56  ;;  %v11894_v48 = vld [vmem:[#allocation90_spill] sm:$0xff]  ;;  %v11895_v56 = vld [vmem:[#allocation91_spill] sm:$0xff] }
 0x4e3   :  { %1698 = vmatprep.mubr.f32.mxu0 %v11705_v62  ;;  %2054 = vmatpush1.msra.mxu0 %v11863_v8  ;;  %v11896_v8 = vld [vmem:[#allocation92_spill] sm:$0xff] }
 0x4e4   :  { %2055 = vmatprep.subr.mxu0 %v11864_v53  ;;  %v11897_v53 = vld [vmem:[#allocation93_spill] sm:$0xff] }
 0x4e5   :  { %2056 = vmatpush1.msra.mxu0 %v11865_v7  ;;  %v11898_v7 = vld [vmem:[#allocation94_spill] sm:$0xff] }
 0x4e6   :  { %5920 = vmatmul.mubr.msk.f32.gmra.mxu0 %vm497_vm0, %v11866_v34  ;;  %2057 = vmatprep.subr.mxu0 %v11867_v32  ;;  %v11899_v34 = vld [vmem:[#allocation95_spill] sm:$0xff]  ;;  %v11900_v32 = vld [vmem:[#allocation96_spill] sm:$0xff] }
 0x4e7   :  { %1704 = vmatprep.mubr.f32.mxu0 %v11705_v62  ;;  %2058 = vmatpush1.msra.mxu0 %v11868_v33  ;;  %v11901_v33 = vld [vmem:[#allocation97_spill] sm:$0xff] }
 0x4e8   :  { %2059 = vmatprep.subr.mxu0 %v11869_v44  ;;  %v11902_v44 = vld [vmem:[#allocation98_spill] sm:$0xff] }
 0x4e9   :  { %2060 = vmatpush1.msra.mxu0 %v11870_v35  ;;  %v11903_v35 = vld [vmem:[#allocation99_spill] sm:$0xff] }
 0x4ea   :  { %5921 = vmatmul.mubr.msk.f32.gmra.mxu0 %vm497_vm0, %v8552_v6  ;;  %2061 = vmatprep.subr.mxu0 %v11871_v60  ;;  %v11904_v60 = vld [vmem:[#allocation100_spill] sm:$0xff] }
 0x4eb   :  { %1710 = vmatprep.mubr.f32.mxu0 %v11705_v62  ;;  %2062 = vmatpush1.msra.mxu0 %v11872_v61  ;;  %v11905_v61 = vld [vmem:[#allocation101_spill] sm:$0xff] }
 0x4ec   :  { %2063 = vmatprep.subr.mxu0 %v11873_v47  ;;  %v11906_v47 = vld [vmem:[#allocation102_spill] sm:$0xff] }
 0x4ed   :  { %2064 = vmatpush1.msra.mxu0 %v11874_v49  ;;  %v5912_v49 = vld [vmem:[%s11169_s0 + $0x4] ss:$8 sm:$0x3] }
 0x4ee   :  { %5922 = vmatmul.mubr.msk.f32.gmra.mxu0 %vm497_vm0, %v8564_v15  ;;  %2065 = vmatprep.subr.mxu0 %v11875_v9  ;;  %v11907_v9 = vld [vmem:[#allocation28_spill] sm:$0xff] }
 0x4ef   :  { %1716 = vmatprep.mubr.f32.mxu0 %v11705_v62  ;;  %2066 = vmatpush2.msra.mxu0 %v11876_v20  ;;  %v8628_v20 = vrot.slane %v5912_v49, %v11907_v9 }
 0x4f0   :  { %2067 = vmatprep.subr.mxu0 %v11877_v18  ;;  %v5913_v18 = vld [vmem:[%s11169_s0 + $0x5] ss:$8 sm:$0x3] }
 0x4f1   :  { %2068 = vmatpush2.msra.mxu0 %v11878_v36  ;;  %v11908_v36 = vld [vmem:[#allocation31_spill] sm:$0xff] }
 0x4f2   :  { %5923 = vmatmul.mubr.msk.f32.gmra.mxu0 %vm497_vm0, %v8576_v30  ;;  %2069 = vmatprep.subr.mxu0 %v11879_v10  ;;  %v8634_v10 = vrot.slane %v5912_v49, %v11908_v36 }
 0x4f3   :  { %1722 = vmatprep.mubr.f32.mxu0 %v11705_v62  ;;  %2070 = vmatpush2.msra.mxu0 %v11880_v31  ;;  %v11909_v31 = vld [vmem:[#allocation17_spill] sm:$0xff] }
 0x4f4   :  { %2071 = vmatprep.subr.mxu0 %v11881_v40  ;;  %v1400_v40 = vmul.f32 %v8628_v20, %v11909_v31 }
 0x4f5   :  { %2072 = vmatpush2.msra.mxu0 %v11882_v29  ;;  %v8639_v29 = vrot.slane %v5913_v18, %v11907_v9 }
 0x4f6   :  { %5924 = vmatmul.mubr.msk.f32.gmra.mxu0 %vm497_vm0, %v8588_v63  ;;  %2073 = vmatprep.subr.mxu0 %v11883_v28  ;;  %v1401_v28 = vmul.f32 %v8634_v10, %v11909_v31 }
 0x4f7   :  { %1728 = vmatprep.mubr.f32.mxu0 %v11705_v62  ;;  %2074 = vmatpush2.msra.mxu0 %v11884_v4  ;;  %v8644_v4 = vrot.slane %v5913_v18, %v11908_v36  ;;  %v11916_v18 = vld [vmem:[#allocation12_spill] sm:$0xff] }
 0x4f8   :  { %2075 = vmatprep.subr.mxu0 %v11885_v58  ;;  %v11910_v58 = vld [vmem:[#allocation30_spill] sm:$0xff] }
 0x4f9   :  { %2076 = vmatpush2.msra.mxu0 %v11886_v1  ;;  %v1424_v1 = vadd.f32 %v1400_v40, %v11910_v58 }
 0x4fa   :  { %5925 = vmatmul.mubr.msk.f32.gmra.mxu0 %vm497_vm0, %v8600_v12  ;;  %2077 = vmatprep.subr.mxu0 %v11887_v57  ;;  %v11911_v57 = vld [vmem:[#allocation8_spill] sm:$0xff] }
 0x4fb   :  { %2078 = vmatpush2.msra.mxu0 %v11888_v23  ;;  %v1461_v23 = vmul.f32 %v8639_v29, %v11911_v57 }
 0x4fc   :  { %2079 = vmatprep.subr.mxu0 %v11889_v41  ;;  %v11912_v41 = vld [vmem:[#allocation9_spill] sm:$0xff] }
 0x4fd   :  { %2080 = vmatpush2.msra.mxu0 %v11890_v17  ;;  %v1402_v17 = vmul.f32 %v8628_v20, %v11912_v41 }
 0x4fe   :  { %2081 = vmatprep.subr.mxu0 %v11891_v59  ;;  %v1403_v59 = vmul.f32 %v8634_v10, %v11912_v41 }
 0x4ff   :  { %2082 = vmatpush2.msra.mxu0 %v11892_v51  ;;  %v1425_v51 = vadd.f32 %v1401_v28, %v11910_v58  ;;  %v11917_v28 = vld [vmem:[#allocation21_spill] sm:$0xff] }
 0x500   :  { %2083 = vmatprep.subr.mxu0 %v11893_v24  ;;  %v1462_v24 = vmul.f32 %v8644_v4, %v11911_v57  ;;  %v11918_v57 = vld [vmem:[#allocation13_spill] sm:$0xff] }
 0x501   :  { %2084 = vmatpush2.msra.mxu0 %v11894_v48  ;;  %v11913_v48 = vld [vmem:[#allocation11_spill] sm:$0xff] }
 0x502   :  { %2085 = vmatprep.subr.mxu0 %v11895_v56  ;;  %v1404_v56 = vmul.f32 %v8628_v20, %v11913_v48 }
 0x503   :  { %2086 = vmatpush2.msra.mxu0 %v11896_v8  ;;  %v1485_v8 = vadd.f32 %v1461_v23, %v1424_v1  ;;  %v1465_v1 = vmul.f32 %v8639_v29, %v11917_v28 }
 0x504   :  { %2087 = vmatprep.subr.mxu0 %v11897_v53  ;;  %v11914_v53 = vld [vmem:[#allocation10_spill] sm:$0xff]  ;;  %v1428_v40 = vadd.f32 %v1404_v56, %v11916_v18  ;;  %v1407_v56 = vmul.f32 %v8634_v10, %v11918_v57 }
 0x505   :  { %2088 = vmatpush2.msra.mxu0 %v11898_v7  ;;  %v1426_v7 = vadd.f32 %v1402_v17, %v11914_v53 }
 0x506   :  { %2089 = vmatprep.subr.mxu0 %v11899_v34  ;;  %v11915_v34 = vld [vmem:[#allocation19_spill] sm:$0xff] }
 0x507   :  { %2090 = vmatpush2.msra.mxu0 %v11900_v32  ;;  %v1463_v32 = vmul.f32 %v8639_v29, %v11915_v34 }
 0x508   :  { %2091 = vmatprep.subr.mxu0 %v11901_v33 }
 0x509   :  { %2092 = vmatpush2.msra.mxu0 %v11902_v44  ;;  %v1427_v44 = vadd.f32 %v1403_v59, %v11914_v53  ;;  %v1487_v41 = vadd.f32 %v1463_v32, %v1426_v7  ;;  %v1406_v59 = vmul.f32 %v8628_v20, %v11918_v57  ;;  %v11920_v32 = vld [vmem:[#allocation15_spill] sm:$0xff] }
 0x50a   :  { %2093 = vmatprep.subr.mxu0 %v11903_v35  ;;  %v1464_v35 = vmul.f32 %v8644_v4, %v11915_v34 }
 0x50b   :  { %2094 = vmatpush2.msra.mxu0 %v11904_v60  ;;  %v1405_v60 = vmul.f32 %v8634_v10, %v11913_v48 }
 0x50c   :  { %2095 = vmatprep.subr.mxu0 %v11905_v61  ;;  %v1488_v58 = vadd.f32 %v1464_v35, %v1427_v44  ;;  %v1409_v44 = vmul.f32 %v8634_v10, %v11920_v32 }
 0x50d   :  { %2096 = vmatpush2.msra.mxu0 %v11906_v47  ;;  %v1486_v47 = vadd.f32 %v1462_v24, %v1425_v51  ;;  %v1429_v34 = vadd.f32 %v1405_v60, %v11916_v18 }
 0x58e   :  { %v1664_v33 = vpop.f32.mrf.mxu0 }
 0x58f   :  { %v1735_v61 = vadd.f32 %v1664_v33, %v1485_v8  ;;  %v1466_v8 = vmul.f32 %v8644_v4, %v11917_v28 }
 0x590   :  { %v1666_v49 = vpop.f32.mrf.mxu0 }
 0x591   :  { %v5926_v23 = vmul.f32 -1.442695, %v1735_v61  ;;  %v1736_v17 = vadd.f32 %v1666_v49, %v1486_v47  ;;  %v1489_v61 = vadd.f32 %v1465_v1, %v1428_v40  ;;  %v11919_v47 = vld [vmem:[#allocation14_spill] sm:$0xff]  ;;  %v1408_v49 = vmul.f32 %v8628_v20, %v11920_v32  ;;  %v11922_v40 = vld [vmem:[#allocation37_spill] sm:$0xff] }
 0x592   :  { %v1670_v53 = vpop.f32.mrf.mxu0  ;;  %v1467_v7 = vmul.f32 %v8639_v29, %v11919_v47  ;;  %v1468_v57 = vmul.f32 %v8644_v4, %v11919_v47  ;;  %v1410_v1 = vmul.f32 %v8628_v20, %v11922_v40  ;;  %v11923_v32 = vld [vmem:[#allocation34_spill] sm:$0xff] }
 0x593   :  { %6351 = vpow2.f32 %v5926_v23  ;;  %v5927_v51 = vmul.f32 -1.442695, %v1736_v17  ;;  %v1737_v24 = vadd.f32 %v1670_v53, %v1487_v41  ;;  %v11921_v23 = vld [vmem:[#allocation32_spill] sm:$0xff]  ;;  %v1490_v53 = vadd.f32 %v1466_v8, %v1429_v34 }
 0x594   :  { %v1672_v33 = vpop.f32.mrf.mxu0  ;;  %v1430_v17 = vadd.f32 %v1406_v59, %v11921_v23  ;;  %v1431_v48 = vadd.f32 %v1407_v56, %v11921_v23  ;;  %v1433_v59 = vadd.f32 %v1409_v44, %v11923_v32  ;;  %v11927_v23 = vld [vmem:[#allocation39_spill] sm:$0xff] }
 0x595   :  { %6353 = vpow2.f32 %v5927_v51  ;;  %v5928_v35 = vmul.f32 -1.442695, %v1737_v24  ;;  %v1738_v60 = vadd.f32 %v1672_v33, %v1488_v58  ;;  %v1432_v51 = vadd.f32 %v1408_v49, %v11923_v32  ;;  %v11924_v24 = vld [vmem:[#allocation16_spill] sm:$0xff] }
 0x596   :  { %v1676_v41 = vpop.f32.mrf.mxu0  ;;  %v1469_v58 = vmul.f32 %v8639_v29, %v11924_v24  ;;  %v1470_v34 = vmul.f32 %v8644_v4, %v11924_v24  ;;  %v1491_v47 = vadd.f32 %v1467_v7, %v1430_v17  ;;  %v1411_v49 = vmul.f32 %v8634_v10, %v11922_v40 }
 0x597   :  { %6355 = vpow2.f32 %v5928_v35  ;;  %v5929_v28 = vmul.f32 -1.442695, %v1738_v60  ;;  %v1739_v18 = vadd.f32 %v1676_v41, %v1489_v61  ;;  %v11925_v60 = vld [vmem:[#allocation18_spill] sm:$0xff]  ;;  %v11926_v41 = vld [vmem:[#allocation20_spill] sm:$0xff]  ;;  %v1412_v36 = vmul.f32 %v8628_v20, %v11927_v23 }
 0x598   :  { %v1678_v31 = vpop.f32.mrf.mxu0  ;;  %v1434_v61 = vadd.f32 %v1410_v1, %v11925_v60  ;;  %v1471_v56 = vmul.f32 %v8639_v29, %v11926_v41  ;;  %v1492_v24 = vadd.f32 %v1468_v57, %v1431_v48  ;;  %v1413_v7 = vmul.f32 %v8634_v10, %v11927_v23 }
 0x599   :  { %6357 = vpow2.f32 %v5929_v28  ;;  %v5930_v8 = vmul.f32 -1.442695, %v1739_v18  ;;  %v1740_v33 = vadd.f32 %v1678_v31, %v1490_v53  ;;  %v1493_v18 = vadd.f32 %v1469_v58, %v1432_v51 }
 0x59a   :  { %v1682_v35 = vpop.f32.mrf.mxu0  ;;  %v1494_v31 = vadd.f32 %v1470_v34, %v1433_v59  ;;  %v1414_v17 = vmul.f32 %v8628_v20, %v11837_v55  ;;  %v1472_v40 = vmul.f32 %v8644_v4, %v11926_v41  ;;  %v1436_v57 = vadd.f32 %v1412_v36, %v7820_v42 }
 0x59b   :  { %6359 = vpow2.f32 %v5930_v8  ;;  %v5931_v44 = vmul.f32 -1.442695, %v1740_v33  ;;  %v1741_v32 = vadd.f32 %v1682_v35, %v1491_v47  ;;  %v1495_v8 = vadd.f32 %v1471_v56, %v1434_v61 }
 0x59c   :  { %v1684_v28 = vpop.f32.mrf.mxu0  ;;  %v1435_v47 = vadd.f32 %v1411_v49, %v11925_v60  ;;  %v1473_v48 = vmul.f32 %v8639_v29, %v7822_v43  ;;  %v1474_v59 = vmul.f32 %v8644_v4, %v7822_v43  ;;  %v1437_v34 = vadd.f32 %v1413_v7, %v7820_v42 }
 0x59d   :  { %6361 = vpow2.f32 %v5931_v44  ;;  %v5932_v53 = vmul.f32 -1.442695, %v1741_v32  ;;  %v1742_v1 = vadd.f32 %v1684_v28, %v1492_v24  ;;  %v1438_v33 = vadd.f32 %v1414_v17, %v11838_v38 }
 0x59e   :  { %v1688_v9 = vpop.f32.mrf.mxu0  ;;  %v1475_v35 = vmul.f32 %v8639_v29, %v11839_v25  ;;  %v1415_v36 = vmul.f32 %v8634_v10, %v11837_v55  ;;  %v1496_v28 = vadd.f32 %v1472_v40, %v1435_v47  ;;  %v1416_v7 = vmul.f32 %v8628_v20, %v7836_v50 }
 0x59f   :  { %6363 = vpow2.f32 %v5932_v53  ;;  %v5933_v51 = vmul.f32 -1.442695, %v1742_v1  ;;  %v1791_v58 = vadd.f32 %v1688_v9, %v1493_v18  ;;  %v1497_v18 = vadd.f32 %v1473_v48, %v1436_v57 }
 0x5a0   :  { %v6352_v32 = vpop.eup %6351  ;;  %v1690_v24 = vpop.f32.mrf.mxu0  ;;  %v1476_v53 = vmul.f32 %v8644_v4, %v11839_v25  ;;  %v1440_v25 = vadd.f32 %v1416_v7, %v7886_v22 }
 0x5a1   :  { %v1767_v61 = vadd.f32 1.0, %v6352_v32  ;;  %6365 = vpow2.f32 %v5933_v51  ;;  %v5934_v56 = vmul.f32 -1.442695, %v1791_v58  ;;  %v1792_v49 = vadd.f32 %v1690_v24, %v1494_v31 }
 0x5a2   :  { %v6354_v9 = vpop.eup %6353  ;;  %v1694_v44 = vpop.f32.mrf.mxu0  ;;  %v1498_v51 = vadd.f32 %v1474_v59, %v1437_v34  ;;  %v1499_v58 = vadd.f32 %v1475_v35, %v1438_v33  ;;  %v1439_v31 = vadd.f32 %v1415_v36, %v11838_v38  ;;  %v1478_v36 = vmul.f32 %v8644_v4, %v7857_v2 }
 0x5a3   :  { %6367 = vrcp.f32 %v1767_v61  ;;  %v1768_v17 = vadd.f32 1.0, %v6354_v9  ;;  %v5935_v1 = vmul.f32 -1.442695, %v1792_v49  ;;  %v1793_v43 = vadd.f32 %v1694_v44, %v1495_v8 }
 0x5a4   :  { %v6356_v42 = vpop.eup %6355  ;;  %6369 = vpow2.f32 %v5934_v56  ;;  %v1696_v32 = vpop.f32.mrf.mxu0  ;;  %v1477_v61 = vmul.f32 %v8639_v29, %v7857_v2  ;;  %v1417_v8 = vmul.f32 %v8634_v10, %v7836_v50  ;;  %v11928_v56 = vld [vmem:[#allocation42_spill] sm:$0xff] }
 0x5a5   :  { %6371 = vrcp.f32 %v1768_v17  ;;  %v1769_v40 = vadd.f32 1.0, %v6356_v42  ;;  %v5936_v47 = vmul.f32 -1.442695, %v1793_v43  ;;  %v1794_v57 = vadd.f32 %v1696_v32, %v1496_v28 }
 0x5a6   :  { %v6358_v48 = vpop.eup %6357  ;;  %6373 = vpow2.f32 %v5935_v1  ;;  %v1700_v24 = vpop.f32.mrf.mxu0  ;;  %v1500_v43 = vadd.f32 %v1476_v53, %v1439_v31  ;;  %v1418_v49 = vmul.f32 %v8628_v20, %v11928_v56  ;;  %v1501_v1 = vadd.f32 %v1477_v61, %v1440_v25 }
 0x5a7   :  { %6375 = vrcp.f32 %v1769_v40  ;;  %v1770_v59 = vadd.f32 1.0, %v6358_v48  ;;  %v5937_v34 = vmul.f32 -1.442695, %v1794_v57  ;;  %v1795_v33 = vadd.f32 %v1700_v24, %v1497_v18  ;;  %v11929_v48 = vld [vmem:[#allocation36_spill] sm:$0xff] }
 0x5a8   :  { %v6360_v35 = vpop.eup %6359  ;;  %6377 = vpow2.f32 %v5936_v47  ;;  %v1702_v42 = vpop.f32.mrf.mxu0  ;;  %v1441_v18 = vadd.f32 %v1417_v8, %v7886_v22  ;;  %v1419_v32 = vmul.f32 %v8634_v10, %v11928_v56  ;;  %v1442_v24 = vadd.f32 %v1418_v49, %v11929_v48 }
 0x5a9   :  { %6379 = vrcp.f32 %v1770_v59  ;;  %v1771_v9 = vadd.f32 1.0, %v6360_v35  ;;  %v5938_v44 = vmul.f32 -1.442695, %v1795_v33  ;;  %v1796_v28 = vadd.f32 %v1702_v42, %v1498_v51  ;;  %v11930_v59 = vld [vmem:[#allocation38_spill] sm:$0xff] }
 0x5aa   :  { %v6362_v7 = vpop.eup %6361  ;;  %6381 = vpow2.f32 %v5937_v34  ;;  %v1706_v17 = vpop.f32.mrf.mxu0  ;;  %v1479_v51 = vmul.f32 %v8639_v29, %v11930_v59  ;;  %v11931_v34 = vld [vmem:[#allocation40_spill] sm:$0xff] }
 0x5ab   :  { %6383 = vrcp.f32 %v1771_v9  ;;  %v1772_v53 = vadd.f32 1.0, %v6362_v7  ;;  %v5939_v31 = vmul.f32 -1.442695, %v1796_v28  ;;  %v1797_v40 = vadd.f32 %v1706_v17, %v1499_v58 }
 0x5ac   :  { %v6364_v47 = vpop.eup %6363  ;;  %6385 = vpow2.f32 %v5938_v44  ;;  %v1708_v57 = vpop.f32.mrf.mxu0  ;;  %v1420_v25 = vmul.f32 %v8628_v20, %v11931_v34  ;;  %v1443_v58 = vadd.f32 %v1419_v32, %v11929_v48  ;;  %v1480_v9 = vmul.f32 %v8644_v4, %v11930_v59 }
 0x5ad   :  { %6387 = vrcp.f32 %v1772_v53  ;;  %v1773_v61 = vadd.f32 1.0, %v6364_v47  ;;  %v5940_v8 = vmul.f32 -1.442695, %v1797_v40  ;;  %v1798_v33 = vadd.f32 %v1708_v57, %v1500_v43  ;;  %v11932_v40 = vld [vmem:[#allocation43_spill] sm:$0xff] }
 0x5ae   :  { %v6366_v35 = vpop.eup %6365  ;;  %6389 = vpow2.f32 %v5939_v31  ;;  %v1712_v42 = vpop.f32.mrf.mxu0  ;;  %v1421_v49 = vmul.f32 %v8634_v10, %v11931_v34  ;;  %v1502_v53 = vadd.f32 %v1478_v36, %v1441_v18  ;;  %v1444_v31 = vadd.f32 %v1420_v25, %v7956_v26 }
 0x5af   :  { %6391 = vrcp.f32 %v1773_v61  ;;  %v1774_v44 = vadd.f32 1.0, %v6366_v35  ;;  %v5941_v28 = vmul.f32 -1.442695, %v1798_v33  ;;  %v1847_v7 = vadd.f32 %v1712_v42, %v7876_v16 }
 0x5b0   :  { %v6368_v17 = vpop.eup %6367  ;;  %6393 = vpow2.f32 %v5940_v8  ;;  %v1714_v43 = vpop.f32.mrf.mxu0  ;;  %v1481_v32 = vmul.f32 %v8639_v29, %v11932_v40  ;;  %v1503_v34 = vadd.f32 %v1479_v51, %v1442_v24  ;;  %v1445_v42 = vadd.f32 %v1421_v49, %v7956_v26 }
 0x5b1   :  { %v6370_v47 = vpop.eup %6369  ;;  %6395 = vrcp.f32 %v1774_v44  ;;  %v1855_v57 = vmul.f32 %v6368_v17, %v1847_v7  ;;  %v1848_v59 = vadd.f32 %v1714_v43, %v7876_v16  ;;  %v1482_v36 = vmul.f32 %v8644_v4, %v11932_v40 }
 0x5b2   :  { %v6372_v61 = vpop.eup %6371  ;;  %v1823_v35 = vadd.f32 1.0, %v6370_v47  ;;  %6397 = vpow2.f32 %v5941_v28  ;;  %v1718_v33 = vpop.f32.mrf.mxu0  ;;  %v1504_v56 = vadd.f32 %v1480_v9, %v1443_v58  ;;  %v1505_v24 = vadd.f32 %v1481_v32, %v1444_v31 }
 0x5b3   :  { %v6374_v18 = vpop.eup %6373  ;;  %v1863_v25 = vadd.f32 %v1855_v57, %v1501_v1  ;;  %v1856_v8 = vmul.f32 %v6372_v61, %v1848_v59  ;;  %v1849_v48 = vadd.f32 %v1718_v33, %v7972_v37  ;;  %v1422_v51 = vmul.f32 %v8628_v20, %v7990_v45 }
 0x5b4   :  { %v6376_v44 = vpop.eup %6375  ;;  %6399 = vrcp.f32 %v1823_v35  ;;  %v1824_v7 = vadd.f32 1.0, %v6374_v18  ;;  %v1720_v17 = vpop.f32.mrf.mxu0  ;;  %v1506_v57 = vadd.f32 %v1482_v36, %v1445_v42  ;;  %v1423_v58 = vmul.f32 %v8634_v10, %v7990_v45 }
 0x5b5   :  { %v6378_v28 = vpop.eup %6377  ;;  %6401 = vtanh.f32 %v1863_v25  ;;  %v1864_v49 = vadd.f32 %v1856_v8, %v1502_v53  ;;  %v1857_v43 = vmul.f32 %v6376_v44, %v1849_v48  ;;  %v1850_v47 = vadd.f32 %v1720_v17, %v7972_v37 }
 0x5b6   :  { %v6380_v40 = vpop.eup %6379  ;;  %6403 = vrcp.f32 %v1824_v7  ;;  %v1825_v1 = vadd.f32 1.0, %v6378_v28  ;;  %v1724_v59 = vpop.f32.mrf.mxu0  ;;  %v1446_v35 = vadd.f32 %v1422_v51, %v8011_v21  ;;  %v1483_v33 = vmul.f32 %v8639_v29, %v8006_v5 }
 0x5b7   :  { %v6382_v9 = vpop.eup %6381  ;;  %6405 = vtanh.f32 %v1864_v49  ;;  %v1865_v31 = vadd.f32 %v1857_v43, %v1503_v34  ;;  %v1858_v32 = vmul.f32 %v6380_v40, %v1850_v47  ;;  %v1851_v20 = vadd.f32 %v1724_v59, %v7974_v19 }
 0x5b8   :  { %v6384_v61 = vpop.eup %6383  ;;  %6407 = vrcp.f32 %v1825_v1  ;;  %v1826_v53 = vadd.f32 1.0, %v6382_v9  ;;  %v1726_v48 = vpop.f32.mrf.mxu0  ;;  %v1447_v8 = vadd.f32 %v1423_v58, %v8011_v21  ;;  %v1484_v44 = vmul.f32 %v8644_v4, %v8006_v5 }
 0x5b9   :  { %v6386_v18 = vpop.eup %6385  ;;  %6409 = vtanh.f32 %v1865_v31  ;;  %v1866_v42 = vadd.f32 %v1858_v32, %v1504_v56  ;;  %v1859_v36 = vmul.f32 %v6384_v61, %v1851_v20  ;;  %v1852_v10 = vadd.f32 %v1726_v48, %v7974_v19 }
 0x5ba   :  { %v6388_v25 = vpop.eup %6387  ;;  %6411 = vrcp.f32 %v1826_v53  ;;  %v1827_v34 = vadd.f32 1.0, %v6386_v18  ;;  %v1730_v40 = vpop.f32.mrf.mxu0  ;;  %v1507_v49 = vadd.f32 %v1483_v33, %v1446_v35  ;;  %v1508_v32 = vadd.f32 %v1484_v44, %v1447_v8 }
 0x5bb   :  { %v6390_v7 = vpop.eup %6389  ;;  %6413 = vtanh.f32 %v1866_v42  ;;  %v1867_v17 = vadd.f32 %v1859_v36, %v1505_v24  ;;  %v1860_v51 = vmul.f32 %v6388_v25, %v1852_v10  ;;  %v1853_v29 = vadd.f32 %v1730_v40, %v8020_v3 }
 0x5bc   :  { %v6392_v28 = vpop.eup %6391  ;;  %6415 = vrcp.f32 %v1827_v34  ;;  %v1828_v56 = vadd.f32 1.0, %v6390_v7  ;;  %v1732_v43 = vpop.f32.mrf.mxu0 }
 0x5bd   :  { %v6394_v47 = vpop.eup %6393  ;;  %6417 = vtanh.f32 %v1867_v17  ;;  %v1868_v1 = vadd.f32 %v1860_v51, %v1506_v57  ;;  %v1861_v59 = vmul.f32 %v6392_v28, %v1853_v29  ;;  %v1854_v58 = vadd.f32 %v1732_v43, %v8020_v3 }
 0x5be   :  { %v6396_v9 = vpop.eup %6395  ;;  %6419 = vrcp.f32 %v1828_v56  ;;  %v1829_v4 = vadd.f32 1.0, %v6394_v47 }
 0x5bf   :  { %v6398_v31 = vpop.eup %6397  ;;  %6421 = vtanh.f32 %v1868_v1  ;;  %v1869_v24 = vadd.f32 %v1861_v59, %v1507_v49  ;;  %v1862_v20 = vmul.f32 %v6396_v9, %v1854_v58 }
 0x5c0   :  { %6423 = vrcp.f32 %v1829_v4  ;;  %v1830_v61 = vadd.f32 1.0, %v6398_v31 }
 0x5c1   :  { %v6400_v53 = vpop.eup %6399  ;;  %6425 = vtanh.f32 %v1869_v24  ;;  %v1870_v48 = vadd.f32 %v1862_v20, %v1508_v32 }
 0x5c2   :  { %v6402_v35 = vpop.eup %6401  ;;  %6427 = vrcp.f32 %v1830_v61  ;;  %v1879_v33 = vsub.f32 1.0, %v6400_v53  ;;  %v1895_v7 = vmul.f32 %v6400_v53, %v8474_v14 }
 0x5c3   :  { %v6404_v57 = vpop.eup %6403  ;;  %6429 = vtanh.f32 %v1870_v48 }
 0x5c4   :  { %v6406_v18 = vpop.eup %6405  ;;  %v1880_v42 = vsub.f32 1.0, %v6404_v57  ;;  %v1887_v10 = vmul.f32 %v6402_v35, %v1879_v33  ;;  %v1896_v40 = vmul.f32 %v6404_v57, %v8476_v0 }
 0x5c5   :  { %v6408_v36 = vpop.eup %6407 }
 0x5c6   :  { %v6410_v25 = vpop.eup %6409  ;;  %v1888_v34 = vmul.f32 %v6406_v18, %v1880_v42  ;;  %v1881_v8 = vsub.f32 1.0, %v6408_v36  ;;  %v1903_v56 = vadd.f32 %v1895_v7, %v1887_v10  ;;  %v1897_v0 = vmul.f32 %v6408_v36, %v8478_v52 }
 0x5c7   :  { %v6412_v44 = vpop.eup %6411 }
 0x5c8   :  { %v6414_v17 = vpop.eup %6413  ;;  %v1904_v51 = vadd.f32 %v1896_v40, %v1888_v34  ;;  %v1882_v29 = vsub.f32 1.0, %v6412_v44  ;;  %v1889_v49 = vmul.f32 %v6410_v25, %v1881_v8  ;;  %v1898_v1 = vmul.f32 %v6412_v44, %v8480_v54 }
 0x5c9   :  { %v6416_v28 = vpop.eup %6415 }
 0x5ca   :  { %v6418_v43 = vpop.eup %6417  ;;  %2097 = vmatprep.mubr.f32.mxu0 %v1904_v51  ;;  %v1890_v47 = vmul.f32 %v6414_v17, %v1882_v29  ;;  %v1883_v59 = vsub.f32 1.0, %v6416_v28  ;;  %v1905_v24 = vadd.f32 %v1897_v0, %v1889_v49  ;;  %v1899_v54 = vmul.f32 %v6416_v28, %v8482_v13  ;;  %v8806_v51 = vld [vmem:[%s11172_s3] sm:$0xff]  ;;  %v8812_v29 = vld [vmem:[#allocation2 + $0xf0] sm:$0xff]  ;;  %v8815_v28 = vld [vmem:[#allocation2 + $0xe8] sm:$0xff] }
 0x5cb   :  { %v6420_v58 = vpop.eup %6419  ;;  %2098 = vmatmul.mubr.f32.vlgmr.msra.gmra.mxu0 %v1903_v56  ;;  %v8818_v56 = vld [vmem:[#allocation2 + $0xe0] sm:$0xff]  ;;  %v8824_v49 = vld [vmem:[%s11172_s3 + $0x8] sm:$0xff]  ;;  %v8852_v0 = vld [vmem:[#allocation2 + $0xb0] sm:$0xff] }
 0x5cc   :  { %v6422_v9 = vpop.eup %6421  ;;  %v1906_v4 = vadd.f32 %v1898_v1, %v1890_v47  ;;  %v1884_v31 = vsub.f32 1.0, %v6420_v58  ;;  %v1891_v32 = vmul.f32 %v6418_v43, %v1883_v59  ;;  %v1900_v53 = vmul.f32 %v6420_v58, %v8484_v46  ;;  %v8832_v43 = vld [vmem:[#allocation2 + $0xd0] sm:$0xff]  ;;  %v8835_v47 = vld [vmem:[#allocation2 + $0xc8] sm:$0xff]  ;;  %v8838_v1 = vld [vmem:[#allocation2 + $0xc0] sm:$0xff]  ;;  %11936 = vst [vmem:[#allocation46_spill] sm:$0xff] %v8852_v0 }
 0x5cd   :  { %v6424_v14 = vpop.eup %6423  ;;  %11933 = vst [vmem:[#allocation27_spill] sm:$0xff] %v8838_v1  ;;  %v8844_v59 = vld [vmem:[%s11172_s3 + $0x10] sm:$0xff]  ;;  %v8848_v58 = vld [vmem:[#allocation2 + $0xb8] sm:$0xff] }
 0x5ce   :  { %v6426_v20 = vpop.eup %6425  ;;  %2103 = vmatprep.mubr.f32.mxu0 %v1906_v4  ;;  %v1892_v61 = vmul.f32 %v6422_v9, %v1884_v31  ;;  %v1885_v48 = vsub.f32 1.0, %v6424_v14  ;;  %v1907_v52 = vadd.f32 %v1899_v54, %v1891_v32  ;;  %v1901_v25 = vmul.f32 %v6424_v14, %v8486_v11  ;;  %11934 = vst [vmem:[#allocation44_spill] sm:$0xff] %v8844_v59  ;;  %v8855_v9 = vld [vmem:[#allocation2 + $0xa8] sm:$0xff]  ;;  %v8858_v4 = vld [vmem:[#allocation2 + $0xa0] sm:$0xff]  ;;  %v8864_v31 = vld [vmem:[%s11172_s3 + $0x18] sm:$0xff] }
 0x5cf   :  { %v6428_v35 = vpop.eup %6427  ;;  %2104 = vmatmul.mubr.f32.gmra.mxu0 %v1905_v24  ;;  %11935 = vst [vmem:[#allocation45_spill] sm:$0xff] %v8848_v58  ;;  %11937 = vst [vmem:[#allocation103_spill] sm:$0xff] %v8855_v9  ;;  %v8868_v14 = vld [vmem:[#allocation2 + $0x98] sm:$0xff]  ;;  %v8872_v24 = vld [vmem:[#allocation2 + $0x90] sm:$0xff] }
 0x5d0   :  { %v6430_v33 = vpop.eup %6429  ;;  %v1908_v57 = vadd.f32 %v1900_v53, %v1892_v61  ;;  %v1886_v18 = vsub.f32 1.0, %v6428_v35  ;;  %v1893_v42 = vmul.f32 %v6426_v20, %v1885_v48  ;;  %v1902_v10 = vmul.f32 %v6428_v35, %v8488_v27  ;;  %11938 = vst [vmem:[#allocation47_spill] sm:$0xff] %v8858_v4  ;;  %11939 = vst [vmem:[#allocation48_spill] sm:$0xff] %v8864_v31  ;;  %v8875_v32 = vld [vmem:[#allocation2 + $0x88] sm:$0xff]  ;;  %v8878_v20 = vld [vmem:[#allocation2 + $0x80] sm:$0xff] }
 0x5d1   :  { %11940 = vst [vmem:[#allocation49_spill] sm:$0xff] %v8868_v14  ;;  %11941 = vst [vmem:[#allocation50_spill] sm:$0xff] %v8872_v24  ;;  %v8884_v61 = vld [vmem:[%s11172_s3 + $0x20] sm:$0xff]  ;;  %v8888_v53 = vld [vmem:[#allocation2 + $0x78] sm:$0xff] }
 0x5d2   :  { %2109 = vmatprep.mubr.f32.mxu0 %v1908_v57  ;;  %v1894_v36 = vmul.f32 %v6430_v33, %v1886_v18  ;;  %v1909_v40 = vadd.f32 %v1901_v25, %v1893_v42  ;;  %11942 = vst [vmem:[#allocation104_spill] sm:$0xff] %v8875_v32  ;;  %11943 = vst [vmem:[#allocation51_spill] sm:$0xff] %v8878_v20  ;;  %v8892_v48 = vld [vmem:[#allocation2 + $0x70] sm:$0xff]  ;;  %v8895_v35 = vld [vmem:[#allocation2 + $0x68] sm:$0xff] }
 0x5d3   :  { %2110 = vmatmul.mubr.f32.gmra.mxu0 %v1907_v52  ;;  %11944 = vst [vmem:[#allocation52_spill] sm:$0xff] %v8884_v61  ;;  %11945 = vst [vmem:[#allocation53_spill] sm:$0xff] %v8888_v53  ;;  %v8898_v54 = vld [vmem:[#allocation2 + $0x60] sm:$0xff]  ;;  %v8904_v33 = vld [vmem:[%s11172_s3 + $0x28] sm:$0xff] }
 0x5d4   :  { %v1910_v34 = vadd.f32 %v1902_v10, %v1894_v36  ;;  %11946 = vst [vmem:[#allocation54_spill] sm:$0xff] %v8892_v48  ;;  %11947 = vst [vmem:[#allocation105_spill] sm:$0xff] %v8895_v35  ;;  %v8908_v57 = vld [vmem:[#allocation2 + $0x58] sm:$0xff]  ;;  %v8912_v18 = vld [vmem:[#allocation2 + $0x50] sm:$0xff] }
 0x5d5   :  { %11948 = vst [vmem:[#allocation55_spill] sm:$0xff] %v8898_v54  ;;  %11949 = vst [vmem:[#allocation56_spill] sm:$0xff] %v8904_v33  ;;  %v8915_v52 = vld [vmem:[#allocation2 + $0x48] sm:$0xff]  ;;  %v8918_v42 = vld [vmem:[#allocation2 + $0x40] sm:$0xff] }
 0x5d6   :  { %2115 = vmatprep.mubr.f32.mxu0 %v1910_v34  ;;  %11950 = vst [vmem:[#allocation57_spill] sm:$0xff] %v8908_v57  ;;  %11951 = vst [vmem:[#allocation58_spill] sm:$0xff] %v8912_v18  ;;  %v8924_v36 = vld [vmem:[%s11172_s3 + $0x30] sm:$0xff]  ;;  %v8928_v10 = vld [vmem:[#allocation2 + $0x38] sm:$0xff] }
 0x5d7   :  { %2116 = vmatmul.mubr.f32.gmra.mxu0 %v1909_v40  ;;  %11952 = vst [vmem:[#allocation106_spill] sm:$0xff] %v8915_v52  ;;  %11953 = vst [vmem:[#allocation59_spill] sm:$0xff] %v8918_v42  ;;  %v8932_v25 = vld [vmem:[#allocation2 + $0x30] sm:$0xff]  ;;  %v8935_v34 = vld [vmem:[#allocation2 + $0x28] sm:$0xff] }
 0x5d8   :  { %2710 = vmatprep.mubr.f32.mxu0 %v11705_v62  ;;  %11954 = vst [vmem:[#allocation60_spill] sm:$0xff] %v8924_v36  ;;  %11955 = vst [vmem:[#allocation61_spill] sm:$0xff] %v8928_v10  ;;  %v8938_v40 = vld [vmem:[#allocation2 + $0x20] sm:$0xff] }
 0x5d9   :  { %11956 = vst [vmem:[#allocation62_spill] sm:$0xff] %v8932_v25  ;;  %11957 = vst [vmem:[#allocation107_spill] sm:$0xff] %v8935_v34 }
 0x5da   :  { %11958 = vst [vmem:[#allocation63_spill] sm:$0xff] %v8938_v40 }
 0x68b   :  { %v8779_v46 = vpop.f32.mrf.mxu0 }
 0x68d   :  { %v8781_v13 = vpop.f32.mrf.mxu0 }
 0x68f   :  { %v8783_v8 = vpop.f32.mrf.mxu0 }
 0x691   :  { %v8785_v44 = vpop.f32.mrf.mxu0 }
 0x693   :  { %v8787_v7 = vpop.f32.mrf.mxu0 }
 0x695   :  { %v8789_v27 = vpop.f32.mrf.mxu0 }
 0x697   :  { %v8791_v17 = vpop.f32.mrf.mxu0 }
 0x699   :  { %v8793_v11 = vpop.f32.mrf.mxu0 }
 0x69a   :  { %2146 = vmatprep.subr.mxu1 %v8793_v11 }
 0x69b   :  { %2147 = vmatpush1.msra.mxu1 %v8791_v17 }
 0x69c   :  { %2148 = vmatprep.subr.mxu1 %v8789_v27 }
 0x69d   :  { %2149 = vmatpush1.msra.mxu1 %v8787_v7 }
 0x69e   :  { %2150 = vmatprep.subr.mxu1 %v8785_v44 }
 0x69f   :  { %2151 = vmatpush1.msra.mxu1 %v8783_v8 }
 0x6a0   :  { %2152 = vmatprep.subr.mxu1 %v8781_v13 }
 0x6a1   :  { %2153 = vmatpush1.msra.mxu1 %v8779_v46 }
 0x6a2   :  { %5944 = vmatmul.mubr.msk.f32.vlgmr.msra.gmra.mxu1 %vm497_vm0, %v8806_v51  ;;  %2557 = vmatprep.subr.mxu1 %v8500_v39  ;;  %v8828_v39 = vld [vmem:[#allocation2 + $0xd8] sm:$0xff] }
 0x6a3   :  { %2192 = vmatprep.mubr.f32.mxu1 %v11705_v62  ;;  %2558 = vmatpush1.msra.mxu1 %v8812_v29 }
 0x6a4   :  { %2559 = vmatprep.subr.mxu1 %v8815_v28 }
 0x6a5   :  { %2560 = vmatpush1.msra.mxu1 %v8818_v56 }
 0x6a6   :  { %5945 = vmatmul.mubr.msk.f32.gmra.mxu1 %vm497_vm0, %v8824_v49  ;;  %2561 = vmatprep.subr.mxu1 %v8828_v39 }
 0x6a7   :  { %2198 = vmatprep.mubr.f32.mxu1 %v11705_v62  ;;  %2562 = vmatpush1.msra.mxu1 %v8832_v43 }
 0x6a8   :  { %2563 = vmatprep.subr.mxu1 %v8835_v47 }
 0x6a9   :  { %2564 = vmatpush1.msra.mxu1 %v8838_v1 }
 0x6aa   :  { %5946 = vmatmul.mubr.msk.f32.gmra.mxu1 %vm497_vm0, %v8844_v59  ;;  %2565 = vmatprep.subr.mxu1 %v8848_v58  ;;  %v12006_v58 = vld [vmem:[#allocation13_spill] sm:$0xff] }
 0x6ab   :  { %2204 = vmatprep.mubr.f32.mxu1 %v11705_v62  ;;  %2566 = vmatpush1.msra.mxu1 %v8852_v0 }
 0x6ac   :  { %2567 = vmatprep.subr.mxu1 %v8855_v9 }
 0x6ad   :  { %2568 = vmatpush1.msra.mxu1 %v8858_v4 }
 0x6ae   :  { %5947 = vmatmul.mubr.msk.f32.gmra.mxu1 %vm497_vm0, %v8864_v31  ;;  %2569 = vmatprep.subr.mxu1 %v8868_v14  ;;  %v12004_v31 = vld [vmem:[#allocation12_spill] sm:$0xff] }
 0x6af   :  { %2210 = vmatprep.mubr.f32.mxu1 %v11705_v62  ;;  %2570 = vmatpush1.msra.mxu1 %v8872_v24 }
 0x6b0   :  { %2571 = vmatprep.subr.mxu1 %v8875_v32 }
 0x6b1   :  { %2572 = vmatpush1.msra.mxu1 %v8878_v20 }
 0x6b2   :  { %5948 = vmatmul.mubr.msk.f32.gmra.mxu1 %vm497_vm0, %v8884_v61  ;;  %2573 = vmatprep.subr.mxu1 %v8888_v53  ;;  %v12002_v53 = vld [vmem:[#allocation10_spill] sm:$0xff]  ;;  %v12003_v61 = vld [vmem:[#allocation19_spill] sm:$0xff] }
 0x6b3   :  { %2216 = vmatprep.mubr.f32.mxu1 %v11705_v62  ;;  %2574 = vmatpush1.msra.mxu1 %v8892_v48 }
 0x6b4   :  { %2575 = vmatprep.subr.mxu1 %v8895_v35 }
 0x6b5   :  { %2576 = vmatpush1.msra.mxu1 %v8898_v54  ;;  %v12000_v54 = vld [vmem:[#allocation9_spill] sm:$0xff] }
 0x6b6   :  { %5949 = vmatmul.mubr.msk.f32.gmra.mxu1 %vm497_vm0, %v8904_v33  ;;  %2577 = vmatprep.subr.mxu1 %v8908_v57  ;;  %v11999_v57 = vld [vmem:[#allocation8_spill] sm:$0xff] }
 0x6b7   :  { %2222 = vmatprep.mubr.f32.mxu1 %v11705_v62  ;;  %2578 = vmatpush1.msra.mxu1 %v8912_v18 }
 0x6b8   :  { %2579 = vmatprep.subr.mxu1 %v8915_v52  ;;  %v11998_v52 = vld [vmem:[#allocation30_spill] sm:$0xff] }
 0x6b9   :  { %2580 = vmatpush1.msra.mxu1 %v8918_v42 }
 0x6ba   :  { %5950 = vmatmul.mubr.msk.f32.gmra.mxu1 %vm497_vm0, %v8924_v36  ;;  %2581 = vmatprep.subr.mxu1 %v8928_v10  ;;  %v8943_v36 = vld [vmem:[#allocation2 + $0x18] sm:$0xff]  ;;  %v8947_v10 = vld [vmem:[#allocation2 + $0x10] sm:$0xff] }
 0x6bb   :  { %2228 = vmatprep.mubr.f32.mxu1 %v11705_v62  ;;  %2582 = vmatpush1.msra.mxu1 %v8932_v25  ;;  %11959 = vst [vmem:[#allocation64_spill] sm:$0xff] %v8943_v36  ;;  %11960 = vst [vmem:[#allocation65_spill] sm:$0xff] %v8947_v10  ;;  %v8950_v25 = vld [vmem:[#allocation2 + $0x8] sm:$0xff] }
 0x6bc   :  { %2583 = vmatprep.subr.mxu1 %v8935_v34  ;;  %11961 = vst [vmem:[#allocation66_spill] sm:$0xff] %v8950_v25  ;;  %v8953_v34 = vld [vmem:[#allocation2] sm:$0xff] }
 0x6bd   :  { %2584 = vmatpush1.msra.mxu1 %v8938_v40  ;;  %11962 = vst [vmem:[#allocation67_spill] sm:$0xff] %v8953_v34 }
 0x6be   :  { %5951 = vmatmul.mubr.msk.f32.gmra.mxu1 %vm497_vm0, %v8552_v6  ;;  %2585 = vmatprep.subr.mxu1 %v8943_v36  ;;  %v8958_v6 = vld [vmem:[#allocation2 + $0x1f8] sm:$0xff]  ;;  %v8962_v36 = vld [vmem:[#allocation2 + $0x1f0] sm:$0xff] }
 0x6bf   :  { %2234 = vmatprep.mubr.f32.mxu1 %v11705_v62  ;;  %2586 = vmatpush1.msra.mxu1 %v8947_v10  ;;  %11963 = vst [vmem:[#allocation68_spill] sm:$0xff] %v8958_v6  ;;  %11964 = vst [vmem:[#allocation69_spill] sm:$0xff] %v8962_v36  ;;  %v8965_v10 = vld [vmem:[#allocation2 + $0x1e8] sm:$0xff] }
 0x6c0   :  { %2587 = vmatprep.subr.mxu1 %v8950_v25  ;;  %11965 = vst [vmem:[#allocation70_spill] sm:$0xff] %v8965_v10  ;;  %v8968_v25 = vld [vmem:[#allocation2 + $0x1e0] sm:$0xff] }
 0x6c1   :  { %2588 = vmatpush1.msra.mxu1 %v8953_v34  ;;  %11966 = vst [vmem:[#allocation71_spill] sm:$0xff] %v8968_v25  ;;  %v11997_v34 = vld [vmem:[#allocation17_spill] sm:$0xff] }
 0x6c2   :  { %5952 = vmatmul.mubr.msk.f32.gmra.mxu1 %vm497_vm0, %v8564_v15  ;;  %2589 = vmatprep.subr.mxu1 %v8958_v6  ;;  %v8973_v15 = vld [vmem:[#allocation2 + $0x1d8] sm:$0xff]  ;;  %v8977_v6 = vld [vmem:[#allocation2 + $0x1d0] sm:$0xff] }
 0x6c3   :  { %2240 = vmatprep.mubr.f32.mxu1 %v11705_v62  ;;  %2590 = vmatpush2.msra.mxu1 %v8962_v36  ;;  %11967 = vst [vmem:[#allocation72_spill] sm:$0xff] %v8973_v15  ;;  %11968 = vst [vmem:[#allocation73_spill] sm:$0xff] %v8977_v6  ;;  %v8980_v36 = vld [vmem:[#allocation2 + $0x1c8] sm:$0xff] }
 0x6c4   :  { %2591 = vmatprep.subr.mxu1 %v8965_v10  ;;  %11969 = vst [vmem:[#allocation74_spill] sm:$0xff] %v8980_v36  ;;  %v8983_v10 = vld [vmem:[#allocation2 + $0x1c0] sm:$0xff] }
 0x6c5   :  { %2592 = vmatpush2.msra.mxu1 %v8968_v25  ;;  %11970 = vst [vmem:[#allocation75_spill] sm:$0xff] %v8983_v10 }
 0x6c6   :  { %5953 = vmatmul.mubr.msk.f32.gmra.mxu1 %vm497_vm0, %v8576_v30  ;;  %2593 = vmatprep.subr.mxu1 %v8973_v15  ;;  %v8988_v30 = vld [vmem:[#allocation2 + $0x1b8] sm:$0xff]  ;;  %v8992_v15 = vld [vmem:[#allocation2 + $0x1b0] sm:$0xff] }
 0x6c7   :  { %2246 = vmatprep.mubr.f32.mxu1 %v11705_v62  ;;  %2594 = vmatpush2.msra.mxu1 %v8977_v6  ;;  %11971 = vst [vmem:[#allocation76_spill] sm:$0xff] %v8988_v30  ;;  %11972 = vst [vmem:[#allocation77_spill] sm:$0xff] %v8992_v15  ;;  %v8995_v6 = vld [vmem:[#allocation2 + $0x1a8] sm:$0xff] }
 0x6c8   :  { %2595 = vmatprep.subr.mxu1 %v8980_v36  ;;  %11973 = vst [vmem:[#allocation78_spill] sm:$0xff] %v8995_v6  ;;  %v8998_v36 = vld [vmem:[#allocation2 + $0x1a0] sm:$0xff] }
 0x6c9   :  { %2596 = vmatpush2.msra.mxu1 %v8983_v10  ;;  %11974 = vst [vmem:[#allocation79_spill] sm:$0xff] %v8998_v36 }
 0x6ca   :  { %5954 = vmatmul.mubr.msk.f32.gmra.mxu1 %vm497_vm0, %v8588_v63  ;;  %2597 = vmatprep.subr.mxu1 %v8988_v30  ;;  %v9003_v63 = vld [vmem:[#allocation2 + $0x198] sm:$0xff]  ;;  %v9006_v30 = vld [vmem:[#allocation2 + $0x190] sm:$0xff] }
 0x6cb   :  { %2252 = vmatprep.mubr.f32.mxu1 %v11705_v62  ;;  %2598 = vmatpush2.msra.mxu1 %v8992_v15  ;;  %11975 = vst [vmem:[#allocation80_spill] sm:$0xff] %v9003_v63  ;;  %11976 = vst [vmem:[#allocation81_spill] sm:$0xff] %v9006_v30  ;;  %v9009_v15 = vld [vmem:[#allocation2 + $0x188] sm:$0xff] }
 0x6cc   :  { %2599 = vmatprep.subr.mxu1 %v8995_v6  ;;  %11977 = vst [vmem:[#allocation82_spill] sm:$0xff] %v9009_v15  ;;  %v9012_v6 = vld [vmem:[#allocation2 + $0x180] sm:$0xff] }
 0x6cd   :  { %2600 = vmatpush2.msra.mxu1 %v8998_v36  ;;  %11978 = vst [vmem:[#allocation83_spill] sm:$0xff] %v9012_v6  ;;  %v9015_v36 = vld [vmem:[#allocation2 + $0x178] sm:$0xff] }
 0x6ce   :  { %5955 = vmatmul.mubr.msk.f32.gmra.mxu1 %vm497_vm0, %v8600_v12  ;;  %2601 = vmatprep.subr.mxu1 %v9003_v63  ;;  %11979 = vst [vmem:[#allocation84_spill] sm:$0xff] %v9015_v36  ;;  %v9018_v12 = vld [vmem:[#allocation2 + $0x170] sm:$0xff]  ;;  %v9021_v63 = vld [vmem:[#allocation2 + $0x168] sm:$0xff] }
 0x6cf   :  { %2602 = vmatpush2.msra.mxu1 %v9006_v30  ;;  %11980 = vst [vmem:[#allocation85_spill] sm:$0xff] %v9018_v12  ;;  %11981 = vst [vmem:[#allocation86_spill] sm:$0xff] %v9021_v63  ;;  %v9024_v30 = vld [vmem:[#allocation2 + $0x160] sm:$0xff] }
 0x6d0   :  { %2603 = vmatprep.subr.mxu1 %v9009_v15  ;;  %11982 = vst [vmem:[#allocation87_spill] sm:$0xff] %v9024_v30  ;;  %v9027_v15 = vld [vmem:[#allocation2 + $0x158] sm:$0xff] }
 0x6d1   :  { %2604 = vmatpush2.msra.mxu1 %v9012_v6  ;;  %11983 = vst [vmem:[#allocation88_spill] sm:$0xff] %v9027_v15  ;;  %v9030_v6 = vld [vmem:[#allocation2 + $0x150] sm:$0xff] }
 0x6d2   :  { %2605 = vmatprep.subr.mxu1 %v9015_v36  ;;  %11984 = vst [vmem:[#allocation89_spill] sm:$0xff] %v9030_v6  ;;  %v9033_v36 = vld [vmem:[#allocation2 + $0x148] sm:$0xff] }
 0x6d3   :  { %2606 = vmatpush2.msra.mxu1 %v9018_v12  ;;  %11985 = vst [vmem:[#allocation90_spill] sm:$0xff] %v9033_v36  ;;  %v9036_v12 = vld [vmem:[#allocation2 + $0x140] sm:$0xff] }
 0x6d4   :  { %2607 = vmatprep.subr.mxu1 %v9021_v63  ;;  %11986 = vst [vmem:[#allocation91_spill] sm:$0xff] %v9036_v12  ;;  %v9039_v63 = vld [vmem:[#allocation2 + $0x138] sm:$0xff] }
 0x6d5   :  { %2608 = vmatpush2.msra.mxu1 %v9024_v30  ;;  %11987 = vst [vmem:[#allocation92_spill] sm:$0xff] %v9039_v63  ;;  %v9042_v30 = vld [vmem:[#allocation2 + $0x130] sm:$0xff] }
 0x6d6   :  { %2609 = vmatprep.subr.mxu1 %v9027_v15  ;;  %11988 = vst [vmem:[#allocation93_spill] sm:$0xff] %v9042_v30  ;;  %v9045_v15 = vld [vmem:[#allocation2 + $0x128] sm:$0xff] }
 0x6d7   :  { %2610 = vmatpush2.msra.mxu1 %v9030_v6  ;;  %11989 = vst [vmem:[#allocation94_spill] sm:$0xff] %v9045_v15  ;;  %v9048_v6 = vld [vmem:[#allocation2 + $0x120] sm:$0xff] }
 0x6d8   :  { %2611 = vmatprep.subr.mxu1 %v9033_v36  ;;  %11990 = vst [vmem:[#allocation95_spill] sm:$0xff] %v9048_v6  ;;  %v9051_v36 = vld [vmem:[#allocation2 + $0x118] sm:$0xff] }
 0x6d9   :  { %2612 = vmatpush2.msra.mxu1 %v9036_v12  ;;  %11991 = vst [vmem:[#allocation96_spill] sm:$0xff] %v9051_v36  ;;  %v9054_v12 = vld [vmem:[#allocation2 + $0x110] sm:$0xff] }
 0x6da   :  { %2613 = vmatprep.subr.mxu1 %v9039_v63  ;;  %11992 = vst [vmem:[#allocation97_spill] sm:$0xff] %v9054_v12  ;;  %v9057_v63 = vld [vmem:[#allocation2 + $0x108] sm:$0xff] }
 0x6db   :  { %2614 = vmatpush2.msra.mxu1 %v9042_v30  ;;  %11993 = vst [vmem:[#allocation98_spill] sm:$0xff] %v9057_v63  ;;  %v9060_v30 = vld [vmem:[#allocation2 + $0x100] sm:$0xff] }
 0x6dc   :  { %2615 = vmatprep.subr.mxu1 %v9045_v15  ;;  %11994 = vst [vmem:[#allocation99_spill] sm:$0xff] %v9060_v30  ;;  %v11995_v15 = vld [vmem:[#allocation28_spill] sm:$0xff] }
 0x6dd   :  { %2616 = vmatpush2.msra.mxu1 %v9048_v6  ;;  %v5942_v6 = vld [vmem:[%s11169_s0 + $0x6] ss:$8 sm:$0x3] }
 0x6de   :  { %2617 = vmatprep.subr.mxu1 %v9051_v36  ;;  %v9067_v10 = vrot.slane %v5942_v6, %v11995_v15  ;;  %v5943_v36 = vld [vmem:[%s11169_s0 + $0x7] ss:$8 sm:$0x3] }
 0x6df   :  { %2618 = vmatpush2.msra.mxu1 %v9054_v12  ;;  %v11996_v12 = vld [vmem:[#allocation31_spill] sm:$0xff]  ;;  %v9078_v40 = vrot.slane %v5943_v36, %v11995_v15 }
 0x6e0   :  { %2619 = vmatprep.subr.mxu1 %v9057_v63  ;;  %v9073_v25 = vrot.slane %v5942_v6, %v11996_v12  ;;  %v1924_v63 = vmul.f32 %v9067_v10, %v11997_v34  ;;  %v9083_v42 = vrot.slane %v5943_v36, %v11996_v12  ;;  %v1926_v6 = vmul.f32 %v9067_v10, %v12000_v54 }
 0x6e1   :  { %2620 = vmatpush2.msra.mxu1 %v9060_v30  ;;  %v1985_v33 = vmul.f32 %v9078_v40, %v11999_v57  ;;  %v1987_v20 = vmul.f32 %v9078_v40, %v12003_v61 }
 0x6e2   :  { %v1925_v30 = vmul.f32 %v9073_v25, %v11997_v34  ;;  %v1948_v18 = vadd.f32 %v1924_v63, %v11998_v52  ;;  %v1927_v35 = vmul.f32 %v9073_v25, %v12000_v54  ;;  %v1986_v48 = vmul.f32 %v9083_v42, %v11999_v57  ;;  %v12001_v34 = vld [vmem:[#allocation11_spill] sm:$0xff] }
 0x6e3   :  { %v1928_v36 = vmul.f32 %v9067_v10, %v12001_v34  ;;  %v1950_v63 = vadd.f32 %v1926_v6, %v12002_v53  ;;  %v1988_v54 = vmul.f32 %v9083_v42, %v12003_v61 }
 0x6e4   :  { %v1949_v15 = vadd.f32 %v1925_v30, %v11998_v52  ;;  %v2009_v12 = vadd.f32 %v1985_v33, %v1948_v18  ;;  %v1951_v24 = vadd.f32 %v1927_v35, %v12002_v53  ;;  %v1929_v30 = vmul.f32 %v9073_v25, %v12001_v34  ;;  %v12005_v33 = vld [vmem:[#allocation21_spill] sm:$0xff] }
 0x6e5   :  { %v1952_v4 = vadd.f32 %v1928_v36, %v12004_v31  ;;  %v1989_v18 = vmul.f32 %v9078_v40, %v12005_v33  ;;  %v2011_v0 = vadd.f32 %v1987_v20, %v1950_v63  ;;  %v1930_v35 = vmul.f32 %v9067_v10, %v12006_v58 }
 0x6e6   :  { %v2010_v57 = vadd.f32 %v1986_v48, %v1949_v15  ;;  %v2012_v59 = vadd.f32 %v1988_v54, %v1951_v24  ;;  %v1953_v61 = vadd.f32 %v1929_v30, %v12004_v31 }
 0x762   :  { %v2188_v32 = vpop.f32.mrf.mxu1 }
 0x763   :  { %v2259_v52 = vadd.f32 %v2188_v32, %v2009_v12  ;;  %v1990_v32 = vmul.f32 %v9083_v42, %v12005_v33  ;;  %v1931_v12 = vmul.f32 %v9073_v25, %v12006_v58 }
 0x764   :  { %v2190_v14 = vpop.f32.mrf.mxu1 }
 0x765   :  { %v5956_v6 = vmul.f32 -1.442695, %v2259_v52  ;;  %v2260_v9 = vadd.f32 %v2190_v14, %v2010_v57  ;;  %v2013_v52 = vadd.f32 %v1989_v18, %v1952_v4  ;;  %v12007_v14 = vld [vmem:[#allocation14_spill] sm:$0xff]  ;;  %v12008_v57 = vld [vmem:[#allocation15_spill] sm:$0xff]  ;;  %v12010_v4 = vld [vmem:[#allocation37_spill] sm:$0xff] }
 0x766   :  { %v2194_v53 = vpop.f32.mrf.mxu1  ;;  %v1991_v20 = vmul.f32 %v9078_v40, %v12007_v14  ;;  %v1932_v63 = vmul.f32 %v9067_v10, %v12008_v57  ;;  %v1933_v24 = vmul.f32 %v9073_v25, %v12008_v57  ;;  %v1992_v33 = vmul.f32 %v9083_v42, %v12007_v14  ;;  %v12011_v57 = vld [vmem:[#allocation34_spill] sm:$0xff] }
 0x767   :  { %6431 = vpow2.f32 %v5956_v6  ;;  %v5957_v48 = vmul.f32 -1.442695, %v2260_v9  ;;  %v2261_v15 = vadd.f32 %v2194_v53, %v2011_v0  ;;  %v12009_v6 = vld [vmem:[#allocation32_spill] sm:$0xff]  ;;  %v2014_v53 = vadd.f32 %v1990_v32, %v1953_v61 }
 0x768   :  { %v2196_v36 = vpop.f32.mrf.mxu1  ;;  %v1954_v9 = vadd.f32 %v1930_v35, %v12009_v6  ;;  %v1934_v18 = vmul.f32 %v9067_v10, %v12010_v4  ;;  %v1955_v34 = vadd.f32 %v1931_v12, %v12009_v6  ;;  %v1957_v35 = vadd.f32 %v1933_v24, %v12011_v57 }
 0x769   :  { %6433 = vpow2.f32 %v5957_v48  ;;  %v5958_v54 = vmul.f32 -1.442695, %v2261_v15  ;;  %v2262_v30 = vadd.f32 %v2196_v36, %v2012_v59  ;;  %v1956_v48 = vadd.f32 %v1932_v63, %v12011_v57  ;;  %v12012_v15 = vld [vmem:[#allocation16_spill] sm:$0xff] }
 0x76a   :  { %v2200_v0 = vpop.f32.mrf.mxu1  ;;  %v1993_v59 = vmul.f32 %v9078_v40, %v12012_v15  ;;  %v1994_v61 = vmul.f32 %v9083_v42, %v12012_v15  ;;  %v2015_v14 = vadd.f32 %v1991_v20, %v1954_v9  ;;  %v1995_v12 = vmul.f32 %v9078_v40, %v11926_v41 }
 0x76b   :  { %6435 = vpow2.f32 %v5958_v54  ;;  %v5959_v31 = vmul.f32 -1.442695, %v2262_v30  ;;  %v2263_v58 = vadd.f32 %v2200_v0, %v2013_v52  ;;  %v1958_v52 = vadd.f32 %v1934_v18, %v11925_v60 }
 0x76c   :  { %v2202_v1 = vpop.f32.mrf.mxu1  ;;  %v1935_v63 = vmul.f32 %v9073_v25, %v12010_v4  ;;  %v1936_v30 = vmul.f32 %v9067_v10, %v11927_v23  ;;  %v2016_v15 = vadd.f32 %v1992_v33, %v1955_v34  ;;  %v1937_v20 = vmul.f32 %v9073_v25, %v11927_v23  ;;  %v12013_v34 = vld [vmem:[#allocation22_spill] sm:$0xff] }
 0x76d   :  { %6437 = vpow2.f32 %v5959_v31  ;;  %v5960_v32 = vmul.f32 -1.442695, %v2263_v58  ;;  %v2264_v36 = vadd.f32 %v2202_v1, %v2014_v53  ;;  %v2017_v58 = vadd.f32 %v1993_v59, %v1956_v48  ;;  %v12014_v48 = vld [vmem:[#allocation23_spill] sm:$0xff] }
 0x76e   :  { %v2206_v54 = vpop.f32.mrf.mxu1  ;;  %v2018_v1 = vadd.f32 %v1994_v61, %v1957_v35  ;;  %v1938_v9 = vmul.f32 %v9067_v10, %v11837_v55  ;;  %v1996_v57 = vmul.f32 %v9083_v42, %v11926_v41  ;;  %v1960_v33 = vadd.f32 %v1936_v30, %v12013_v34 }
 0x76f   :  { %6439 = vpow2.f32 %v5960_v32  ;;  %v5961_v24 = vmul.f32 -1.442695, %v2264_v36  ;;  %v2265_v0 = vadd.f32 %v2206_v54, %v2015_v14  ;;  %v2019_v32 = vadd.f32 %v1995_v12, %v1958_v52  ;;  %v12015_v52 = vld [vmem:[#allocation25_spill] sm:$0xff] }
 0x770   :  { %v2208_v31 = vpop.f32.mrf.mxu1  ;;  %v1959_v14 = vadd.f32 %v1935_v63, %v11925_v60  ;;  %v1997_v59 = vmul.f32 %v9078_v40, %v12014_v48  ;;  %v1998_v36 = vmul.f32 %v9083_v42, %v12014_v48  ;;  %v1999_v12 = vmul.f32 %v9078_v40, %v12015_v52 }
 0x771   :  { %6441 = vpow2.f32 %v5961_v24  ;;  %v5962_v53 = vmul.f32 -1.442695, %v2265_v0  ;;  %v2266_v18 = vadd.f32 %v2208_v31, %v2016_v15  ;;  %v1961_v24 = vadd.f32 %v1937_v20, %v12013_v34 }
 0x772   :  { %v2212_v4 = vpop.f32.mrf.mxu1  ;;  %v1962_v0 = vadd.f32 %v1938_v9, %v11838_v38  ;;  %v1939_v63 = vmul.f32 %v9073_v25, %v11837_v55  ;;  %v2021_v48 = vadd.f32 %v1997_v59, %v1960_v33  ;;  %v2000_v23 = vmul.f32 %v9083_v42, %v12015_v52 }
 0x773   :  { %6443 = vpow2.f32 %v5962_v53  ;;  %v5963_v35 = vmul.f32 -1.442695, %v2266_v18  ;;  %v2315_v61 = vadd.f32 %v2212_v4, %v2017_v58  ;;  %v2020_v18 = vadd.f32 %v1996_v57, %v1959_v14 }
 0x774   :  { %v6432_v54 = vpop.eup %6431  ;;  %v2214_v15 = vpop.f32.mrf.mxu1  ;;  %v1940_v20 = vmul.f32 %v9067_v10, %v7836_v50 }
 0x775   :  { %v2291_v30 = vadd.f32 1.0, %v6432_v54  ;;  %6445 = vpow2.f32 %v5963_v35  ;;  %v5964_v31 = vmul.f32 -1.442695, %v2315_v61  ;;  %v2316_v53 = vadd.f32 %v2214_v15, %v2018_v1 }
 0x776   :  { %v6434_v4 = vpop.eup %6433  ;;  %v2218_v58 = vpop.f32.mrf.mxu1  ;;  %v2022_v35 = vadd.f32 %v1998_v36, %v1961_v24  ;;  %v2023_v61 = vadd.f32 %v1999_v12, %v1962_v0  ;;  %v1963_v1 = vadd.f32 %v1939_v63, %v11838_v38  ;;  %v1964_v52 = vadd.f32 %v1940_v20, %v7886_v22  ;;  %v12016_v63 = vld [vmem:[#allocation42_spill] sm:$0xff] }
 0x777   :  { %6447 = vrcp.f32 %v2291_v30  ;;  %v2292_v9 = vadd.f32 1.0, %v6434_v4  ;;  %v5965_v34 = vmul.f32 -1.442695, %v2316_v53  ;;  %v2317_v41 = vadd.f32 %v2218_v58, %v2019_v32 }
 0x778   :  { %v6436_v60 = vpop.eup %6435  ;;  %6449 = vpow2.f32 %v5964_v31  ;;  %v2220_v54 = vpop.f32.mrf.mxu1  ;;  %v2001_v30 = vmul.f32 %v9078_v40, %v7857_v2  ;;  %v1941_v32 = vmul.f32 %v9073_v25, %v7836_v50  ;;  %v1942_v31 = vmul.f32 %v9067_v10, %v12016_v63 }
 0x779   :  { %6451 = vrcp.f32 %v2292_v9  ;;  %v2293_v57 = vadd.f32 1.0, %v6436_v60  ;;  %v5966_v14 = vmul.f32 -1.442695, %v2317_v41  ;;  %v2318_v33 = vadd.f32 %v2220_v54, %v2020_v18 }
 0x77a   :  { %v6438_v59 = vpop.eup %6437  ;;  %6453 = vpow2.f32 %v5965_v34  ;;  %v2224_v15 = vpop.f32.mrf.mxu1  ;;  %v2024_v41 = vadd.f32 %v2000_v23, %v1963_v1  ;;  %v2002_v34 = vmul.f32 %v9083_v42, %v7857_v2  ;;  %v2025_v9 = vadd.f32 %v2001_v30, %v1964_v52 }
 0x77b   :  { %6455 = vrcp.f32 %v2293_v57  ;;  %v2294_v36 = vadd.f32 1.0, %v6438_v59  ;;  %v5967_v24 = vmul.f32 -1.442695, %v2318_v33  ;;  %v2319_v0 = vadd.f32 %v2224_v15, %v2021_v48  ;;  %v12017_v59 = vld [vmem:[#allocation36_spill] sm:$0xff] }
 0x77c   :  { %v6440_v12 = vpop.eup %6439  ;;  %6457 = vpow2.f32 %v5966_v14  ;;  %v2226_v60 = vpop.f32.mrf.mxu1  ;;  %v1965_v48 = vadd.f32 %v1941_v32, %v7886_v22  ;;  %v1943_v54 = vmul.f32 %v9073_v25, %v12016_v63  ;;  %v1966_v15 = vadd.f32 %v1942_v31, %v12017_v59 }
 0x77d   :  { %6459 = vrcp.f32 %v2294_v36  ;;  %v2295_v53 = vadd.f32 1.0, %v6440_v12  ;;  %v5968_v4 = vmul.f32 -1.442695, %v2319_v0  ;;  %v2320_v58 = vadd.f32 %v2226_v60, %v2022_v35  ;;  %v12018_v36 = vld [vmem:[#allocation38_spill] sm:$0xff] }
 0x77e   :  { %v6442_v18 = vpop.eup %6441  ;;  %6461 = vpow2.f32 %v5967_v24  ;;  %v2230_v20 = vpop.f32.mrf.mxu1  ;;  %v2003_v35 = vmul.f32 %v9078_v40, %v12018_v36  ;;  %v12019_v24 = vld [vmem:[#allocation40_spill] sm:$0xff] }
 0x77f   :  { %6463 = vrcp.f32 %v2295_v53  ;;  %v2296_v23 = vadd.f32 1.0, %v6442_v18  ;;  %v5969_v1 = vmul.f32 -1.442695, %v2320_v58  ;;  %v2321_v57 = vadd.f32 %v2230_v20, %v2023_v61 }
 0x780   :  { %v6444_v14 = vpop.eup %6443  ;;  %6465 = vpow2.f32 %v5968_v4  ;;  %v2232_v33 = vpop.f32.mrf.mxu1  ;;  %v1944_v52 = vmul.f32 %v9067_v10, %v12019_v24  ;;  %v1967_v61 = vadd.f32 %v1943_v54, %v12017_v59  ;;  %v2004_v53 = vmul.f32 %v9083_v42, %v12018_v36 }
 0x781   :  { %6467 = vrcp.f32 %v2296_v23  ;;  %v2297_v30 = vadd.f32 1.0, %v6444_v14  ;;  %v5970_v32 = vmul.f32 -1.442695, %v2321_v57  ;;  %v2322_v0 = vadd.f32 %v2232_v33, %v2024_v41  ;;  %v12020_v57 = vld [vmem:[#allocation43_spill] sm:$0xff] }
 0x782   :  { %v6446_v12 = vpop.eup %6445  ;;  %6469 = vpow2.f32 %v5969_v1  ;;  %v2236_v60 = vpop.f32.mrf.mxu1  ;;  %v1945_v31 = vmul.f32 %v9073_v25, %v12019_v24  ;;  %v2026_v23 = vadd.f32 %v2002_v34, %v1965_v48  ;;  %v1968_v1 = vadd.f32 %v1944_v52, %v7956_v26 }
 0x783   :  { %6471 = vrcp.f32 %v2297_v30  ;;  %v2298_v4 = vadd.f32 1.0, %v6446_v12  ;;  %v5971_v58 = vmul.f32 -1.442695, %v2322_v0  ;;  %v2371_v18 = vadd.f32 %v2236_v60, %v7876_v16 }
 0x784   :  { %v6448_v20 = vpop.eup %6447  ;;  %6473 = vpow2.f32 %v5970_v32  ;;  %v2238_v41 = vpop.f32.mrf.mxu1  ;;  %v2005_v54 = vmul.f32 %v9078_v40, %v12020_v57  ;;  %v2027_v24 = vadd.f32 %v2003_v35, %v1966_v15  ;;  %v1969_v60 = vadd.f32 %v1945_v31, %v7956_v26 }
 0x785   :  { %v6450_v14 = vpop.eup %6449  ;;  %6475 = vrcp.f32 %v2298_v4  ;;  %v2379_v33 = vmul.f32 %v6448_v20, %v2371_v18  ;;  %v2372_v36 = vadd.f32 %v2238_v41, %v7876_v16  ;;  %v2006_v34 = vmul.f32 %v9083_v42, %v12020_v57 }
 0x786   :  { %v6452_v30 = vpop.eup %6451  ;;  %v2347_v12 = vadd.f32 1.0, %v6450_v14  ;;  %6477 = vpow2.f32 %v5971_v58  ;;  %v2242_v0 = vpop.f32.mrf.mxu1  ;;  %v2028_v63 = vadd.f32 %v2004_v53, %v1967_v61  ;;  %v2029_v15 = vadd.f32 %v2005_v54, %v1968_v1 }
 0x787   :  { %v6454_v48 = vpop.eup %6453  ;;  %v2387_v52 = vadd.f32 %v2379_v33, %v2025_v9  ;;  %v2380_v32 = vmul.f32 %v6452_v30, %v2372_v36  ;;  %v2373_v59 = vadd.f32 %v2242_v0, %v7972_v37  ;;  %v1946_v35 = vmul.f32 %v9067_v10, %v7990_v45 }
 0x788   :  { %v6456_v4 = vpop.eup %6455  ;;  %6479 = vrcp.f32 %v2347_v12  ;;  %v2348_v18 = vadd.f32 1.0, %v6454_v48  ;;  %v2244_v20 = vpop.f32.mrf.mxu1  ;;  %v2030_v33 = vadd.f32 %v2006_v34, %v1969_v60  ;;  %v1947_v61 = vmul.f32 %v9073_v25, %v7990_v45 }
 0x789   :  { %v6458_v58 = vpop.eup %6457  ;;  %6481 = vtanh.f32 %v2387_v52  ;;  %v2388_v31 = vadd.f32 %v2380_v32, %v2026_v23  ;;  %v2381_v41 = vmul.f32 %v6456_v4, %v2373_v59  ;;  %v2374_v14 = vadd.f32 %v2244_v20, %v7972_v37 }
 0x78a   :  { %v6460_v26 = vpop.eup %6459  ;;  %6483 = vrcp.f32 %v2348_v18  ;;  %v2349_v9 = vadd.f32 1.0, %v6458_v58  ;;  %v2248_v36 = vpop.f32.mrf.mxu1  ;;  %v1970_v12 = vadd.f32 %v1946_v35, %v8011_v21  ;;  %v2007_v0 = vmul.f32 %v9078_v40, %v8006_v5 }
 0x78b   :  { %v6462_v53 = vpop.eup %6461  ;;  %6485 = vtanh.f32 %v2388_v31  ;;  %v2389_v1 = vadd.f32 %v2381_v41, %v2027_v24  ;;  %v2382_v54 = vmul.f32 %v6460_v26, %v2374_v14  ;;  %v2375_v10 = vadd.f32 %v2248_v36, %v7974_v19 }
 0x78c   :  { %v6464_v30 = vpop.eup %6463  ;;  %6487 = vrcp.f32 %v2349_v9  ;;  %v2350_v23 = vadd.f32 1.0, %v6462_v53  ;;  %v2250_v59 = vpop.f32.mrf.mxu1  ;;  %v1971_v32 = vadd.f32 %v1947_v61, %v8011_v21  ;;  %v2008_v4 = vmul.f32 %v9083_v42, %v8006_v5 }
 0x78d   :  { %v6466_v48 = vpop.eup %6465  ;;  %6489 = vtanh.f32 %v2389_v1  ;;  %v2390_v60 = vadd.f32 %v2382_v54, %v2028_v63  ;;  %v2383_v34 = vmul.f32 %v6464_v30, %v2375_v10  ;;  %v2376_v25 = vadd.f32 %v2250_v59, %v7974_v19 }
 0x78e   :  { %v6468_v52 = vpop.eup %6467  ;;  %6491 = vrcp.f32 %v2350_v23  ;;  %v2351_v26 = vadd.f32 1.0, %v6466_v48  ;;  %v2254_v24 = vpop.f32.mrf.mxu1  ;;  %v2031_v31 = vadd.f32 %v2007_v0, %v1970_v12  ;;  %v2032_v54 = vadd.f32 %v2008_v4, %v1971_v32 }
 0x78f   :  { %v6470_v18 = vpop.eup %6469  ;;  %6493 = vtanh.f32 %v2390_v60  ;;  %v2391_v20 = vadd.f32 %v2383_v34, %v2029_v15  ;;  %v2384_v35 = vmul.f32 %v6468_v52, %v2376_v25  ;;  %v2377_v40 = vadd.f32 %v2254_v24, %v8020_v3 }
 0x790   :  { %v6472_v58 = vpop.eup %6471  ;;  %6495 = vrcp.f32 %v2351_v26  ;;  %v2352_v63 = vadd.f32 1.0, %v6470_v18  ;;  %v2256_v41 = vpop.f32.mrf.mxu1 }
 0x791   :  { %v6474_v14 = vpop.eup %6473  ;;  %6497 = vtanh.f32 %v2391_v20  ;;  %v2392_v9 = vadd.f32 %v2384_v35, %v2030_v33  ;;  %v2385_v36 = vmul.f32 %v6472_v58, %v2377_v40  ;;  %v2378_v61 = vadd.f32 %v2256_v41, %v8020_v3 }
 0x792   :  { %v6476_v53 = vpop.eup %6475  ;;  %6499 = vrcp.f32 %v2352_v63  ;;  %v2353_v42 = vadd.f32 1.0, %v6474_v14 }
 0x793   :  { %v6478_v1 = vpop.eup %6477  ;;  %6501 = vtanh.f32 %v2392_v9  ;;  %v2393_v15 = vadd.f32 %v2385_v36, %v2031_v31  ;;  %v2386_v10 = vmul.f32 %v6476_v53, %v2378_v61 }
 0x794   :  { %6503 = vrcp.f32 %v2353_v42  ;;  %v2354_v30 = vadd.f32 1.0, %v6478_v1 }
 0x795   :  { %v6480_v23 = vpop.eup %6479  ;;  %6505 = vtanh.f32 %v2393_v15  ;;  %v2394_v59 = vadd.f32 %v2386_v10, %v2032_v54 }
 0x796   :  { %v6482_v12 = vpop.eup %6481  ;;  %6507 = vrcp.f32 %v2354_v30  ;;  %v2403_v0 = vsub.f32 1.0, %v6480_v23  ;;  %v2419_v18 = vmul.f32 %v6480_v23, %v8779_v46 }
 0x797   :  { %v6484_v33 = vpop.eup %6483  ;;  %6509 = vtanh.f32 %v2394_v59 }
 0x798   :  { %v6486_v48 = vpop.eup %6485  ;;  %v2404_v60 = vsub.f32 1.0, %v6484_v33  ;;  %v2411_v25 = vmul.f32 %v6482_v12, %v2403_v0  ;;  %v2420_v24 = vmul.f32 %v6484_v33, %v8781_v13 }
 0x799   :  { %v6488_v34 = vpop.eup %6487 }
 0x79a   :  { %v6490_v52 = vpop.eup %6489  ;;  %v2412_v26 = vmul.f32 %v6486_v48, %v2404_v60  ;;  %v2405_v32 = vsub.f32 1.0, %v6488_v34  ;;  %v2427_v63 = vadd.f32 %v2419_v18, %v2411_v25  ;;  %v2421_v13 = vmul.f32 %v6488_v34, %v8783_v8 }
 0x79b   :  { %v6492_v4 = vpop.eup %6491 }
 0x79c   :  { %v6494_v20 = vpop.eup %6493  ;;  %v2428_v35 = vadd.f32 %v2420_v24, %v2412_v26  ;;  %v2406_v40 = vsub.f32 1.0, %v6492_v4  ;;  %v2413_v31 = vmul.f32 %v6490_v52, %v2405_v32  ;;  %v2422_v9 = vmul.f32 %v6492_v4, %v8785_v44 }
 0x79d   :  { %v6496_v58 = vpop.eup %6495 }
 0x79e   :  { %v6498_v41 = vpop.eup %6497  ;;  %2621 = vmatprep.mubr.f32.mxu1 %v2428_v35  ;;  %v2414_v14 = vmul.f32 %v6494_v20, %v2406_v40  ;;  %v2407_v36 = vsub.f32 1.0, %v6496_v58  ;;  %v2429_v15 = vadd.f32 %v2421_v13, %v2413_v31  ;;  %v2423_v44 = vmul.f32 %v6496_v58, %v8787_v7  ;;  %v9244_v35 = vld [vmem:[#allocation2 + $0xf8] sm:$0xff]  ;;  %v12022_v40 = vld [vmem:[#allocation44_spill] sm:$0xff]  ;;  %v12038_v13 = vld [vmem:[#allocation57_spill] sm:$0xff] }
 0x79f   :  { %v6500_v61 = vpop.eup %6499  ;;  %2622 = vmatmul.mubr.f32.vlgmr.msra.gmra.mxu1 %v2427_v63  ;;  %v12030_v58 = vld [vmem:[#allocation104_spill] sm:$0xff]  ;;  %v12031_v63 = vld [vmem:[#allocation51_spill] sm:$0xff] }
 0x7a0   :  { %v6502_v53 = vpop.eup %6501  ;;  %v2430_v42 = vadd.f32 %v2422_v9, %v2414_v14  ;;  %v2408_v1 = vsub.f32 1.0, %v6500_v61  ;;  %v2415_v54 = vmul.f32 %v6498_v41, %v2407_v36  ;;  %v2424_v23 = vmul.f32 %v6500_v61, %v8789_v27  ;;  %v12032_v31 = vld [vmem:[#allocation52_spill] sm:$0xff]  ;;  %v12033_v41 = vld [vmem:[#allocation53_spill] sm:$0xff]  ;;  %v12034_v14 = vld [vmem:[#allocation54_spill] sm:$0xff] }
 0x7a1   :  { %v6504_v46 = vpop.eup %6503  ;;  %v12035_v9 = vld [vmem:[#allocation105_spill] sm:$0xff]  ;;  %v12036_v36 = vld [vmem:[#allocation55_spill] sm:$0xff]  ;;  %v12037_v61 = vld [vmem:[#allocation56_spill] sm:$0xff] }
 0x7a2   :  { %v6506_v10 = vpop.eup %6505  ;;  %2627 = vmatprep.mubr.f32.mxu1 %v2430_v42  ;;  %v2416_v30 = vmul.f32 %v6502_v53, %v2408_v1  ;;  %v2409_v59 = vsub.f32 1.0, %v6504_v46  ;;  %v2431_v8 = vadd.f32 %v2423_v44, %v2415_v54  ;;  %v2425_v52 = vmul.f32 %v6504_v46, %v8791_v17  ;;  %v12039_v53 = vld [vmem:[#allocation58_spill] sm:$0xff]  ;;  %v12041_v1 = vld [vmem:[#allocation59_spill] sm:$0xff]  ;;  %v12042_v46 = vld [vmem:[#allocation60_spill] sm:$0xff] }
 0x7a3   :  { %v6508_v12 = vpop.eup %6507  ;;  %2628 = vmatmul.mubr.f32.gmra.mxu1 %v2429_v15  ;;  %v12040_v42 = vld [vmem:[#allocation106_spill] sm:$0xff]  ;;  %v12043_v15 = vld [vmem:[#allocation61_spill] sm:$0xff] }
 0x7a4   :  { %v6510_v0 = vpop.eup %6509  ;;  %v2432_v33 = vadd.f32 %v2424_v23, %v2416_v30  ;;  %v2410_v48 = vsub.f32 1.0, %v6508_v12  ;;  %v2417_v60 = vmul.f32 %v6506_v10, %v2409_v59  ;;  %v2426_v25 = vmul.f32 %v6508_v12, %v8793_v11  ;;  %v12044_v54 = vld [vmem:[#allocation62_spill] sm:$0xff]  ;;  %v12045_v10 = vld [vmem:[#allocation107_spill] sm:$0xff]  ;;  %v12047_v59 = vld [vmem:[#allocation64_spill] sm:$0xff] }
 0x7a5   :  { %v12046_v30 = vld [vmem:[#allocation63_spill] sm:$0xff]  ;;  %v9296_v23 = vld [vmem:[%s11172_s3 + $0x38] sm:$0xff]  ;;  %v12048_v12 = vld [vmem:[#allocation65_spill] sm:$0xff] }
 0x7a6   :  { %2633 = vmatprep.mubr.f32.mxu1 %v2432_v33  ;;  %v2418_v34 = vmul.f32 %v6510_v0, %v2410_v48  ;;  %v2433_v24 = vadd.f32 %v2425_v52, %v2417_v60  ;;  %v12049_v44 = vld [vmem:[#allocation66_spill] sm:$0xff]  ;;  %v12050_v0 = vld [vmem:[#allocation67_spill] sm:$0xff]  ;;  %v12051_v48 = vld [vmem:[#allocation68_spill] sm:$0xff] }
 0x7a7   :  { %2634 = vmatmul.mubr.f32.gmra.mxu1 %v2431_v8  ;;  %v9308_v33 = vld [vmem:[%s11172_s3 + $0x40] sm:$0xff]  ;;  %v12052_v8 = vld [vmem:[#allocation69_spill] sm:$0xff]  ;;  %v12053_v60 = vld [vmem:[#allocation70_spill] sm:$0xff] }
 0x7a8   :  { %v2434_v26 = vadd.f32 %v2426_v25, %v2418_v34  ;;  %v12054_v34 = vld [vmem:[#allocation71_spill] sm:$0xff]  ;;  %v9320_v25 = vld [vmem:[%s11172_s3 + $0x48] sm:$0xff] }
 0x7a9   :  { %v12055_v52 = vld [vmem:[#allocation72_spill] sm:$0xff] }
 0x7aa   :  { %2639 = vmatprep.mubr.f32.mxu1 %v2434_v26  ;;  %v12056_v26 = vld [vmem:[#allocation73_spill] sm:$0xff] }
 0x7ab   :  { %2640 = vmatmul.mubr.f32.gmra.mxu1 %v2433_v24  ;;  %v12057_v24 = vld [vmem:[#allocation74_spill] sm:$0xff] }
 0x7ac   :  { %3234 = vmatprep.mubr.f32.mxu1 %v11705_v62 }
 0x85f   :  { %v9218_v27 = vpop.f32.mrf.mxu1 }
 0x861   :  { %v9220_v7 = vpop.f32.mrf.mxu1 }
 0x863   :  { %v9222_v32 = vpop.f32.mrf.mxu1 }
 0x865   :  { %v9224_v4 = vpop.f32.mrf.mxu1 }
 0x867   :  { %v9226_v18 = vpop.f32.mrf.mxu1 }
 0x869   :  { %v9228_v11 = vpop.f32.mrf.mxu1 }
 0x86b   :  { %v9230_v20 = vpop.f32.mrf.mxu1 }
 0x86d   :  { %v9232_v17 = vpop.f32.mrf.mxu1 }
 0x86e   :  { %2670 = vmatprep.subr.mxu0 %v9232_v17 }
 0x86f   :  { %2671 = vmatpush1.msra.mxu0 %v9230_v20 }
 0x870   :  { %2672 = vmatprep.subr.mxu0 %v9228_v11 }
 0x871   :  { %2673 = vmatpush1.msra.mxu0 %v9226_v18 }
 0x872   :  { %2674 = vmatprep.subr.mxu0 %v9224_v4 }
 0x873   :  { %2675 = vmatpush1.msra.mxu0 %v9222_v32 }
 0x874   :  { %2676 = vmatprep.subr.mxu0 %v9220_v7 }
 0x875   :  { %2677 = vmatpush1.msra.mxu0 %v9218_v27 }
 0x876   :  { %5974 = vmatmul.mubr.msk.f32.vlgmr.msra.gmra.mxu0 %vm497_vm0, %v8806_v51  ;;  %3081 = vmatprep.subr.mxu0 %v9244_v35  ;;  %v12021_v51 = vld [vmem:[#allocation27_spill] sm:$0xff] }
 0x877   :  { %2716 = vmatprep.mubr.f32.mxu0 %v11705_v62  ;;  %3082 = vmatpush1.msra.mxu0 %v8812_v29  ;;  %v12023_v29 = vld [vmem:[#allocation45_spill] sm:$0xff] }
 0x878   :  { %3083 = vmatprep.subr.mxu0 %v8815_v28  ;;  %v12024_v28 = vld [vmem:[#allocation46_spill] sm:$0xff] }
 0x879   :  { %3084 = vmatpush1.msra.mxu0 %v8818_v56  ;;  %v12025_v56 = vld [vmem:[#allocation103_spill] sm:$0xff] }
 0x87a   :  { %5975 = vmatmul.mubr.msk.f32.gmra.mxu0 %vm497_vm0, %v8824_v49  ;;  %3085 = vmatprep.subr.mxu0 %v8828_v39  ;;  %v12026_v49 = vld [vmem:[#allocation47_spill] sm:$0xff]  ;;  %v12027_v39 = vld [vmem:[#allocation48_spill] sm:$0xff] }
 0x87b   :  { %2722 = vmatprep.mubr.f32.mxu0 %v11705_v62  ;;  %3086 = vmatpush1.msra.mxu0 %v8832_v43  ;;  %v12028_v43 = vld [vmem:[#allocation49_spill] sm:$0xff] }
 0x87c   :  { %3087 = vmatprep.subr.mxu0 %v8835_v47  ;;  %v12029_v47 = vld [vmem:[#allocation50_spill] sm:$0xff] }
 0x87d   :  { %3088 = vmatpush1.msra.mxu0 %v12021_v51  ;;  %v12058_v51 = vld [vmem:[#allocation75_spill] sm:$0xff] }
 0x87e   :  { %5976 = vmatmul.mubr.msk.f32.gmra.mxu0 %vm497_vm0, %v12022_v40  ;;  %3089 = vmatprep.subr.mxu0 %v12023_v29  ;;  %v9332_v40 = vld [vmem:[%s11172_s3 + $0x50] sm:$0xff]  ;;  %v12059_v29 = vld [vmem:[#allocation76_spill] sm:$0xff] }
 0x87f   :  { %2728 = vmatprep.mubr.f32.mxu0 %v11705_v62  ;;  %3090 = vmatpush1.msra.mxu0 %v12024_v28  ;;  %v12060_v28 = vld [vmem:[#allocation77_spill] sm:$0xff] }
 0x880   :  { %3091 = vmatprep.subr.mxu0 %v12025_v56  ;;  %v12061_v56 = vld [vmem:[#allocation78_spill] sm:$0xff] }
 0x881   :  { %3092 = vmatpush1.msra.mxu0 %v12026_v49  ;;  %v12062_v49 = vld [vmem:[#allocation79_spill] sm:$0xff] }
 0x882   :  { %5977 = vmatmul.mubr.msk.f32.gmra.mxu0 %vm497_vm0, %v12027_v39  ;;  %3093 = vmatprep.subr.mxu0 %v12028_v43  ;;  %v9344_v39 = vld [vmem:[%s11172_s3 + $0x58] sm:$0xff]  ;;  %v12063_v43 = vld [vmem:[#allocation80_spill] sm:$0xff] }
 0x883   :  { %2734 = vmatprep.mubr.f32.mxu0 %v11705_v62  ;;  %3094 = vmatpush1.msra.mxu0 %v12029_v47  ;;  %v12064_v47 = vld [vmem:[#allocation81_spill] sm:$0xff] }
 0x884   :  { %3095 = vmatprep.subr.mxu0 %v12030_v58  ;;  %v12065_v58 = vld [vmem:[#allocation82_spill] sm:$0xff] }
 0x885   :  { %3096 = vmatpush1.msra.mxu0 %v12031_v63  ;;  %v12066_v63 = vld [vmem:[#allocation83_spill] sm:$0xff] }
 0x886   :  { %5978 = vmatmul.mubr.msk.f32.gmra.mxu0 %vm497_vm0, %v12032_v31  ;;  %3097 = vmatprep.subr.mxu0 %v12033_v41  ;;  %v12067_v31 = vld [vmem:[#allocation84_spill] sm:$0xff]  ;;  %v12068_v41 = vld [vmem:[#allocation85_spill] sm:$0xff] }
 0x887   :  { %2740 = vmatprep.mubr.f32.mxu0 %v11705_v62  ;;  %3098 = vmatpush1.msra.mxu0 %v12034_v14  ;;  %v12069_v14 = vld [vmem:[#allocation86_spill] sm:$0xff] }
 0x888   :  { %3099 = vmatprep.subr.mxu0 %v12035_v9  ;;  %v12070_v9 = vld [vmem:[#allocation87_spill] sm:$0xff] }
 0x889   :  { %3100 = vmatpush1.msra.mxu0 %v12036_v36  ;;  %v12071_v36 = vld [vmem:[#allocation88_spill] sm:$0xff] }
 0x88a   :  { %5979 = vmatmul.mubr.msk.f32.gmra.mxu0 %vm497_vm0, %v12037_v61  ;;  %3101 = vmatprep.subr.mxu0 %v12038_v13  ;;  %v12072_v61 = vld [vmem:[#allocation89_spill] sm:$0xff]  ;;  %v12073_v13 = vld [vmem:[#allocation90_spill] sm:$0xff] }
 0x88b   :  { %2746 = vmatprep.mubr.f32.mxu0 %v11705_v62  ;;  %3102 = vmatpush1.msra.mxu0 %v12039_v53  ;;  %v12074_v53 = vld [vmem:[#allocation91_spill] sm:$0xff] }
 0x88c   :  { %3103 = vmatprep.subr.mxu0 %v12040_v42  ;;  %v12075_v42 = vld [vmem:[#allocation92_spill] sm:$0xff] }
 0x88d   :  { %3104 = vmatpush1.msra.mxu0 %v12041_v1  ;;  %v12076_v1 = vld [vmem:[#allocation93_spill] sm:$0xff] }
 0x88e   :  { %5980 = vmatmul.mubr.msk.f32.gmra.mxu0 %vm497_vm0, %v12042_v46  ;;  %3105 = vmatprep.subr.mxu0 %v12043_v15  ;;  %v12077_v46 = vld [vmem:[#allocation94_spill] sm:$0xff]  ;;  %v12078_v15 = vld [vmem:[#allocation95_spill] sm:$0xff] }
 0x88f   :  { %2752 = vmatprep.mubr.f32.mxu0 %v11705_v62  ;;  %3106 = vmatpush1.msra.mxu0 %v12044_v54  ;;  %v12079_v54 = vld [vmem:[#allocation96_spill] sm:$0xff] }
 0x890   :  { %3107 = vmatprep.subr.mxu0 %v12045_v10  ;;  %v12080_v10 = vld [vmem:[#allocation97_spill] sm:$0xff] }
 0x891   :  { %3108 = vmatpush1.msra.mxu0 %v12046_v30  ;;  %v12081_v30 = vld [vmem:[#allocation98_spill] sm:$0xff] }
 0x892   :  { %5981 = vmatmul.mubr.msk.f32.gmra.mxu0 %vm497_vm0, %v9296_v23  ;;  %3109 = vmatprep.subr.mxu0 %v12047_v59  ;;  %v12082_v59 = vld [vmem:[#allocation99_spill] sm:$0xff] }
 0x893   :  { %2758 = vmatprep.mubr.f32.mxu0 %v11705_v62  ;;  %3110 = vmatpush1.msra.mxu0 %v12048_v12  ;;  %v5972_v12 = vld [vmem:[%s11169_s0 + $0x10] ss:$8 sm:$0x3] }
 0x894   :  { %3111 = vmatprep.subr.mxu0 %v12049_v44  ;;  %v12083_v44 = vld [vmem:[#allocation28_spill] sm:$0xff] }
 0x895   :  { %3112 = vmatpush1.msra.mxu0 %v12050_v0  ;;  %v9372_v0 = vrot.slane %v5972_v12, %v12083_v44 }
 0x896   :  { %5982 = vmatmul.mubr.msk.f32.gmra.mxu0 %vm497_vm0, %v9308_v33  ;;  %3113 = vmatprep.subr.mxu0 %v12051_v48  ;;  %v5973_v48 = vld [vmem:[%s11169_s0 + $0x11] ss:$8 sm:$0x3] }
 0x897   :  { %2764 = vmatprep.mubr.f32.mxu0 %v11705_v62  ;;  %3114 = vmatpush2.msra.mxu0 %v12052_v8  ;;  %v12084_v8 = vld [vmem:[#allocation31_spill] sm:$0xff] }
 0x898   :  { %3115 = vmatprep.subr.mxu0 %v12053_v60  ;;  %v9378_v60 = vrot.slane %v5972_v12, %v12084_v8 }
 0x899   :  { %3116 = vmatpush2.msra.mxu0 %v12054_v34  ;;  %v12085_v34 = vld [vmem:[#allocation17_spill] sm:$0xff] }
 0x89a   :  { %5983 = vmatmul.mubr.msk.f32.gmra.mxu0 %vm497_vm0, %v9320_v25  ;;  %3117 = vmatprep.subr.mxu0 %v12055_v52  ;;  %v2448_v52 = vmul.f32 %v9372_v0, %v12085_v34 }
 0x89b   :  { %2770 = vmatprep.mubr.f32.mxu0 %v11705_v62  ;;  %3118 = vmatpush2.msra.mxu0 %v12056_v26  ;;  %v9383_v26 = vrot.slane %v5973_v48, %v12083_v44 }
 0x89c   :  { %3119 = vmatprep.subr.mxu0 %v12057_v24  ;;  %v2449_v24 = vmul.f32 %v9378_v60, %v12085_v34 }
 0x89d   :  { %3120 = vmatpush2.msra.mxu0 %v12058_v51  ;;  %v9388_v51 = vrot.slane %v5973_v48, %v12084_v8  ;;  %v12093_v48 = vld [vmem:[#allocation12_spill] sm:$0xff] }
 0x89e   :  { %5984 = vmatmul.mubr.msk.f32.gmra.mxu0 %vm497_vm0, %v9332_v40  ;;  %3121 = vmatprep.subr.mxu0 %v12059_v29  ;;  %v12086_v29 = vld [vmem:[#allocation30_spill] sm:$0xff] }
 0x89f   :  { %2776 = vmatprep.mubr.f32.mxu0 %v11705_v62  ;;  %3122 = vmatpush2.msra.mxu0 %v12060_v28  ;;  %v2472_v28 = vadd.f32 %v2448_v52, %v12086_v29 }
 0x8a0   :  { %3123 = vmatprep.subr.mxu0 %v12061_v56  ;;  %v12087_v56 = vld [vmem:[#allocation8_spill] sm:$0xff] }
 0x8a1   :  { %3124 = vmatpush2.msra.mxu0 %v12062_v49  ;;  %v2509_v49 = vmul.f32 %v9383_v26, %v12087_v56 }
 0x8a2   :  { %5985 = vmatmul.mubr.msk.f32.gmra.mxu0 %vm497_vm0, %v9344_v39  ;;  %3125 = vmatprep.subr.mxu0 %v12063_v43  ;;  %v12088_v43 = vld [vmem:[#allocation9_spill] sm:$0xff] }
 0x8a3   :  { %3126 = vmatpush2.msra.mxu0 %v12064_v47  ;;  %v2450_v47 = vmul.f32 %v9372_v0, %v12088_v43 }
 0x8a4   :  { %3127 = vmatprep.subr.mxu0 %v12065_v58  ;;  %v2451_v58 = vmul.f32 %v9378_v60, %v12088_v43 }
 0x8a5   :  { %3128 = vmatpush2.msra.mxu0 %v12066_v63  ;;  %v2473_v63 = vadd.f32 %v2449_v24, %v12086_v29  ;;  %v12094_v24 = vld [vmem:[#allocation21_spill] sm:$0xff] }
 0x8a6   :  { %3129 = vmatprep.subr.mxu0 %v12067_v31  ;;  %v2510_v31 = vmul.f32 %v9388_v51, %v12087_v56 }
 0x8a7   :  { %3130 = vmatpush2.msra.mxu0 %v12068_v41  ;;  %v12089_v41 = vld [vmem:[#allocation11_spill] sm:$0xff] }
 0x8a8   :  { %3131 = vmatprep.subr.mxu0 %v12069_v14  ;;  %v2452_v14 = vmul.f32 %v9372_v0, %v12089_v41 }
 0x8a9   :  { %3132 = vmatpush2.msra.mxu0 %v12070_v9  ;;  %v2533_v9 = vadd.f32 %v2509_v49, %v2472_v28  ;;  %v2513_v28 = vmul.f32 %v9383_v26, %v12094_v24 }
 0x8aa   :  { %3133 = vmatprep.subr.mxu0 %v12071_v36  ;;  %v12090_v36 = vld [vmem:[#allocation10_spill] sm:$0xff]  ;;  %v2476_v52 = vadd.f32 %v2452_v14, %v12093_v48 }
 0x8ab   :  { %3134 = vmatpush2.msra.mxu0 %v12072_v61  ;;  %v2474_v61 = vadd.f32 %v2450_v47, %v12090_v36 }
 0x8ac   :  { %3135 = vmatprep.subr.mxu0 %v12073_v13  ;;  %v12091_v13 = vld [vmem:[#allocation19_spill] sm:$0xff] }
 0x8ad   :  { %3136 = vmatpush2.msra.mxu0 %v12074_v53  ;;  %v2511_v53 = vmul.f32 %v9383_v26, %v12091_v13 }
 0x8ae   :  { %3137 = vmatprep.subr.mxu0 %v12075_v42 }
 0x8af   :  { %3138 = vmatpush2.msra.mxu0 %v12076_v1  ;;  %v2475_v1 = vadd.f32 %v2451_v58, %v12090_v36  ;;  %v2535_v58 = vadd.f32 %v2511_v53, %v2474_v61  ;;  %v2537_v61 = vadd.f32 %v2513_v28, %v2476_v52  ;;  %v12096_v53 = vld [vmem:[#allocation15_spill] sm:$0xff] }
 0x8b0   :  { %3139 = vmatprep.subr.mxu0 %v12077_v46  ;;  %v2512_v46 = vmul.f32 %v9388_v51, %v12091_v13  ;;  %v2514_v13 = vmul.f32 %v9388_v51, %v12094_v24 }
 0x8b1   :  { %3140 = vmatpush2.msra.mxu0 %v12078_v15  ;;  %v2453_v15 = vmul.f32 %v9378_v60, %v12089_v41 }
 0x8b2   :  { %3141 = vmatprep.subr.mxu0 %v12079_v54  ;;  %v12092_v54 = vld [vmem:[#allocation13_spill] sm:$0xff]  ;;  %v2536_v43 = vadd.f32 %v2512_v46, %v2475_v1 }
 0x8b3   :  { %3142 = vmatpush2.msra.mxu0 %v12080_v10  ;;  %v2454_v10 = vmul.f32 %v9372_v0, %v12092_v54  ;;  %v2477_v41 = vadd.f32 %v2453_v15, %v12093_v48  ;;  %v2457_v15 = vmul.f32 %v9378_v60, %v12096_v53 }
 0x8b4   :  { %3143 = vmatprep.subr.mxu0 %v12081_v30 }
 0x8b5   :  { %3144 = vmatpush2.msra.mxu0 %v12082_v59  ;;  %v2534_v59 = vadd.f32 %v2510_v31, %v2473_v63  ;;  %v2478_v56 = vadd.f32 %v2454_v10, %v12009_v6 }
 0x936   :  { %v2712_v42 = vpop.f32.mrf.mxu0 }
 0x937   :  { %v2783_v30 = vadd.f32 %v2712_v42, %v2533_v9  ;;  %v12095_v9 = vld [vmem:[#allocation14_spill] sm:$0xff]  ;;  %v2455_v42 = vmul.f32 %v9378_v60, %v12092_v54 }
 0x938   :  { %v2714_v12 = vpop.f32.mrf.mxu0  ;;  %v2515_v63 = vmul.f32 %v9383_v26, %v12095_v9 }
 0x939   :  { %v5986_v49 = vmul.f32 -1.442695, %v2783_v30  ;;  %v2784_v47 = vadd.f32 %v2714_v12, %v2534_v59  ;;  %v2456_v59 = vmul.f32 %v9372_v0, %v12096_v53  ;;  %v2538_v12 = vadd.f32 %v2514_v13, %v2477_v41 }
 0x93a   :  { %v2718_v36 = vpop.f32.mrf.mxu0  ;;  %v2539_v24 = vadd.f32 %v2515_v63, %v2478_v56 }
 0x93b   :  { %6511 = vpow2.f32 %v5986_v49  ;;  %v5987_v31 = vmul.f32 -1.442695, %v2784_v47  ;;  %v2785_v14 = vadd.f32 %v2718_v36, %v2535_v58  ;;  %v2516_v36 = vmul.f32 %v9388_v51, %v12095_v9  ;;  %v12097_v49 = vld [vmem:[#allocation37_spill] sm:$0xff] }
 0x93c   :  { %v2720_v30 = vpop.f32.mrf.mxu0  ;;  %v2458_v47 = vmul.f32 %v9372_v0, %v12097_v49  ;;  %v2479_v58 = vadd.f32 %v2455_v42, %v12009_v6  ;;  %v2459_v41 = vmul.f32 %v9378_v60, %v12097_v49  ;;  %v12102_v6 = vld [vmem:[#allocation39_spill] sm:$0xff] }
 0x93d   :  { %6513 = vpow2.f32 %v5987_v31  ;;  %v5988_v1 = vmul.f32 -1.442695, %v2785_v14  ;;  %v2786_v46 = vadd.f32 %v2720_v30, %v2536_v43  ;;  %v12098_v14 = vld [vmem:[#allocation34_spill] sm:$0xff]  ;;  %v12099_v30 = vld [vmem:[#allocation16_spill] sm:$0xff]  ;;  %v2460_v9 = vmul.f32 %v9372_v0, %v12102_v6 }
 0x93e   :  { %v2724_v10 = vpop.f32.mrf.mxu0  ;;  %v2480_v43 = vadd.f32 %v2456_v59, %v12098_v14  ;;  %v2517_v53 = vmul.f32 %v9383_v26, %v12099_v30  ;;  %v2518_v56 = vmul.f32 %v9388_v51, %v12099_v30  ;;  %v2540_v48 = vadd.f32 %v2516_v36, %v2479_v58 }
 0x93f   :  { %6515 = vpow2.f32 %v5988_v1  ;;  %v5989_v52 = vmul.f32 -1.442695, %v2786_v46  ;;  %v2787_v28 = vadd.f32 %v2724_v10, %v2537_v61  ;;  %v2481_v1 = vadd.f32 %v2457_v15, %v12098_v14  ;;  %v12100_v46 = vld [vmem:[#allocation18_spill] sm:$0xff]  ;;  %v12101_v10 = vld [vmem:[#allocation20_spill] sm:$0xff] }
 0x940   :  { %v2726_v31 = vpop.f32.mrf.mxu0  ;;  %v2482_v42 = vadd.f32 %v2458_v47, %v12100_v46  ;;  %v2519_v59 = vmul.f32 %v9383_v26, %v12101_v10  ;;  %v2541_v49 = vadd.f32 %v2517_v53, %v2480_v43  ;;  %v2520_v15 = vmul.f32 %v9388_v51, %v12101_v10 }
 0x941   :  { %6517 = vpow2.f32 %v5989_v52  ;;  %v5990_v13 = vmul.f32 -1.442695, %v2787_v28  ;;  %v2788_v63 = vadd.f32 %v2726_v31, %v2538_v12  ;;  %v2483_v52 = vadd.f32 %v2459_v41, %v12100_v46 }
 0x942   :  { %v2730_v61 = vpop.f32.mrf.mxu0  ;;  %v2461_v12 = vmul.f32 %v9378_v60, %v12102_v6  ;;  %v2542_v31 = vadd.f32 %v2518_v56, %v2481_v1  ;;  %v2543_v34 = vadd.f32 %v2519_v59, %v2482_v42  ;;  %v2462_v53 = vmul.f32 %v9372_v0, %v11837_v55  ;;  %v12105_v56 = vld [vmem:[#allocation25_spill] sm:$0xff] }
 0x943   :  { %6519 = vpow2.f32 %v5990_v13  ;;  %v5991_v54 = vmul.f32 -1.442695, %v2788_v63  ;;  %v2789_v30 = vadd.f32 %v2730_v61, %v2539_v24  ;;  %v12103_v13 = vld [vmem:[#allocation22_spill] sm:$0xff]  ;;  %v12104_v24 = vld [vmem:[#allocation23_spill] sm:$0xff]  ;;  %v2463_v1 = vmul.f32 %v9378_v60, %v11837_v55 }
 0x944   :  { %v2732_v29 = vpop.f32.mrf.mxu0  ;;  %v2484_v63 = vadd.f32 %v2460_v9, %v12103_v13  ;;  %v2521_v36 = vmul.f32 %v9383_v26, %v12104_v24  ;;  %v2522_v41 = vmul.f32 %v9388_v51, %v12104_v24  ;;  %v2523_v9 = vmul.f32 %v9383_v26, %v12105_v56 }
 0x945   :  { %6521 = vpow2.f32 %v5991_v54  ;;  %v5992_v47 = vmul.f32 -1.442695, %v2789_v30  ;;  %v2790_v28 = vadd.f32 %v2732_v29, %v2540_v48  ;;  %v2544_v29 = vadd.f32 %v2520_v15, %v2483_v52 }
 0x946   :  { %v2736_v14 = vpop.f32.mrf.mxu0  ;;  %v2485_v48 = vadd.f32 %v2461_v12, %v12103_v13  ;;  %v2524_v52 = vmul.f32 %v9388_v51, %v12105_v56  ;;  %v2464_v15 = vmul.f32 %v9372_v0, %v7836_v50 }
 0x947   :  { %6523 = vpow2.f32 %v5992_v47  ;;  %v5993_v58 = vmul.f32 -1.442695, %v2790_v28  ;;  %v2839_v43 = vadd.f32 %v2736_v14, %v2541_v49  ;;  %v2545_v14 = vadd.f32 %v2521_v36, %v2484_v63 }
 0x948   :  { %v6512_v54 = vpop.eup %6511  ;;  %v2738_v30 = vpop.f32.mrf.mxu0  ;;  %v2486_v28 = vadd.f32 %v2462_v53, %v11838_v38  ;;  %v2465_v63 = vmul.f32 %v9378_v60, %v7836_v50 }
 0x949   :  { %v2815_v61 = vadd.f32 1.0, %v6512_v54  ;;  %6525 = vpow2.f32 %v5993_v58  ;;  %v5994_v42 = vmul.f32 -1.442695, %v2839_v43  ;;  %v2840_v59 = vadd.f32 %v2738_v30, %v2542_v31 }
 0x94a   :  { %v6514_v47 = vpop.eup %6513  ;;  %v2742_v49 = vpop.f32.mrf.mxu0  ;;  %v2546_v43 = vadd.f32 %v2522_v41, %v2485_v48  ;;  %v2525_v31 = vmul.f32 %v9383_v26, %v7857_v2  ;;  %v2526_v41 = vmul.f32 %v9388_v51, %v7857_v2 }
 0x94b   :  { %6527 = vrcp.f32 %v2815_v61  ;;  %v2816_v12 = vadd.f32 1.0, %v6514_v47  ;;  %v5995_v13 = vmul.f32 -1.442695, %v2840_v59  ;;  %v2841_v24 = vadd.f32 %v2742_v49, %v2543_v34 }
 0x94c   :  { %v6516_v55 = vpop.eup %6515  ;;  %6529 = vpow2.f32 %v5994_v42  ;;  %v2744_v58 = vpop.f32.mrf.mxu0  ;;  %v2487_v59 = vadd.f32 %v2463_v1, %v11838_v38  ;;  %v2488_v34 = vadd.f32 %v2464_v15, %v7886_v22 }
 0x94d   :  { %6531 = vrcp.f32 %v2816_v12  ;;  %v2817_v36 = vadd.f32 1.0, %v6516_v55  ;;  %v5996_v53 = vmul.f32 -1.442695, %v2841_v24  ;;  %v2842_v54 = vadd.f32 %v2744_v58, %v2544_v29  ;;  %v12106_v29 = vld [vmem:[#allocation42_spill] sm:$0xff] }
 0x94e   :  { %v6518_v30 = vpop.eup %6517  ;;  %6533 = vpow2.f32 %v5995_v13  ;;  %v2748_v61 = vpop.f32.mrf.mxu0  ;;  %v2547_v55 = vadd.f32 %v2523_v9, %v2486_v28  ;;  %v2489_v24 = vadd.f32 %v2465_v63, %v7886_v22  ;;  %v2466_v13 = vmul.f32 %v9372_v0, %v12106_v29 }
 0x94f   :  { %6535 = vrcp.f32 %v2817_v36  ;;  %v2818_v48 = vadd.f32 1.0, %v6518_v30  ;;  %v5997_v42 = vmul.f32 -1.442695, %v2842_v54  ;;  %v2843_v47 = vadd.f32 %v2748_v61, %v2545_v14 }
 0x950   :  { %v6520_v49 = vpop.eup %6519  ;;  %6537 = vpow2.f32 %v5996_v53  ;;  %v2750_v12 = vpop.f32.mrf.mxu0  ;;  %v2548_v36 = vadd.f32 %v2524_v52, %v2487_v59  ;;  %v2549_v30 = vadd.f32 %v2525_v31, %v2488_v34  ;;  %v2467_v14 = vmul.f32 %v9378_v60, %v12106_v29 }
 0x951   :  { %6539 = vrcp.f32 %v2818_v48  ;;  %v2819_v1 = vadd.f32 1.0, %v6520_v49  ;;  %v5998_v58 = vmul.f32 -1.442695, %v2843_v47  ;;  %v2844_v15 = vadd.f32 %v2750_v12, %v2546_v43  ;;  %v12107_v48 = vld [vmem:[#allocation36_spill] sm:$0xff]  ;;  %v12108_v47 = vld [vmem:[#allocation38_spill] sm:$0xff] }
 0x952   :  { %v6522_v50 = vpop.eup %6521  ;;  %6541 = vpow2.f32 %v5997_v42  ;;  %v2754_v2 = vpop.f32.mrf.mxu0  ;;  %v2550_v61 = vadd.f32 %v2526_v41, %v2489_v24  ;;  %v2490_v49 = vadd.f32 %v2466_v13, %v12107_v48  ;;  %v2527_v43 = vmul.f32 %v9383_v26, %v12108_v47  ;;  %v12109_v12 = vld [vmem:[#allocation40_spill] sm:$0xff] }
 0x953   :  { %6543 = vrcp.f32 %v2819_v1  ;;  %v2820_v53 = vadd.f32 1.0, %v6522_v50  ;;  %v5999_v9 = vmul.f32 -1.442695, %v2844_v15  ;;  %v2845_v28 = vadd.f32 %v2754_v2, %v2547_v55 }
 0x954   :  { %v6524_v63 = vpop.eup %6523  ;;  %6545 = vpow2.f32 %v5998_v58  ;;  %v2756_v54 = vpop.f32.mrf.mxu0  ;;  %v2491_v50 = vadd.f32 %v2467_v14, %v12107_v48  ;;  %v2528_v2 = vmul.f32 %v9388_v51, %v12108_v47  ;;  %v2468_v41 = vmul.f32 %v9372_v0, %v12109_v12 }
 0x955   :  { %6547 = vrcp.f32 %v2820_v53  ;;  %v2821_v42 = vadd.f32 1.0, %v6524_v63  ;;  %v6000_v52 = vmul.f32 -1.442695, %v2845_v28  ;;  %v2846_v31 = vadd.f32 %v2756_v54, %v2548_v36 }
 0x956   :  { %v6526_v59 = vpop.eup %6525  ;;  %6549 = vpow2.f32 %v5999_v9  ;;  %v2760_v34 = vpop.f32.mrf.mxu0  ;;  %v2529_v15 = vmul.f32 %v9383_v26, %v12020_v57  ;;  %v2469_v36 = vmul.f32 %v9378_v60, %v12109_v12  ;;  %v2530_v14 = vmul.f32 %v9388_v51, %v12020_v57 }
 0x957   :  { %6551 = vrcp.f32 %v2821_v42  ;;  %v2822_v55 = vadd.f32 1.0, %v6526_v59  ;;  %v6001_v24 = vmul.f32 -1.442695, %v2846_v31  ;;  %v2895_v13 = vadd.f32 %v2760_v34, %v7876_v16  ;;  %v12110_v31 = vld [vmem:[#allocation41_spill] sm:$0xff] }
 0x958   :  { %v6528_v1 = vpop.eup %6527  ;;  %6553 = vpow2.f32 %v6000_v52  ;;  %v2762_v58 = vpop.f32.mrf.mxu0  ;;  %v2551_v63 = vadd.f32 %v2527_v43, %v2490_v49  ;;  %v2492_v59 = vadd.f32 %v2468_v41, %v12110_v31  ;;  %v2470_v34 = vmul.f32 %v9372_v0, %v7990_v45 }
 0x959   :  { %v6530_v53 = vpop.eup %6529  ;;  %6555 = vrcp.f32 %v2822_v55  ;;  %v2903_v9 = vmul.f32 %v6528_v1, %v2895_v13  ;;  %v2896_v28 = vadd.f32 %v2762_v58, %v7876_v16  ;;  %v2531_v55 = vmul.f32 %v9383_v26, %v8006_v5 }
 0x95a   :  { %v6532_v54 = vpop.eup %6531  ;;  %v2871_v42 = vadd.f32 1.0, %v6530_v53  ;;  %6557 = vpow2.f32 %v6001_v24  ;;  %v2766_v52 = vpop.f32.mrf.mxu0  ;;  %v2552_v43 = vadd.f32 %v2528_v2, %v2491_v50  ;;  %v2493_v24 = vadd.f32 %v2469_v36, %v12110_v31 }
 0x95b   :  { %v6534_v48 = vpop.eup %6533  ;;  %v2911_v12 = vadd.f32 %v2903_v9, %v2549_v30  ;;  %v2904_v47 = vmul.f32 %v6532_v54, %v2896_v28  ;;  %v2897_v57 = vadd.f32 %v2766_v52, %v7972_v37  ;;  %v2471_v26 = vmul.f32 %v9378_v60, %v7990_v45 }
 0x95c   :  { %v6536_v13 = vpop.eup %6535  ;;  %6559 = vrcp.f32 %v2871_v42  ;;  %v2872_v49 = vadd.f32 1.0, %v6534_v48  ;;  %v2768_v1 = vpop.f32.mrf.mxu0  ;;  %v2532_v48 = vmul.f32 %v9388_v51, %v8006_v5  ;;  %v2494_v42 = vadd.f32 %v2470_v34, %v8011_v21 }
 0x95d   :  { %v6538_v58 = vpop.eup %6537  ;;  %6561 = vtanh.f32 %v2911_v12  ;;  %v2912_v41 = vadd.f32 %v2904_v47, %v2550_v61  ;;  %v2905_v53 = vmul.f32 %v6536_v13, %v2897_v57  ;;  %v2898_v0 = vadd.f32 %v2768_v1, %v7972_v37 }
 0x95e   :  { %v6540_v30 = vpop.eup %6539  ;;  %6563 = vrcp.f32 %v2872_v49  ;;  %v2873_v9 = vadd.f32 1.0, %v6538_v58  ;;  %v2772_v28 = vpop.f32.mrf.mxu0  ;;  %v2553_v47 = vadd.f32 %v2529_v15, %v2492_v59 }
 0x95f   :  { %v6542_v50 = vpop.eup %6541  ;;  %6565 = vtanh.f32 %v2912_v41  ;;  %v2913_v2 = vadd.f32 %v2905_v53, %v2551_v63  ;;  %v2906_v36 = vmul.f32 %v6540_v30, %v2898_v0  ;;  %v2899_v12 = vadd.f32 %v2772_v28, %v7974_v19 }
 0x960   :  { %v6544_v61 = vpop.eup %6543  ;;  %6567 = vrcp.f32 %v2873_v9  ;;  %v2874_v57 = vadd.f32 1.0, %v6542_v50  ;;  %v2774_v54 = vpop.f32.mrf.mxu0  ;;  %v2554_v63 = vadd.f32 %v2530_v14, %v2493_v24  ;;  %v2495_v41 = vadd.f32 %v2471_v26, %v8011_v21 }
 0x961   :  { %v6546_v52 = vpop.eup %6545  ;;  %6569 = vtanh.f32 %v2913_v2  ;;  %v2914_v13 = vadd.f32 %v2906_v36, %v2552_v43  ;;  %v2907_v60 = vmul.f32 %v6544_v61, %v2899_v12  ;;  %v2900_v49 = vadd.f32 %v2774_v54, %v7974_v19 }
 0x962   :  { %v6548_v51 = vpop.eup %6547  ;;  %6571 = vrcp.f32 %v2874_v57  ;;  %v2875_v1 = vadd.f32 1.0, %v6546_v52  ;;  %v2778_v58 = vpop.f32.mrf.mxu0  ;;  %v2555_v43 = vadd.f32 %v2531_v55, %v2494_v42  ;;  %v2556_v61 = vadd.f32 %v2532_v48, %v2495_v41 }
 0x963   :  { %v6550_v53 = vpop.eup %6549  ;;  %6573 = vtanh.f32 %v2914_v13  ;;  %v2915_v0 = vadd.f32 %v2907_v60, %v2553_v47  ;;  %v2908_v15 = vmul.f32 %v6548_v51, %v2900_v49  ;;  %v2901_v59 = vadd.f32 %v2778_v58, %v8020_v3 }
 0x964   :  { %v6552_v34 = vpop.eup %6551  ;;  %6575 = vrcp.f32 %v2875_v1  ;;  %v2876_v30 = vadd.f32 1.0, %v6550_v53  ;;  %v2780_v9 = vpop.f32.mrf.mxu0 }
 0x965   :  { %v6554_v28 = vpop.eup %6553  ;;  %6577 = vtanh.f32 %v2915_v0  ;;  %v2916_v50 = vadd.f32 %v2908_v15, %v2554_v63  ;;  %v2909_v2 = vmul.f32 %v6552_v34, %v2901_v59  ;;  %v2902_v14 = vadd.f32 %v2780_v9, %v8020_v3 }
 0x966   :  { %v6556_v24 = vpop.eup %6555  ;;  %6579 = vrcp.f32 %v2876_v30  ;;  %v2877_v26 = vadd.f32 1.0, %v6554_v28 }
 0x967   :  { %v6558_v36 = vpop.eup %6557  ;;  %6581 = vtanh.f32 %v2916_v50  ;;  %v2917_v12 = vadd.f32 %v2909_v2, %v2555_v43  ;;  %v2910_v57 = vmul.f32 %v6556_v24, %v2902_v14 }
 0x968   :  { %6583 = vrcp.f32 %v2877_v26  ;;  %v2878_v47 = vadd.f32 1.0, %v6558_v36 }
 0x969   :  { %v6560_v54 = vpop.eup %6559  ;;  %6585 = vtanh.f32 %v2917_v12  ;;  %v2918_v55 = vadd.f32 %v2910_v57, %v2556_v61 }
 0x96a   :  { %v6562_v42 = vpop.eup %6561  ;;  %6587 = vrcp.f32 %v2878_v47  ;;  %v2927_v52 = vsub.f32 1.0, %v6560_v54  ;;  %v2943_v0 = vmul.f32 %v6560_v54, %v9218_v27 }
 0x96b   :  { %v6564_v13 = vpop.eup %6563  ;;  %6589 = vtanh.f32 %v2918_v55 }
 0x96c   :  { %v6566_v60 = vpop.eup %6565  ;;  %v2928_v49 = vsub.f32 1.0, %v6564_v13  ;;  %v2935_v1 = vmul.f32 %v6562_v42, %v2927_v52  ;;  %v2944_v53 = vmul.f32 %v6564_v13, %v9220_v7 }
 0x96d   :  { %v6568_v51 = vpop.eup %6567 }
 0x96e   :  { %v6570_v63 = vpop.eup %6569  ;;  %v2936_v58 = vmul.f32 %v6566_v60, %v2928_v49  ;;  %v2929_v48 = vsub.f32 1.0, %v6568_v51  ;;  %v2951_v43 = vadd.f32 %v2943_v0, %v2935_v1  ;;  %v2945_v7 = vmul.f32 %v6568_v51, %v9222_v32 }
 0x96f   :  { %v6572_v41 = vpop.eup %6571 }
 0x970   :  { %v6574_v15 = vpop.eup %6573  ;;  %v2952_v59 = vadd.f32 %v2944_v53, %v2936_v58  ;;  %v2930_v34 = vsub.f32 1.0, %v6572_v41  ;;  %v2937_v9 = vmul.f32 %v6570_v63, %v2929_v48  ;;  %v2946_v2 = vmul.f32 %v6572_v41, %v9224_v4 }
 0x971   :  { %v6576_v30 = vpop.eup %6575 }
 0x972   :  { %v6578_v28 = vpop.eup %6577  ;;  %3145 = vmatprep.mubr.f32.mxu0 %v2952_v59  ;;  %v2938_v50 = vmul.f32 %v6574_v15, %v2930_v34  ;;  %v2931_v14 = vsub.f32 1.0, %v6576_v30  ;;  %v2953_v61 = vadd.f32 %v2945_v7, %v2937_v9  ;;  %v2947_v4 = vmul.f32 %v6576_v30, %v9226_v18  ;;  %v9550_v34 = vld [vmem:[%s11172_s3] sm:$0xff]  ;;  %v9556_v30 = vld [vmem:[#allocation2 + $0xf0] sm:$0xff]  ;;  %v9592_v7 = vld [vmem:[#allocation2 + $0xb8] sm:$0xff] }
 0x973   :  { %v6580_v24 = vpop.eup %6579  ;;  %3146 = vmatmul.mubr.f32.vlgmr.msra.gmra.mxu0 %v2951_v43  ;;  %v9559_v43 = vld [vmem:[#allocation2 + $0xe8] sm:$0xff]  ;;  %v9562_v9 = vld [vmem:[#allocation2 + $0xe0] sm:$0xff]  ;;  %12113 = vst [vmem:[#allocation102_spill] sm:$0xff] %v9592_v7 }
 0x974   :  { %v6582_v26 = vpop.eup %6581  ;;  %v2954_v36 = vadd.f32 %v2946_v2, %v2938_v50  ;;  %v2932_v12 = vsub.f32 1.0, %v6580_v24  ;;  %v2939_v57 = vmul.f32 %v6578_v28, %v2931_v14  ;;  %v2948_v55 = vmul.f32 %v6580_v24, %v9228_v11  ;;  %v9568_v28 = vld [vmem:[%s11172_s3 + $0x8] sm:$0xff]  ;;  %v9576_v50 = vld [vmem:[#allocation2 + $0xd0] sm:$0xff]  ;;  %v9582_v14 = vld [vmem:[#allocation2 + $0xc0] sm:$0xff] }
 0x975   :  { %v6584_v27 = vpop.eup %6583  ;;  %v9579_v2 = vld [vmem:[#allocation2 + $0xc8] sm:$0xff]  ;;  %12111 = vst [vmem:[#allocation100_spill] sm:$0xff] %v9582_v14  ;;  %v9588_v24 = vld [vmem:[%s11172_s3 + $0x10] sm:$0xff] }
 0x976   :  { %v6586_v47 = vpop.eup %6585  ;;  %3151 = vmatprep.mubr.f32.mxu0 %v2954_v36  ;;  %v2940_v54 = vmul.f32 %v6582_v26, %v2932_v12  ;;  %v2933_v42 = vsub.f32 1.0, %v6584_v27  ;;  %v2955_v32 = vadd.f32 %v2947_v4, %v2939_v57  ;;  %v2949_v58 = vmul.f32 %v6584_v27, %v9230_v20  ;;  %12112 = vst [vmem:[#allocation101_spill] sm:$0xff] %v9588_v24  ;;  %v9596_v26 = vld [vmem:[#allocation2 + $0xb0] sm:$0xff]  ;;  %v9599_v36 = vld [vmem:[#allocation2 + $0xa8] sm:$0xff]  ;;  %v9602_v12 = vld [vmem:[#allocation2 + $0xa0] sm:$0xff] }
 0x977   :  { %v6588_v52 = vpop.eup %6587  ;;  %3152 = vmatmul.mubr.f32.gmra.mxu0 %v2953_v61  ;;  %12114 = vst [vmem:[#allocation27_spill] sm:$0xff] %v9596_v26  ;;  %12115 = vst [vmem:[#allocation44_spill] sm:$0xff] %v9599_v36  ;;  %v9608_v27 = vld [vmem:[%s11172_s3 + $0x18] sm:$0xff]  ;;  %v9616_v57 = vld [vmem:[#allocation2 + $0x90] sm:$0xff] }
 0x978   :  { %v6590_v13 = vpop.eup %6589  ;;  %v2956_v60 = vadd.f32 %v2948_v55, %v2940_v54  ;;  %v2934_v49 = vsub.f32 1.0, %v6588_v52  ;;  %v2941_v51 = vmul.f32 %v6586_v47, %v2933_v42  ;;  %v2950_v63 = vmul.f32 %v6588_v52, %v9232_v17  ;;  %12116 = vst [vmem:[#allocation45_spill] sm:$0xff] %v9602_v12  ;;  %12117 = vst [vmem:[#allocation46_spill] sm:$0xff] %v9608_v27  ;;  %v9612_v61 = vld [vmem:[#allocation2 + $0x98] sm:$0xff]  ;;  %v9619_v47 = vld [vmem:[#allocation2 + $0x88] sm:$0xff] }
 0x979   :  { %12118 = vst [vmem:[#allocation103_spill] sm:$0xff] %v9612_v61  ;;  %12119 = vst [vmem:[#allocation47_spill] sm:$0xff] %v9616_v57  ;;  %v9622_v54 = vld [vmem:[#allocation2 + $0x80] sm:$0xff]  ;;  %v9632_v42 = vld [vmem:[#allocation2 + $0x78] sm:$0xff] }
 0x97a   :  { %3157 = vmatprep.mubr.f32.mxu0 %v2956_v60  ;;  %v2942_v1 = vmul.f32 %v6590_v13, %v2934_v49  ;;  %v2957_v48 = vadd.f32 %v2949_v58, %v2941_v51  ;;  %12120 = vst [vmem:[#allocation48_spill] sm:$0xff] %v9619_v47  ;;  %12121 = vst [vmem:[#allocation49_spill] sm:$0xff] %v9622_v54  ;;  %v9628_v55 = vld [vmem:[%s11172_s3 + $0x20] sm:$0xff]  ;;  %v9636_v52 = vld [vmem:[#allocation2 + $0x70] sm:$0xff] }
 0x97b   :  { %3158 = vmatmul.mubr.f32.gmra.mxu0 %v2955_v32  ;;  %12122 = vst [vmem:[#allocation50_spill] sm:$0xff] %v9628_v55  ;;  %12123 = vst [vmem:[#allocation104_spill] sm:$0xff] %v9632_v42  ;;  %v9639_v4 = vld [vmem:[#allocation2 + $0x68] sm:$0xff]  ;;  %v9642_v13 = vld [vmem:[#allocation2 + $0x60] sm:$0xff] }
 0x97c   :  { %v2958_v53 = vadd.f32 %v2950_v63, %v2942_v1  ;;  %12124 = vst [vmem:[#allocation51_spill] sm:$0xff] %v9636_v52  ;;  %12125 = vst [vmem:[#allocation52_spill] sm:$0xff] %v9639_v4  ;;  %v9648_v60 = vld [vmem:[%s11172_s3 + $0x28] sm:$0xff]  ;;  %v9652_v49 = vld [vmem:[#allocation2 + $0x58] sm:$0xff] }
 0x97d   :  { %12126 = vst [vmem:[#allocation53_spill] sm:$0xff] %v9642_v13  ;;  %12127 = vst [vmem:[#allocation54_spill] sm:$0xff] %v9648_v60  ;;  %v9656_v32 = vld [vmem:[#allocation2 + $0x50] sm:$0xff]  ;;  %v9659_v51 = vld [vmem:[#allocation2 + $0x48] sm:$0xff] }
 0x97e   :  { %3163 = vmatprep.mubr.f32.mxu0 %v2958_v53  ;;  %12128 = vst [vmem:[#allocation105_spill] sm:$0xff] %v9652_v49  ;;  %12129 = vst [vmem:[#allocation55_spill] sm:$0xff] %v9656_v32  ;;  %v9662_v1 = vld [vmem:[#allocation2 + $0x40] sm:$0xff]  ;;  %v9668_v63 = vld [vmem:[%s11172_s3 + $0x30] sm:$0xff] }
 0x97f   :  { %3164 = vmatmul.mubr.f32.gmra.mxu0 %v2957_v48  ;;  %12130 = vst [vmem:[#allocation56_spill] sm:$0xff] %v9659_v51  ;;  %12131 = vst [vmem:[#allocation57_spill] sm:$0xff] %v9662_v1  ;;  %v9672_v58 = vld [vmem:[#allocation2 + $0x38] sm:$0xff]  ;;  %v9676_v53 = vld [vmem:[#allocation2 + $0x30] sm:$0xff] }
 0x980   :  { %3758 = vmatprep.mubr.f32.mxu0 %v11705_v62  ;;  %12132 = vst [vmem:[#allocation58_spill] sm:$0xff] %v9668_v63  ;;  %12133 = vst [vmem:[#allocation106_spill] sm:$0xff] %v9672_v58  ;;  %v9679_v48 = vld [vmem:[#allocation2 + $0x28] sm:$0xff] }
 0x981   :  { %12134 = vst [vmem:[#allocation59_spill] sm:$0xff] %v9676_v53  ;;  %12135 = vst [vmem:[#allocation60_spill] sm:$0xff] %v9679_v48 }
 0xa33   :  { %v9523_v11 = vpop.f32.mrf.mxu0 }
 0xa35   :  { %v9525_v18 = vpop.f32.mrf.mxu0 }
 0xa37   :  { %v9527_v41 = vpop.f32.mrf.mxu0 }
 0xa39   :  { %v9529_v0 = vpop.f32.mrf.mxu0 }
 0xa3b   :  { %v9531_v15 = vpop.f32.mrf.mxu0 }
 0xa3d   :  { %v9533_v17 = vpop.f32.mrf.mxu0 }
 0xa3f   :  { %v9535_v59 = vpop.f32.mrf.mxu0 }
 0xa41   :  { %v9537_v20 = vpop.f32.mrf.mxu0 }
 0xa42   :  { %3194 = vmatprep.subr.mxu1 %v9537_v20 }
 0xa43   :  { %3195 = vmatpush1.msra.mxu1 %v9535_v59 }
 0xa44   :  { %3196 = vmatprep.subr.mxu1 %v9533_v17 }
 0xa45   :  { %3197 = vmatpush1.msra.mxu1 %v9531_v15 }
 0xa46   :  { %3198 = vmatprep.subr.mxu1 %v9529_v0 }
 0xa47   :  { %3199 = vmatpush1.msra.mxu1 %v9527_v41 }
 0xa48   :  { %3200 = vmatprep.subr.mxu1 %v9525_v18 }
 0xa49   :  { %3201 = vmatpush1.msra.mxu1 %v9523_v11 }
 0xa4a   :  { %6004 = vmatmul.mubr.msk.f32.vlgmr.msra.gmra.mxu1 %vm497_vm0, %v9550_v34  ;;  %3605 = vmatprep.subr.mxu1 %v9244_v35  ;;  %v9572_v35 = vld [vmem:[#allocation2 + $0xd8] sm:$0xff] }
 0xa4b   :  { %3240 = vmatprep.mubr.f32.mxu1 %v11705_v62  ;;  %3606 = vmatpush1.msra.mxu1 %v9556_v30 }
 0xa4c   :  { %3607 = vmatprep.subr.mxu1 %v9559_v43 }
 0xa4d   :  { %3608 = vmatpush1.msra.mxu1 %v9562_v9 }
 0xa4e   :  { %6005 = vmatmul.mubr.msk.f32.gmra.mxu1 %vm497_vm0, %v9568_v28  ;;  %3609 = vmatprep.subr.mxu1 %v9572_v35 }
 0xa4f   :  { %3246 = vmatprep.mubr.f32.mxu1 %v11705_v62  ;;  %3610 = vmatpush1.msra.mxu1 %v9576_v50 }
 0xa50   :  { %3611 = vmatprep.subr.mxu1 %v9579_v2 }
 0xa51   :  { %3612 = vmatpush1.msra.mxu1 %v9582_v14 }
 0xa52   :  { %6006 = vmatmul.mubr.msk.f32.gmra.mxu1 %vm497_vm0, %v9588_v24  ;;  %3613 = vmatprep.subr.mxu1 %v9592_v7 }
 0xa53   :  { %3252 = vmatprep.mubr.f32.mxu1 %v11705_v62  ;;  %3614 = vmatpush1.msra.mxu1 %v9596_v26  ;;  %v12182_v26 = vld [vmem:[#allocation13_spill] sm:$0xff] }
 0xa54   :  { %3615 = vmatprep.subr.mxu1 %v9599_v36 }
 0xa55   :  { %3616 = vmatpush1.msra.mxu1 %v9602_v12 }
 0xa56   :  { %6007 = vmatmul.mubr.msk.f32.gmra.mxu1 %vm497_vm0, %v9608_v27  ;;  %3617 = vmatprep.subr.mxu1 %v9612_v61  ;;  %v12180_v61 = vld [vmem:[#allocation12_spill] sm:$0xff] }
 0xa57   :  { %3258 = vmatprep.mubr.f32.mxu1 %v11705_v62  ;;  %3618 = vmatpush1.msra.mxu1 %v9616_v57 }
 0xa58   :  { %3619 = vmatprep.subr.mxu1 %v9619_v47 }
 0xa59   :  { %3620 = vmatpush1.msra.mxu1 %v9622_v54 }
 0xa5a   :  { %6008 = vmatmul.mubr.msk.f32.gmra.mxu1 %vm497_vm0, %v9628_v55  ;;  %3621 = vmatprep.subr.mxu1 %v9632_v42  ;;  %v12179_v42 = vld [vmem:[#allocation19_spill] sm:$0xff] }
 0xa5b   :  { %3264 = vmatprep.mubr.f32.mxu1 %v11705_v62  ;;  %3622 = vmatpush1.msra.mxu1 %v9636_v52  ;;  %v12178_v52 = vld [vmem:[#allocation10_spill] sm:$0xff] }
 0xa5c   :  { %3623 = vmatprep.subr.mxu1 %v9639_v4 }
 0xa5d   :  { %3624 = vmatpush1.msra.mxu1 %v9642_v13 }
 0xa5e   :  { %6009 = vmatmul.mubr.msk.f32.gmra.mxu1 %vm497_vm0, %v9648_v60  ;;  %3625 = vmatprep.subr.mxu1 %v9652_v49  ;;  %v12176_v60 = vld [vmem:[#allocation9_spill] sm:$0xff] }
 0xa5f   :  { %3270 = vmatprep.mubr.f32.mxu1 %v11705_v62  ;;  %3626 = vmatpush1.msra.mxu1 %v9656_v32  ;;  %v12175_v32 = vld [vmem:[#allocation8_spill] sm:$0xff] }
 0xa60   :  { %3627 = vmatprep.subr.mxu1 %v9659_v51 }
 0xa61   :  { %3628 = vmatpush1.msra.mxu1 %v9662_v1  ;;  %v9682_v1 = vld [vmem:[#allocation2 + $0x20] sm:$0xff] }
 0xa62   :  { %6010 = vmatmul.mubr.msk.f32.gmra.mxu1 %vm497_vm0, %v9668_v63  ;;  %3629 = vmatprep.subr.mxu1 %v9672_v58  ;;  %12136 = vst [vmem:[#allocation61_spill] sm:$0xff] %v9682_v1  ;;  %v9687_v63 = vld [vmem:[#allocation2 + $0x18] sm:$0xff]  ;;  %v9691_v58 = vld [vmem:[#allocation2 + $0x10] sm:$0xff] }
 0xa63   :  { %3276 = vmatprep.mubr.f32.mxu1 %v11705_v62  ;;  %3630 = vmatpush1.msra.mxu1 %v9676_v53  ;;  %12137 = vst [vmem:[#allocation62_spill] sm:$0xff] %v9687_v63  ;;  %12138 = vst [vmem:[#allocation107_spill] sm:$0xff] %v9691_v58  ;;  %v9694_v53 = vld [vmem:[#allocation2 + $0x8] sm:$0xff] }
 0xa64   :  { %3631 = vmatprep.subr.mxu1 %v9679_v48  ;;  %12139 = vst [vmem:[#allocation63_spill] sm:$0xff] %v9694_v53  ;;  %v9697_v48 = vld [vmem:[#allocation2] sm:$0xff] }
 0xa65   :  { %3632 = vmatpush1.msra.mxu1 %v9682_v1  ;;  %12140 = vst [vmem:[#allocation64_spill] sm:$0xff] %v9697_v48  ;;  %v12174_v1 = vld [vmem:[#allocation30_spill] sm:$0xff] }
 0xa66   :  { %6011 = vmatmul.mubr.msk.f32.gmra.mxu1 %vm497_vm0, %v9296_v23  ;;  %3633 = vmatprep.subr.mxu1 %v9687_v63  ;;  %v9702_v23 = vld [vmem:[#allocation2 + $0x1f8] sm:$0xff]  ;;  %v9706_v63 = vld [vmem:[#allocation2 + $0x1f0] sm:$0xff] }
 0xa67   :  { %3282 = vmatprep.mubr.f32.mxu1 %v11705_v62  ;;  %3634 = vmatpush1.msra.mxu1 %v9691_v58  ;;  %12141 = vst [vmem:[#allocation65_spill] sm:$0xff] %v9702_v23  ;;  %12142 = vst [vmem:[#allocation66_spill] sm:$0xff] %v9706_v63  ;;  %v9709_v58 = vld [vmem:[#allocation2 + $0x1e8] sm:$0xff] }
 0xa68   :  { %3635 = vmatprep.subr.mxu1 %v9694_v53  ;;  %12143 = vst [vmem:[#allocation67_spill] sm:$0xff] %v9709_v58  ;;  %v9712_v53 = vld [vmem:[#allocation2 + $0x1e0] sm:$0xff] }
 0xa69   :  { %3636 = vmatpush1.msra.mxu1 %v9697_v48  ;;  %12144 = vst [vmem:[#allocation68_spill] sm:$0xff] %v9712_v53 }
 0xa6a   :  { %6012 = vmatmul.mubr.msk.f32.gmra.mxu1 %vm497_vm0, %v9308_v33  ;;  %3637 = vmatprep.subr.mxu1 %v9702_v23  ;;  %v9717_v33 = vld [vmem:[#allocation2 + $0x1d8] sm:$0xff]  ;;  %v9721_v23 = vld [vmem:[#allocation2 + $0x1d0] sm:$0xff] }
 0xa6b   :  { %3288 = vmatprep.mubr.f32.mxu1 %v11705_v62  ;;  %3638 = vmatpush2.msra.mxu1 %v9706_v63  ;;  %12145 = vst [vmem:[#allocation69_spill] sm:$0xff] %v9717_v33  ;;  %12146 = vst [vmem:[#allocation70_spill] sm:$0xff] %v9721_v23  ;;  %v9724_v63 = vld [vmem:[#allocation2 + $0x1c8] sm:$0xff] }
 0xa6c   :  { %3639 = vmatprep.subr.mxu1 %v9709_v58  ;;  %12147 = vst [vmem:[#allocation71_spill] sm:$0xff] %v9724_v63  ;;  %v9727_v58 = vld [vmem:[#allocation2 + $0x1c0] sm:$0xff] }
 0xa6d   :  { %3640 = vmatpush2.msra.mxu1 %v9712_v53  ;;  %12148 = vst [vmem:[#allocation72_spill] sm:$0xff] %v9727_v58 }
 0xa6e   :  { %6013 = vmatmul.mubr.msk.f32.gmra.mxu1 %vm497_vm0, %v9320_v25  ;;  %3641 = vmatprep.subr.mxu1 %v9717_v33  ;;  %v9732_v25 = vld [vmem:[#allocation2 + $0x1b8] sm:$0xff]  ;;  %v9736_v33 = vld [vmem:[#allocation2 + $0x1b0] sm:$0xff] }
 0xa6f   :  { %3294 = vmatprep.mubr.f32.mxu1 %v11705_v62  ;;  %3642 = vmatpush2.msra.mxu1 %v9721_v23  ;;  %12149 = vst [vmem:[#allocation73_spill] sm:$0xff] %v9732_v25  ;;  %12150 = vst [vmem:[#allocation74_spill] sm:$0xff] %v9736_v33  ;;  %v9739_v23 = vld [vmem:[#allocation2 + $0x1a8] sm:$0xff] }
 0xa70   :  { %3643 = vmatprep.subr.mxu1 %v9724_v63  ;;  %12151 = vst [vmem:[#allocation75_spill] sm:$0xff] %v9739_v23  ;;  %v9742_v63 = vld [vmem:[#allocation2 + $0x1a0] sm:$0xff] }
 0xa71   :  { %3644 = vmatpush2.msra.mxu1 %v9727_v58  ;;  %12152 = vst [vmem:[#allocation76_spill] sm:$0xff] %v9742_v63  ;;  %v12173_v58 = vld [vmem:[#allocation17_spill] sm:$0xff] }
 0xa72   :  { %6014 = vmatmul.mubr.msk.f32.gmra.mxu1 %vm497_vm0, %v9332_v40  ;;  %3645 = vmatprep.subr.mxu1 %v9732_v25  ;;  %v9747_v40 = vld [vmem:[#allocation2 + $0x198] sm:$0xff]  ;;  %v9750_v25 = vld [vmem:[#allocation2 + $0x190] sm:$0xff] }
 0xa73   :  { %3300 = vmatprep.mubr.f32.mxu1 %v11705_v62  ;;  %3646 = vmatpush2.msra.mxu1 %v9736_v33  ;;  %12153 = vst [vmem:[#allocation77_spill] sm:$0xff] %v9747_v40  ;;  %12154 = vst [vmem:[#allocation78_spill] sm:$0xff] %v9750_v25  ;;  %v9753_v33 = vld [vmem:[#allocation2 + $0x188] sm:$0xff] }
 0xa74   :  { %3647 = vmatprep.subr.mxu1 %v9739_v23  ;;  %12155 = vst [vmem:[#allocation79_spill] sm:$0xff] %v9753_v33  ;;  %v9756_v23 = vld [vmem:[#allocation2 + $0x180] sm:$0xff] }
 0xa75   :  { %3648 = vmatpush2.msra.mxu1 %v9742_v63  ;;  %12156 = vst [vmem:[#allocation80_spill] sm:$0xff] %v9756_v23  ;;  %v9759_v63 = vld [vmem:[#allocation2 + $0x178] sm:$0xff] }
 0xa76   :  { %6015 = vmatmul.mubr.msk.f32.gmra.mxu1 %vm497_vm0, %v9344_v39  ;;  %3649 = vmatprep.subr.mxu1 %v9747_v40  ;;  %12157 = vst [vmem:[#allocation81_spill] sm:$0xff] %v9759_v63  ;;  %v9762_v39 = vld [vmem:[#allocation2 + $0x170] sm:$0xff]  ;;  %v9765_v40 = vld [vmem:[#allocation2 + $0x168] sm:$0xff] }
 0xa77   :  { %3650 = vmatpush2.msra.mxu1 %v9750_v25  ;;  %12158 = vst [vmem:[#allocation82_spill] sm:$0xff] %v9762_v39  ;;  %12159 = vst [vmem:[#allocation83_spill] sm:$0xff] %v9765_v40  ;;  %v9768_v25 = vld [vmem:[#allocation2 + $0x160] sm:$0xff] }
 0xa78   :  { %3651 = vmatprep.subr.mxu1 %v9753_v33  ;;  %12160 = vst [vmem:[#allocation84_spill] sm:$0xff] %v9768_v25  ;;  %v9771_v33 = vld [vmem:[#allocation2 + $0x158] sm:$0xff] }
 0xa79   :  { %3652 = vmatpush2.msra.mxu1 %v9756_v23  ;;  %12161 = vst [vmem:[#allocation85_spill] sm:$0xff] %v9771_v33  ;;  %v9774_v23 = vld [vmem:[#allocation2 + $0x150] sm:$0xff] }
 0xa7a   :  { %3653 = vmatprep.subr.mxu1 %v9759_v63  ;;  %12162 = vst [vmem:[#allocation86_spill] sm:$0xff] %v9774_v23  ;;  %v9777_v63 = vld [vmem:[#allocation2 + $0x148] sm:$0xff] }
 0xa7b   :  { %3654 = vmatpush2.msra.mxu1 %v9762_v39  ;;  %12163 = vst [vmem:[#allocation87_spill] sm:$0xff] %v9777_v63  ;;  %v9780_v39 = vld [vmem:[#allocation2 + $0x140] sm:$0xff] }
 0xa7c   :  { %3655 = vmatprep.subr.mxu1 %v9765_v40  ;;  %12164 = vst [vmem:[#allocation88_spill] sm:$0xff] %v9780_v39  ;;  %v9783_v40 = vld [vmem:[#allocation2 + $0x138] sm:$0xff] }
 0xa7d   :  { %3656 = vmatpush2.msra.mxu1 %v9768_v25  ;;  %12165 = vst [vmem:[#allocation89_spill] sm:$0xff] %v9783_v40  ;;  %v9786_v25 = vld [vmem:[#allocation2 + $0x130] sm:$0xff] }
 0xa7e   :  { %3657 = vmatprep.subr.mxu1 %v9771_v33  ;;  %12166 = vst [vmem:[#allocation90_spill] sm:$0xff] %v9786_v25  ;;  %v9789_v33 = vld [vmem:[#allocation2 + $0x128] sm:$0xff] }
 0xa7f   :  { %3658 = vmatpush2.msra.mxu1 %v9774_v23  ;;  %12167 = vst [vmem:[#allocation91_spill] sm:$0xff] %v9789_v33  ;;  %v9792_v23 = vld [vmem:[#allocation2 + $0x120] sm:$0xff] }
 0xa80   :  { %3659 = vmatprep.subr.mxu1 %v9777_v63  ;;  %12168 = vst [vmem:[#allocation92_spill] sm:$0xff] %v9792_v23  ;;  %v9795_v63 = vld [vmem:[#allocation2 + $0x118] sm:$0xff] }
 0xa81   :  { %3660 = vmatpush2.msra.mxu1 %v9780_v39  ;;  %12169 = vst [vmem:[#allocation93_spill] sm:$0xff] %v9795_v63  ;;  %v9798_v39 = vld [vmem:[#allocation2 + $0x110] sm:$0xff] }
 0xa82   :  { %3661 = vmatprep.subr.mxu1 %v9783_v40  ;;  %12170 = vst [vmem:[#allocation94_spill] sm:$0xff] %v9798_v39  ;;  %v9801_v40 = vld [vmem:[#allocation2 + $0x108] sm:$0xff] }
 0xa83   :  { %3662 = vmatpush2.msra.mxu1 %v9786_v25  ;;  %12171 = vst [vmem:[#allocation95_spill] sm:$0xff] %v9801_v40  ;;  %v9804_v25 = vld [vmem:[#allocation2 + $0x100] sm:$0xff] }
 0xa84   :  { %3663 = vmatprep.subr.mxu1 %v9789_v33  ;;  %12172 = vst [vmem:[#allocation96_spill] sm:$0xff] %v9804_v25 }
 0xa85   :  { %3664 = vmatpush2.msra.mxu1 %v9792_v23  ;;  %v6002_v23 = vld [vmem:[%s11169_s0 + $0x12] ss:$8 sm:$0x3] }
 0xa86   :  { %3665 = vmatprep.subr.mxu1 %v9795_v63  ;;  %v9811_v33 = vrot.slane %v6002_v23, %v12083_v44  ;;  %v6003_v63 = vld [vmem:[%s11169_s0 + $0x13] ss:$8 sm:$0x3] }
 0xa87   :  { %3666 = vmatpush2.msra.mxu1 %v9798_v39  ;;  %v9817_v39 = vrot.slane %v6002_v23, %v12084_v8  ;;  %v9822_v53 = vrot.slane %v6003_v63, %v12083_v44  ;;  %v9827_v48 = vrot.slane %v6003_v63, %v12084_v8 }
 0xa88   :  { %3667 = vmatprep.subr.mxu1 %v9801_v40  ;;  %v2972_v40 = vmul.f32 %v9811_v33, %v12173_v58  ;;  %v2974_v23 = vmul.f32 %v9811_v33, %v12176_v60  ;;  %v2978_v7 = vmul.f32 %v9811_v33, %v12182_v26 }
 0xa89   :  { %3668 = vmatpush2.msra.mxu1 %v9804_v25  ;;  %v2973_v25 = vmul.f32 %v9817_v39, %v12173_v58  ;;  %v3033_v49 = vmul.f32 %v9822_v53, %v12175_v32  ;;  %v3034_v44 = vmul.f32 %v9827_v48, %v12175_v32  ;;  %v2975_v4 = vmul.f32 %v9817_v39, %v12176_v60  ;;  %v12177_v58 = vld [vmem:[#allocation11_spill] sm:$0xff] }
 0xa8a   :  { %v2996_v51 = vadd.f32 %v2972_v40, %v12174_v1  ;;  %v2976_v63 = vmul.f32 %v9811_v33, %v12177_v58  ;;  %v2998_v40 = vadd.f32 %v2974_v23, %v12178_v52  ;;  %v3035_v55 = vmul.f32 %v9822_v53, %v12179_v42 }
 0xa8b   :  { %v2997_v13 = vadd.f32 %v2973_v25, %v12174_v1  ;;  %v2977_v47 = vmul.f32 %v9817_v39, %v12177_v58  ;;  %v2999_v32 = vadd.f32 %v2975_v4, %v12178_v52  ;;  %v3036_v60 = vmul.f32 %v9827_v48, %v12179_v42  ;;  %v12185_v52 = vld [vmem:[#allocation32_spill] sm:$0xff] }
 0xa8c   :  { %v3057_v8 = vadd.f32 %v3033_v49, %v2996_v51  ;;  %v3000_v27 = vadd.f32 %v2976_v63, %v12180_v61  ;;  %v12181_v49 = vld [vmem:[#allocation21_spill] sm:$0xff]  ;;  %v3059_v36 = vadd.f32 %v3035_v55, %v2998_v40 }
 0xa8d   :  { %v3058_v1 = vadd.f32 %v3034_v44, %v2997_v13  ;;  %v3037_v51 = vmul.f32 %v9822_v53, %v12181_v49  ;;  %v3001_v44 = vadd.f32 %v2977_v47, %v12180_v61  ;;  %v3060_v63 = vadd.f32 %v3036_v60, %v2999_v32  ;;  %v12186_v32 = vld [vmem:[#allocation37_spill] sm:$0xff] }
 0xb0a   :  { %v3236_v54 = vpop.f32.mrf.mxu1 }
 0xb0b   :  { %v3307_v25 = vadd.f32 %v3236_v54, %v3057_v8  ;;  %v3038_v8 = vmul.f32 %v9827_v48, %v12181_v49  ;;  %v2979_v54 = vmul.f32 %v9817_v39, %v12182_v26  ;;  %v3002_v49 = vadd.f32 %v2978_v7, %v12185_v52  ;;  %v12188_v7 = vld [vmem:[#allocation16_spill] sm:$0xff] }
 0xb0c   :  { %v3238_v57 = vpop.f32.mrf.mxu1 }
 0xb0d   :  { %v6016_v23 = vmul.f32 -1.442695, %v3307_v25  ;;  %v3308_v12 = vadd.f32 %v3238_v57, %v3058_v1  ;;  %v3061_v25 = vadd.f32 %v3037_v51, %v3000_v27  ;;  %v12183_v57 = vld [vmem:[#allocation14_spill] sm:$0xff]  ;;  %v12184_v1 = vld [vmem:[#allocation15_spill] sm:$0xff]  ;;  %v3062_v14 = vadd.f32 %v3038_v8, %v3001_v44 }
 0xb0e   :  { %v3242_v58 = vpop.f32.mrf.mxu1  ;;  %v3039_v55 = vmul.f32 %v9822_v53, %v12183_v57  ;;  %v2980_v40 = vmul.f32 %v9811_v33, %v12184_v1  ;;  %v3041_v44 = vmul.f32 %v9822_v53, %v12188_v7  ;;  %v3042_v8 = vmul.f32 %v9827_v48, %v12188_v7 }
 0xb0f   :  { %6591 = vpow2.f32 %v6016_v23  ;;  %v6017_v4 = vmul.f32 -1.442695, %v3308_v12  ;;  %v3309_v13 = vadd.f32 %v3242_v58, %v3059_v36  ;;  %v3003_v23 = vadd.f32 %v2979_v54, %v12185_v52 }
 0xb10   :  { %v3244_v42 = vpop.f32.mrf.mxu1  ;;  %v3040_v36 = vmul.f32 %v9827_v48, %v12183_v57  ;;  %v2981_v12 = vmul.f32 %v9817_v39, %v12184_v1  ;;  %v2982_v58 = vmul.f32 %v9811_v33, %v12186_v32  ;;  %v2983_v54 = vmul.f32 %v9817_v39, %v12186_v32 }
 0xb11   :  { %6593 = vpow2.f32 %v6017_v4  ;;  %v6018_v47 = vmul.f32 -1.442695, %v3309_v13  ;;  %v3310_v61 = vadd.f32 %v3244_v42, %v3060_v63  ;;  %v12187_v42 = vld [vmem:[#allocation34_spill] sm:$0xff]  ;;  %v2984_v52 = vmul.f32 %v9811_v33, %v12102_v6 }
 0xb12   :  { %v3248_v24 = vpop.f32.mrf.mxu1  ;;  %v3004_v4 = vadd.f32 %v2980_v40, %v12187_v42  ;;  %v3043_v40 = vmul.f32 %v9822_v53, %v12101_v10  ;;  %v3006_v57 = vadd.f32 %v2982_v58, %v12100_v46 }
 0xb13   :  { %6595 = vpow2.f32 %v6018_v47  ;;  %v6019_v27 = vmul.f32 -1.442695, %v3310_v61  ;;  %v3311_v60 = vadd.f32 %v3248_v24, %v3061_v25  ;;  %v3063_v61 = vadd.f32 %v3039_v55, %v3002_v49 }
 0xb14   :  { %v3250_v51 = vpop.f32.mrf.mxu1  ;;  %v3064_v25 = vadd.f32 %v3040_v36, %v3003_v23  ;;  %v3005_v47 = vadd.f32 %v2981_v12, %v12187_v42  ;;  %v3044_v49 = vmul.f32 %v9827_v48, %v12101_v10  ;;  %v2985_v55 = vmul.f32 %v9817_v39, %v12102_v6  ;;  %v12189_v12 = vld [vmem:[#allocation23_spill] sm:$0xff] }
 0xb15   :  { %6597 = vpow2.f32 %v6019_v27  ;;  %v6020_v13 = vmul.f32 -1.442695, %v3311_v60  ;;  %v3312_v63 = vadd.f32 %v3250_v51, %v3062_v14  ;;  %v3065_v27 = vadd.f32 %v3041_v44, %v3004_v4  ;;  %v12191_v44 = vld [vmem:[#allocation24_spill] sm:$0xff] }
 0xb16   :  { %v3254_v24 = vpop.f32.mrf.mxu1  ;;  %v3007_v14 = vadd.f32 %v2983_v54, %v12100_v46  ;;  %v3045_v60 = vmul.f32 %v9822_v53, %v12189_v12  ;;  %v3046_v4 = vmul.f32 %v9827_v48, %v12189_v12  ;;  %v2986_v54 = vmul.f32 %v9811_v33, %v12191_v44 }
 0xb17   :  { %6599 = vpow2.f32 %v6020_v13  ;;  %v6021_v1 = vmul.f32 -1.442695, %v3312_v63  ;;  %v3313_v7 = vadd.f32 %v3254_v24, %v3063_v61  ;;  %v3066_v13 = vadd.f32 %v3042_v8, %v3005_v47  ;;  %v12190_v63 = vld [vmem:[#allocation22_spill] sm:$0xff] }
 0xb18   :  { %v3256_v32 = vpop.f32.mrf.mxu1  ;;  %v3008_v58 = vadd.f32 %v2984_v52, %v12190_v63  ;;  %v3067_v46 = vadd.f32 %v3043_v40, %v3006_v57  ;;  %v3047_v8 = vmul.f32 %v9822_v53, %v12105_v56  ;;  %v2987_v52 = vmul.f32 %v9817_v39, %v12191_v44 }
 0xb19   :  { %6601 = vpow2.f32 %v6021_v1  ;;  %v6022_v23 = vmul.f32 -1.442695, %v3313_v7  ;;  %v3314_v36 = vadd.f32 %v3256_v32, %v3064_v25  ;;  %v3068_v32 = vadd.f32 %v3044_v49, %v3007_v14 }
 0xb1a   :  { %v3260_v51 = vpop.f32.mrf.mxu1  ;;  %v3009_v25 = vadd.f32 %v2985_v55, %v12190_v63  ;;  %v3010_v57 = vadd.f32 %v2986_v54, %v11838_v38  ;;  %v3048_v40 = vmul.f32 %v9827_v48, %v12105_v56 }
 0xb1b   :  { %6603 = vpow2.f32 %v6022_v23  ;;  %v6023_v61 = vmul.f32 -1.442695, %v3314_v36  ;;  %v3363_v24 = vadd.f32 %v3260_v51, %v3065_v27  ;;  %v3069_v36 = vadd.f32 %v3045_v60, %v3008_v58  ;;  %v12192_v27 = vld [vmem:[#allocation29_spill] sm:$0xff] }
 0xb1c   :  { %v6592_v1 = vpop.eup %6591  ;;  %v3262_v7 = vpop.f32.mrf.mxu1  ;;  %v2988_v14 = vmul.f32 %v9811_v33, %v12192_v27 }
 0xb1d   :  { %v3339_v47 = vadd.f32 1.0, %v6592_v1  ;;  %6605 = vpow2.f32 %v6023_v61  ;;  %v6024_v12 = vmul.f32 -1.442695, %v3363_v24  ;;  %v3364_v6 = vadd.f32 %v3262_v7, %v3066_v13  ;;  %v12193_v1 = vld [vmem:[#allocation33_spill] sm:$0xff] }
 0xb1e   :  { %v6594_v10 = vpop.eup %6593  ;;  %v3266_v23 = vpop.f32.mrf.mxu1  ;;  %v3070_v24 = vadd.f32 %v3046_v4, %v3009_v25  ;;  %v3011_v13 = vadd.f32 %v2987_v52, %v11838_v38  ;;  %v3049_v60 = vmul.f32 %v9822_v53, %v12193_v1 }
 0xb1f   :  { %6607 = vrcp.f32 %v3339_v47  ;;  %v3340_v49 = vadd.f32 1.0, %v6594_v10  ;;  %v6025_v55 = vmul.f32 -1.442695, %v3364_v6  ;;  %v3365_v51 = vadd.f32 %v3266_v23, %v3067_v46  ;;  %v12194_v23 = vld [vmem:[#allocation38_spill] sm:$0xff] }
 0xb20   :  { %v6596_v44 = vpop.eup %6595  ;;  %6609 = vpow2.f32 %v6024_v12  ;;  %v3268_v61 = vpop.f32.mrf.mxu1  ;;  %v3071_v47 = vadd.f32 %v3047_v8, %v3010_v57  ;;  %v2989_v6 = vmul.f32 %v9817_v39, %v12192_v27  ;;  %v3050_v46 = vmul.f32 %v9827_v48, %v12193_v1 }
 0xb21   :  { %6611 = vrcp.f32 %v3340_v49  ;;  %v3341_v58 = vadd.f32 1.0, %v6596_v44  ;;  %v6026_v54 = vmul.f32 -1.442695, %v3365_v51  ;;  %v3366_v7 = vadd.f32 %v3268_v61, %v3068_v32 }
 0xb22   :  { %v6598_v56 = vpop.eup %6597  ;;  %6613 = vpow2.f32 %v6025_v55  ;;  %v3272_v63 = vpop.f32.mrf.mxu1  ;;  %v3012_v44 = vadd.f32 %v2988_v14, %v7886_v22  ;;  %v2990_v32 = vmul.f32 %v9811_v33, %v12106_v29  ;;  %v3051_v8 = vmul.f32 %v9822_v53, %v12194_v23 }
 0xb23   :  { %6615 = vrcp.f32 %v3341_v58  ;;  %v3342_v10 = vadd.f32 1.0, %v6598_v56  ;;  %v6027_v12 = vmul.f32 -1.442695, %v3366_v7  ;;  %v3367_v4 = vadd.f32 %v3272_v63, %v3069_v36 }
 0xb24   :  { %v6600_v25 = vpop.eup %6599  ;;  %6617 = vpow2.f32 %v6026_v54  ;;  %v3274_v52 = vpop.f32.mrf.mxu1  ;;  %v3072_v61 = vadd.f32 %v3048_v40, %v3011_v13  ;;  %v3013_v63 = vadd.f32 %v2989_v6, %v7886_v22  ;;  %v2991_v36 = vmul.f32 %v9817_v39, %v12106_v29 }
 0xb25   :  { %6619 = vrcp.f32 %v3342_v10  ;;  %v3343_v57 = vadd.f32 1.0, %v6600_v25  ;;  %v6028_v49 = vmul.f32 -1.442695, %v3367_v4  ;;  %v3368_v55 = vadd.f32 %v3274_v52, %v3070_v24  ;;  %v12195_v25 = vld [vmem:[#allocation36_spill] sm:$0xff] }
 0xb26   :  { %v6602_v51 = vpop.eup %6601  ;;  %6621 = vpow2.f32 %v6027_v12  ;;  %v3278_v56 = vpop.f32.mrf.mxu1  ;;  %v3073_v10 = vadd.f32 %v3049_v60, %v3012_v44  ;;  %v3014_v4 = vadd.f32 %v2990_v32, %v12195_v25  ;;  %v3052_v24 = vmul.f32 %v9827_v48, %v12194_v23 }
 0xb27   :  { %6623 = vrcp.f32 %v3343_v57  ;;  %v3344_v14 = vadd.f32 1.0, %v6602_v51  ;;  %v6029_v58 = vmul.f32 -1.442695, %v3368_v55  ;;  %v3369_v54 = vadd.f32 %v3278_v56, %v3071_v47  ;;  %v12196_v51 = vld [vmem:[#allocation40_spill] sm:$0xff]  ;;  %v12197_v55 = vld [vmem:[#allocation43_spill] sm:$0xff] }
 0xb28   :  { %v6604_v7 = vpop.eup %6603  ;;  %6625 = vpow2.f32 %v6028_v49  ;;  %v3280_v1 = vpop.f32.mrf.mxu1  ;;  %v3074_v57 = vadd.f32 %v3050_v46, %v3013_v63  ;;  %v2992_v47 = vmul.f32 %v9811_v33, %v12196_v51  ;;  %v3053_v49 = vmul.f32 %v9822_v53, %v12197_v55 }
 0xb29   :  { %6627 = vrcp.f32 %v3344_v14  ;;  %v3345_v40 = vadd.f32 1.0, %v6604_v7  ;;  %v6030_v13 = vmul.f32 -1.442695, %v3369_v54  ;;  %v3370_v6 = vadd.f32 %v3280_v1, %v3072_v61 }
 0xb2a   :  { %v6606_v12 = vpop.eup %6605  ;;  %6629 = vpow2.f32 %v6029_v58  ;;  %v3284_v52 = vpop.f32.mrf.mxu1  ;;  %v3015_v1 = vadd.f32 %v2991_v36, %v12195_v25  ;;  %v2993_v61 = vmul.f32 %v9817_v39, %v12196_v51  ;;  %v3054_v46 = vmul.f32 %v9827_v48, %v12197_v55 }
 0xb2b   :  { %6631 = vrcp.f32 %v3345_v40  ;;  %v3346_v60 = vadd.f32 1.0, %v6606_v12  ;;  %v6031_v44 = vmul.f32 -1.442695, %v3370_v6  ;;  %v3419_v32 = vadd.f32 %v3284_v52, %v7876_v16 }
 0xb2c   :  { %v6608_v56 = vpop.eup %6607  ;;  %6633 = vpow2.f32 %v6030_v13  ;;  %v3286_v14 = vpop.f32.mrf.mxu1  ;;  %v3075_v7 = vadd.f32 %v3051_v8, %v3014_v4  ;;  %v3016_v13 = vadd.f32 %v2992_v47, %v12110_v31  ;;  %v2994_v36 = vmul.f32 %v9811_v33, %v7990_v45 }
 0xb2d   :  { %v6610_v63 = vpop.eup %6609  ;;  %6635 = vrcp.f32 %v3346_v60  ;;  %v3427_v58 = vmul.f32 %v6608_v56, %v3419_v32  ;;  %v3420_v54 = vadd.f32 %v3286_v14, %v7876_v16  ;;  %v3055_v60 = vmul.f32 %v9822_v53, %v8006_v5 }
 0xb2e   :  { %v6612_v40 = vpop.eup %6611  ;;  %v3395_v6 = vadd.f32 1.0, %v6610_v63  ;;  %6637 = vpow2.f32 %v6031_v44  ;;  %v3290_v12 = vpop.f32.mrf.mxu1  ;;  %v3076_v4 = vadd.f32 %v3052_v24, %v3015_v1  ;;  %v3017_v44 = vadd.f32 %v2993_v61, %v12110_v31 }
 0xb2f   :  { %v6614_v52 = vpop.eup %6613  ;;  %v3435_v51 = vadd.f32 %v3427_v58, %v3073_v10  ;;  %v3428_v25 = vmul.f32 %v6612_v40, %v3420_v54  ;;  %v3421_v55 = vadd.f32 %v3290_v12, %v7972_v37  ;;  %v2995_v53 = vmul.f32 %v9817_v39, %v7990_v45 }
 0xb30   :  { %v6616_v32 = vpop.eup %6615  ;;  %6639 = vrcp.f32 %v3395_v6  ;;  %v3396_v8 = vadd.f32 1.0, %v6614_v52  ;;  %v3292_v56 = vpop.f32.mrf.mxu1  ;;  %v3056_v40 = vmul.f32 %v9827_v48, %v8006_v5  ;;  %v3018_v12 = vadd.f32 %v2994_v36, %v8011_v21 }
 0xb31   :  { %v6618_v14 = vpop.eup %6617  ;;  %6641 = vtanh.f32 %v3435_v51  ;;  %v3436_v47 = vadd.f32 %v3428_v25, %v3074_v57  ;;  %v3429_v63 = vmul.f32 %v6616_v32, %v3421_v55  ;;  %v3422_v33 = vadd.f32 %v3292_v56, %v7972_v37 }
 0xb32   :  { %v6620_v10 = vpop.eup %6619  ;;  %6643 = vrcp.f32 %v3396_v8  ;;  %v3397_v58 = vadd.f32 1.0, %v6618_v14  ;;  %v3296_v54 = vpop.f32.mrf.mxu1  ;;  %v3077_v55 = vadd.f32 %v3053_v49, %v3016_v13 }
 0xb33   :  { %v6622_v24 = vpop.eup %6621  ;;  %6645 = vtanh.f32 %v3436_v47  ;;  %v3437_v1 = vadd.f32 %v3429_v63, %v3075_v7  ;;  %v3430_v61 = vmul.f32 %v6620_v10, %v3422_v33  ;;  %v3423_v51 = vadd.f32 %v3296_v54, %v7974_v19 }
 0xb34   :  { %v6624_v25 = vpop.eup %6623  ;;  %6647 = vrcp.f32 %v3397_v58  ;;  %v3398_v57 = vadd.f32 1.0, %v6622_v24  ;;  %v3298_v6 = vpop.f32.mrf.mxu1  ;;  %v3078_v7 = vadd.f32 %v3054_v46, %v3017_v44  ;;  %v3019_v47 = vadd.f32 %v2995_v53, %v8011_v21 }
 0xb35   :  { %v6626_v52 = vpop.eup %6625  ;;  %6649 = vtanh.f32 %v3437_v1  ;;  %v3438_v32 = vadd.f32 %v3430_v61, %v3076_v4  ;;  %v3431_v39 = vmul.f32 %v6624_v25, %v3423_v51  ;;  %v3424_v8 = vadd.f32 %v3298_v6, %v7974_v19 }
 0xb36   :  { %v6628_v48 = vpop.eup %6627  ;;  %6651 = vrcp.f32 %v3398_v57  ;;  %v3399_v56 = vadd.f32 1.0, %v6626_v52  ;;  %v3302_v14 = vpop.f32.mrf.mxu1  ;;  %v3079_v4 = vadd.f32 %v3055_v60, %v3018_v12  ;;  %v3080_v25 = vadd.f32 %v3056_v40, %v3019_v47 }
 0xb37   :  { %v6630_v63 = vpop.eup %6629  ;;  %6653 = vtanh.f32 %v3438_v32  ;;  %v3439_v33 = vadd.f32 %v3431_v39, %v3077_v55  ;;  %v3432_v49 = vmul.f32 %v6628_v48, %v3424_v8  ;;  %v3425_v13 = vadd.f32 %v3302_v14, %v8020_v3 }
 0xb38   :  { %v6632_v36 = vpop.eup %6631  ;;  %6655 = vrcp.f32 %v3399_v56  ;;  %v3400_v10 = vadd.f32 1.0, %v6630_v63  ;;  %v3304_v58 = vpop.f32.mrf.mxu1 }
 0xb39   :  { %v6634_v54 = vpop.eup %6633  ;;  %6657 = vtanh.f32 %v3439_v33  ;;  %v3440_v24 = vadd.f32 %v3432_v49, %v3078_v7  ;;  %v3433_v1 = vmul.f32 %v6632_v36, %v3425_v13  ;;  %v3426_v46 = vadd.f32 %v3304_v58, %v8020_v3 }
 0xb3a   :  { %v6636_v44 = vpop.eup %6635  ;;  %6659 = vrcp.f32 %v3400_v10  ;;  %v3401_v53 = vadd.f32 1.0, %v6634_v54 }
 0xb3b   :  { %v6638_v61 = vpop.eup %6637  ;;  %6661 = vtanh.f32 %v3440_v24  ;;  %v3441_v51 = vadd.f32 %v3433_v1, %v3079_v4  ;;  %v3434_v57 = vmul.f32 %v6636_v44, %v3426_v46 }
 0xb3c   :  { %6663 = vrcp.f32 %v3401_v53  ;;  %v3402_v55 = vadd.f32 1.0, %v6638_v61 }
 0xb3d   :  { %v6640_v6 = vpop.eup %6639  ;;  %6665 = vtanh.f32 %v3441_v51  ;;  %v3442_v60 = vadd.f32 %v3434_v57, %v3080_v25 }
 0xb3e   :  { %v6642_v12 = vpop.eup %6641  ;;  %6667 = vrcp.f32 %v3402_v55  ;;  %v3451_v52 = vsub.f32 1.0, %v6640_v6  ;;  %v3467_v33 = vmul.f32 %v6640_v6, %v9523_v11 }
 0xb3f   :  { %v6644_v32 = vpop.eup %6643  ;;  %6669 = vtanh.f32 %v3442_v60 }
 0xb40   :  { %v6646_v39 = vpop.eup %6645  ;;  %v3452_v8 = vsub.f32 1.0, %v6644_v32  ;;  %v3459_v56 = vmul.f32 %v6642_v12, %v3451_v52  ;;  %v3468_v63 = vmul.f32 %v6644_v32, %v9525_v18 }
 0xb41   :  { %v6648_v48 = vpop.eup %6647 }
 0xb42   :  { %v6650_v7 = vpop.eup %6649  ;;  %v3460_v14 = vmul.f32 %v6646_v39, %v3452_v8  ;;  %v3453_v40 = vsub.f32 1.0, %v6648_v48  ;;  %v3475_v4 = vadd.f32 %v3467_v33, %v3459_v56  ;;  %v3469_v18 = vmul.f32 %v6648_v48, %v9527_v41 }
 0xb43   :  { %v6652_v47 = vpop.eup %6651 }
 0xb44   :  { %v6654_v49 = vpop.eup %6653  ;;  %v3476_v13 = vadd.f32 %v3468_v63, %v3460_v14  ;;  %v3454_v36 = vsub.f32 1.0, %v6652_v47  ;;  %v3461_v58 = vmul.f32 %v6650_v7, %v3453_v40  ;;  %v3470_v1 = vmul.f32 %v6652_v47, %v9529_v0 }
 0xb45   :  { %v6656_v10 = vpop.eup %6655 }
 0xb46   :  { %v6658_v54 = vpop.eup %6657  ;;  %3669 = vmatprep.mubr.f32.mxu1 %v3476_v13  ;;  %v3462_v24 = vmul.f32 %v6654_v49, %v3454_v36  ;;  %v3455_v46 = vsub.f32 1.0, %v6656_v10  ;;  %v3477_v25 = vadd.f32 %v3469_v18, %v3461_v58  ;;  %v3471_v0 = vmul.f32 %v6656_v10, %v9531_v15  ;;  %v7213_v36 = vld [vmem:[#allocation2 + $0xf8] sm:$0xff]  ;;  %v12199_v10 = vld [vmem:[#allocation101_spill] sm:$0xff] }
 0xb47   :  { %v6660_v44 = vpop.eup %6659  ;;  %3670 = vmatmul.mubr.f32.vlgmr.msra.gmra.mxu1 %v3475_v4  ;;  %v12207_v4 = vld [vmem:[#allocation48_spill] sm:$0xff]  ;;  %v12208_v58 = vld [vmem:[#allocation49_spill] sm:$0xff]  ;;  %v12214_v18 = vld [vmem:[#allocation54_spill] sm:$0xff] }
 0xb48   :  { %v6662_v53 = vpop.eup %6661  ;;  %v3478_v61 = vadd.f32 %v3470_v1, %v3462_v24  ;;  %v3456_v51 = vsub.f32 1.0, %v6660_v44  ;;  %v3463_v57 = vmul.f32 %v6658_v54, %v3455_v46  ;;  %v3472_v60 = vmul.f32 %v6660_v44, %v9533_v17  ;;  %v12209_v54 = vld [vmem:[#allocation50_spill] sm:$0xff]  ;;  %v12210_v24 = vld [vmem:[#allocation104_spill] sm:$0xff]  ;;  %v12211_v1 = vld [vmem:[#allocation51_spill] sm:$0xff] }
 0xb49   :  { %v6664_v11 = vpop.eup %6663  ;;  %v12212_v46 = vld [vmem:[#allocation52_spill] sm:$0xff]  ;;  %v12213_v44 = vld [vmem:[#allocation53_spill] sm:$0xff] }
 0xb4a   :  { %v6666_v55 = vpop.eup %6665  ;;  %3675 = vmatprep.mubr.f32.mxu1 %v3478_v61  ;;  %v3464_v6 = vmul.f32 %v6662_v53, %v3456_v51  ;;  %v3457_v12 = vsub.f32 1.0, %v6664_v11  ;;  %v3479_v41 = vadd.f32 %v3471_v0, %v3463_v57  ;;  %v3473_v14 = vmul.f32 %v6664_v11, %v9535_v59  ;;  %v12215_v53 = vld [vmem:[#allocation105_spill] sm:$0xff]  ;;  %v12216_v61 = vld [vmem:[#allocation55_spill] sm:$0xff]  ;;  %v12217_v51 = vld [vmem:[#allocation56_spill] sm:$0xff] }
 0xb4b   :  { %v6668_v52 = vpop.eup %6667  ;;  %3676 = vmatmul.mubr.f32.gmra.mxu1 %v3477_v25  ;;  %v12218_v11 = vld [vmem:[#allocation57_spill] sm:$0xff]  ;;  %v12219_v25 = vld [vmem:[#allocation58_spill] sm:$0xff]  ;;  %v12225_v0 = vld [vmem:[#allocation107_spill] sm:$0xff] }
 0xb4c   :  { %v6670_v32 = vpop.eup %6669  ;;  %v3480_v39 = vadd.f32 %v3472_v60, %v3464_v6  ;;  %v3458_v8 = vsub.f32 1.0, %v6668_v52  ;;  %v3465_v48 = vmul.f32 %v6666_v55, %v3457_v12  ;;  %v3474_v7 = vmul.f32 %v6668_v52, %v9537_v20  ;;  %v12220_v57 = vld [vmem:[#allocation106_spill] sm:$0xff]  ;;  %v12221_v55 = vld [vmem:[#allocation59_spill] sm:$0xff]  ;;  %v12222_v6 = vld [vmem:[#allocation60_spill] sm:$0xff] }
 0xb4d   :  { %v12223_v60 = vld [vmem:[#allocation61_spill] sm:$0xff]  ;;  %v10037_v12 = vld [vmem:[%s11172_s3 + $0x38] sm:$0xff] }
 0xb4e   :  { %3681 = vmatprep.mubr.f32.mxu1 %v3480_v39  ;;  %v3466_v56 = vmul.f32 %v6670_v32, %v3458_v8  ;;  %v3481_v40 = vadd.f32 %v3473_v14, %v3465_v48  ;;  %v12224_v52 = vld [vmem:[#allocation62_spill] sm:$0xff]  ;;  %v12226_v32 = vld [vmem:[#allocation63_spill] sm:$0xff]  ;;  %v12227_v39 = vld [vmem:[#allocation64_spill] sm:$0xff] }
 0xb4f   :  { %3682 = vmatmul.mubr.f32.gmra.mxu1 %v3479_v41  ;;  %v10049_v8 = vld [vmem:[%s11172_s3 + $0x40] sm:$0xff]  ;;  %v12228_v41 = vld [vmem:[#allocation65_spill] sm:$0xff]  ;;  %v12229_v48 = vld [vmem:[#allocation66_spill] sm:$0xff] }
 0xb50   :  { %v3482_v63 = vadd.f32 %v3474_v7, %v3466_v56  ;;  %v12230_v56 = vld [vmem:[#allocation67_spill] sm:$0xff]  ;;  %v12231_v7 = vld [vmem:[#allocation68_spill] sm:$0xff] }
 0xb51   :  { %v10061_v14 = vld [vmem:[%s11172_s3 + $0x48] sm:$0xff] }
 0xb52   :  { %3687 = vmatprep.mubr.f32.mxu1 %v3482_v63  ;;  %v12232_v63 = vld [vmem:[#allocation69_spill] sm:$0xff] }
 0xb53   :  { %3688 = vmatmul.mubr.f32.gmra.mxu1 %v3481_v40  ;;  %v12233_v40 = vld [vmem:[#allocation70_spill] sm:$0xff] }
 0xb54   :  { %4282 = vmatprep.mubr.f32.mxu1 %v11705_v62 }
 0xc07   :  { %v9962_v17 = vpop.f32.mrf.mxu1 }
 0xc09   :  { %v9964_v15 = vpop.f32.mrf.mxu1 }
 0xc0b   :  { %v9966_v47 = vpop.f32.mrf.mxu1 }
 0xc0d   :  { %v9968_v33 = vpop.f32.mrf.mxu1 }
 0xc0f   :  { %v9970_v49 = vpop.f32.mrf.mxu1 }
 0xc11   :  { %v9972_v20 = vpop.f32.mrf.mxu1 }
 0xc13   :  { %v9974_v13 = vpop.f32.mrf.mxu1 }
 0xc15   :  { %v9976_v59 = vpop.f32.mrf.mxu1 }
 0xc16   :  { %3718 = vmatprep.subr.mxu0 %v9976_v59 }
 0xc17   :  { %3719 = vmatpush1.msra.mxu0 %v9974_v13 }
 0xc18   :  { %3720 = vmatprep.subr.mxu0 %v9972_v20 }
 0xc19   :  { %3721 = vmatpush1.msra.mxu0 %v9970_v49 }
 0xc1a   :  { %3722 = vmatprep.subr.mxu0 %v9968_v33 }
 0xc1b   :  { %3723 = vmatpush1.msra.mxu0 %v9966_v47 }
 0xc1c   :  { %3724 = vmatprep.subr.mxu0 %v9964_v15 }
 0xc1d   :  { %3725 = vmatpush1.msra.mxu0 %v9962_v17 }
 0xc1e   :  { %6034 = vmatmul.mubr.msk.f32.vlgmr.msra.gmra.mxu0 %vm497_vm0, %v9550_v34  ;;  %4129 = vmatprep.subr.mxu0 %v7213_v36  ;;  %v12198_v34 = vld [vmem:[#allocation100_spill] sm:$0xff]  ;;  %v12234_v36 = vld [vmem:[#allocation71_spill] sm:$0xff] }
 0xc1f   :  { %3764 = vmatprep.mubr.f32.mxu0 %v11705_v62  ;;  %4130 = vmatpush1.msra.mxu0 %v9556_v30  ;;  %v12200_v30 = vld [vmem:[#allocation102_spill] sm:$0xff] }
 0xc20   :  { %4131 = vmatprep.subr.mxu0 %v9559_v43  ;;  %v12201_v43 = vld [vmem:[#allocation27_spill] sm:$0xff] }
 0xc21   :  { %4132 = vmatpush1.msra.mxu0 %v9562_v9  ;;  %v12202_v9 = vld [vmem:[#allocation44_spill] sm:$0xff] }
 0xc22   :  { %6035 = vmatmul.mubr.msk.f32.gmra.mxu0 %vm497_vm0, %v9568_v28  ;;  %4133 = vmatprep.subr.mxu0 %v9572_v35  ;;  %v12203_v28 = vld [vmem:[#allocation45_spill] sm:$0xff]  ;;  %v12204_v35 = vld [vmem:[#allocation46_spill] sm:$0xff] }
 0xc23   :  { %3770 = vmatprep.mubr.f32.mxu0 %v11705_v62  ;;  %4134 = vmatpush1.msra.mxu0 %v9576_v50  ;;  %v12205_v50 = vld [vmem:[#allocation103_spill] sm:$0xff] }
 0xc24   :  { %4135 = vmatprep.subr.mxu0 %v9579_v2  ;;  %v12206_v2 = vld [vmem:[#allocation47_spill] sm:$0xff] }
 0xc25   :  { %4136 = vmatpush1.msra.mxu0 %v12198_v34  ;;  %v12235_v34 = vld [vmem:[#allocation72_spill] sm:$0xff] }
 0xc26   :  { %6036 = vmatmul.mubr.msk.f32.gmra.mxu0 %vm497_vm0, %v12199_v10  ;;  %4137 = vmatprep.subr.mxu0 %v12200_v30  ;;  %v10073_v10 = vld [vmem:[%s11172_s3 + $0x50] sm:$0xff] }
 0xc27   :  { %3776 = vmatprep.mubr.f32.mxu0 %v11705_v62  ;;  %4138 = vmatpush1.msra.mxu0 %v12201_v43  ;;  %v12236_v30 = vld [vmem:[#allocation73_spill] sm:$0xff]  ;;  %v12237_v43 = vld [vmem:[#allocation74_spill] sm:$0xff] }
 0xc28   :  { %4139 = vmatprep.subr.mxu0 %v12202_v9  ;;  %v12238_v9 = vld [vmem:[#allocation75_spill] sm:$0xff] }
 0xc29   :  { %4140 = vmatpush1.msra.mxu0 %v12203_v28  ;;  %v12239_v28 = vld [vmem:[#allocation76_spill] sm:$0xff] }
 0xc2a   :  { %6037 = vmatmul.mubr.msk.f32.gmra.mxu0 %vm497_vm0, %v12204_v35  ;;  %4141 = vmatprep.subr.mxu0 %v12205_v50  ;;  %v10085_v35 = vld [vmem:[%s11172_s3 + $0x58] sm:$0xff]  ;;  %v12240_v50 = vld [vmem:[#allocation77_spill] sm:$0xff] }
 0xc2b   :  { %3782 = vmatprep.mubr.f32.mxu0 %v11705_v62  ;;  %4142 = vmatpush1.msra.mxu0 %v12206_v2  ;;  %v12241_v2 = vld [vmem:[#allocation78_spill] sm:$0xff] }
 0xc2c   :  { %4143 = vmatprep.subr.mxu0 %v12207_v4  ;;  %v12242_v4 = vld [vmem:[#allocation79_spill] sm:$0xff] }
 0xc2d   :  { %4144 = vmatpush1.msra.mxu0 %v12208_v58  ;;  %v12243_v58 = vld [vmem:[#allocation80_spill] sm:$0xff] }
 0xc2e   :  { %6038 = vmatmul.mubr.msk.f32.gmra.mxu0 %vm497_vm0, %v12209_v54  ;;  %4145 = vmatprep.subr.mxu0 %v12210_v24  ;;  %v12244_v54 = vld [vmem:[#allocation81_spill] sm:$0xff]  ;;  %v12245_v24 = vld [vmem:[#allocation82_spill] sm:$0xff] }
 0xc2f   :  { %3788 = vmatprep.mubr.f32.mxu0 %v11705_v62  ;;  %4146 = vmatpush1.msra.mxu0 %v12211_v1  ;;  %v12246_v1 = vld [vmem:[#allocation83_spill] sm:$0xff] }
 0xc30   :  { %4147 = vmatprep.subr.mxu0 %v12212_v46  ;;  %v12247_v46 = vld [vmem:[#allocation84_spill] sm:$0xff] }
 0xc31   :  { %4148 = vmatpush1.msra.mxu0 %v12213_v44  ;;  %v12248_v44 = vld [vmem:[#allocation85_spill] sm:$0xff] }
 0xc32   :  { %6039 = vmatmul.mubr.msk.f32.gmra.mxu0 %vm497_vm0, %v12214_v18  ;;  %4149 = vmatprep.subr.mxu0 %v12215_v53  ;;  %v12249_v18 = vld [vmem:[#allocation86_spill] sm:$0xff]  ;;  %v12250_v53 = vld [vmem:[#allocation87_spill] sm:$0xff] }
 0xc33   :  { %3794 = vmatprep.mubr.f32.mxu0 %v11705_v62  ;;  %4150 = vmatpush1.msra.mxu0 %v12216_v61  ;;  %v12251_v61 = vld [vmem:[#allocation88_spill] sm:$0xff] }
 0xc34   :  { %4151 = vmatprep.subr.mxu0 %v12217_v51  ;;  %v12252_v51 = vld [vmem:[#allocation89_spill] sm:$0xff] }
 0xc35   :  { %4152 = vmatpush1.msra.mxu0 %v12218_v11  ;;  %v12253_v11 = vld [vmem:[#allocation90_spill] sm:$0xff] }
 0xc36   :  { %6040 = vmatmul.mubr.msk.f32.gmra.mxu0 %vm497_vm0, %v12219_v25  ;;  %4153 = vmatprep.subr.mxu0 %v12220_v57  ;;  %v12254_v25 = vld [vmem:[#allocation91_spill] sm:$0xff]  ;;  %v12255_v57 = vld [vmem:[#allocation92_spill] sm:$0xff] }
 0xc37   :  { %3800 = vmatprep.mubr.f32.mxu0 %v11705_v62  ;;  %4154 = vmatpush1.msra.mxu0 %v12221_v55  ;;  %v12256_v55 = vld [vmem:[#allocation93_spill] sm:$0xff] }
 0xc38   :  { %4155 = vmatprep.subr.mxu0 %v12222_v6  ;;  %v12257_v6 = vld [vmem:[#allocation94_spill] sm:$0xff] }
 0xc39   :  { %4156 = vmatpush1.msra.mxu0 %v12223_v60  ;;  %v12258_v60 = vld [vmem:[#allocation95_spill] sm:$0xff] }
 0xc3a   :  { %6041 = vmatmul.mubr.msk.f32.gmra.mxu0 %vm497_vm0, %v10037_v12  ;;  %4157 = vmatprep.subr.mxu0 %v12224_v52  ;;  %v12259_v52 = vld [vmem:[#allocation96_spill] sm:$0xff] }
 0xc3b   :  { %3806 = vmatprep.mubr.f32.mxu0 %v11705_v62  ;;  %4158 = vmatpush1.msra.mxu0 %v12225_v0  ;;  %v6032_v0 = vld [vmem:[%s11169_s0 + $0x14] ss:$8 sm:$0x3] }
 0xc3c   :  { %4159 = vmatprep.subr.mxu0 %v12226_v32  ;;  %v12260_v32 = vld [vmem:[#allocation28_spill] sm:$0xff] }
 0xc3d   :  { %4160 = vmatpush1.msra.mxu0 %v12227_v39  ;;  %v10113_v39 = vrot.slane %v6032_v0, %v12260_v32 }
 0xc3e   :  { %6042 = vmatmul.mubr.msk.f32.gmra.mxu0 %vm497_vm0, %v10049_v8  ;;  %4161 = vmatprep.subr.mxu0 %v12228_v41  ;;  %v6033_v41 = vld [vmem:[%s11169_s0 + $0x15] ss:$8 sm:$0x3] }
 0xc3f   :  { %3812 = vmatprep.mubr.f32.mxu0 %v11705_v62  ;;  %4162 = vmatpush2.msra.mxu0 %v12229_v48  ;;  %v12261_v48 = vld [vmem:[#allocation31_spill] sm:$0xff] }
 0xc40   :  { %4163 = vmatprep.subr.mxu0 %v12230_v56  ;;  %v10119_v56 = vrot.slane %v6032_v0, %v12261_v48 }
 0xc41   :  { %4164 = vmatpush2.msra.mxu0 %v12231_v7  ;;  %v12262_v7 = vld [vmem:[#allocation17_spill] sm:$0xff] }
 0xc42   :  { %6043 = vmatmul.mubr.msk.f32.gmra.mxu0 %vm497_vm0, %v10061_v14  ;;  %4165 = vmatprep.subr.mxu0 %v12232_v63  ;;  %v3496_v63 = vmul.f32 %v10113_v39, %v12262_v7 }
 0xc43   :  { %3818 = vmatprep.mubr.f32.mxu0 %v11705_v62  ;;  %4166 = vmatpush2.msra.mxu0 %v12233_v40  ;;  %v10124_v40 = vrot.slane %v6033_v41, %v12260_v32 }
 0xc44   :  { %4167 = vmatprep.subr.mxu0 %v12234_v36  ;;  %v3497_v36 = vmul.f32 %v10119_v56, %v12262_v7 }
 0xc45   :  { %4168 = vmatpush2.msra.mxu0 %v12235_v34  ;;  %v10129_v34 = vrot.slane %v6033_v41, %v12261_v48  ;;  %v12270_v41 = vld [vmem:[#allocation21_spill] sm:$0xff] }
 0xc46   :  { %6044 = vmatmul.mubr.msk.f32.gmra.mxu0 %vm497_vm0, %v10073_v10  ;;  %4169 = vmatprep.subr.mxu0 %v12236_v30  ;;  %v12263_v30 = vld [vmem:[#allocation30_spill] sm:$0xff] }
 0xc47   :  { %3824 = vmatprep.mubr.f32.mxu0 %v11705_v62  ;;  %4170 = vmatpush2.msra.mxu0 %v12237_v43  ;;  %v3520_v43 = vadd.f32 %v3496_v63, %v12263_v30  ;;  %v3561_v63 = vmul.f32 %v10124_v40, %v12270_v41 }
 0xc48   :  { %4171 = vmatprep.subr.mxu0 %v12238_v9  ;;  %v12264_v9 = vld [vmem:[#allocation8_spill] sm:$0xff] }
 0xc49   :  { %4172 = vmatpush2.msra.mxu0 %v12239_v28  ;;  %v3557_v28 = vmul.f32 %v10124_v40, %v12264_v9 }
 0xc4a   :  { %6045 = vmatmul.mubr.msk.f32.gmra.mxu0 %vm497_vm0, %v10085_v35  ;;  %4173 = vmatprep.subr.mxu0 %v12240_v50  ;;  %v12265_v50 = vld [vmem:[#allocation9_spill] sm:$0xff] }
 0xc4b   :  { %4174 = vmatpush2.msra.mxu0 %v12241_v2  ;;  %v3498_v2 = vmul.f32 %v10113_v39, %v12265_v50 }
 0xc4c   :  { %4175 = vmatprep.subr.mxu0 %v12242_v4  ;;  %v3521_v4 = vadd.f32 %v3497_v36, %v12263_v30 }
 0xc4d   :  { %4176 = vmatpush2.msra.mxu0 %v12243_v58  ;;  %v3558_v58 = vmul.f32 %v10129_v34, %v12264_v9 }
 0xc4e   :  { %4177 = vmatprep.subr.mxu0 %v12244_v54  ;;  %v3499_v54 = vmul.f32 %v10119_v56, %v12265_v50 }
 0xc4f   :  { %4178 = vmatpush2.msra.mxu0 %v12245_v24  ;;  %v12266_v24 = vld [vmem:[#allocation11_spill] sm:$0xff] }
 0xc50   :  { %4179 = vmatprep.subr.mxu0 %v12246_v1  ;;  %v3500_v1 = vmul.f32 %v10113_v39, %v12266_v24 }
 0xc51   :  { %4180 = vmatpush2.msra.mxu0 %v12247_v46  ;;  %v3581_v46 = vadd.f32 %v3557_v28, %v3520_v43 }
 0xc52   :  { %4181 = vmatprep.subr.mxu0 %v12248_v44  ;;  %v12267_v44 = vld [vmem:[#allocation10_spill] sm:$0xff] }
 0xc53   :  { %4182 = vmatpush2.msra.mxu0 %v12249_v18  ;;  %v3522_v18 = vadd.f32 %v3498_v2, %v12267_v44  ;;  %v3502_v2 = vmul.f32 %v10113_v39, %v12182_v26 }
 0xc54   :  { %4183 = vmatprep.subr.mxu0 %v12250_v53  ;;  %v12268_v53 = vld [vmem:[#allocation19_spill] sm:$0xff] }
 0xc55   :  { %4184 = vmatpush2.msra.mxu0 %v12251_v61  ;;  %v3559_v61 = vmul.f32 %v10124_v40, %v12268_v53 }
 0xc56   :  { %4185 = vmatprep.subr.mxu0 %v12252_v51 }
 0xc57   :  { %4186 = vmatpush2.msra.mxu0 %v12253_v11  ;;  %v3501_v11 = vmul.f32 %v10119_v56, %v12266_v24  ;;  %v3583_v28 = vadd.f32 %v3559_v61, %v3522_v18  ;;  %v12272_v61 = vld [vmem:[#allocation15_spill] sm:$0xff] }
 0xc58   :  { %4187 = vmatprep.subr.mxu0 %v12254_v25 }
 0xc59   :  { %4188 = vmatpush2.msra.mxu0 %v12255_v57  ;;  %v3582_v57 = vadd.f32 %v3558_v58, %v3521_v4  ;;  %v3562_v58 = vmul.f32 %v10129_v34, %v12270_v41 }
 0xc5a   :  { %4189 = vmatprep.subr.mxu0 %v12256_v55  ;;  %v3523_v55 = vadd.f32 %v3499_v54, %v12267_v44  ;;  %v3503_v54 = vmul.f32 %v10119_v56, %v12182_v26  ;;  %v12273_v44 = vld [vmem:[#allocation32_spill] sm:$0xff]  ;;  %v12278_v26 = vld [vmem:[#allocation18_spill] sm:$0xff] }
 0xc5b   :  { %4190 = vmatpush2.msra.mxu0 %v12257_v6  ;;  %v3560_v6 = vmul.f32 %v10129_v34, %v12268_v53  ;;  %v3526_v41 = vadd.f32 %v3502_v2, %v12273_v44  ;;  %v12275_v2 = vld [vmem:[#allocation16_spill] sm:$0xff] }
 0xc5c   :  { %4191 = vmatprep.subr.mxu0 %v12258_v60 }
 0xc5d   :  { %4192 = vmatpush2.msra.mxu0 %v12259_v52  ;;  %v12269_v52 = vld [vmem:[#allocation12_spill] sm:$0xff] }
 0xc5e   :  { %v3524_v0 = vadd.f32 %v3500_v1, %v12269_v52  ;;  %v3525_v4 = vadd.f32 %v3501_v11, %v12269_v52 }
 0xc60   :  { %v3586_v9 = vadd.f32 %v3562_v58, %v3525_v4  ;;  %v3565_v4 = vmul.f32 %v10124_v40, %v12275_v2  ;;  %v3566_v58 = vmul.f32 %v10129_v34, %v12275_v2 }
 0xcde   :  { %v3760_v51 = vpop.f32.mrf.mxu0 }
 0xcdf   :  { %v3831_v25 = vadd.f32 %v3760_v51, %v3581_v46  ;;  %v3584_v51 = vadd.f32 %v3560_v6, %v3523_v55  ;;  %v3505_v55 = vmul.f32 %v10119_v56, %v12272_v61 }
 0xce0   :  { %v3762_v60 = vpop.f32.mrf.mxu0 }
 0xce1   :  { %v6046_v36 = vmul.f32 -1.442695, %v3831_v25  ;;  %v3832_v43 = vadd.f32 %v3762_v60, %v3582_v57  ;;  %v3585_v25 = vadd.f32 %v3561_v63, %v3524_v0  ;;  %v12271_v57 = vld [vmem:[#allocation14_spill] sm:$0xff]  ;;  %v3504_v60 = vmul.f32 %v10113_v39, %v12272_v61  ;;  %v12274_v63 = vld [vmem:[#allocation37_spill] sm:$0xff] }
 0xce2   :  { %v3766_v24 = vpop.f32.mrf.mxu0  ;;  %v3563_v18 = vmul.f32 %v10124_v40, %v12271_v57 }
 0xce3   :  { %6671 = vpow2.f32 %v6046_v36  ;;  %v6047_v1 = vmul.f32 -1.442695, %v3832_v43  ;;  %v3833_v46 = vadd.f32 %v3766_v24, %v3583_v28  ;;  %v3527_v36 = vadd.f32 %v3503_v54, %v12273_v44  ;;  %v12277_v44 = vld [vmem:[#allocation39_spill] sm:$0xff] }
 0xce4   :  { %v3768_v53 = vpop.f32.mrf.mxu0  ;;  %v3564_v24 = vmul.f32 %v10129_v34, %v12271_v57  ;;  %v3506_v43 = vmul.f32 %v10113_v39, %v12274_v63  ;;  %v3507_v54 = vmul.f32 %v10119_v56, %v12274_v63  ;;  %v3508_v61 = vmul.f32 %v10113_v39, %v12277_v44 }
 0xce5   :  { %6673 = vpow2.f32 %v6047_v1  ;;  %v6048_v11 = vmul.f32 -1.442695, %v3833_v46  ;;  %v3834_v52 = vadd.f32 %v3768_v53, %v3584_v51  ;;  %v3528_v53 = vadd.f32 %v3504_v60, %v12187_v42 }
 0xce6   :  { %v3772_v50 = vpop.f32.mrf.mxu0  ;;  %v3588_v51 = vadd.f32 %v3564_v24, %v3527_v36  ;;  %v3530_v30 = vadd.f32 %v3506_v43, %v12278_v26 }
 0xce7   :  { %6675 = vpow2.f32 %v6048_v11  ;;  %v6049_v6 = vmul.f32 -1.442695, %v3834_v52  ;;  %v3835_v0 = vadd.f32 %v3772_v50, %v3585_v25  ;;  %v3587_v52 = vadd.f32 %v3563_v18, %v3526_v41  ;;  %v12276_v11 = vld [vmem:[#allocation20_spill] sm:$0xff] }
 0xce8   :  { %v3774_v28 = vpop.f32.mrf.mxu0  ;;  %v3529_v25 = vadd.f32 %v3505_v55, %v12187_v42  ;;  %v3567_v60 = vmul.f32 %v10124_v40, %v12276_v11  ;;  %v3568_v41 = vmul.f32 %v10129_v34, %v12276_v11  ;;  %v3509_v18 = vmul.f32 %v10119_v56, %v12277_v44  ;;  %v12279_v55 = vld [vmem:[#allocation23_spill] sm:$0xff]  ;;  %v12282_v44 = vld [vmem:[#allocation25_spill] sm:$0xff] }
 0xce9   :  { %6677 = vpow2.f32 %v6049_v6  ;;  %v6050_v1 = vmul.f32 -1.442695, %v3835_v0  ;;  %v3836_v46 = vadd.f32 %v3774_v28, %v3586_v9  ;;  %v3589_v6 = vadd.f32 %v3565_v4, %v3528_v53  ;;  %v12281_v4 = vld [vmem:[#allocation24_spill] sm:$0xff] }
 0xcea   :  { %v3778_v50 = vpop.f32.mrf.mxu0  ;;  %v3531_v9 = vadd.f32 %v3507_v54, %v12278_v26  ;;  %v3569_v0 = vmul.f32 %v10124_v40, %v12279_v55  ;;  %v3570_v53 = vmul.f32 %v10129_v34, %v12279_v55  ;;  %v3510_v54 = vmul.f32 %v10113_v39, %v12281_v4 }
 0xceb   :  { %6679 = vpow2.f32 %v6050_v1  ;;  %v6051_v57 = vmul.f32 -1.442695, %v3836_v46  ;;  %v3837_v2 = vadd.f32 %v3778_v50, %v3587_v52  ;;  %v3590_v1 = vadd.f32 %v3566_v58, %v3529_v25  ;;  %v12280_v46 = vld [vmem:[#allocation22_spill] sm:$0xff] }
 0xcec   :  { %v3780_v63 = vpop.f32.mrf.mxu0  ;;  %v3532_v43 = vadd.f32 %v3508_v61, %v12280_v46  ;;  %v3591_v26 = vadd.f32 %v3567_v60, %v3530_v30  ;;  %v3571_v58 = vmul.f32 %v10124_v40, %v12282_v44  ;;  %v3511_v61 = vmul.f32 %v10119_v56, %v12281_v4 }
 0xced   :  { %6681 = vpow2.f32 %v6051_v57  ;;  %v6052_v36 = vmul.f32 -1.442695, %v3837_v2  ;;  %v3838_v24 = vadd.f32 %v3780_v63, %v3588_v51  ;;  %v3592_v63 = vadd.f32 %v3568_v41, %v3531_v9 }
 0xcee   :  { %v3784_v28 = vpop.f32.mrf.mxu0  ;;  %v3533_v51 = vadd.f32 %v3509_v18, %v12280_v46  ;;  %v3534_v30 = vadd.f32 %v3510_v54, %v11838_v38  ;;  %v3572_v60 = vmul.f32 %v10129_v34, %v12282_v44 }
 0xcef   :  { %6683 = vpow2.f32 %v6052_v36  ;;  %v6053_v52 = vmul.f32 -1.442695, %v3838_v24  ;;  %v3887_v50 = vadd.f32 %v3784_v28, %v3589_v6  ;;  %v3593_v24 = vadd.f32 %v3569_v0, %v3532_v43 }
 0xcf0   :  { %v6672_v57 = vpop.eup %6671  ;;  %v3786_v2 = vpop.f32.mrf.mxu0  ;;  %v3512_v6 = vmul.f32 %v10113_v39, %v12192_v27 }
 0xcf1   :  { %v3863_v25 = vadd.f32 1.0, %v6672_v57  ;;  %6685 = vpow2.f32 %v6053_v52  ;;  %v6054_v55 = vmul.f32 -1.442695, %v3887_v50  ;;  %v3888_v11 = vadd.f32 %v3786_v2, %v3590_v1  ;;  %v12283_v57 = vld [vmem:[#allocation33_spill] sm:$0xff] }
 0xcf2   :  { %v6674_v42 = vpop.eup %6673  ;;  %v3790_v36 = vpop.f32.mrf.mxu0  ;;  %v3594_v50 = vadd.f32 %v3570_v53, %v3533_v51  ;;  %v3535_v1 = vadd.f32 %v3511_v61, %v11838_v38  ;;  %v3573_v0 = vmul.f32 %v10124_v40, %v12283_v57 }
 0xcf3   :  { %6687 = vrcp.f32 %v3863_v25  ;;  %v3864_v9 = vadd.f32 1.0, %v6674_v42  ;;  %v6055_v41 = vmul.f32 -1.442695, %v3888_v11  ;;  %v3889_v18 = vadd.f32 %v3790_v36, %v3591_v26 }
 0xcf4   :  { %v6676_v28 = vpop.eup %6675  ;;  %6689 = vpow2.f32 %v6054_v55  ;;  %v3792_v52 = vpop.f32.mrf.mxu0  ;;  %v3595_v25 = vadd.f32 %v3571_v58, %v3534_v30  ;;  %v3513_v26 = vmul.f32 %v10119_v56, %v12192_v27  ;;  %v3574_v42 = vmul.f32 %v10129_v34, %v12283_v57 }
 0xcf5   :  { %6691 = vrcp.f32 %v3864_v9  ;;  %v3865_v43 = vadd.f32 1.0, %v6676_v28  ;;  %v6056_v54 = vmul.f32 -1.442695, %v3889_v18  ;;  %v3890_v2 = vadd.f32 %v3792_v52, %v3592_v63 }
 0xcf6   :  { %v6678_v44 = vpop.eup %6677  ;;  %6693 = vpow2.f32 %v6055_v41  ;;  %v3796_v4 = vpop.f32.mrf.mxu0  ;;  %v3536_v36 = vadd.f32 %v3512_v6, %v7886_v22  ;;  %v3514_v63 = vmul.f32 %v10113_v39, %v12106_v29  ;;  %v3575_v58 = vmul.f32 %v10124_v40, %v12194_v23 }
 0xcf7   :  { %6695 = vrcp.f32 %v3865_v43  ;;  %v3866_v11 = vadd.f32 1.0, %v6678_v44  ;;  %v6057_v55 = vmul.f32 -1.442695, %v3890_v2  ;;  %v3891_v53 = vadd.f32 %v3796_v4, %v3593_v24 }
 0xcf8   :  { %v6680_v51 = vpop.eup %6679  ;;  %6697 = vpow2.f32 %v6056_v54  ;;  %v3798_v61 = vpop.f32.mrf.mxu0  ;;  %v3596_v28 = vadd.f32 %v3572_v60, %v3535_v1  ;;  %v3537_v4 = vadd.f32 %v3513_v26, %v7886_v22  ;;  %v3515_v24 = vmul.f32 %v10119_v56, %v12106_v29 }
 0xcf9   :  { %6699 = vrcp.f32 %v3866_v11  ;;  %v3867_v30 = vadd.f32 1.0, %v6680_v51  ;;  %v6058_v9 = vmul.f32 -1.442695, %v3891_v53  ;;  %v3892_v41 = vadd.f32 %v3798_v61, %v3594_v50  ;;  %v12284_v51 = vld [vmem:[#allocation36_spill] sm:$0xff] }
 0xcfa   :  { %v6682_v18 = vpop.eup %6681  ;;  %6701 = vpow2.f32 %v6057_v55  ;;  %v3802_v44 = vpop.f32.mrf.mxu0  ;;  %v3597_v11 = vadd.f32 %v3573_v0, %v3536_v36  ;;  %v3538_v53 = vadd.f32 %v3514_v63, %v12284_v51  ;;  %v3576_v50 = vmul.f32 %v10129_v34, %v12194_v23 }
 0xcfb   :  { %6703 = vrcp.f32 %v3867_v30  ;;  %v3868_v6 = vadd.f32 1.0, %v6682_v18  ;;  %v6059_v52 = vmul.f32 -1.442695, %v3892_v41  ;;  %v3893_v43 = vadd.f32 %v3802_v44, %v3595_v25  ;;  %v12285_v18 = vld [vmem:[#allocation40_spill] sm:$0xff]  ;;  %v12286_v41 = vld [vmem:[#allocation43_spill] sm:$0xff] }
 0xcfc   :  { %v6684_v54 = vpop.eup %6683  ;;  %6705 = vpow2.f32 %v6058_v9  ;;  %v3804_v2 = vpop.f32.mrf.mxu0  ;;  %v3598_v30 = vadd.f32 %v3574_v42, %v3537_v4  ;;  %v3516_v25 = vmul.f32 %v10113_v39, %v12285_v18  ;;  %v3577_v9 = vmul.f32 %v10124_v40, %v12286_v41 }
 0xcfd   :  { %6707 = vrcp.f32 %v3868_v6  ;;  %v3869_v60 = vadd.f32 1.0, %v6684_v54  ;;  %v6060_v1 = vmul.f32 -1.442695, %v3893_v43  ;;  %v3894_v26 = vadd.f32 %v3804_v2, %v3596_v28 }
 0xcfe   :  { %v6686_v55 = vpop.eup %6685  ;;  %6709 = vpow2.f32 %v6059_v52  ;;  %v3808_v61 = vpop.f32.mrf.mxu0  ;;  %v3539_v28 = vadd.f32 %v3515_v24, %v12284_v51  ;;  %v3517_v52 = vmul.f32 %v10119_v56, %v12285_v18  ;;  %v3578_v42 = vmul.f32 %v10129_v34, %v12286_v41 }
 0xcff   :  { %6711 = vrcp.f32 %v3869_v60  ;;  %v3870_v0 = vadd.f32 1.0, %v6686_v55  ;;  %v6061_v36 = vmul.f32 -1.442695, %v3894_v26  ;;  %v3943_v63 = vadd.f32 %v3808_v61, %v7876_v16 }
 0xd00   :  { %v6688_v44 = vpop.eup %6687  ;;  %6713 = vpow2.f32 %v6060_v1  ;;  %v3810_v6 = vpop.f32.mrf.mxu0  ;;  %v3599_v2 = vadd.f32 %v3575_v58, %v3538_v53  ;;  %v3540_v1 = vadd.f32 %v3516_v25, %v12110_v31  ;;  %v3518_v24 = vmul.f32 %v10113_v39, %v7990_v45 }
 0xd01   :  { %v6690_v4 = vpop.eup %6689  ;;  %6715 = vrcp.f32 %v3870_v0  ;;  %v3951_v43 = vmul.f32 %v6688_v44, %v3943_v63  ;;  %v3944_v54 = vadd.f32 %v3810_v6, %v7876_v16  ;;  %v3579_v0 = vmul.f32 %v10124_v40, %v8006_v5 }
 0xd02   :  { %v6692_v60 = vpop.eup %6691  ;;  %v3919_v26 = vadd.f32 1.0, %v6690_v4  ;;  %6717 = vpow2.f32 %v6061_v36  ;;  %v3814_v55 = vpop.f32.mrf.mxu0  ;;  %v3600_v53 = vadd.f32 %v3576_v50, %v3539_v28  ;;  %v3541_v36 = vadd.f32 %v3517_v52, %v12110_v31 }
 0xd03   :  { %v6694_v61 = vpop.eup %6693  ;;  %v3959_v18 = vadd.f32 %v3951_v43, %v3597_v11  ;;  %v3952_v51 = vmul.f32 %v6692_v60, %v3944_v54  ;;  %v3945_v41 = vadd.f32 %v3814_v55, %v7972_v37  ;;  %v3519_v40 = vmul.f32 %v10119_v56, %v7990_v45 }
 0xd04   :  { %v6696_v63 = vpop.eup %6695  ;;  %6719 = vrcp.f32 %v3919_v26  ;;  %v3920_v58 = vadd.f32 1.0, %v6694_v61  ;;  %v3816_v44 = vpop.f32.mrf.mxu0  ;;  %v3580_v60 = vmul.f32 %v10129_v34, %v8006_v5  ;;  %v3542_v55 = vadd.f32 %v3518_v24, %v8011_v21 }
 0xd05   :  { %v6698_v6 = vpop.eup %6697  ;;  %6721 = vtanh.f32 %v3959_v18  ;;  %v3960_v25 = vadd.f32 %v3952_v51, %v3598_v30  ;;  %v3953_v4 = vmul.f32 %v6696_v63, %v3945_v41  ;;  %v3946_v39 = vadd.f32 %v3816_v44, %v7972_v37 }
 0xd06   :  { %v6700_v11 = vpop.eup %6699  ;;  %6723 = vrcp.f32 %v3920_v58  ;;  %v3921_v43 = vadd.f32 1.0, %v6698_v6  ;;  %v3820_v54 = vpop.f32.mrf.mxu0  ;;  %v3601_v41 = vadd.f32 %v3577_v9, %v3540_v1 }
 0xd07   :  { %v6702_v50 = vpop.eup %6701  ;;  %6725 = vtanh.f32 %v3960_v25  ;;  %v3961_v28 = vadd.f32 %v3953_v4, %v3599_v2  ;;  %v3954_v52 = vmul.f32 %v6700_v11, %v3946_v39  ;;  %v3947_v18 = vadd.f32 %v3820_v54, %v7974_v19 }
 0xd08   :  { %v6704_v51 = vpop.eup %6703  ;;  %6727 = vrcp.f32 %v3921_v43  ;;  %v3922_v30 = vadd.f32 1.0, %v6702_v50  ;;  %v3822_v26 = vpop.f32.mrf.mxu0  ;;  %v3602_v2 = vadd.f32 %v3578_v42, %v3541_v36  ;;  %v3543_v25 = vadd.f32 %v3519_v40, %v8011_v21 }
 0xd09   :  { %v6706_v61 = vpop.eup %6705  ;;  %6729 = vtanh.f32 %v3961_v28  ;;  %v3962_v63 = vadd.f32 %v3954_v52, %v3600_v53  ;;  %v3955_v56 = vmul.f32 %v6704_v51, %v3947_v18  ;;  %v3948_v58 = vadd.f32 %v3822_v26, %v7974_v19 }
 0xd0a   :  { %v6708_v34 = vpop.eup %6707  ;;  %6731 = vrcp.f32 %v3922_v30  ;;  %v3923_v44 = vadd.f32 1.0, %v6706_v61  ;;  %v3826_v6 = vpop.f32.mrf.mxu0  ;;  %v3603_v53 = vadd.f32 %v3579_v0, %v3542_v55  ;;  %v3604_v51 = vadd.f32 %v3580_v60, %v3543_v25 }
 0xd0b   :  { %v6710_v4 = vpop.eup %6709  ;;  %6733 = vtanh.f32 %v3962_v63  ;;  %v3963_v39 = vadd.f32 %v3955_v56, %v3601_v41  ;;  %v3956_v9 = vmul.f32 %v6708_v34, %v3948_v58  ;;  %v3949_v1 = vadd.f32 %v3826_v6, %v8020_v3 }
 0xd0c   :  { %v6712_v24 = vpop.eup %6711  ;;  %6735 = vrcp.f32 %v3923_v44  ;;  %v3924_v11 = vadd.f32 1.0, %v6710_v4  ;;  %v3828_v43 = vpop.f32.mrf.mxu0 }
 0xd0d   :  { %v6714_v54 = vpop.eup %6713  ;;  %6737 = vtanh.f32 %v3963_v39  ;;  %v3964_v50 = vadd.f32 %v3956_v9, %v3602_v2  ;;  %v3957_v28 = vmul.f32 %v6712_v24, %v3949_v1  ;;  %v3950_v42 = vadd.f32 %v3828_v43, %v8020_v3 }
 0xd0e   :  { %v6716_v36 = vpop.eup %6715  ;;  %6739 = vrcp.f32 %v3924_v11  ;;  %v3925_v40 = vadd.f32 1.0, %v6714_v54 }
 0xd0f   :  { %v6718_v52 = vpop.eup %6717  ;;  %6741 = vtanh.f32 %v3964_v50  ;;  %v3965_v18 = vadd.f32 %v3957_v28, %v3603_v53  ;;  %v3958_v30 = vmul.f32 %v6716_v36, %v3950_v42 }
 0xd10   :  { %6743 = vrcp.f32 %v3925_v40  ;;  %v3926_v41 = vadd.f32 1.0, %v6718_v52 }
 0xd11   :  { %v6720_v26 = vpop.eup %6719  ;;  %6745 = vtanh.f32 %v3965_v18  ;;  %v3966_v0 = vadd.f32 %v3958_v30, %v3604_v51 }
 0xd12   :  { %v6722_v55 = vpop.eup %6721  ;;  %v3975_v61 = vsub.f32 1.0, %v6720_v26  ;;  %6747 = vrcp.f32 %v3926_v41  ;;  %v3991_v39 = vmul.f32 %v6720_v26, %v9962_v17 }
 0xd13   :  { %v6724_v63 = vpop.eup %6723  ;;  %6749 = vtanh.f32 %v3966_v0 }
 0xd14   :  { %v6726_v56 = vpop.eup %6725  ;;  %v3976_v58 = vsub.f32 1.0, %v6724_v63  ;;  %v3983_v44 = vmul.f32 %v6722_v55, %v3975_v61  ;;  %v3992_v4 = vmul.f32 %v6724_v63, %v9964_v15 }
 0xd15   :  { %v6728_v34 = vpop.eup %6727 }
 0xd16   :  { %v6730_v2 = vpop.eup %6729  ;;  %v3984_v6 = vmul.f32 %v6726_v56, %v3976_v58  ;;  %v3977_v60 = vsub.f32 1.0, %v6728_v34  ;;  %v3999_v53 = vadd.f32 %v3991_v39, %v3983_v44  ;;  %v3993_v15 = vmul.f32 %v6728_v34, %v9966_v47 }
 0xd17   :  { %v6732_v25 = vpop.eup %6731 }
 0xd18   :  { %v6734_v9 = vpop.eup %6733  ;;  %v4000_v1 = vadd.f32 %v3992_v4, %v3984_v6  ;;  %v3978_v24 = vsub.f32 1.0, %v6732_v25  ;;  %v3985_v43 = vmul.f32 %v6730_v2, %v3977_v60  ;;  %v3994_v28 = vmul.f32 %v6732_v25, %v9968_v33 }
 0xd19   :  { %v6736_v11 = vpop.eup %6735 }
 0xd1a   :  { %v6738_v54 = vpop.eup %6737  ;;  %4193 = vmatprep.mubr.f32.mxu0 %v4000_v1  ;;  %v3986_v50 = vmul.f32 %v6734_v9, %v3978_v24  ;;  %v3979_v42 = vsub.f32 1.0, %v6736_v11  ;;  %v4001_v51 = vadd.f32 %v3993_v15, %v3985_v43  ;;  %v3995_v33 = vmul.f32 %v6736_v11, %v9970_v49  ;;  %v4689_v24 = vld [vmem:[#allocation2 + $0xf8] sm:$0xff]  ;;  %v4688_v11 = vld [vmem:[#allocation2 + $0xf0] sm:$0xff]  ;;  %v7219_v43 = vld [vmem:[%s11172_s3] sm:$0xff] }
 0xd1b   :  { %v6740_v36 = vpop.eup %6739  ;;  %4194 = vmatmul.mubr.f32.vlgmr.msra.gmra.mxu0 %v3999_v53  ;;  %v4687_v53 = vld [vmem:[#allocation2 + $0xe8] sm:$0xff] }
 0xd1c   :  { %v6742_v40 = vpop.eup %6741  ;;  %v4002_v52 = vadd.f32 %v3994_v28, %v3986_v50  ;;  %v3980_v18 = vsub.f32 1.0, %v6740_v36  ;;  %v3987_v30 = vmul.f32 %v6738_v54, %v3979_v42  ;;  %v3996_v0 = vmul.f32 %v6740_v36, %v9972_v20  ;;  %v4686_v54 = vld [vmem:[#allocation2 + $0xe0] sm:$0xff]  ;;  %v7220_v50 = vld [vmem:[%s11172_s3 + $0x8] sm:$0xff]  ;;  %v7221_v28 = vld [vmem:[%s11172_s3 + $0x10] sm:$0xff] }
 0xd1d   :  { %v6744_v17 = vpop.eup %6743  ;;  %v7222_v42 = vld [vmem:[%s11172_s3 + $0x18] sm:$0xff]  ;;  %v7223_v36 = vld [vmem:[%s11172_s3 + $0x20] sm:$0xff]  ;;  %v7224_v15 = vld [vmem:[%s11172_s3 + $0x28] sm:$0xff] }
 0xd1e   :  { %v6746_v41 = vpop.eup %6745  ;;  %4199 = vmatprep.mubr.f32.mxu0 %v4002_v52  ;;  %v3988_v26 = vmul.f32 %v6742_v40, %v3980_v18  ;;  %v3981_v55 = vsub.f32 1.0, %v6744_v17  ;;  %v4003_v47 = vadd.f32 %v3995_v33, %v3987_v30  ;;  %v3997_v6 = vmul.f32 %v6744_v17, %v9974_v13  ;;  %v7225_v40 = vld [vmem:[%s11172_s3 + $0x30] sm:$0xff]  ;;  %v10357_v17 = vld [vmem:[#allocation2 + $0xa0] sm:$0xff] }
 0xd1f   :  { %v6748_v61 = vpop.eup %6747  ;;  %4200 = vmatmul.mubr.f32.gmra.mxu0 %v4001_v51  ;;  %v10339_v52 = vld [vmem:[#allocation2 + $0xd0] sm:$0xff]  ;;  %12288 = vst [vmem:[#allocation98_spill] sm:$0xff] %v10357_v17  ;;  %v10361_v51 = vld [vmem:[#allocation2 + $0x98] sm:$0xff]  ;;  %v10381_v33 = vld [vmem:[#allocation2 + $0x60] sm:$0xff] }
 0xd20   :  { %v6750_v63 = vpop.eup %6749  ;;  %v4004_v56 = vadd.f32 %v3996_v0, %v3988_v26  ;;  %v3982_v58 = vsub.f32 1.0, %v6748_v61  ;;  %v3989_v34 = vmul.f32 %v6746_v41, %v3981_v55  ;;  %v3998_v2 = vmul.f32 %v6748_v61, %v9976_v59  ;;  %v10351_v18 = vld [vmem:[#allocation2 + $0xb0] sm:$0xff]  ;;  %12289 = vst [vmem:[#allocation99_spill] sm:$0xff] %v10361_v51  ;;  %v10367_v41 = vld [vmem:[#allocation2 + $0x88] sm:$0xff]  ;;  %v10369_v26 = vld [vmem:[#allocation2 + $0x80] sm:$0xff] }
 0xd21   :  { %v10363_v30 = vld [vmem:[#allocation2 + $0x90] sm:$0xff]  ;;  %12291 = vst [vmem:[#allocation41_spill] sm:$0xff] %v10367_v41  ;;  %12292 = vst [vmem:[#allocation29_spill] sm:$0xff] %v10369_v26  ;;  %v10373_v0 = vld [vmem:[#allocation2 + $0x78] sm:$0xff] }
 0xd22   :  { %4205 = vmatprep.mubr.f32.mxu0 %v4004_v56  ;;  %v3990_v44 = vmul.f32 %v6750_v63, %v3982_v58  ;;  %v4005_v60 = vadd.f32 %v3997_v6, %v3989_v34  ;;  %12290 = vst [vmem:[#allocation42_spill] sm:$0xff] %v10363_v30  ;;  %12293 = vst [vmem:[#allocation38_spill] sm:$0xff] %v10373_v0  ;;  %v10375_v55 = vld [vmem:[#allocation2 + $0x70] sm:$0xff]  ;;  %v10379_v61 = vld [vmem:[#allocation2 + $0x68] sm:$0xff] }
 0xd23   :  { %4206 = vmatmul.mubr.f32.gmra.mxu0 %v4003_v47  ;;  %12294 = vst [vmem:[#allocation100_spill] sm:$0xff] %v10375_v55  ;;  %12295 = vst [vmem:[#allocation101_spill] sm:$0xff] %v10379_v61  ;;  %v10385_v63 = vld [vmem:[#allocation2 + $0x58] sm:$0xff]  ;;  %v10387_v56 = vld [vmem:[#allocation2 + $0x50] sm:$0xff] }
 0xd24   :  { %v4006_v4 = vadd.f32 %v3998_v2, %v3990_v44  ;;  %12296 = vst [vmem:[#allocation102_spill] sm:$0xff] %v10381_v33  ;;  %12297 = vst [vmem:[#allocation27_spill] sm:$0xff] %v10385_v63  ;;  %v10391_v58 = vld [vmem:[#allocation2 + $0x48] sm:$0xff]  ;;  %v10393_v47 = vld [vmem:[#allocation2 + $0x40] sm:$0xff] }
 0xd25   :  { %12298 = vst [vmem:[#allocation44_spill] sm:$0xff] %v10387_v56  ;;  %12299 = vst [vmem:[#allocation45_spill] sm:$0xff] %v10391_v58  ;;  %v10397_v34 = vld [vmem:[#allocation2 + $0x38] sm:$0xff]  ;;  %v10399_v44 = vld [vmem:[#allocation2 + $0x30] sm:$0xff] }
 0xd26   :  { %4211 = vmatprep.mubr.f32.mxu0 %v4006_v4  ;;  %12300 = vst [vmem:[#allocation46_spill] sm:$0xff] %v10393_v47  ;;  %12301 = vst [vmem:[#allocation103_spill] sm:$0xff] %v10397_v34  ;;  %v10403_v2 = vld [vmem:[#allocation2 + $0x28] sm:$0xff]  ;;  %v10405_v6 = vld [vmem:[#allocation2 + $0x20] sm:$0xff] }
 0xd27   :  { %4212 = vmatmul.mubr.f32.gmra.mxu0 %v4005_v60  ;;  %12302 = vst [vmem:[#allocation47_spill] sm:$0xff] %v10399_v44  ;;  %12303 = vst [vmem:[#allocation48_spill] sm:$0xff] %v10403_v2  ;;  %v10409_v4 = vld [vmem:[#allocation2 + $0x18] sm:$0xff]  ;;  %v10411_v60 = vld [vmem:[#allocation2 + $0x10] sm:$0xff] }
 0xd28   :  { %4923 = vmatprep.mubr.f32.mxu0 %v11705_v62  ;;  %12304 = vst [vmem:[#allocation49_spill] sm:$0xff] %v10405_v6  ;;  %12305 = vst [vmem:[#allocation50_spill] sm:$0xff] %v10409_v4 }
 0xd29   :  { %12306 = vst [vmem:[#allocation104_spill] sm:$0xff] %v10411_v60 }
 0xddb   :  { %v10264_v20 = vpop.f32.mrf.mxu0 }
 0xddd   :  { %v10266_v49 = vpop.f32.mrf.mxu0 }
 0xddf   :  { %v10268_v25 = vpop.f32.mrf.mxu0 }
 0xde1   :  { %v10270_v39 = vpop.f32.mrf.mxu0 }
 0xde3   :  { %v10272_v9 = vpop.f32.mrf.mxu0 }
 0xde5   :  { %v10274_v59 = vpop.f32.mrf.mxu0 }
 0xde7   :  { %v10276_v1 = vpop.f32.mrf.mxu0 }
 0xde9   :  { %v10278_v13 = vpop.f32.mrf.mxu0 }
 0xdea   :  { %4242 = vmatprep.subr.mxu1 %v10278_v13 }
 0xdeb   :  { %4243 = vmatpush1.msra.mxu1 %v10276_v1 }
 0xdec   :  { %4244 = vmatprep.subr.mxu1 %v10274_v59 }
 0xded   :  { %4245 = vmatpush1.msra.mxu1 %v10272_v9 }
 0xdee   :  { %4246 = vmatprep.subr.mxu1 %v10270_v39 }
 0xdef   :  { %4247 = vmatpush1.msra.mxu1 %v10268_v25 }
 0xdf0   :  { %4248 = vmatprep.subr.mxu1 %v10266_v49 }
 0xdf1   :  { %4249 = vmatpush1.msra.mxu1 %v10264_v20 }
 0xdf2   :  { %6064 = vmatmul.mubr.msk.f32.vlgmr.msra.gmra.mxu1 %vm497_vm0, %v7219_v43  ;;  %4722 = vmatprep.subr.mxu1 %v4689_v24  ;;  %v10415_v24 = vld [vmem:[#allocation2 + $0x8] sm:$0xff]  ;;  %v10423_v43 = vld [vmem:[#allocation2 + $0x1f0] sm:$0xff] }
 0xdf3   :  { %4288 = vmatprep.mubr.f32.mxu1 %v11705_v62  ;;  %4723 = vmatpush1.msra.mxu1 %v4688_v11  ;;  %12307 = vst [vmem:[#allocation51_spill] sm:$0xff] %v10415_v24  ;;  %v10417_v11 = vld [vmem:[#allocation2] sm:$0xff]  ;;  %12310 = vst [vmem:[#allocation54_spill] sm:$0xff] %v10423_v43 }
 0xdf4   :  { %4724 = vmatprep.subr.mxu1 %v4687_v53  ;;  %12308 = vst [vmem:[#allocation52_spill] sm:$0xff] %v10417_v11  ;;  %v10421_v53 = vld [vmem:[#allocation2 + $0x1f8] sm:$0xff] }
 0xdf5   :  { %4725 = vmatpush1.msra.mxu1 %v4686_v54  ;;  %12309 = vst [vmem:[#allocation53_spill] sm:$0xff] %v10421_v53  ;;  %v10427_v54 = vld [vmem:[#allocation2 + $0x1e8] sm:$0xff] }
 0xdf6   :  { %6065 = vmatmul.mubr.msk.f32.gmra.mxu1 %vm497_vm0, %v7220_v50  ;;  %12311 = vst [vmem:[#allocation105_spill] sm:$0xff] %v10427_v54  ;;  %v10429_v50 = vld [vmem:[#allocation2 + $0x1e0] sm:$0xff] }
 0xdf7   :  { %4294 = vmatprep.mubr.f32.mxu1 %v11705_v62  ;;  %12312 = vst [vmem:[#allocation55_spill] sm:$0xff] %v10429_v50 }
 0xdfa   :  { %6066 = vmatmul.mubr.msk.f32.gmra.mxu1 %vm497_vm0, %v7221_v28  ;;  %v10431_v28 = vld [vmem:[#allocation2 + $0x1d8] sm:$0xff] }
 0xdfb   :  { %4300 = vmatprep.mubr.f32.mxu1 %v11705_v62  ;;  %12313 = vst [vmem:[#allocation56_spill] sm:$0xff] %v10431_v28 }
 0xdfe   :  { %6067 = vmatmul.mubr.msk.f32.gmra.mxu1 %vm497_vm0, %v7222_v42  ;;  %v10434_v42 = vld [vmem:[#allocation2 + $0x1d0] sm:$0xff] }
 0xdff   :  { %4306 = vmatprep.mubr.f32.mxu1 %v11705_v62  ;;  %12314 = vst [vmem:[#allocation57_spill] sm:$0xff] %v10434_v42 }
 0xe02   :  { %6068 = vmatmul.mubr.msk.f32.gmra.mxu1 %vm497_vm0, %v7223_v36  ;;  %v10437_v36 = vld [vmem:[#allocation2 + $0x1c8] sm:$0xff] }
 0xe03   :  { %4312 = vmatprep.mubr.f32.mxu1 %v11705_v62  ;;  %12315 = vst [vmem:[#allocation58_spill] sm:$0xff] %v10437_v36 }
 0xe06   :  { %6069 = vmatmul.mubr.msk.f32.gmra.mxu1 %vm497_vm0, %v7224_v15  ;;  %v10440_v15 = vld [vmem:[#allocation2 + $0x1c0] sm:$0xff] }
 0xe07   :  { %4318 = vmatprep.mubr.f32.mxu1 %v11705_v62  ;;  %12316 = vst [vmem:[#allocation106_spill] sm:$0xff] %v10440_v15 }
 0xe0a   :  { %6070 = vmatmul.mubr.msk.f32.gmra.mxu1 %vm497_vm0, %v7225_v40  ;;  %v10443_v40 = vld [vmem:[#allocation2 + $0x1b8] sm:$0xff] }
 0xe0b   :  { %4324 = vmatprep.mubr.f32.mxu1 %v11705_v62  ;;  %12317 = vst [vmem:[#allocation59_spill] sm:$0xff] %v10443_v40 }
 0xe0e   :  { %6071 = vmatmul.mubr.msk.f32.gmra.mxu1 %vm497_vm0, %v10037_v12  ;;  %v10337_v12 = vld [vmem:[#allocation2 + $0xd8] sm:$0xff] }
 0xe0f   :  { %4330 = vmatprep.mubr.f32.mxu1 %v11705_v62  ;;  %4726 = vmatprep.subr.mxu1 %v10337_v12 }
 0xe10   :  { %4727 = vmatpush1.msra.mxu1 %v10339_v52 }
 0xe12   :  { %6072 = vmatmul.mubr.msk.f32.gmra.mxu1 %vm497_vm0, %v10049_v8  ;;  %v10343_v8 = vld [vmem:[#allocation2 + $0xc8] sm:$0xff] }
 0xe13   :  { %4336 = vmatprep.mubr.f32.mxu1 %v11705_v62  ;;  %4728 = vmatprep.subr.mxu1 %v10343_v8 }
 0xe16   :  { %6073 = vmatmul.mubr.msk.f32.gmra.mxu1 %vm497_vm0, %v10061_v14  ;;  %v10345_v14 = vld [vmem:[#allocation2 + $0xc0] sm:$0xff] }
 0xe17   :  { %4342 = vmatprep.mubr.f32.mxu1 %v11705_v62  ;;  %4729 = vmatpush1.msra.mxu1 %v10345_v14 }
 0xe1a   :  { %6074 = vmatmul.mubr.msk.f32.gmra.mxu1 %vm497_vm0, %v10073_v10  ;;  %v10349_v10 = vld [vmem:[#allocation2 + $0xb8] sm:$0xff] }
 0xe1b   :  { %4348 = vmatprep.mubr.f32.mxu1 %v11705_v62  ;;  %4730 = vmatprep.subr.mxu1 %v10349_v10 }
 0xe1c   :  { %4731 = vmatpush1.msra.mxu1 %v10351_v18 }
 0xe1e   :  { %6075 = vmatmul.mubr.msk.f32.gmra.mxu1 %vm497_vm0, %v10085_v35  ;;  %v10355_v35 = vld [vmem:[#allocation2 + $0xa8] sm:$0xff] }
 0xe1f   :  { %12287 = vst [vmem:[#allocation97_spill] sm:$0xff] %v10355_v35  ;;  %4732 = vmatprep.subr.mxu1 %v10355_v35 }
 0xe20   :  { %4733 = vmatpush1.msra.mxu1 %v10357_v17  ;;  %v12358_v17 = vld [vmem:[#allocation18_spill] sm:$0xff] }
 0xe21   :  { %4734 = vmatprep.subr.mxu1 %v10361_v51 }
 0xe22   :  { %4735 = vmatpush1.msra.mxu1 %v10363_v30 }
 0xe23   :  { %4736 = vmatprep.subr.mxu1 %v10367_v41 }
 0xe24   :  { %4737 = vmatpush1.msra.mxu1 %v10369_v26  ;;  %v12349_v26 = vld [vmem:[#allocation13_spill] sm:$0xff] }
 0xe25   :  { %4738 = vmatprep.subr.mxu1 %v10373_v0 }
 0xe26   :  { %4739 = vmatpush1.msra.mxu1 %v10375_v55 }
 0xe27   :  { %4740 = vmatprep.subr.mxu1 %v10379_v61 }
 0xe28   :  { %4741 = vmatpush1.msra.mxu1 %v10381_v33  ;;  %v12347_v33 = vld [vmem:[#allocation12_spill] sm:$0xff] }
 0xe29   :  { %4742 = vmatprep.subr.mxu1 %v10385_v63 }
 0xe2a   :  { %4743 = vmatpush1.msra.mxu1 %v10387_v56 }
 0xe2b   :  { %4744 = vmatprep.subr.mxu1 %v10391_v58 }
 0xe2c   :  { %4745 = vmatpush1.msra.mxu1 %v10393_v47 }
 0xe2d   :  { %4746 = vmatprep.subr.mxu1 %v10397_v34  ;;  %v12346_v34 = vld [vmem:[#allocation19_spill] sm:$0xff] }
 0xe2e   :  { %4747 = vmatpush1.msra.mxu1 %v10399_v44  ;;  %v12345_v44 = vld [vmem:[#allocation10_spill] sm:$0xff] }
 0xe2f   :  { %4748 = vmatprep.subr.mxu1 %v10403_v2 }
 0xe30   :  { %4749 = vmatpush1.msra.mxu1 %v10405_v6 }
 0xe31   :  { %4750 = vmatprep.subr.mxu1 %v10409_v4  ;;  %v12343_v4 = vld [vmem:[#allocation9_spill] sm:$0xff] }
 0xe32   :  { %4751 = vmatpush1.msra.mxu1 %v10411_v60 }
 0xe33   :  { %4752 = vmatprep.subr.mxu1 %v10415_v24  ;;  %v12342_v24 = vld [vmem:[#allocation8_spill] sm:$0xff] }
 0xe34   :  { %4753 = vmatpush1.msra.mxu1 %v10417_v11 }
 0xe35   :  { %4754 = vmatprep.subr.mxu1 %v10421_v53  ;;  %v12341_v53 = vld [vmem:[#allocation30_spill] sm:$0xff] }
 0xe36   :  { %4755 = vmatpush2.msra.mxu1 %v10423_v43  ;;  %v10446_v43 = vld [vmem:[#allocation2 + $0x1b0] sm:$0xff] }
 0xe37   :  { %4756 = vmatprep.subr.mxu1 %v10427_v54  ;;  %12318 = vst [vmem:[#allocation60_spill] sm:$0xff] %v10446_v43  ;;  %v10449_v54 = vld [vmem:[#allocation2 + $0x1a8] sm:$0xff] }
 0xe38   :  { %4757 = vmatpush2.msra.mxu1 %v10429_v50  ;;  %12319 = vst [vmem:[#allocation61_spill] sm:$0xff] %v10449_v54  ;;  %v10452_v50 = vld [vmem:[#allocation2 + $0x1a0] sm:$0xff] }
 0xe39   :  { %4758 = vmatprep.subr.mxu1 %v10431_v28  ;;  %12320 = vst [vmem:[#allocation62_spill] sm:$0xff] %v10452_v50  ;;  %v10455_v28 = vld [vmem:[#allocation2 + $0x198] sm:$0xff] }
 0xe3a   :  { %4759 = vmatpush2.msra.mxu1 %v10434_v42  ;;  %12321 = vst [vmem:[#allocation107_spill] sm:$0xff] %v10455_v28  ;;  %v10458_v42 = vld [vmem:[#allocation2 + $0x190] sm:$0xff] }
 0xe3b   :  { %4760 = vmatprep.subr.mxu1 %v10437_v36  ;;  %12322 = vst [vmem:[#allocation63_spill] sm:$0xff] %v10458_v42  ;;  %v10461_v36 = vld [vmem:[#allocation2 + $0x188] sm:$0xff] }
 0xe3c   :  { %4761 = vmatpush2.msra.mxu1 %v10440_v15  ;;  %12323 = vst [vmem:[#allocation64_spill] sm:$0xff] %v10461_v36  ;;  %v10464_v15 = vld [vmem:[#allocation2 + $0x180] sm:$0xff] }
 0xe3d   :  { %4762 = vmatprep.subr.mxu1 %v10443_v40  ;;  %12324 = vst [vmem:[#allocation65_spill] sm:$0xff] %v10464_v15  ;;  %v10467_v40 = vld [vmem:[#allocation2 + $0x178] sm:$0xff] }
 0xe3e   :  { %4763 = vmatpush2.msra.mxu1 %v10446_v43  ;;  %12325 = vst [vmem:[#allocation66_spill] sm:$0xff] %v10467_v40  ;;  %v10470_v43 = vld [vmem:[#allocation2 + $0x170] sm:$0xff] }
 0xe3f   :  { %4764 = vmatprep.subr.mxu1 %v10449_v54  ;;  %12326 = vst [vmem:[#allocation67_spill] sm:$0xff] %v10470_v43  ;;  %v10473_v54 = vld [vmem:[#allocation2 + $0x168] sm:$0xff] }
 0xe40   :  { %4765 = vmatpush2.msra.mxu1 %v10452_v50  ;;  %12327 = vst [vmem:[#allocation68_spill] sm:$0xff] %v10473_v54  ;;  %v10476_v50 = vld [vmem:[#allocation2 + $0x160] sm:$0xff] }
 0xe41   :  { %4766 = vmatprep.subr.mxu1 %v10455_v28  ;;  %12328 = vst [vmem:[#allocation69_spill] sm:$0xff] %v10476_v50  ;;  %v10479_v28 = vld [vmem:[#allocation2 + $0x158] sm:$0xff] }
 0xe42   :  { %4767 = vmatpush2.msra.mxu1 %v10458_v42  ;;  %12329 = vst [vmem:[#allocation70_spill] sm:$0xff] %v10479_v28  ;;  %v10482_v42 = vld [vmem:[#allocation2 + $0x150] sm:$0xff] }
 0xe43   :  { %4768 = vmatprep.subr.mxu1 %v10461_v36  ;;  %12330 = vst [vmem:[#allocation71_spill] sm:$0xff] %v10482_v42  ;;  %v10485_v36 = vld [vmem:[#allocation2 + $0x148] sm:$0xff] }
 0xe44   :  { %4769 = vmatpush2.msra.mxu1 %v10464_v15  ;;  %12331 = vst [vmem:[#allocation72_spill] sm:$0xff] %v10485_v36  ;;  %v10488_v15 = vld [vmem:[#allocation2 + $0x140] sm:$0xff] }
 0xe45   :  { %4770 = vmatprep.subr.mxu1 %v10467_v40  ;;  %12332 = vst [vmem:[#allocation73_spill] sm:$0xff] %v10488_v15  ;;  %v10491_v40 = vld [vmem:[#allocation2 + $0x138] sm:$0xff] }
 0xe46   :  { %4771 = vmatpush2.msra.mxu1 %v10470_v43  ;;  %12333 = vst [vmem:[#allocation74_spill] sm:$0xff] %v10491_v40  ;;  %v10494_v43 = vld [vmem:[#allocation2 + $0x130] sm:$0xff] }
 0xe47   :  { %4772 = vmatprep.subr.mxu1 %v10473_v54  ;;  %12334 = vst [vmem:[#allocation75_spill] sm:$0xff] %v10494_v43  ;;  %v10497_v54 = vld [vmem:[#allocation2 + $0x128] sm:$0xff] }
 0xe48   :  { %4773 = vmatpush2.msra.mxu1 %v10476_v50  ;;  %12335 = vst [vmem:[#allocation76_spill] sm:$0xff] %v10497_v54  ;;  %v10500_v50 = vld [vmem:[#allocation2 + $0x120] sm:$0xff] }
 0xe49   :  { %4774 = vmatprep.subr.mxu1 %v10479_v28  ;;  %12336 = vst [vmem:[#allocation77_spill] sm:$0xff] %v10500_v50  ;;  %v10503_v28 = vld [vmem:[#allocation2 + $0x118] sm:$0xff] }
 0xe4a   :  { %4775 = vmatpush2.msra.mxu1 %v10482_v42  ;;  %12337 = vst [vmem:[#allocation78_spill] sm:$0xff] %v10503_v28  ;;  %v10506_v42 = vld [vmem:[#allocation2 + $0x110] sm:$0xff] }
 0xe4b   :  { %4776 = vmatprep.subr.mxu1 %v10485_v36  ;;  %12338 = vst [vmem:[#allocation79_spill] sm:$0xff] %v10506_v42  ;;  %v10509_v36 = vld [vmem:[#allocation2 + $0x108] sm:$0xff] }
 0xe4c   :  { %4777 = vmatpush2.msra.mxu1 %v10488_v15  ;;  %12339 = vst [vmem:[#allocation80_spill] sm:$0xff] %v10509_v36  ;;  %v10512_v15 = vld [vmem:[#allocation2 + $0x100] sm:$0xff] }
 0xe4d   :  { %4778 = vmatprep.subr.mxu1 %v10491_v40  ;;  %12340 = vst [vmem:[#allocation81_spill] sm:$0xff] %v10512_v15 }
 0xe4e   :  { %4779 = vmatpush2.msra.mxu1 %v10494_v43 }
 0xe4f   :  { %4780 = vmatprep.subr.mxu1 %v10497_v54  ;;  %v6062_v54 = vld [vmem:[%s11169_s0 + $0x16] ss:$8 sm:$0x3] }
 0xe50   :  { %4781 = vmatpush2.msra.mxu1 %v10500_v50  ;;  %v10521_v43 = vrot.slane %v6062_v54, %v12260_v32  ;;  %v6063_v50 = vld [vmem:[%s11169_s0 + $0x17] ss:$8 sm:$0x3] }
 0xe51   :  { %4782 = vmatprep.subr.mxu1 %v10503_v28  ;;  %v10527_v28 = vrot.slane %v6062_v54, %v12261_v48  ;;  %v10537_v40 = vrot.slane %v6063_v50, %v12261_v48 }
 0xe52   :  { %4783 = vmatpush2.msra.mxu1 %v10506_v42  ;;  %v4020_v42 = vmul.f32 %v10521_v43, %v12262_v7  ;;  %v4022_v54 = vmul.f32 %v10521_v43, %v12343_v4  ;;  %v4026_v41 = vmul.f32 %v10521_v43, %v12349_v26 }
 0xe53   :  { %4784 = vmatprep.subr.mxu1 %v10509_v36  ;;  %v10532_v36 = vrot.slane %v6063_v50, %v12260_v32  ;;  %v4082_v32 = vmul.f32 %v10537_v40, %v12342_v24  ;;  %v4023_v2 = vmul.f32 %v10527_v28, %v12343_v4  ;;  %v4084_v4 = vmul.f32 %v10537_v40, %v12346_v34 }
 0xe54   :  { %4785 = vmatpush2.msra.mxu1 %v10512_v15  ;;  %v4021_v15 = vmul.f32 %v10527_v28, %v12262_v7  ;;  %v4044_v11 = vadd.f32 %v4020_v42, %v12341_v53  ;;  %v12344_v7 = vld [vmem:[#allocation11_spill] sm:$0xff]  ;;  %v4046_v42 = vadd.f32 %v4022_v54, %v12345_v44 }
 0xe55   :  { %v4081_v60 = vmul.f32 %v10532_v36, %v12342_v24  ;;  %v4024_v48 = vmul.f32 %v10521_v43, %v12344_v7  ;;  %v4083_v47 = vmul.f32 %v10532_v36, %v12346_v34  ;;  %v4025_v56 = vmul.f32 %v10527_v28, %v12344_v7 }
 0xe56   :  { %v4045_v6 = vadd.f32 %v4021_v15, %v12341_v53  ;;  %v4047_v24 = vadd.f32 %v4023_v2, %v12345_v44  ;;  %v4027_v34 = vmul.f32 %v10527_v28, %v12349_v26  ;;  %v12352_v44 = vld [vmem:[#allocation32_spill] sm:$0xff] }
 0xe57   :  { %v4105_v50 = vadd.f32 %v4081_v60, %v4044_v11  ;;  %v4048_v61 = vadd.f32 %v4024_v48, %v12347_v33  ;;  %v12348_v60 = vld [vmem:[#allocation21_spill] sm:$0xff]  ;;  %v4107_v0 = vadd.f32 %v4083_v47, %v4046_v42 }
 0xe58   :  { %v4106_v53 = vadd.f32 %v4082_v32, %v4045_v6  ;;  %v4085_v11 = vmul.f32 %v10532_v36, %v12348_v60  ;;  %v4049_v32 = vadd.f32 %v4025_v56, %v12347_v33  ;;  %v4108_v48 = vadd.f32 %v4084_v4, %v4047_v24  ;;  %v12353_v4 = vld [vmem:[#allocation37_spill] sm:$0xff] }
 0xe59   :  { %v4030_v24 = vmul.f32 %v10521_v43, %v12353_v4 }
 0xe5b   :  { %v4054_v35 = vadd.f32 %v4030_v24, %v12358_v17 }
 0xeb2   :  { %v4284_v58 = vpop.f32.mrf.mxu1 }
 0xeb3   :  { %v4355_v15 = vadd.f32 %v4284_v58, %v4105_v50  ;;  %v4086_v58 = vmul.f32 %v10537_v40, %v12348_v60  ;;  %v4050_v60 = vadd.f32 %v4026_v41, %v12352_v44  ;;  %v12355_v41 = vld [vmem:[#allocation16_spill] sm:$0xff] }
 0xeb4   :  { %v4286_v63 = vpop.f32.mrf.mxu1 }
 0xeb5   :  { %v6076_v54 = vmul.f32 -1.442695, %v4355_v15  ;;  %v4356_v55 = vadd.f32 %v4286_v63, %v4106_v53  ;;  %v4109_v15 = vadd.f32 %v4085_v11, %v4048_v61  ;;  %v12350_v63 = vld [vmem:[#allocation14_spill] sm:$0xff]  ;;  %v12351_v53 = vld [vmem:[#allocation15_spill] sm:$0xff]  ;;  %v4110_v51 = vadd.f32 %v4086_v58, %v4049_v32 }
 0xeb6   :  { %v4290_v7 = vpop.f32.mrf.mxu1  ;;  %v4087_v47 = vmul.f32 %v10532_v36, %v12350_v63  ;;  %v4028_v42 = vmul.f32 %v10521_v43, %v12351_v53  ;;  %v4089_v32 = vmul.f32 %v10532_v36, %v12355_v41  ;;  %v4090_v58 = vmul.f32 %v10537_v40, %v12355_v41 }
 0xeb7   :  { %6751 = vpow2.f32 %v6076_v54  ;;  %v6077_v2 = vmul.f32 -1.442695, %v4356_v55  ;;  %v4357_v6 = vadd.f32 %v4290_v7, %v4107_v0  ;;  %v4051_v54 = vadd.f32 %v4027_v34, %v12352_v44 }
 0xeb8   :  { %v4292_v50 = vpop.f32.mrf.mxu1  ;;  %v4088_v7 = vmul.f32 %v10537_v40, %v12350_v63  ;;  %v4029_v0 = vmul.f32 %v10527_v28, %v12351_v53  ;;  %v4031_v34 = vmul.f32 %v10527_v28, %v12353_v4  ;;  %v12357_v53 = vld [vmem:[#allocation39_spill] sm:$0xff] }
 0xeb9   :  { %6753 = vpow2.f32 %v6077_v2  ;;  %v6078_v56 = vmul.f32 -1.442695, %v4357_v6  ;;  %v4358_v33 = vadd.f32 %v4292_v50, %v4108_v48  ;;  %v12354_v2 = vld [vmem:[#allocation34_spill] sm:$0xff]  ;;  %v4032_v44 = vmul.f32 %v10521_v43, %v12357_v53 }
 0xeba   :  { %v4296_v30 = vpop.f32.mrf.mxu1  ;;  %v4052_v6 = vadd.f32 %v4028_v42, %v12354_v2  ;;  %v4053_v63 = vadd.f32 %v4029_v0, %v12354_v2  ;;  %v12359_v0 = vld [vmem:[#allocation23_spill] sm:$0xff] }
 0xebb   :  { %6755 = vpow2.f32 %v6078_v56  ;;  %v6079_v55 = vmul.f32 -1.442695, %v4358_v33  ;;  %v4359_v61 = vadd.f32 %v4296_v30, %v4109_v15  ;;  %v4111_v33 = vadd.f32 %v4087_v47, %v4050_v60  ;;  %v12356_v56 = vld [vmem:[#allocation20_spill] sm:$0xff] }
 0xebc   :  { %v4298_v11 = vpop.f32.mrf.mxu1  ;;  %v4112_v15 = vadd.f32 %v4088_v7, %v4051_v54  ;;  %v4091_v42 = vmul.f32 %v10532_v36, %v12356_v56  ;;  %v4092_v47 = vmul.f32 %v10537_v40, %v12356_v56  ;;  %v4033_v60 = vmul.f32 %v10527_v28, %v12357_v53 }
 0xebd   :  { %6757 = vpow2.f32 %v6079_v55  ;;  %v6080_v48 = vmul.f32 -1.442695, %v4359_v61  ;;  %v4360_v50 = vadd.f32 %v4298_v11, %v4110_v51  ;;  %v4113_v55 = vadd.f32 %v4089_v32, %v4052_v6  ;;  %v12360_v32 = vld [vmem:[#allocation24_spill] sm:$0xff] }
 0xebe   :  { %v4302_v30 = vpop.f32.mrf.mxu1  ;;  %v4055_v51 = vadd.f32 %v4031_v34, %v12358_v17  ;;  %v4093_v61 = vmul.f32 %v10532_v36, %v12359_v0  ;;  %v4056_v24 = vadd.f32 %v4032_v44, %v12280_v46  ;;  %v4094_v6 = vmul.f32 %v10537_v40, %v12359_v0 }
 0xebf   :  { %6759 = vpow2.f32 %v6080_v48  ;;  %v6081_v26 = vmul.f32 -1.442695, %v4360_v50  ;;  %v4361_v41 = vadd.f32 %v4302_v30, %v4111_v33  ;;  %v4114_v48 = vadd.f32 %v4090_v58, %v4053_v63 }
 0xec0   :  { %v4304_v4 = vpop.f32.mrf.mxu1  ;;  %v4034_v34 = vmul.f32 %v10521_v43, %v12360_v32  ;;  %v4115_v30 = vadd.f32 %v4091_v42, %v4054_v35  ;;  %v4035_v44 = vmul.f32 %v10527_v28, %v12360_v32 }
 0xec1   :  { %6761 = vpow2.f32 %v6081_v26  ;;  %v6082_v54 = vmul.f32 -1.442695, %v4361_v41  ;;  %v4362_v7 = vadd.f32 %v4304_v4, %v4112_v15  ;;  %v4116_v4 = vadd.f32 %v4092_v47, %v4055_v51  ;;  %v12361_v41 = vld [vmem:[#allocation25_spill] sm:$0xff] }
 0xec2   :  { %v4308_v11 = vpop.f32.mrf.mxu1  ;;  %v4057_v15 = vadd.f32 %v4033_v60, %v12280_v46  ;;  %v4095_v58 = vmul.f32 %v10532_v36, %v12361_v41  ;;  %v4058_v35 = vadd.f32 %v4034_v34, %v11838_v38  ;;  %v4096_v42 = vmul.f32 %v10537_v40, %v12361_v41 }
 0xec3   :  { %6763 = vpow2.f32 %v6082_v54  ;;  %v6083_v50 = vmul.f32 -1.442695, %v4362_v7  ;;  %v4411_v33 = vadd.f32 %v4308_v11, %v4113_v55  ;;  %v4117_v7 = vadd.f32 %v4093_v61, %v4056_v24 }
 0xec4   :  { %v6752_v26 = vpop.eup %6751  ;;  %v4310_v56 = vpop.f32.mrf.mxu1  ;;  %v4036_v55 = vmul.f32 %v10521_v43, %v12192_v27  ;;  %v4097_v61 = vmul.f32 %v10532_v36, %v12283_v57 }
 0xec5   :  { %v4387_v63 = vadd.f32 1.0, %v6752_v26  ;;  %6765 = vpow2.f32 %v6083_v50  ;;  %v6084_v0 = vmul.f32 -1.442695, %v4411_v33  ;;  %v4412_v53 = vadd.f32 %v4310_v56, %v4114_v48 }
 0xec6   :  { %v6754_v17 = vpop.eup %6753  ;;  %v4314_v54 = vpop.f32.mrf.mxu1  ;;  %v4118_v33 = vadd.f32 %v4094_v6, %v4057_v15  ;;  %v4059_v48 = vadd.f32 %v4035_v44, %v11838_v38 }
 0xec7   :  { %6767 = vrcp.f32 %v4387_v63  ;;  %v4388_v51 = vadd.f32 1.0, %v6754_v17  ;;  %v6085_v47 = vmul.f32 -1.442695, %v4412_v53  ;;  %v4413_v60 = vadd.f32 %v4314_v54, %v4115_v30 }
 0xec8   :  { %v6756_v11 = vpop.eup %6755  ;;  %6769 = vpow2.f32 %v6084_v0  ;;  %v4316_v50 = vpop.f32.mrf.mxu1  ;;  %v4119_v63 = vadd.f32 %v4095_v58, %v4058_v35  ;;  %v4037_v17 = vmul.f32 %v10527_v28, %v12192_v27  ;;  %v4098_v53 = vmul.f32 %v10537_v40, %v12283_v57 }
 0xec9   :  { %6771 = vrcp.f32 %v4388_v51  ;;  %v4389_v24 = vadd.f32 1.0, %v6756_v11  ;;  %v6086_v34 = vmul.f32 -1.442695, %v4413_v60  ;;  %v4414_v26 = vadd.f32 %v4316_v50, %v4116_v4 }
 0xeca   :  { %v6758_v56 = vpop.eup %6757  ;;  %6773 = vpow2.f32 %v6085_v47  ;;  %v4320_v41 = vpop.f32.mrf.mxu1  ;;  %v4060_v54 = vadd.f32 %v4036_v55, %v7886_v22  ;;  %v4038_v4 = vmul.f32 %v10521_v43, %v12106_v29  ;;  %v4099_v58 = vmul.f32 %v10532_v36, %v12194_v23 }
 0xecb   :  { %6775 = vrcp.f32 %v4389_v24  ;;  %v4390_v6 = vadd.f32 1.0, %v6758_v56  ;;  %v6087_v30 = vmul.f32 -1.442695, %v4414_v26  ;;  %v4415_v15 = vadd.f32 %v4320_v41, %v4117_v7 }
 0xecc   :  { %v6760_v44 = vpop.eup %6759  ;;  %6777 = vpow2.f32 %v6086_v34  ;;  %v4322_v0 = vpop.f32.mrf.mxu1  ;;  %v4120_v11 = vadd.f32 %v4096_v42, %v4059_v48  ;;  %v4061_v7 = vadd.f32 %v4037_v17, %v7886_v22  ;;  %v4039_v50 = vmul.f32 %v10527_v28, %v12106_v29 }
 0xecd   :  { %6779 = vrcp.f32 %v4390_v6  ;;  %v4391_v35 = vadd.f32 1.0, %v6760_v44  ;;  %v6088_v51 = vmul.f32 -1.442695, %v4415_v15  ;;  %v4416_v47 = vadd.f32 %v4322_v0, %v4118_v33  ;;  %v12362_v6 = vld [vmem:[#allocation36_spill] sm:$0xff] }
 0xece   :  { %v6762_v57 = vpop.eup %6761  ;;  %6781 = vpow2.f32 %v6087_v30  ;;  %v4326_v60 = vpop.f32.mrf.mxu1  ;;  %v4121_v41 = vadd.f32 %v4097_v61, %v4060_v54  ;;  %v4062_v15 = vadd.f32 %v4038_v4, %v12362_v6  ;;  %v4100_v33 = vmul.f32 %v10537_v40, %v12194_v23 }
 0xecf   :  { %6783 = vrcp.f32 %v4391_v35  ;;  %v4392_v55 = vadd.f32 1.0, %v6762_v57  ;;  %v6089_v24 = vmul.f32 -1.442695, %v4416_v47  ;;  %v4417_v34 = vadd.f32 %v4326_v60, %v4119_v63  ;;  %v12363_v35 = vld [vmem:[#allocation40_spill] sm:$0xff]  ;;  %v12364_v47 = vld [vmem:[#allocation43_spill] sm:$0xff] }
 0xed0   :  { %v6764_v26 = vpop.eup %6763  ;;  %6785 = vpow2.f32 %v6088_v51  ;;  %v4328_v56 = vpop.f32.mrf.mxu1  ;;  %v4122_v0 = vadd.f32 %v4098_v53, %v4061_v7  ;;  %v4040_v63 = vmul.f32 %v10521_v43, %v12363_v35  ;;  %v4101_v51 = vmul.f32 %v10532_v36, %v12364_v47 }
 0xed1   :  { %6787 = vrcp.f32 %v4392_v55  ;;  %v4393_v42 = vadd.f32 1.0, %v6764_v26  ;;  %v6090_v48 = vmul.f32 -1.442695, %v4417_v34  ;;  %v4418_v17 = vadd.f32 %v4328_v56, %v4120_v11 }
 0xed2   :  { %v6766_v30 = vpop.eup %6765  ;;  %6789 = vpow2.f32 %v6089_v24  ;;  %v4332_v44 = vpop.f32.mrf.mxu1  ;;  %v4063_v60 = vadd.f32 %v4039_v50, %v12362_v6  ;;  %v4041_v11 = vmul.f32 %v10527_v28, %v12363_v35  ;;  %v4102_v53 = vmul.f32 %v10537_v40, %v12364_v47 }
 0xed3   :  { %6791 = vrcp.f32 %v4393_v42  ;;  %v4394_v61 = vadd.f32 1.0, %v6766_v30  ;;  %v6091_v54 = vmul.f32 -1.442695, %v4418_v17  ;;  %v4467_v4 = vadd.f32 %v4332_v44, %v7876_v16 }
 0xed4   :  { %v6768_v23 = vpop.eup %6767  ;;  %6793 = vpow2.f32 %v6090_v48  ;;  %v4334_v57 = vpop.f32.mrf.mxu1  ;;  %v4123_v34 = vadd.f32 %v4099_v58, %v4062_v15  ;;  %v4064_v48 = vadd.f32 %v4040_v63, %v12110_v31  ;;  %v4042_v50 = vmul.f32 %v10521_v43, %v7990_v45 }
 0xed5   :  { %v6770_v7 = vpop.eup %6769  ;;  %6795 = vrcp.f32 %v4394_v61  ;;  %v4475_v55 = vmul.f32 %v6768_v23, %v4467_v4  ;;  %v4468_v24 = vadd.f32 %v4334_v57, %v7876_v16  ;;  %v4103_v61 = vmul.f32 %v10532_v36, %v8006_v5 }
 0xed6   :  { %v6772_v26 = vpop.eup %6771  ;;  %v4443_v56 = vadd.f32 1.0, %v6770_v7  ;;  %6797 = vpow2.f32 %v6091_v54  ;;  %v4338_v42 = vpop.f32.mrf.mxu1  ;;  %v4124_v15 = vadd.f32 %v4100_v33, %v4063_v60  ;;  %v4065_v54 = vadd.f32 %v4041_v11, %v12110_v31 }
 0xed7   :  { %v6774_v17 = vpop.eup %6773  ;;  %v4483_v30 = vadd.f32 %v4475_v55, %v4121_v41  ;;  %v4476_v44 = vmul.f32 %v6772_v26, %v4468_v24  ;;  %v4469_v47 = vadd.f32 %v4338_v42, %v7972_v37  ;;  %v4043_v36 = vmul.f32 %v10527_v28, %v7990_v45 }
 0xed8   :  { %v6776_v4 = vpop.eup %6775  ;;  %6799 = vrcp.f32 %v4443_v56  ;;  %v4444_v58 = vadd.f32 1.0, %v6774_v17  ;;  %v4340_v23 = vpop.f32.mrf.mxu1  ;;  %v4104_v26 = vmul.f32 %v10537_v40, %v8006_v5  ;;  %v4125_v17 = vadd.f32 %v4101_v51, %v4064_v48 }
 0xed9   :  { %v6778_v57 = vpop.eup %6777  ;;  %6801 = vtanh.f32 %v4483_v30  ;;  %v4484_v63 = vadd.f32 %v4476_v44, %v4122_v0  ;;  %v4477_v7 = vmul.f32 %v6776_v4, %v4469_v47  ;;  %v4470_v43 = vadd.f32 %v4340_v23, %v7972_v37 }
 0xeda   :  { %v6780_v41 = vpop.eup %6779  ;;  %6803 = vrcp.f32 %v4444_v58  ;;  %v4445_v55 = vadd.f32 1.0, %v6778_v57  ;;  %v4344_v24 = vpop.f32.mrf.mxu1  ;;  %v4066_v44 = vadd.f32 %v4042_v50, %v8011_v21  ;;  %v4067_v57 = vadd.f32 %v4043_v36, %v8011_v21 }
 0xedb   :  { %v6782_v33 = vpop.eup %6781  ;;  %6805 = vtanh.f32 %v4484_v63  ;;  %v4485_v60 = vadd.f32 %v4477_v7, %v4123_v34  ;;  %v4478_v11 = vmul.f32 %v6780_v41, %v4470_v43  ;;  %v4471_v56 = vadd.f32 %v4344_v24, %v7974_v19 }
 0xedc   :  { %v6784_v0 = vpop.eup %6783  ;;  %6807 = vrcp.f32 %v4445_v55  ;;  %v4446_v42 = vadd.f32 1.0, %v6782_v33  ;;  %v4346_v30 = vpop.f32.mrf.mxu1  ;;  %v4126_v34 = vadd.f32 %v4102_v53, %v4065_v54 }
 0xedd   :  { %v6786_v47 = vpop.eup %6785  ;;  %6809 = vtanh.f32 %v4485_v60  ;;  %v4486_v4 = vadd.f32 %v4478_v11, %v4124_v15  ;;  %v4479_v28 = vmul.f32 %v6784_v0, %v4471_v56  ;;  %v4472_v58 = vadd.f32 %v4346_v30, %v7974_v19 }
 0xede   :  { %v6788_v5 = vpop.eup %6787  ;;  %6811 = vrcp.f32 %v4446_v42  ;;  %v4447_v40 = vadd.f32 1.0, %v6786_v47  ;;  %v4350_v23 = vpop.f32.mrf.mxu1  ;;  %v4127_v15 = vadd.f32 %v4103_v61, %v4066_v44  ;;  %v4128_v56 = vadd.f32 %v4104_v26, %v4067_v57 }
 0xedf   :  { %v6790_v63 = vpop.eup %6789  ;;  %6813 = vtanh.f32 %v4486_v4  ;;  %v4487_v7 = vadd.f32 %v4479_v28, %v4125_v17  ;;  %v4480_v51 = vmul.f32 %v6788_v5, %v4472_v58  ;;  %v4473_v48 = vadd.f32 %v4350_v23, %v8020_v3 }
 0xee0   :  { %v6792_v50 = vpop.eup %6791  ;;  %6815 = vrcp.f32 %v4447_v40  ;;  %v4448_v43 = vadd.f32 1.0, %v6790_v63  ;;  %v4352_v41 = vpop.f32.mrf.mxu1 }
 0xee1   :  { %v6794_v55 = vpop.eup %6793  ;;  %6817 = vtanh.f32 %v4487_v7  ;;  %v4488_v24 = vadd.f32 %v4480_v51, %v4126_v34  ;;  %v4481_v33 = vmul.f32 %v6792_v50, %v4473_v48  ;;  %v4474_v53 = vadd.f32 %v4352_v41, %v8020_v3 }
 0xee2   :  { %v6796_v54 = vpop.eup %6795  ;;  %6819 = vrcp.f32 %v4448_v43  ;;  %v4449_v36 = vadd.f32 1.0, %v6794_v55 }
 0xee3   :  { %v6798_v60 = vpop.eup %6797  ;;  %6821 = vtanh.f32 %v4488_v24  ;;  %v4489_v11 = vadd.f32 %v4481_v33, %v4127_v15  ;;  %v4482_v0 = vmul.f32 %v6796_v54, %v4474_v53  ;;  %v10666_v24 = vpop.permute.xlu1 %4536 }
 0xee4   :  { %6823 = vrcp.f32 %v4449_v36  ;;  %v4450_v42 = vadd.f32 1.0, %v6798_v60 }
 0xee5   :  { %v6800_v17 = vpop.eup %6799  ;;  %6825 = vtanh.f32 %v4489_v11  ;;  %v4490_v61 = vadd.f32 %v4482_v0, %v4128_v56 }
 0xee6   :  { %v6802_v30 = vpop.eup %6801  ;;  %6827 = vrcp.f32 %v4450_v42  ;;  %v4499_v44 = vsub.f32 1.0, %v6800_v17  ;;  %v4515_v63 = vmul.f32 %v6800_v17, %v10264_v20 }
 0xee7   :  { %v6804_v47 = vpop.eup %6803  ;;  %6829 = vtanh.f32 %v4490_v61 }
 0xee8   :  { %v6806_v4 = vpop.eup %6805  ;;  %v4500_v28 = vsub.f32 1.0, %v6804_v47  ;;  %v4507_v5 = vmul.f32 %v6802_v30, %v4499_v44  ;;  %v4516_v23 = vmul.f32 %v6804_v47, %v10266_v49 }
 0xee9   :  { %v6808_v58 = vpop.eup %6807 }
 0xeea   :  { %v6810_v40 = vpop.eup %6809  ;;  %v4508_v34 = vmul.f32 %v6806_v4, %v4500_v28  ;;  %v4501_v26 = vsub.f32 1.0, %v6808_v58  ;;  %v4523_v43 = vadd.f32 %v4515_v63, %v4507_v5  ;;  %v4517_v41 = vmul.f32 %v6808_v58, %v10268_v25  ;;  %v10670_v25 = vpop.permute.xlu0 %4532 }
 0xeeb   :  { %v6812_v57 = vpop.eup %6811  ;;  %v10674_v58 = vpop.permute.xlu1 %4540 }
 0xeec   :  { %v6814_v7 = vpop.eup %6813  ;;  %v4524_v51 = vadd.f32 %v4516_v23, %v4508_v34  ;;  %v4502_v48 = vsub.f32 1.0, %v6812_v57  ;;  %v4509_v15 = vmul.f32 %v6810_v40, %v4501_v26  ;;  %v4518_v53 = vmul.f32 %v6812_v57, %v10270_v39 }
 0xeed   :  { %v6816_v50 = vpop.eup %6815  ;;  %v4547_v34 = vmul.f32 %v10670_v25, %v4523_v43 }
 0xeee   :  { %v6818_v55 = vpop.eup %6817  ;;  %4786 = vmatprep.mubr.f32.mxu1 %v4524_v51  ;;  %v4510_v33 = vmul.f32 %v6814_v7, %v4502_v48  ;;  %v4503_v49 = vsub.f32 1.0, %v6816_v50  ;;  %v4525_v36 = vadd.f32 %v4517_v41, %v4509_v15  ;;  %v4519_v0 = vmul.f32 %v6816_v50, %v10272_v9  ;;  %v10682_v7 = vpop.permute.xlu0 %4544 }
 0xeef   :  { %v6820_v54 = vpop.eup %6819  ;;  %4787 = vmatmul.mubr.f32.vlgmr.msra.gmra.mxu1 %v4523_v43  ;;  %v4548_v57 = vmul.f32 %v10670_v25, %v4524_v51 }
 0xef0   :  { %v6822_v20 = vpop.eup %6821  ;;  %v4526_v60 = vadd.f32 %v4518_v53, %v4510_v33  ;;  %v4504_v11 = vsub.f32 1.0, %v6820_v54  ;;  %v4511_v56 = vmul.f32 %v6818_v55, %v4503_v49  ;;  %v4520_v30 = vmul.f32 %v6820_v54, %v10274_v59 }
 0xef1   :  { %v6824_v42 = vpop.eup %6823  ;;  %v4549_v4 = vmul.f32 %v10666_v24, %v4525_v36 }
 0xef2   :  { %v6826_v17 = vpop.eup %6825  ;;  %4792 = vmatprep.mubr.f32.mxu1 %v4526_v60  ;;  %v4512_v61 = vmul.f32 %v6822_v20, %v4504_v11  ;;  %v4527_v44 = vadd.f32 %v4519_v0, %v4511_v56  ;;  %v4505_v39 = vsub.f32 1.0, %v6824_v42  ;;  %v4550_v5 = vmul.f32 %v10666_v24, %v4526_v60 }
 0xef3   :  { %v6828_v47 = vpop.eup %6827  ;;  %4793 = vmatmul.mubr.f32.gmra.mxu1 %v4525_v36  ;;  %v4521_v59 = vmul.f32 %v6824_v42, %v10276_v1  ;;  %v4555_v15 = vadd.f32 %v4549_v4, %v4547_v34  ;;  %v10688_v4 = vpop.permute.xlu1 %4574  ;;  %v12365_v34 = vld [vmem:[#allocation26_spill] sm:$0xff] }
 0xef4   :  { %v6830_v28 = vpop.eup %6829  ;;  %v4528_v9 = vadd.f32 %v4520_v30, %v4512_v61  ;;  %v4506_v40 = vsub.f32 1.0, %v6828_v47  ;;  %v4551_v23 = vmul.f32 %v10674_v58, %v4527_v44  ;;  %v4513_v26 = vmul.f32 %v6826_v17, %v4505_v39 }
 0xef5   :  { %v4522_v50 = vmul.f32 %v6828_v47, %v10278_v13  ;;  %v4564_v55 = vadd.f32 %v4550_v5, %v4548_v57 }
 0xef6   :  { %v4552_v63 = vmul.f32 %v10674_v58, %v4528_v9  ;;  %4798 = vmatprep.mubr.f32.mxu1 %v4528_v9  ;;  %v4514_v48 = vmul.f32 %v6830_v28, %v4506_v40  ;;  %v4529_v41 = vadd.f32 %v4521_v59, %v4513_v26  ;;  %v4556_v33 = vadd.f32 %v4555_v15, %v4551_v23 }
 0xef7   :  { %4799 = vmatmul.mubr.f32.gmra.mxu1 %v4527_v44  ;;  %v7282_v44 = vmov 1966171168   ;;  %v12366_v59 = vlaneseq }
 0xef8   :  { %v4530_v43 = vadd.f32 %v4522_v50, %v4514_v48  ;;  %v4553_v53 = vmul.f32 %v10682_v7, %v4529_v41  ;;  %v4565_v49 = vadd.f32 %v4564_v55, %v4552_v63  ;;  %v4583_v39 = vunpack.c.l.s4 %v7282_v44  ;;  %v10802_v44 = vld [vmem:[%s11172_s3 + $0x30] sm:$0xff] }
 0xef9   :  { %vm10703_vm1 = vcmp.lt.s32.totalorder %v12366_v59, 256  ;;  %v12385_v59 = vld [vmem:[#allocation48_spill] sm:$0xff] }
 0xefa   :  { %v4554_v1 = vmul.f32 %v10682_v7, %v4530_v43  ;;  %4804 = vmatprep.mubr.f32.mxu1 %v4530_v43  ;;  %v4557_v51 = vadd.f32 %v4556_v33, %v4553_v53  ;;  %v4584_v5 = vunpack.c.0.s8 %v4583_v39  ;;  %v12380_v39 = vld [vmem:[#allocation44_spill] sm:$0xff] }
 0xefb   :  { %4805 = vmatmul.mubr.f32.gmra.mxu1 %v4529_v41 }
 0xefc   :  { %v4566_v54 = vadd.f32 %v4565_v49, %v4554_v1  ;;  %5541 = vmatprep.mubr.f32.mxu1 %v11705_v62  ;;  %v4558_v36 = vrot.slane %v4557_v51, 4  ;;  %v10699_v23 = vsub.s32 %v4584_v5, %v12365_v34  ;;  %v10735_v49 = vld [vmem:[%s11172_s3] sm:$0xff]  ;;  %v7226_v1 = vld [vmem:[#allocation2 + $0xf8] sm:$0xff] }
 0xefd   :  { %v12382_v5 = vld [vmem:[#allocation46_spill] sm:$0xff] }
 0xefe   :  { %v4567_v20 = vrot.slane %v4566_v54, 4  ;;  %v4559_v13 = vadd.f32 %v4558_v36, %v4557_v51  ;;  %v10745_v51 = vld [vmem:[%s11172_s3 + $0x8] sm:$0xff]  ;;  %v10814_v34 = vld [vmem:[%s11172_s3 + $0x38] sm:$0xff] }
 0xeff   :  { %v7228_v36 = vld [vmem:[#allocation2 + $0xe8] sm:$0xff] }
 0xf00   :  { %v4568_v60 = vadd.f32 %v4567_v20, %v4566_v54  ;;  %v4560_v56 = vrot.slane %v4559_v13, 2  ;;  %v7227_v54 = vld [vmem:[#allocation2 + $0xf0] sm:$0xff]  ;;  %v7229_v20 = vld [vmem:[#allocation2 + $0xe0] sm:$0xff] }
 0xf02   :  { %v4569_v11 = vrot.slane %v4568_v60, 2  ;;  %v4561_v42 = vadd.f32 %v4560_v56, %v4559_v13  ;;  %v10754_v13 = vld [vmem:[%s11172_s3 + $0x10] sm:$0xff]  ;;  %v12375_v56 = vld [vmem:[#allocation38_spill] sm:$0xff] }
 0xf04   :  { %v4570_v0 = vadd.f32 %v4569_v11, %v4568_v60  ;;  %v4562_v61 = vrot.slane %v4561_v42, 1  ;;  %v12369_v60 = vld [vmem:[#allocation97_spill] sm:$0xff] }
 0xf05   :  { %v12373_v11 = vld [vmem:[#allocation41_spill] sm:$0xff] }
 0xf06   :  { %v4571_v17 = vrot.slane %v4570_v0, 1  ;;  %v4563_v47 = vadd.f32 %v4562_v61, %v4561_v42  ;;  %v12376_v42 = vld [vmem:[#allocation100_spill] sm:$0xff]  ;;  %v12378_v61 = vld [vmem:[#allocation102_spill] sm:$0xff] }
 0xf08   :  { %v4572_v30 = vadd.f32 %v4571_v17, %v4570_v0  ;;  %v10694_v9 = vadd.f32 %v10688_v4, %v4563_v47  ;;  %v10790_v0 = vld [vmem:[%s11172_s3 + $0x28] sm:$0xff]  ;;  %v12377_v17 = vld [vmem:[#allocation101_spill] sm:$0xff] }
 0xf09   :  { %v12381_v47 = vld [vmem:[#allocation45_spill] sm:$0xff] }
 0xf0a   :  { %v10691_v28 = vadd.f32 %v10688_v4, %v4572_v30  ;;  %v12379_v30 = vld [vmem:[#allocation27_spill] sm:$0xff] }
 0xf0c   :  { %v4581_v40 = vcombine.low %v10694_v9, %v10691_v28 }
 0xf0e   :  { %v4588_v26 = vrot.slane %v4581_v40, %v10699_v23  ;;  %v12383_v40 = vld [vmem:[#allocation103_spill] sm:$0xff] }
 0xf10   :  { %v4595_v63 = vrot.slane %v4588_v26, %v10699_v23  ;;  %v12384_v26 = vld [vmem:[#allocation47_spill] sm:$0xff] }
 0xf12   :  { %4601 = vst.msk [vmem:[#allocation5] ss:$4 sm:$0x3] %vm10703_vm1, %v4595_v63  ;;  %v12386_v63 = vld [vmem:[#allocation49_spill] sm:$0xff] }
 0xfaf   :  { %v10710_v48 = vpop.f32.mrf.mxu1 }
 0xfb1   :  { %v10712_v50 = vpop.f32.mrf.mxu1 }
 0xfb3   :  { %v10714_v15 = vpop.f32.mrf.mxu1 }
 0xfb5   :  { %v10716_v41 = vpop.f32.mrf.mxu1 }
 0xfb7   :  { %v10718_v55 = vpop.f32.mrf.mxu1 }
 0xfb9   :  { %v10720_v43 = vpop.f32.mrf.mxu1 }
 0xfbb   :  { %v10722_v33 = vpop.f32.mrf.mxu1 }
 0xfbd   :  { %v10724_v53 = vpop.f32.mrf.mxu1 }
 0xfbe   :  { %4883 = vmatprep.subr.mxu0 %v10724_v53 }
 0xfbf   :  { %4884 = vmatpush1.msra.mxu0 %v10722_v33 }
 0xfc0   :  { %4885 = vmatprep.subr.mxu0 %v10720_v43 }
 0xfc1   :  { %4886 = vmatpush1.msra.mxu0 %v10718_v55 }
 0xfc2   :  { %4887 = vmatprep.subr.mxu0 %v10716_v41 }
 0xfc3   :  { %4888 = vmatpush1.msra.mxu0 %v10714_v15 }
 0xfc4   :  { %4889 = vmatprep.subr.mxu0 %v10712_v50 }
 0xfc5   :  { %4890 = vmatpush1.msra.mxu0 %v10710_v48 }
 0xfc6   :  { %6092 = vmatmul.mubr.msk.f32.vlgmr.msra.gmra.mxu0 %vm497_vm0, %v10735_v49  ;;  %5340 = vmatprep.subr.mxu0 %v7226_v1  ;;  %v12387_v1 = vld [vmem:[#allocation50_spill] sm:$0xff] }
 0xfc7   :  { %4929 = vmatprep.mubr.f32.mxu0 %v11705_v62  ;;  %5341 = vmatpush1.msra.mxu0 %v7227_v54  ;;  %v10826_v54 = vld [vmem:[%s11172_s3 + $0x40] sm:$0xff] }
 0xfc8   :  { %5342 = vmatprep.subr.mxu0 %v7228_v36  ;;  %12388 = vst [vmem:[#allocation82_spill] sm:$0xff] %v10826_v54  ;;  %v12389_v36 = vld [vmem:[#allocation104_spill] sm:$0xff] }
 0xfc9   :  { %5343 = vmatpush1.msra.mxu0 %v7229_v20  ;;  %v12390_v20 = vld [vmem:[#allocation51_spill] sm:$0xff] }
 0xfca   :  { %6093 = vmatmul.mubr.msk.f32.gmra.mxu0 %vm497_vm0, %v10745_v51  ;;  %5344 = vmatprep.subr.mxu0 %v10337_v12  ;;  %v10766_v12 = vld [vmem:[%s11172_s3 + $0x18] sm:$0xff] }
 0xfcb   :  { %4935 = vmatprep.mubr.f32.mxu0 %v11705_v62  ;;  %5345 = vmatpush1.msra.mxu0 %v10339_v52  ;;  %v12370_v52 = vld [vmem:[#allocation98_spill] sm:$0xff] }
 0xfcc   :  { %5346 = vmatprep.subr.mxu0 %v10343_v8  ;;  %v12371_v8 = vld [vmem:[#allocation99_spill] sm:$0xff] }
 0xfcd   :  { %5347 = vmatpush1.msra.mxu0 %v10345_v14  ;;  %v10778_v14 = vld [vmem:[%s11172_s3 + $0x20] sm:$0xff] }
 0xfce   :  { %6094 = vmatmul.mubr.msk.f32.gmra.mxu0 %vm497_vm0, %v10754_v13  ;;  %5348 = vmatprep.subr.mxu0 %v10349_v10  ;;  %v12372_v10 = vld [vmem:[#allocation42_spill] sm:$0xff] }
 0xfcf   :  { %4941 = vmatprep.mubr.f32.mxu0 %v11705_v62  ;;  %5349 = vmatpush1.msra.mxu0 %v10351_v18  ;;  %v12374_v18 = vld [vmem:[#allocation29_spill] sm:$0xff] }
 0xfd0   :  { %5350 = vmatprep.subr.mxu0 %v12369_v60  ;;  %v12391_v60 = vld [vmem:[#allocation52_spill] sm:$0xff] }
 0xfd1   :  { %5351 = vmatpush1.msra.mxu0 %v12370_v52  ;;  %v12392_v52 = vld [vmem:[#allocation53_spill] sm:$0xff] }
 0xfd2   :  { %6095 = vmatmul.mubr.msk.f32.gmra.mxu0 %vm497_vm0, %v10766_v12  ;;  %5352 = vmatprep.subr.mxu0 %v12371_v8  ;;  %v10838_v8 = vld [vmem:[%s11172_s3 + $0x48] sm:$0xff] }
 0xfd3   :  { %4947 = vmatprep.mubr.f32.mxu0 %v11705_v62  ;;  %5353 = vmatpush1.msra.mxu0 %v12372_v10  ;;  %12393 = vst [vmem:[#allocation83_spill] sm:$0xff] %v10838_v8  ;;  %v12394_v10 = vld [vmem:[#allocation54_spill] sm:$0xff] }
 0xfd4   :  { %5354 = vmatprep.subr.mxu0 %v12373_v11  ;;  %v12395_v11 = vld [vmem:[#allocation105_spill] sm:$0xff] }
 0xfd5   :  { %5355 = vmatpush1.msra.mxu0 %v12374_v18  ;;  %v12396_v18 = vld [vmem:[#allocation55_spill] sm:$0xff] }
 0xfd6   :  { %6096 = vmatmul.mubr.msk.f32.gmra.mxu0 %vm497_vm0, %v10778_v14  ;;  %5356 = vmatprep.subr.mxu0 %v12375_v56  ;;  %v12397_v56 = vld [vmem:[#allocation56_spill] sm:$0xff] }
 0xfd7   :  { %4953 = vmatprep.mubr.f32.mxu0 %v11705_v62  ;;  %5357 = vmatpush1.msra.mxu0 %v12376_v42  ;;  %v10850_v42 = vld [vmem:[%s11172_s3 + $0x50] sm:$0xff] }
 0xfd8   :  { %5358 = vmatprep.subr.mxu0 %v12377_v17  ;;  %12398 = vst [vmem:[#allocation84_spill] sm:$0xff] %v10850_v42  ;;  %v12399_v17 = vld [vmem:[#allocation57_spill] sm:$0xff] }
 0xfd9   :  { %5359 = vmatpush1.msra.mxu0 %v12378_v61  ;;  %v12400_v61 = vld [vmem:[#allocation58_spill] sm:$0xff] }
 0xfda   :  { %6097 = vmatmul.mubr.msk.f32.gmra.mxu0 %vm497_vm0, %v10790_v0  ;;  %5360 = vmatprep.subr.mxu0 %v12379_v30  ;;  %v12401_v30 = vld [vmem:[#allocation106_spill] sm:$0xff] }
 0xfdb   :  { %4959 = vmatprep.mubr.f32.mxu0 %v11705_v62  ;;  %5361 = vmatpush1.msra.mxu0 %v12380_v39  ;;  %v12402_v39 = vld [vmem:[#allocation59_spill] sm:$0xff] }
 0xfdc   :  { %5362 = vmatprep.subr.mxu0 %v12381_v47  ;;  %v10862_v47 = vld [vmem:[%s11172_s3 + $0x58] sm:$0xff]  ;;  %s7283_s3 = smov [#allocation5]  }
 0xfdd   :  { %5363 = vmatpush1.msra.mxu0 %v12382_v5  ;;  %12403 = vst [vmem:[#allocation85_spill] sm:$0xff] %v10862_v47  ;;  %v12404_v5 = vld [vmem:[#allocation60_spill] sm:$0xff]  ;;  %s5844_s9 = sshll.u32 %s7283_s3, 4  ;;  %s5845_s9 = int_to_ptr.vmem [resolvable:$true] %s5844_s9 }
 0xfde   :  { %6098 = vmatmul.mubr.msk.f32.gmra.mxu0 %vm497_vm0, %v10802_v44  ;;  %5364 = vmatprep.subr.mxu0 %v12383_v40  ;;  %v12405_v40 = vld [vmem:[#allocation61_spill] sm:$0xff]  ;;  %s7250_s10 = scalar_lea.vmem %s5845_s9, 128  ;;  %p7255_p6 = scmp.lt.s32.totalorder %s5845_s9, %s5845_s9 }
 0xfdf   :  { %4965 = vmatprep.mubr.f32.mxu0 %v11705_v62  ;;  %5365 = vmatpush1.msra.mxu0 %v12384_v26  ;;  %v12406_v26 = vld [vmem:[#allocation62_spill] sm:$0xff]  ;;  %p7251_p5 = scmp.ne.s32.totalorder %s5845_s9, %s7250_s10  ;;  %p7256_p7 = scmp.lt.s32.totalorder %s7250_s10, %s7250_s10 }
 0xfe0   :  { %5366 = vmatprep.subr.mxu0 %v12385_v59  ;;  %v12407_v59 = vld [vmem:[#allocation107_spill] sm:$0xff] }
 0xfe1   :  { %5367 = vmatpush1.msra.mxu0 %v12386_v63  ;;  %v12408_v63 = vld [vmem:[#allocation63_spill] sm:$0xff]  ;;  %p7257_p8 = por %p7256_p7, %p7255_p6 }
 0xfe2   :  { %6099 = vmatmul.mubr.msk.f32.gmra.mxu0 %vm497_vm0, %v10814_v34  ;;  %5368 = vmatprep.subr.mxu0 %v12387_v1  ;;  %v12409_v1 = vld [vmem:[#allocation64_spill] sm:$0xff] }
 0xfe3   :  { %4971 = vmatprep.mubr.f32.mxu0 %v11705_v62  ;;  %5369 = vmatpush1.msra.mxu0 %v12389_v36  ;;  %v12410_v36 = vld [vmem:[#allocation65_spill] sm:$0xff]  ;;  %p7258_p9 = pnand %p7257_p8, %p7251_p5 }
 0xfe4   :  { %5370 = vmatprep.subr.mxu0 %v12390_v20  ;;  %v12411_v20 = vld [vmem:[#allocation66_spill] sm:$0xff] }
 0xfe5   :  { %5371 = vmatpush1.msra.mxu0 %v12391_v60  ;;  %v12412_v60 = vld [vmem:[#allocation67_spill] sm:$0xff] }
 0xfe6   :  { %6100 = vmatmul.mubr.msk.f32.gmra.mxu0 %vm497_vm0, %v10826_v54  ;;  %5372 = vmatprep.subr.mxu0 %v12392_v52  ;;  %v12413_v52 = vld [vmem:[#allocation68_spill] sm:$0xff] }
 0xfe7   :  { %4977 = vmatprep.mubr.f32.mxu0 %v11705_v62  ;;  %5373 = vmatpush2.msra.mxu0 %v12394_v10  ;;  %v12414_v10 = vld [vmem:[#allocation69_spill] sm:$0xff] }
 0xfe8   :  { %5374 = vmatprep.subr.mxu0 %v12395_v11  ;;  %v12415_v11 = vld [vmem:[#allocation70_spill] sm:$0xff] }
 0xfe9   :  { %5375 = vmatpush2.msra.mxu0 %v12396_v18  ;;  %v12416_v18 = vld [vmem:[#allocation71_spill] sm:$0xff] }
 0xfea   :  { %6101 = vmatmul.mubr.msk.f32.gmra.mxu0 %vm497_vm0, %v10838_v8  ;;  %5376 = vmatprep.subr.mxu0 %v12397_v56  ;;  %v12417_v56 = vld [vmem:[#allocation72_spill] sm:$0xff] }
 0xfeb   :  { %4983 = vmatprep.mubr.f32.mxu0 %v11705_v62  ;;  %5377 = vmatpush2.msra.mxu0 %v12399_v17  ;;  %v12418_v17 = vld [vmem:[#allocation73_spill] sm:$0xff] }
 0xfec   :  { %5378 = vmatprep.subr.mxu0 %v12400_v61  ;;  %v12419_v61 = vld [vmem:[#allocation74_spill] sm:$0xff] }
 0xfed   :  { %5379 = vmatpush2.msra.mxu0 %v12401_v30  ;;  %v12420_v30 = vld [vmem:[#allocation75_spill] sm:$0xff] }
 0xfee   :  { %6102 = vmatmul.mubr.msk.f32.gmra.mxu0 %vm497_vm0, %v10850_v42  ;;  %5380 = vmatprep.subr.mxu0 %v12402_v39  ;;  %v12421_v39 = vld [vmem:[#allocation76_spill] sm:$0xff] }
 0xfef   :  { %4989 = vmatprep.mubr.f32.mxu0 %v11705_v62  ;;  %5381 = vmatpush2.msra.mxu0 %v12404_v5  ;;  %v12422_v5 = vld [vmem:[#allocation77_spill] sm:$0xff] }
 0xff0   :  { %5382 = vmatprep.subr.mxu0 %v12405_v40  ;;  %v12423_v40 = vld [vmem:[#allocation78_spill] sm:$0xff] }
 0xff1   :  { %5383 = vmatpush2.msra.mxu0 %v12406_v26  ;;  %v12424_v26 = vld [vmem:[#allocation79_spill] sm:$0xff] }
 0xff2   :  { %6103 = vmatmul.mubr.msk.f32.gmra.mxu0 %vm497_vm0, %v10862_v47  ;;  %5384 = vmatprep.subr.mxu0 %v12407_v59  ;;  %v12425_v59 = vld [vmem:[#allocation80_spill] sm:$0xff] }
 0xff3   :  { %5385 = vmatpush2.msra.mxu0 %v12408_v63  ;;  %v12426_v63 = vld [vmem:[#allocation81_spill] sm:$0xff] }
 0xff4   :  { %5386 = vmatprep.subr.mxu0 %v12409_v1  ;;  %v12427_v1 = vld [vmem:[#allocation28_spill] sm:$0xff] }
 0xff5   :  { %5387 = vmatpush2.msra.mxu0 %v12410_v36  ;;  %v10891_v36 = vrot.slane %v10694_v9, %v12427_v1 }
 0xff6   :  { %5388 = vmatprep.subr.mxu0 %v12411_v20  ;;  %v10895_v20 = vrot.slane %v10691_v28, %v12427_v1 }
 0xff7   :  { %5389 = vmatpush2.msra.mxu0 %v12412_v60  ;;  %v12428_v60 = vld [vmem:[#allocation17_spill] sm:$0xff] }
 0xff8   :  { %5390 = vmatprep.subr.mxu0 %v12413_v52  ;;  %v4610_v52 = vmul.f32 %v10891_v36, %v12428_v60 }
 0xff9   :  { %5391 = vmatpush2.msra.mxu0 %v12414_v10  ;;  %v4611_v10 = vmul.f32 %v10895_v20, %v12428_v60 }
 0xffa   :  { %5392 = vmatprep.subr.mxu0 %v12415_v11  ;;  %v12429_v11 = vld [vmem:[#allocation30_spill] sm:$0xff] }
 0xffb   :  { %5393 = vmatpush2.msra.mxu0 %v12416_v18  ;;  %v4634_v18 = vadd.f32 %v4610_v52, %v12429_v11  ;;  %v4635_v9 = vadd.f32 %v4611_v10, %v12429_v11  ;;  %v12433_v11 = vld [vmem:[#allocation13_spill] sm:$0xff] }
 0xffc   :  { %5394 = vmatprep.subr.mxu0 %v12417_v56  ;;  %v12430_v56 = vld [vmem:[#allocation9_spill] sm:$0xff]  ;;  %v4617_v8 = vmul.f32 %v10895_v20, %v12433_v11 }
 0xffd   :  { %5395 = vmatpush2.msra.mxu0 %v12418_v17  ;;  %v4612_v17 = vmul.f32 %v10891_v36, %v12430_v56 }
 0xffe   :  { %5396 = vmatprep.subr.mxu0 %v12419_v61 }
 0xfff   :  { %5397 = vmatpush2.msra.mxu0 %v12420_v30 }
0x1000   :  { %5398 = vmatprep.subr.mxu0 %v12421_v39  ;;  %v4613_v39 = vmul.f32 %v10895_v20, %v12430_v56  ;;  %v4616_v56 = vmul.f32 %v10891_v36, %v12433_v11 }
0x1001   :  { %5399 = vmatpush2.msra.mxu0 %v12422_v5 }
0x1002   :  { %5400 = vmatprep.subr.mxu0 %v12423_v40 }
0x1003   :  { %5401 = vmatpush2.msra.mxu0 %v12424_v26  ;;  %v12431_v26 = vld [vmem:[#allocation10_spill] sm:$0xff] }
0x1004   :  { %5402 = vmatprep.subr.mxu0 %v12425_v59  ;;  %v4636_v59 = vadd.f32 %v4612_v17, %v12431_v26  ;;  %v4637_v10 = vadd.f32 %v4613_v39, %v12431_v26  ;;  %v12434_v17 = vld [vmem:[#allocation12_spill] sm:$0xff] }
0x1005   :  { %5403 = vmatpush2.msra.mxu0 %v12426_v63  ;;  %v12432_v63 = vld [vmem:[#allocation11_spill] sm:$0xff]  ;;  %v12435_v39 = vld [vmem:[#allocation32_spill] sm:$0xff] }
0x1006   :  { %v4614_v60 = vmul.f32 %v10891_v36, %v12432_v63  ;;  %v4615_v52 = vmul.f32 %v10895_v20, %v12432_v63 }
0x1086   :  { %v4925_v61 = vpop.f32.mrf.mxu0 }
0x1087   :  { %v4996_v30 = vadd.f32 %v4925_v61, %v4634_v18 }
0x1088   :  { %v4927_v28 = vpop.f32.mrf.mxu0 }
0x1089   :  { %v6104_v5 = vmul.f32 -1.442695, %v4996_v30  ;;  %v4997_v40 = vadd.f32 %v4927_v28, %v4635_v9  ;;  %v4638_v28 = vadd.f32 %v4614_v60, %v12434_v17  ;;  %v4641_v60 = vadd.f32 %v4617_v8, %v12435_v39 }
0x108a   :  { %v4931_v1 = vpop.f32.mrf.mxu0 }
0x108b   :  { %6831 = vpow2.f32 %v6104_v5  ;;  %v6105_v47 = vmul.f32 -1.442695, %v4997_v40  ;;  %v4998_v18 = vadd.f32 %v4931_v1, %v4636_v59  ;;  %v4639_v1 = vadd.f32 %v4615_v52, %v12434_v17  ;;  %v12437_v52 = vld [vmem:[#allocation37_spill] sm:$0xff] }
0x108c   :  { %v4933_v61 = vpop.f32.mrf.mxu0  ;;  %v4640_v59 = vadd.f32 %v4616_v56, %v12435_v39  ;;  %v12439_v39 = vld [vmem:[#allocation39_spill] sm:$0xff] }
0x108d   :  { %6833 = vpow2.f32 %v6105_v47  ;;  %v6106_v30 = vmul.f32 -1.442695, %v4998_v18  ;;  %v4999_v9 = vadd.f32 %v4933_v61, %v4637_v10  ;;  %v12436_v47 = vld [vmem:[#allocation15_spill] sm:$0xff] }
0x108e   :  { %v4937_v42 = vpop.f32.mrf.mxu0  ;;  %v4618_v18 = vmul.f32 %v10891_v36, %v12436_v47 }
0x108f   :  { %6835 = vpow2.f32 %v6106_v30  ;;  %v6107_v63 = vmul.f32 -1.442695, %v4999_v9  ;;  %v5000_v5 = vadd.f32 %v4937_v42, %v4638_v28  ;;  %v4619_v42 = vmul.f32 %v10895_v20, %v12436_v47 }
0x1090   :  { %v4939_v40 = vpop.f32.mrf.mxu0  ;;  %v4620_v9 = vmul.f32 %v10891_v36, %v12437_v52  ;;  %v4642_v28 = vadd.f32 %v4618_v18, %v12354_v2 }
0x1091   :  { %6837 = vpow2.f32 %v6107_v63  ;;  %v6108_v26 = vmul.f32 -1.442695, %v5000_v5  ;;  %v5001_v54 = vadd.f32 %v4939_v40, %v4639_v1  ;;  %v4621_v1 = vmul.f32 %v10895_v20, %v12437_v52 }
0x1092   :  { %v4943_v10 = vpop.f32.mrf.mxu0 }
0x1093   :  { %6839 = vpow2.f32 %v6108_v26  ;;  %v6109_v61 = vmul.f32 -1.442695, %v5001_v54  ;;  %v5002_v11 = vadd.f32 %v4943_v10, %v4640_v59  ;;  %v4643_v26 = vadd.f32 %v4619_v42, %v12354_v2  ;;  %v12438_v10 = vld [vmem:[#allocation18_spill] sm:$0xff] }
0x1094   :  { %v4945_v30 = vpop.f32.mrf.mxu0  ;;  %v4644_v47 = vadd.f32 %v4620_v9, %v12438_v10  ;;  %v4645_v52 = vadd.f32 %v4621_v1, %v12438_v10 }
0x1095   :  { %6841 = vpow2.f32 %v6109_v61  ;;  %v6110_v56 = vmul.f32 -1.442695, %v5002_v11  ;;  %v5003_v63 = vadd.f32 %v4945_v30, %v4641_v60  ;;  %v4622_v61 = vmul.f32 %v10891_v36, %v12439_v39 }
0x1096   :  { %v4949_v5 = vpop.f32.mrf.mxu0 }
0x1097   :  { %6843 = vpow2.f32 %v6110_v56  ;;  %v6111_v8 = vmul.f32 -1.442695, %v5003_v63  ;;  %v5052_v54 = vadd.f32 %v4949_v5, %v4642_v28  ;;  %v4623_v56 = vmul.f32 %v10895_v20, %v12439_v39 }
0x1098   :  { %v6832_v40 = vpop.eup %6831  ;;  %v4951_v59 = vpop.f32.mrf.mxu0  ;;  %v4646_v2 = vadd.f32 %v4622_v61, %v12280_v46 }
0x1099   :  { %v5028_v11 = vadd.f32 1.0, %v6832_v40  ;;  %6845 = vpow2.f32 %v6111_v8  ;;  %v6112_v60 = vmul.f32 -1.442695, %v5052_v54  ;;  %v5053_v18 = vadd.f32 %v4951_v59, %v4643_v26 }
0x109a   :  { %v6834_v30 = vpop.eup %6833  ;;  %v4955_v17 = vpop.f32.mrf.mxu0  ;;  %v4624_v8 = vmul.f32 %v10891_v36, %v12360_v32 }
0x109b   :  { %6847 = vrcp.f32 %v5028_v11  ;;  %v5029_v42 = vadd.f32 1.0, %v6834_v30  ;;  %v6113_v63 = vmul.f32 -1.442695, %v5053_v18  ;;  %v5054_v28 = vadd.f32 %v4955_v17, %v4644_v47 }
0x109c   :  { %v6836_v5 = vpop.eup %6835  ;;  %6849 = vpow2.f32 %v6112_v60  ;;  %v4957_v9 = vpop.f32.mrf.mxu0  ;;  %v4647_v11 = vadd.f32 %v4623_v56, %v12280_v46  ;;  %v4625_v17 = vmul.f32 %v10895_v20, %v12360_v32 }
0x109d   :  { %6851 = vrcp.f32 %v5029_v42  ;;  %v5030_v54 = vadd.f32 1.0, %v6836_v5  ;;  %v6114_v26 = vmul.f32 -1.442695, %v5054_v28  ;;  %v5055_v40 = vadd.f32 %v4957_v9, %v4645_v52 }
0x109e   :  { %v6838_v1 = vpop.eup %6837  ;;  %6853 = vpow2.f32 %v6113_v63  ;;  %v4961_v59 = vpop.f32.mrf.mxu0  ;;  %v4648_v42 = vadd.f32 %v4624_v8, %v11838_v38  ;;  %v4649_v56 = vadd.f32 %v4625_v17, %v11838_v38  ;;  %v4627_v17 = vmul.f32 %v10895_v20, %v12192_v27 }
0x109f   :  { %6855 = vrcp.f32 %v5030_v54  ;;  %v5031_v47 = vadd.f32 1.0, %v6838_v1  ;;  %v6115_v60 = vmul.f32 -1.442695, %v5055_v40  ;;  %v5056_v18 = vadd.f32 %v4961_v59, %v4646_v2 }
0x10a0   :  { %v6840_v61 = vpop.eup %6839  ;;  %6857 = vpow2.f32 %v6114_v26  ;;  %v4963_v30 = vpop.f32.mrf.mxu0  ;;  %v4626_v26 = vmul.f32 %v10891_v36, %v12192_v27 }
0x10a1   :  { %6859 = vrcp.f32 %v5031_v47  ;;  %v5032_v28 = vadd.f32 1.0, %v6840_v61  ;;  %v6116_v52 = vmul.f32 -1.442695, %v5056_v18  ;;  %v5057_v5 = vadd.f32 %v4963_v30, %v4647_v11 }
0x10a2   :  { %v6842_v63 = vpop.eup %6841  ;;  %6861 = vpow2.f32 %v6115_v60  ;;  %v4967_v9 = vpop.f32.mrf.mxu0 }
0x10a3   :  { %6863 = vrcp.f32 %v5032_v28  ;;  %v5033_v32 = vadd.f32 1.0, %v6842_v63  ;;  %v6117_v54 = vmul.f32 -1.442695, %v5057_v5  ;;  %v5058_v1 = vadd.f32 %v4967_v9, %v4648_v42 }
0x10a4   :  { %v6844_v40 = vpop.eup %6843  ;;  %6865 = vpow2.f32 %v6116_v52  ;;  %v4969_v2 = vpop.f32.mrf.mxu0  ;;  %v4650_v5 = vadd.f32 %v4626_v26, %v7886_v22 }
0x10a5   :  { %6867 = vrcp.f32 %v5033_v32  ;;  %v5034_v8 = vadd.f32 1.0, %v6844_v40  ;;  %v6118_v59 = vmul.f32 -1.442695, %v5058_v1  ;;  %v5059_v47 = vadd.f32 %v4969_v2, %v4649_v56 }
0x10a6   :  { %v6846_v11 = vpop.eup %6845  ;;  %6869 = vpow2.f32 %v6117_v54  ;;  %v4973_v60 = vpop.f32.mrf.mxu0  ;;  %v4628_v32 = vmul.f32 %v10891_v36, %v12106_v29  ;;  %v4629_v40 = vmul.f32 %v10895_v20, %v12106_v29 }
0x10a7   :  { %6871 = vrcp.f32 %v5034_v8  ;;  %v5035_v18 = vadd.f32 1.0, %v6846_v11  ;;  %v6119_v61 = vmul.f32 -1.442695, %v5059_v47  ;;  %v5108_v30 = vadd.f32 %v4973_v60, %v7876_v16 }
0x10a8   :  { %v6848_v42 = vpop.eup %6847  ;;  %6873 = vpow2.f32 %v6118_v59  ;;  %v4975_v28 = vpop.f32.mrf.mxu0  ;;  %v4651_v59 = vadd.f32 %v4627_v17, %v7886_v22 }
0x10a9   :  { %v6850_v52 = vpop.eup %6849  ;;  %6875 = vrcp.f32 %v5035_v18  ;;  %v5116_v63 = vmul.f32 %v6848_v42, %v5108_v30  ;;  %v5109_v9 = vadd.f32 %v4975_v28, %v7876_v16  ;;  %v4652_v18 = vadd.f32 %v4628_v32, %v12362_v6 }
0x10aa   :  { %v6852_v56 = vpop.eup %6851  ;;  %v5084_v54 = vadd.f32 1.0, %v6850_v52  ;;  %6877 = vpow2.f32 %v6119_v61  ;;  %v4979_v1 = vpop.f32.mrf.mxu0  ;;  %v4630_v61 = vmul.f32 %v10891_v36, %v12363_v35 }
0x10ab   :  { %v6854_v2 = vpop.eup %6853  ;;  %v5124_v8 = vadd.f32 %v5116_v63, %v4650_v5  ;;  %v5117_v47 = vmul.f32 %v6852_v56, %v5109_v9  ;;  %v5110_v11 = vadd.f32 %v4979_v1, %v7972_v37  ;;  %v4653_v9 = vadd.f32 %v4629_v40, %v12362_v6 }
0x10ac   :  { %v6856_v60 = vpop.eup %6855  ;;  %6879 = vrcp.f32 %v5084_v54  ;;  %v5085_v26 = vadd.f32 1.0, %v6854_v2  ;;  %v4981_v30 = vpop.f32.mrf.mxu0  ;;  %v4631_v54 = vmul.f32 %v10895_v20, %v12363_v35 }
0x10ad   :  { %v6858_v42 = vpop.eup %6857  ;;  %6881 = vtanh.f32 %v5124_v8  ;;  %v5125_v28 = vadd.f32 %v5117_v47, %v4651_v59  ;;  %v5118_v52 = vmul.f32 %v6856_v60, %v5110_v11  ;;  %v5111_v5 = vadd.f32 %v4981_v30, %v7972_v37 }
0x10ae   :  { %v6860_v63 = vpop.eup %6859  ;;  %6883 = vrcp.f32 %v5085_v26  ;;  %v5086_v17 = vadd.f32 1.0, %v6858_v42  ;;  %v4985_v56 = vpop.f32.mrf.mxu0  ;;  %v4654_v47 = vadd.f32 %v4630_v61, %v12110_v31  ;;  %v4632_v60 = vmul.f32 %v10891_v36, %v7990_v45 }
0x10af   :  { %v6862_v32 = vpop.eup %6861  ;;  %6885 = vtanh.f32 %v5125_v28  ;;  %v5126_v1 = vadd.f32 %v5118_v52, %v4652_v18  ;;  %v5119_v2 = vmul.f32 %v6860_v63, %v5111_v5  ;;  %v5112_v22 = vadd.f32 %v4985_v56, %v7974_v19 }
0x10b0   :  { %v6864_v8 = vpop.eup %6863  ;;  %6887 = vrcp.f32 %v5086_v17  ;;  %v5087_v59 = vadd.f32 1.0, %v6862_v32  ;;  %v4987_v11 = vpop.f32.mrf.mxu0  ;;  %v4655_v52 = vadd.f32 %v4631_v54, %v12110_v31  ;;  %v4633_v63 = vmul.f32 %v10895_v20, %v7990_v45 }
0x10b1   :  { %v6866_v40 = vpop.eup %6865  ;;  %6889 = vtanh.f32 %v5126_v1  ;;  %v5127_v26 = vadd.f32 %v5119_v2, %v4653_v9  ;;  %v5120_v30 = vmul.f32 %v6864_v8, %v5112_v22  ;;  %v5113_v42 = vadd.f32 %v4987_v11, %v7974_v19 }
0x10b2   :  { %v6868_v28 = vpop.eup %6867  ;;  %6891 = vrcp.f32 %v5087_v59  ;;  %v5088_v18 = vadd.f32 1.0, %v6866_v40  ;;  %v4991_v5 = vpop.f32.mrf.mxu0  ;;  %v4656_v9 = vadd.f32 %v4632_v60, %v8011_v21 }
0x10b3   :  { %v6870_v61 = vpop.eup %6869  ;;  %6893 = vtanh.f32 %v5127_v26  ;;  %v5128_v17 = vadd.f32 %v5120_v30, %v4654_v47  ;;  %v5121_v56 = vmul.f32 %v6868_v28, %v5113_v42  ;;  %v5114_v36 = vadd.f32 %v4991_v5, %v8020_v3 }
0x10b4   :  { %v6872_v32 = vpop.eup %6871  ;;  %6895 = vrcp.f32 %v5088_v18  ;;  %v5089_v22 = vadd.f32 1.0, %v6870_v61  ;;  %v4993_v1 = vpop.f32.mrf.mxu0  ;;  %v4657_v26 = vadd.f32 %v4633_v63, %v8011_v21 }
0x10b5   :  { %v6874_v2 = vpop.eup %6873  ;;  %6897 = vtanh.f32 %v5128_v17  ;;  %v5129_v8 = vadd.f32 %v5121_v56, %v4655_v52  ;;  %v5122_v54 = vmul.f32 %v6872_v32, %v5114_v36  ;;  %v5115_v59 = vadd.f32 %v4993_v1, %v8020_v3 }
0x10b6   :  { %v6876_v11 = vpop.eup %6875  ;;  %6899 = vrcp.f32 %v5089_v22  ;;  %v5090_v20 = vadd.f32 1.0, %v6874_v2 }
0x10b7   :  { %v6878_v40 = vpop.eup %6877  ;;  %6901 = vtanh.f32 %v5129_v8  ;;  %v5130_v47 = vadd.f32 %v5122_v54, %v4656_v9  ;;  %v5123_v30 = vmul.f32 %v6876_v11, %v5115_v59 }
0x10b8   :  { %6903 = vrcp.f32 %v5090_v20  ;;  %v5091_v42 = vadd.f32 1.0, %v6878_v40 }
0x10b9   :  { %v6880_v28 = vpop.eup %6879  ;;  %6905 = vtanh.f32 %v5130_v47  ;;  %v5131_v60 = vadd.f32 %v5123_v30, %v4657_v26 }
0x10ba   :  { %v6882_v18 = vpop.eup %6881  ;;  %v5140_v5 = vsub.f32 1.0, %v6880_v28  ;;  %6907 = vrcp.f32 %v5091_v42  ;;  %v5156_v2 = vmul.f32 %v6880_v28, %v10710_v48 }
0x10bb   :  { %v6884_v52 = vpop.eup %6883  ;;  %6909 = vtanh.f32 %v5131_v60 }
0x10bc   :  { %v6886_v61 = vpop.eup %6885  ;;  %v5141_v17 = vsub.f32 1.0, %v6884_v52  ;;  %v5148_v36 = vmul.f32 %v6882_v18, %v5140_v5  ;;  %v5157_v9 = vmul.f32 %v6884_v52, %v10712_v50 }
0x10bd   :  { %v6888_v56 = vpop.eup %6887 }
0x10be   :  { %v6890_v32 = vpop.eup %6889  ;;  %v5149_v22 = vmul.f32 %v6886_v61, %v5141_v17  ;;  %v5142_v63 = vsub.f32 1.0, %v6888_v56  ;;  %v5164_v40 = vadd.f32 %v5156_v2, %v5148_v36  ;;  %v5158_v47 = vmul.f32 %v6888_v56, %v10714_v15 }
0x10bf   :  { %v6892_v1 = vpop.eup %6891 }
0x10c0   :  { %v6894_v8 = vpop.eup %6893  ;;  %v5165_v54 = vadd.f32 %v5157_v9, %v5149_v22  ;;  %v5143_v59 = vsub.f32 1.0, %v6892_v1  ;;  %v5150_v11 = vmul.f32 %v6890_v32, %v5142_v63  ;;  %v5159_v42 = vmul.f32 %v6892_v1, %v10716_v41 }
0x10c1   :  { %v6896_v20 = vpop.eup %6895 }
0x10c2   :  { %v6898_v26 = vpop.eup %6897  ;;  %5404 = vmatprep.mubr.f32.mxu0 %v5165_v54  ;;  %v5151_v30 = vmul.f32 %v6894_v8, %v5143_v59  ;;  %v5144_v60 = vsub.f32 1.0, %v6896_v20  ;;  %v5166_v50 = vadd.f32 %v5158_v47, %v5150_v11  ;;  %v5160_v17 = vmul.f32 %v6896_v20, %v10718_v55 }
0x10c3   :  { %v6900_v18 = vpop.eup %6899  ;;  %5405 = vmatmul.mubr.f32.vlgmr.msra.gmra.mxu0 %v5164_v40  ;;  %v5172_v59 = vmul.f32 %v5164_v40, %v10670_v25 }
0x10c4   :  { %v6902_v5 = vpop.eup %6901  ;;  %v5167_v52 = vadd.f32 %v5159_v42, %v5151_v30  ;;  %v5145_v48 = vsub.f32 1.0, %v6900_v18  ;;  %v5152_v61 = vmul.f32 %v6898_v26, %v5144_v60  ;;  %v5161_v15 = vmul.f32 %v6900_v18, %v10720_v43 }
0x10c5   :  { %v6904_v28 = vpop.eup %6903  ;;  %v5174_v41 = vmul.f32 %v5166_v50, %v10666_v24  ;;  %v5173_v43 = vmul.f32 %v5165_v54, %v10670_v25 }
0x10c6   :  { %v6906_v32 = vpop.eup %6905  ;;  %5410 = vmatprep.mubr.f32.mxu0 %v5167_v52  ;;  %v5153_v36 = vmul.f32 %v6902_v5, %v5145_v48  ;;  %v5146_v56 = vsub.f32 1.0, %v6904_v28  ;;  %v5168_v9 = vadd.f32 %v5160_v17, %v5152_v61  ;;  %v5175_v1 = vmul.f32 %v5167_v52, %v10666_v24 }
0x10c7   :  { %v6908_v22 = vpop.eup %6907  ;;  %5411 = vmatmul.mubr.f32.gmra.mxu0 %v5166_v50  ;;  %v5162_v20 = vmul.f32 %v6904_v28, %v10722_v33  ;;  %v5180_v42 = vadd.f32 %v5174_v41, %v5172_v59 }
0x10c8   :  { %v6910_v63 = vpop.eup %6909  ;;  %v5169_v2 = vadd.f32 %v5161_v15, %v5153_v36  ;;  %v5147_v8 = vsub.f32 1.0, %v6908_v22  ;;  %v5176_v55 = vmul.f32 %v5168_v9, %v10674_v58  ;;  %v5154_v11 = vmul.f32 %v6906_v32, %v5146_v56 }
0x10c9   :  { %v5163_v30 = vmul.f32 %v6908_v22, %v10724_v53  ;;  %v5189_v18 = vadd.f32 %v5175_v1, %v5173_v43 }
0x10ca   :  { %v5177_v47 = vmul.f32 %v5169_v2, %v10674_v58  ;;  %5416 = vmatprep.mubr.f32.mxu0 %v5169_v2  ;;  %v5155_v26 = vmul.f32 %v6910_v63, %v5147_v8  ;;  %v5170_v60 = vadd.f32 %v5162_v20, %v5154_v11  ;;  %v5181_v5 = vadd.f32 %v5180_v42, %v5176_v55 }
0x10cb   :  { %5417 = vmatmul.mubr.f32.gmra.mxu0 %v5168_v9 }
0x10cc   :  { %v5171_v50 = vadd.f32 %v5163_v30, %v5155_v26  ;;  %v5178_v40 = vmul.f32 %v5170_v60, %v10682_v7  ;;  %v5190_v52 = vadd.f32 %v5189_v18, %v5177_v47 }
0x10ce   :  { %v5179_v48 = vmul.f32 %v5171_v50, %v10682_v7  ;;  %5422 = vmatprep.mubr.f32.mxu0 %v5171_v50  ;;  %v5182_v33 = vadd.f32 %v5181_v5, %v5178_v40  ;;  %v12446_v5 = vld [vmem:[#allocation30_spill] sm:$0xff] }
0x10cf   :  { %5423 = vmatmul.mubr.f32.gmra.mxu0 %v5170_v60 }
0x10d0   :  { %v5191_v54 = vadd.f32 %v5190_v52, %v5179_v48  ;;  %v5183_v28 = vrot.slane %v5182_v33, 4  ;;  %v12447_v52 = vld [vmem:[#allocation9_spill] sm:$0xff] }
0x10d2   :  { %v5192_v61 = vrot.slane %v5191_v54, 4  ;;  %v5184_v17 = vadd.f32 %v5183_v28, %v5182_v33 }
0x10d4   :  { %v5193_v32 = vadd.f32 %v5192_v61, %v5191_v54  ;;  %v5185_v53 = vrot.slane %v5184_v17, 2 }
0x10d6   :  { %v5194_v36 = vrot.slane %v5193_v32, 2  ;;  %v5186_v15 = vadd.f32 %v5185_v53, %v5184_v17  ;;  %v12448_v53 = vld [vmem:[#allocation10_spill] sm:$0xff] }
0x10d8   :  { %v5195_v56 = vadd.f32 %v5194_v36, %v5193_v32  ;;  %v5187_v22 = vrot.slane %v5186_v15, 1 }
0x10da   :  { %v5196_v41 = vrot.slane %v5195_v56, 1  ;;  %v5188_v9 = vadd.f32 %v5187_v22, %v5186_v15  ;;  %v12449_v15 = vld [vmem:[#allocation11_spill] sm:$0xff] }
0x10dc   :  { %v5197_v63 = vadd.f32 %v5196_v41, %v5195_v56  ;;  %v5198_v2 = vadd.f32 %v5188_v9, %v10688_v4 }
0x10de   :  { %v5199_v1 = vadd.f32 %v5197_v63, %v10688_v4 }
0x10e0   :  { %v5202_v8 = vcombine.low %v5198_v2, %v5199_v1 }
0x10e2   :  { %v5209_v59 = vrot.slane %v5202_v8, %v10699_v23  ;;  %v12450_v8 = vld [vmem:[#allocation13_spill] sm:$0xff] }
0x10e4   :  { %v5216_v55 = vrot.slane %v5209_v59, %v10699_v23 }
0x10e6   :  { %5219 = vst.msk [vmem:[#allocation5 + $0x1] ss:$4 sm:$0x3] %vm10703_vm1, %v5216_v55 }
0x1183   :  { %v10999_v11 = vpop.f32.mrf.mxu0 }
0x1185   :  { %v11001_v20 = vpop.f32.mrf.mxu0 }
0x1187   :  { %v11003_v43 = vpop.f32.mrf.mxu0 }
0x1189   :  { %v11005_v47 = vpop.f32.mrf.mxu0 }
0x118b   :  { %v11007_v26 = vpop.f32.mrf.mxu0 }
0x118d   :  { %v11009_v30 = vpop.f32.mrf.mxu0 }
0x118f   :  { %v11011_v42 = vpop.f32.mrf.mxu0 }
0x1191   :  { %v11013_v60 = vpop.f32.mrf.mxu0 }
0x1192   :  { %5501 = vmatprep.subr.mxu1 %v11013_v60 }
0x1193   :  { %5502 = vmatpush1.msra.mxu1 %v11011_v42 }
0x1194   :  { %5503 = vmatprep.subr.mxu1 %v11009_v30 }
0x1195   :  { %5504 = vmatpush1.msra.mxu1 %v11007_v26 }
0x1196   :  { %5505 = vmatprep.subr.mxu1 %v11005_v47 }
0x1197   :  { %5506 = vmatpush1.msra.mxu1 %v11003_v43 }
0x1198   :  { %5507 = vmatprep.subr.mxu1 %v11001_v20 }
0x1199   :  { %5508 = vmatpush1.msra.mxu1 %v10999_v11 }
0x119a   :  { %6120 = vmatmul.mubr.msk.f32.vlgmr.msra.gmra.mxu1 %vm497_vm0, %v10735_v49  ;;  %v12440_v49 = vld [vmem:[#allocation82_spill] sm:$0xff] }
0x119b   :  { %5547 = vmatprep.mubr.f32.mxu1 %v11705_v62 }
0x119e   :  { %6121 = vmatmul.mubr.msk.f32.gmra.mxu1 %vm497_vm0, %v10745_v51  ;;  %v12441_v51 = vld [vmem:[#allocation83_spill] sm:$0xff] }
0x119f   :  { %5553 = vmatprep.mubr.f32.mxu1 %v11705_v62 }
0x11a2   :  { %6122 = vmatmul.mubr.msk.f32.gmra.mxu1 %vm497_vm0, %v10754_v13  ;;  %v12442_v13 = vld [vmem:[#allocation84_spill] sm:$0xff] }
0x11a3   :  { %5559 = vmatprep.mubr.f32.mxu1 %v11705_v62 }
0x11a6   :  { %6123 = vmatmul.mubr.msk.f32.gmra.mxu1 %vm497_vm0, %v10766_v12  ;;  %v12443_v12 = vld [vmem:[#allocation85_spill] sm:$0xff] }
0x11a7   :  { %5565 = vmatprep.mubr.f32.mxu1 %v11705_v62 }
0x11aa   :  { %6124 = vmatmul.mubr.msk.f32.gmra.mxu1 %vm497_vm0, %v10778_v14  ;;  %v12444_v14 = vld [vmem:[#allocation28_spill] sm:$0xff] }
0x11ab   :  { %5571 = vmatprep.mubr.f32.mxu1 %v11705_v62 }
0x11ae   :  { %6125 = vmatmul.mubr.msk.f32.gmra.mxu1 %vm497_vm0, %v10790_v0  ;;  %v11059_v0 = vrot.slane %v5198_v2, %v12444_v14 }
0x11af   :  { %5577 = vmatprep.mubr.f32.mxu1 %v11705_v62 }
0x11b0   :  { %v5232_v56 = vmul.f32 %v11059_v0, %v12449_v15  ;;  %v5234_v59 = vmul.f32 %v11059_v0, %v12450_v8 }
0x11b2   :  { %6126 = vmatmul.mubr.msk.f32.gmra.mxu1 %vm497_vm0, %v10802_v44  ;;  %v11062_v44 = vrot.slane %v5199_v1, %v12444_v14 }
0x11b3   :  { %5583 = vmatprep.mubr.f32.mxu1 %v11705_v62 }
0x11b4   :  { %v5231_v28 = vmul.f32 %v11062_v44, %v12447_v52  ;;  %v5233_v41 = vmul.f32 %v11062_v44, %v12449_v15  ;;  %v5235_v14 = vmul.f32 %v11062_v44, %v12450_v8  ;;  %v12454_v15 = vld [vmem:[#allocation37_spill] sm:$0xff] }
0x11b6   :  { %6127 = vmatmul.mubr.msk.f32.gmra.mxu1 %vm497_vm0, %v10814_v34  ;;  %v12445_v34 = vld [vmem:[#allocation17_spill] sm:$0xff]  ;;  %v5255_v1 = vadd.f32 %v5231_v28, %v12448_v53 }
0x11b7   :  { %5589 = vmatprep.mubr.f32.mxu1 %v11705_v62  ;;  %v5228_v18 = vmul.f32 %v11059_v0, %v12445_v34  ;;  %v5229_v50 = vmul.f32 %v11062_v44, %v12445_v34 }
0x11b9   :  { %v5252_v40 = vadd.f32 %v5228_v18, %v12446_v5  ;;  %v5253_v54 = vadd.f32 %v5229_v50, %v12446_v5 }
0x11ba   :  { %6128 = vmatmul.mubr.msk.f32.gmra.mxu1 %vm497_vm0, %v12440_v49 }
0x11bb   :  { %5595 = vmatprep.mubr.f32.mxu1 %v11705_v62 }
0x11be   :  { %6129 = vmatmul.mubr.msk.f32.gmra.mxu1 %vm497_vm0, %v12441_v51  ;;  %v12451_v51 = vld [vmem:[#allocation12_spill] sm:$0xff] }
0x11bf   :  { %5601 = vmatprep.mubr.f32.mxu1 %v11705_v62  ;;  %v5257_v50 = vadd.f32 %v5233_v41, %v12451_v51 }
0x11c2   :  { %6130 = vmatmul.mubr.msk.f32.gmra.mxu1 %vm497_vm0, %v12442_v13  ;;  %v5256_v13 = vadd.f32 %v5232_v56, %v12451_v51  ;;  %v5238_v56 = vmul.f32 %v11059_v0, %v12454_v15 }
0x11c3   :  { %5607 = vmatprep.mubr.f32.mxu1 %v11705_v62  ;;  %v5230_v62 = vmul.f32 %v11059_v0, %v12447_v52 }
0x11c5   :  { %v5254_v36 = vadd.f32 %v5230_v62, %v12448_v53 }
0x11c6   :  { %6131 = vmatmul.mubr.msk.f32.gmra.mxu1 %vm497_vm0, %v12443_v12 }
0x125a   :  { %v5543_v48 = vpop.f32.mrf.mxu1 }
0x125b   :  { %v5614_v33 = vadd.f32 %v5543_v48, %v5252_v40  ;;  %v12452_v40 = vld [vmem:[#allocation32_spill] sm:$0xff] }
0x125c   :  { %v5545_v61 = vpop.f32.mrf.mxu1  ;;  %v5258_v52 = vadd.f32 %v5234_v59, %v12452_v40 }
0x125d   :  { %v6132_v17 = vmul.f32 -1.442695, %v5614_v33  ;;  %v5615_v32 = vadd.f32 %v5545_v61, %v5253_v54  ;;  %v12453_v33 = vld [vmem:[#allocation15_spill] sm:$0xff]  ;;  %v5259_v61 = vadd.f32 %v5235_v14, %v12452_v40 }
0x125e   :  { %v5549_v22 = vpop.f32.mrf.mxu1  ;;  %v5236_v54 = vmul.f32 %v11059_v0, %v12453_v33  ;;  %v5237_v53 = vmul.f32 %v11062_v44, %v12453_v33 }
0x125f   :  { %6911 = vpow2.f32 %v6132_v17  ;;  %v6133_v9 = vmul.f32 -1.442695, %v5615_v32  ;;  %v5616_v63 = vadd.f32 %v5549_v22, %v5254_v36 }
0x1260   :  { %v5551_v2 = vpop.f32.mrf.mxu1 }
0x1261   :  { %6913 = vpow2.f32 %v6133_v9  ;;  %v6134_v55 = vmul.f32 -1.442695, %v5616_v63  ;;  %v5617_v49 = vadd.f32 %v5551_v2, %v5255_v1  ;;  %v12455_v9 = vld [vmem:[#allocation34_spill] sm:$0xff]  ;;  %v5239_v2 = vmul.f32 %v11062_v44, %v12454_v15 }
0x1262   :  { %v5555_v12 = vpop.f32.mrf.mxu1  ;;  %v5260_v63 = vadd.f32 %v5236_v54, %v12455_v9 }
0x1263   :  { %6915 = vpow2.f32 %v6134_v55  ;;  %v6135_v34 = vmul.f32 -1.442695, %v5617_v49  ;;  %v5618_v18 = vadd.f32 %v5555_v12, %v5256_v13  ;;  %v5261_v55 = vadd.f32 %v5237_v53, %v12455_v9 }
0x1264   :  { %v5557_v5 = vpop.f32.mrf.mxu1  ;;  %v5262_v13 = vadd.f32 %v5238_v56, %v12438_v10  ;;  %v5240_v12 = vmul.f32 %v11059_v0, %v12439_v39  ;;  %v5263_v40 = vadd.f32 %v5239_v2, %v12438_v10 }
0x1265   :  { %6917 = vpow2.f32 %v6135_v34  ;;  %v6136_v62 = vmul.f32 -1.442695, %v5618_v18  ;;  %v5619_v48 = vadd.f32 %v5557_v5, %v5257_v50 }
0x1266   :  { %v5561_v28 = vpop.f32.mrf.mxu1 }
0x1267   :  { %6919 = vpow2.f32 %v6136_v62  ;;  %v6137_v17 = vmul.f32 -1.442695, %v5619_v48  ;;  %v5620_v32 = vadd.f32 %v5561_v28, %v5258_v52  ;;  %v5241_v52 = vmul.f32 %v11062_v44, %v12439_v39 }
0x1268   :  { %v5563_v36 = vpop.f32.mrf.mxu1 }
0x1269   :  { %6921 = vpow2.f32 %v6137_v17  ;;  %v6138_v22 = vmul.f32 -1.442695, %v5620_v32  ;;  %v5621_v41 = vadd.f32 %v5563_v36, %v5259_v61  ;;  %v5264_v61 = vadd.f32 %v5240_v12, %v12280_v46  ;;  %v12456_v17 = vld [vmem:[#allocation24_spill] sm:$0xff] }
0x126a   :  { %v5567_v1 = vpop.f32.mrf.mxu1  ;;  %v5242_v32 = vmul.f32 %v11059_v0, %v12456_v17  ;;  %v5265_v39 = vadd.f32 %v5241_v52, %v12280_v46 }
0x126b   :  { %6923 = vpow2.f32 %v6138_v22  ;;  %v6139_v8 = vmul.f32 -1.442695, %v5621_v41  ;;  %v5670_v59 = vadd.f32 %v5567_v1, %v5260_v63  ;;  %v5243_v22 = vmul.f32 %v11062_v44, %v12456_v17 }
0x126c   :  { %v6912_v49 = vpop.eup %6911  ;;  %v5569_v51 = vpop.f32.mrf.mxu1 }
0x126d   :  { %v5646_v14 = vadd.f32 1.0, %v6912_v49  ;;  %6925 = vpow2.f32 %v6139_v8  ;;  %v6140_v34 = vmul.f32 -1.442695, %v5670_v59  ;;  %v5671_v18 = vadd.f32 %v5569_v51, %v5261_v55 }
0x126e   :  { %v6914_v50 = vpop.eup %6913  ;;  %v5573_v5 = vpop.f32.mrf.mxu1  ;;  %v5266_v8 = vadd.f32 %v5242_v32, %v11838_v38  ;;  %v5267_v46 = vadd.f32 %v5243_v22, %v11838_v38  ;;  %v5245_v38 = vmul.f32 %v11062_v44, %v12192_v27 }
0x126f   :  { %6927 = vrcp.f32 %v5646_v14  ;;  %v5647_v62 = vadd.f32 1.0, %v6914_v50  ;;  %v6141_v48 = vmul.f32 -1.442695, %v5671_v18  ;;  %v5672_v33 = vadd.f32 %v5573_v5, %v5262_v13 }
0x1270   :  { %v6916_v54 = vpop.eup %6915  ;;  %6929 = vpow2.f32 %v6140_v34  ;;  %v5575_v28 = vpop.f32.mrf.mxu1  ;;  %v5244_v5 = vmul.f32 %v11059_v0, %v12192_v27 }
0x1271   :  { %6931 = vrcp.f32 %v5647_v62  ;;  %v5648_v53 = vadd.f32 1.0, %v6916_v54  ;;  %v6142_v36 = vmul.f32 -1.442695, %v5672_v33  ;;  %v5673_v15 = vadd.f32 %v5575_v28, %v5263_v40 }
0x1272   :  { %v6918_v10 = vpop.eup %6917  ;;  %6933 = vpow2.f32 %v6141_v48  ;;  %v5579_v56 = vpop.f32.mrf.mxu1 }
0x1273   :  { %6935 = vrcp.f32 %v5648_v53  ;;  %v5649_v41 = vadd.f32 1.0, %v6918_v10  ;;  %v6143_v9 = vmul.f32 -1.442695, %v5673_v15  ;;  %v5674_v63 = vadd.f32 %v5579_v56, %v5264_v61  ;;  %v12457_v15 = vld [vmem:[#allocation35_spill] sm:$0xff] }
0x1274   :  { %v6920_v1 = vpop.eup %6919  ;;  %6937 = vpow2.f32 %v6142_v36  ;;  %v5581_v2 = vpop.f32.mrf.mxu1  ;;  %v5246_v53 = vmul.f32 %v11059_v0, %v12106_v29  ;;  %v5268_v10 = vadd.f32 %v5244_v5, %v12457_v15 }
0x1275   :  { %6939 = vrcp.f32 %v5649_v41  ;;  %v5650_v59 = vadd.f32 1.0, %v6920_v1  ;;  %v6144_v55 = vmul.f32 -1.442695, %v5674_v63  ;;  %v5675_v49 = vadd.f32 %v5581_v2, %v5265_v39 }
0x1276   :  { %v6922_v51 = vpop.eup %6921  ;;  %6941 = vpow2.f32 %v6143_v9  ;;  %v5585_v13 = vpop.f32.mrf.mxu1  ;;  %v5247_v9 = vmul.f32 %v11062_v44, %v12106_v29  ;;  %v5269_v2 = vadd.f32 %v5245_v38, %v12457_v15 }
0x1277   :  { %6943 = vrcp.f32 %v5650_v59  ;;  %v5651_v12 = vadd.f32 1.0, %v6922_v51  ;;  %v6145_v14 = vmul.f32 -1.442695, %v5675_v49  ;;  %v5676_v34 = vadd.f32 %v5585_v13, %v5266_v8 }
0x1278   :  { %v6924_v18 = vpop.eup %6923  ;;  %6945 = vpow2.f32 %v6144_v55  ;;  %v5587_v50 = vpop.f32.mrf.mxu1  ;;  %v5270_v51 = vadd.f32 %v5246_v53, %v12362_v6  ;;  %v5248_v13 = vmul.f32 %v11059_v0, %v12363_v35 }
0x1279   :  { %6947 = vrcp.f32 %v5651_v12  ;;  %v5652_v40 = vadd.f32 1.0, %v6924_v18  ;;  %v6146_v52 = vmul.f32 -1.442695, %v5676_v34  ;;  %v5677_v62 = vadd.f32 %v5587_v50, %v5267_v46 }
0x127a   :  { %v6926_v48 = vpop.eup %6925  ;;  %6949 = vpow2.f32 %v6145_v14  ;;  %v5591_v33 = vpop.f32.mrf.mxu1  ;;  %v5271_v50 = vadd.f32 %v5247_v9, %v12362_v6 }
0x127b   :  { %6951 = vrcp.f32 %v5652_v40  ;;  %v5653_v54 = vadd.f32 1.0, %v6926_v48  ;;  %v6147_v28 = vmul.f32 -1.442695, %v5677_v62  ;;  %v5726_v61 = vadd.f32 %v5591_v33, %v7876_v16 }
0x127c   :  { %v6928_v17 = vpop.eup %6927  ;;  %6953 = vpow2.f32 %v6146_v52  ;;  %v5593_v32 = vpop.f32.mrf.mxu1  ;;  %v5249_v40 = vmul.f32 %v11062_v44, %v12363_v35 }
0x127d   :  { %v6930_v36 = vpop.eup %6929  ;;  %6955 = vrcp.f32 %v5653_v54  ;;  %v5734_v56 = vmul.f32 %v6928_v17, %v5726_v61  ;;  %v5727_v39 = vadd.f32 %v5593_v32, %v7876_v16  ;;  %v5250_v61 = vmul.f32 %v11059_v0, %v7990_v45 }
0x127e   :  { %v6932_v22 = vpop.eup %6931  ;;  %v5702_v27 = vadd.f32 1.0, %v6930_v36  ;;  %6957 = vpow2.f32 %v6147_v28  ;;  %v5597_v41 = vpop.f32.mrf.mxu1  ;;  %v5273_v15 = vadd.f32 %v5249_v40, %v12110_v31 }
0x127f   :  { %v6934_v63 = vpop.eup %6933  ;;  %v5742_v1 = vadd.f32 %v5734_v56, %v5268_v10  ;;  %v5735_v8 = vmul.f32 %v6932_v22, %v5727_v39  ;;  %v5728_v59 = vadd.f32 %v5597_v41, %v7972_v37  ;;  %v5251_v56 = vmul.f32 %v11062_v44, %v7990_v45 }
0x1280   :  { %v6936_v55 = vpop.eup %6935  ;;  %6959 = vrcp.f32 %v5702_v27  ;;  %v5703_v49 = vadd.f32 1.0, %v6934_v63  ;;  %v5599_v16 = vpop.f32.mrf.mxu1 }
0x1281   :  { %v6938_v46 = vpop.eup %6937  ;;  %6961 = vtanh.f32 %v5742_v1  ;;  %v5743_v12 = vadd.f32 %v5735_v8, %v5269_v2  ;;  %v5736_v29 = vmul.f32 %v6936_v55, %v5728_v59  ;;  %v5729_v14 = vadd.f32 %v5599_v16, %v7972_v37 }
0x1282   :  { %v6940_v34 = vpop.eup %6939  ;;  %6963 = vrcp.f32 %v5703_v49  ;;  %v5704_v18 = vadd.f32 1.0, %v6938_v46  ;;  %v5603_v5 = vpop.f32.mrf.mxu1  ;;  %v5272_v37 = vadd.f32 %v5248_v13, %v12110_v31  ;;  %v5275_v49 = vadd.f32 %v5251_v56, %v8011_v21 }
0x1283   :  { %v6942_v52 = vpop.eup %6941  ;;  %6965 = vtanh.f32 %v5743_v12  ;;  %v5744_v62 = vadd.f32 %v5736_v29, %v5270_v51  ;;  %v5737_v48 = vmul.f32 %v6940_v34, %v5729_v14  ;;  %v5730_v33 = vadd.f32 %v5603_v5, %v7974_v19 }
0x1284   :  { %v6944_v38 = vpop.eup %6943  ;;  %6967 = vrcp.f32 %v5704_v18  ;;  %v5705_v54 = vadd.f32 1.0, %v6942_v52  ;;  %v5605_v28 = vpop.f32.mrf.mxu1 }
0x1285   :  { %v6946_v6 = vpop.eup %6945  ;;  %6969 = vtanh.f32 %v5744_v62  ;;  %v5745_v17 = vadd.f32 %v5737_v48, %v5271_v50  ;;  %v5738_v32 = vmul.f32 %v6944_v38, %v5730_v33  ;;  %v5731_v35 = vadd.f32 %v5605_v28, %v7974_v19 }
0x1286   :  { %v6948_v53 = vpop.eup %6947  ;;  %6971 = vrcp.f32 %v5705_v54  ;;  %v5706_v36 = vadd.f32 1.0, %v6946_v6  ;;  %v5609_v10 = vpop.f32.mrf.mxu1  ;;  %v5274_v19 = vadd.f32 %v5250_v61, %v8011_v21 }
0x1287   :  { %v6950_v39 = vpop.eup %6949  ;;  %6973 = vtanh.f32 %v5745_v17  ;;  %v5746_v22 = vadd.f32 %v5738_v32, %v5272_v37  ;;  %v5739_v27 = vmul.f32 %v6948_v53, %v5731_v35  ;;  %v5732_v0 = vadd.f32 %v5609_v10, %v8020_v3 }
0x1288   :  { %v6952_v41 = vpop.eup %6951  ;;  %6975 = vrcp.f32 %v5706_v36  ;;  %v5707_v9 = vadd.f32 1.0, %v6950_v39  ;;  %v5611_v63 = vpop.f32.mrf.mxu1 }
0x1289   :  { %v6954_v1 = vpop.eup %6953  ;;  %6977 = vtanh.f32 %v5746_v22  ;;  %v5747_v2 = vadd.f32 %v5739_v27, %v5273_v15  ;;  %v5740_v31 = vmul.f32 %v6952_v41, %v5732_v0  ;;  %v5733_v8 = vadd.f32 %v5611_v63, %v8020_v3 }
0x128a   :  { %v6956_v59 = vpop.eup %6955  ;;  %6979 = vrcp.f32 %v5707_v9  ;;  %v5708_v45 = vadd.f32 1.0, %v6954_v1 }
0x128b   :  { %v6958_v44 = vpop.eup %6957  ;;  %6981 = vtanh.f32 %v5747_v2  ;;  %v5748_v55 = vadd.f32 %v5740_v31, %v5274_v19  ;;  %v5741_v51 = vmul.f32 %v6956_v59, %v5733_v8 }
0x128c   :  { %6983 = vrcp.f32 %v5708_v45  ;;  %v5709_v16 = vadd.f32 1.0, %v6958_v44 }
0x128d   :  { %v6960_v13 = vpop.eup %6959  ;;  %6985 = vtanh.f32 %v5748_v55  ;;  %v5749_v46 = vadd.f32 %v5741_v51, %v5275_v49 }
0x128e   :  { %v6962_v12 = vpop.eup %6961  ;;  %6987 = vrcp.f32 %v5709_v16  ;;  %v5758_v14 = vsub.f32 1.0, %v6960_v13  ;;  %v5774_v33 = vmul.f32 %v6960_v13, %v10999_v11 }
0x128f   :  { %v6964_v29 = vpop.eup %6963  ;;  %6989 = vtanh.f32 %v5749_v46 }
0x1290   :  { %v6966_v3 = vpop.eup %6965  ;;  %v5759_v50 = vsub.f32 1.0, %v6964_v29  ;;  %v5766_v52 = vmul.f32 %v6962_v12, %v5758_v14  ;;  %v5775_v35 = vmul.f32 %v6964_v29, %v11001_v20 }
0x1291   :  { %v6968_v34 = vpop.eup %6967 }
0x1292   :  { %v6970_v18 = vpop.eup %6969  ;;  %v5760_v5 = vsub.f32 1.0, %v6968_v34  ;;  %v5776_v38 = vmul.f32 %v6968_v34, %v11003_v43  ;;  %v5767_v6 = vmul.f32 %v6966_v3, %v5759_v50  ;;  %v5782_v53 = vadd.f32 %v5774_v33, %v5766_v52 }
0x1293   :  { %v6972_v40 = vpop.eup %6971 }
0x1294   :  { %v6974_v62 = vpop.eup %6973  ;;  %v5761_v21 = vsub.f32 1.0, %v6972_v40  ;;  %v5768_v54 = vmul.f32 %v6970_v18, %v5760_v5  ;;  %v5777_v28 = vmul.f32 %v6972_v40, %v11005_v47  ;;  %v5783_v0 = vadd.f32 %v5775_v35, %v5767_v6 }
0x1295   :  { %v6976_v48 = vpop.eup %6975  ;;  %v5790_v2 = vmul.f32 %v5782_v53, %v10670_v25 }
0x1296   :  { %v6978_v37 = vpop.eup %6977  ;;  %v5762_v61 = vsub.f32 1.0, %v6976_v48  ;;  %v5769_v17 = vmul.f32 %v6974_v62, %v5761_v21  ;;  %v5784_v36 = vadd.f32 %v5776_v38, %v5768_v54  ;;  %v5778_v10 = vmul.f32 %v6976_v48, %v11007_v26 }
0x1297   :  { %v6980_v32 = vpop.eup %6979  ;;  %v5791_v55 = vmul.f32 %v5783_v0, %v10670_v25 }
0x1298   :  { %v6982_v15 = vpop.eup %6981  ;;  %v5763_v56 = vsub.f32 1.0, %v6980_v32  ;;  %v5785_v39 = vadd.f32 %v5777_v28, %v5769_v17  ;;  %v5770_v11 = vmul.f32 %v6978_v37, %v5762_v61  ;;  %v5779_v9 = vmul.f32 %v6980_v32, %v11009_v30 }
0x1299   :  { %v6984_v22 = vpop.eup %6983  ;;  %v5792_v19 = vmul.f32 %v5784_v36, %v10666_v24 }
0x129a   :  { %v6986_v43 = vpop.eup %6985  ;;  %v5764_v27 = vsub.f32 1.0, %v6984_v22  ;;  %v5786_v41 = vadd.f32 %v5778_v10, %v5770_v11  ;;  %v5771_v63 = vmul.f32 %v6982_v15, %v5763_v56  ;;  %v5793_v26 = vmul.f32 %v5785_v39, %v10666_v24 }
0x129b   :  { %v6988_v47 = vpop.eup %6987  ;;  %v5780_v31 = vmul.f32 %v6984_v22, %v11011_v42  ;;  %v5798_v49 = vadd.f32 %v5792_v19, %v5790_v2 }
0x129c   :  { %v6990_v20 = vpop.eup %6989  ;;  %v5765_v1 = vsub.f32 1.0, %v6988_v47  ;;  %v5794_v8 = vmul.f32 %v5786_v41, %v10674_v58  ;;  %v5787_v59 = vadd.f32 %v5779_v9, %v5771_v63  ;;  %v5772_v45 = vmul.f32 %v6986_v43, %v5764_v27 }
0x129d   :  { %v5781_v44 = vmul.f32 %v6988_v47, %v11013_v60  ;;  %v5807_v13 = vadd.f32 %v5793_v26, %v5791_v55 }
0x129e   :  { %v5773_v30 = vmul.f32 %v6990_v20, %v5765_v1  ;;  %v5795_v51 = vmul.f32 %v5787_v59, %v10674_v58  ;;  %v5788_v16 = vadd.f32 %v5780_v31, %v5772_v45  ;;  %v5799_v12 = vadd.f32 %v5798_v49, %v5794_v8 }
0x12a0   :  { %v5789_v46 = vadd.f32 %v5781_v44, %v5773_v30  ;;  %v5796_v24 = vmul.f32 %v5788_v16, %v10682_v7  ;;  %v5808_v29 = vadd.f32 %v5807_v13, %v5795_v51 }
0x12a2   :  { %v5797_v42 = vmul.f32 %v5789_v46, %v10682_v7  ;;  %v5800_v14 = vadd.f32 %v5799_v12, %v5796_v24 }
0x12a4   :  { %v5809_v3 = vadd.f32 %v5808_v29, %v5797_v42  ;;  %v5801_v34 = vrot.slane %v5800_v14, 4 }
0x12a6   :  { %v5810_v18 = vrot.slane %v5809_v3, 4  ;;  %v5802_v60 = vadd.f32 %v5801_v34, %v5800_v14 }
0x12a8   :  { %v5811_v50 = vadd.f32 %v5810_v18, %v5809_v3  ;;  %v5803_v25 = vrot.slane %v5802_v60, 2 }
0x12aa   :  { %v5812_v5 = vrot.slane %v5811_v50, 2  ;;  %v5804_v40 = vadd.f32 %v5803_v25, %v5802_v60 }
0x12ac   :  { %v5813_v52 = vadd.f32 %v5812_v5, %v5811_v50  ;;  %v5805_v58 = vrot.slane %v5804_v40, 1 }
0x12ae   :  { %v5814_v62 = vrot.slane %v5813_v52, 1  ;;  %v5806_v21 = vadd.f32 %v5805_v58, %v5804_v40 }
0x12b0   :  { %v5815_v48 = vadd.f32 %v5814_v62, %v5813_v52  ;;  %v5816_v33 = vadd.f32 %v5806_v21, %v10688_v4 }
0x12b2   :  { %v5817_v38 = vadd.f32 %v5815_v48, %v10688_v4 }
0x12b4   :  { %v5820_v54 = vcombine.low %v5816_v33, %v5817_v38 }
0x12b6   :  { %v5827_v7 = vrot.slane %v5820_v54, %v10699_v23 }
0x12b8   :  { %v5834_v37 = vrot.slane %v5827_v7, %v10699_v23 }
0x12ba   :  { %5837 = vst.msk [vmem:[#allocation5 + $0x2] ss:$4 sm:$0x3] %vm10703_vm1, %v5834_v37 }
0x12bb   :  { %7261 = shalt.err (!%p7258_p9)
}
0x12bc   :  { %5847 = dma.vmem_to_hbm [thread:$0]  %s5845_s9, 128, %s11174_s5, [#allocation4]  }
0x12bd   :  { %7272 = dma.done.wait [#allocation4], 128  }
0x12be   :  { %7273 = vsyncadd [#allocation4], 4294967168 }
0x12bf   :  { %5851 = vsyncpa [#allocation3], 1 }
0x12c0   :  { %5852 = vsyncpa [#allocation4], 1 }

</bundles_post_ra>
